<compile_context>
chip_gen: v5e
topology: v5e:2x2
jax: 0.10.0
libtpu: 0.0.40
codegen_flags: <defaults>
</compile_context>

<pallas_src>
import math

import jax
import jax.numpy as jnp
import numpy as np
from jax.experimental import pallas as pl
from jax.experimental.pallas import tpu as pltpu

# ----------------------------- configuration --------------------------------
NUM_BLOCKS = 8          # N  (sequence of gates)
HISTORY_LEN = 8         # T
D_MODEL = 128
N_HEADS = 4
N_LAYERS = 2
DIM_FF = 256
NUM_OPS = 3
HEAD_DIM = D_MODEL // N_HEADS
LN_EPS = 1e-5
LANE = 128

KP_ORDER = [
    "hist_w_aug", "emb_bias", "mask", "ln_slab",
    "wqkv", "bqkv", "wo",
    "w1", "b1", "w2",
    "pool", "wp_pad", "bp_pad", "wv1", "bv1", "wv2_pad", "bv2_pad",
]


def _pick_b_blk(B: int) -> int:
    # 16*N = 128 rows fills v5e's 128-tall MXU; 32*N = 256 rows fills the
    # 256-tall MXU on v6e/v7x.  Only raise to 32 when the grid still has >= 2
    # steps so v7x's two TensorCores both get work under
    # dimension_semantics=("parallel",).
    return 32 if B >= 64 else 16


# ------------------------------- kernel --------------------------------------
def _layer_norm(x, g, b):
    mu = jnp.mean(x, axis=-1, keepdims=True)
    xc = x - mu
    var = jnp.mean(xc * xc, axis=-1, keepdims=True)
    inv = jax.lax.rsqrt(var + LN_EPS)
    return xc * inv * g + b


def prune_model_kernel(
    enc_ref,
    hist_w_ref, emb_b_ref, mask_ref, ln_slab_ref,
    wqkv_ref, bqkv_ref, wo_ref,
    w1_ref, b1_ref, w2_ref,
    pool_ref, wp_ref, bp_ref, wv1_ref, bv1_ref, wv2_ref, bv2_ref,
    logits_ref, value_ref,
):
    bf = jnp.bfloat16

    # ---- embeddings: [history | scalar] @ augmented weight + fused bias slab
    # enc_ref block is (1, M, T+1); emb_bias already contains tiled gate
    # embeddings + history bias + scalar bias.
    enc = enc_ref[0].astype(bf)                                       # (M, T+1)
    x = jnp.dot(enc, hist_w_ref[...],
                preferred_element_type=jnp.float32) + emb_b_ref[...]  # (M, d) f32

    # Additive block-diagonal mask (0 inside a batch element, -1e30 outside).
    mask = mask_ref[...]                                              # (M, M) f32

    # ---- TransformerEncoder, norm_first=True, eval mode (no dropout) --------
    for l in range(N_LAYERS):
        slab = ln_slab_ref[l]                                         # (6, d) f32
        ln1_g, ln1_b = slab[0:1], slab[1:2]
        ln2_g, ln2_b = slab[2:3], slab[3:4]
        bo, b2 = slab[4:5], slab[5:6]

        # self-attention block (QKV fused, scale folded into Q weights/bias)
        h = _layer_norm(x, ln1_g, ln1_b).astype(bf)
        qkv = (jnp.dot(h, wqkv_ref[l], preferred_element_type=jnp.float32)
               + bqkv_ref[l]).astype(bf)                              # (M, 3d) bf16

        heads = []
        for hh in range(N_HEADS):
            sl_q = slice(hh * HEAD_DIM, (hh + 1) * HEAD_DIM)
            sl_k = slice(D_MODEL + hh * HEAD_DIM, D_MODEL + (hh + 1) * HEAD_DIM)
            sl_v = slice(2 * D_MODEL + hh * HEAD_DIM,
                         2 * D_MODEL + (hh + 1) * HEAD_DIM)
            # scores = Q @ K^T (no materialized transpose), block-diag masked
            s = jax.lax.dot_general(qkv[:, sl_q], qkv[:, sl_k],
                                    (((1,), (1,)), ((), ())),
                                    preferred_element_type=jnp.float32)
            s = s + mask
            s = s - jnp.max(s, axis=-1, keepdims=True)
            p = jnp.exp(s)
            p = p * pl.reciprocal(jnp.sum(p, axis=-1, keepdims=True), approx=True)
            heads.append(jnp.dot(p.astype(bf), qkv[:, sl_v],
                                 preferred_element_type=jnp.float32))
        # concat heads along lanes -> single full-K output projection
        o = jnp.concatenate(heads, axis=-1).astype(bf)                # (M, d)
        x = x + jnp.dot(o, wo_ref[l], preferred_element_type=jnp.float32) + bo

        # feed-forward block
        h2 = _layer_norm(x, ln2_g, ln2_b).astype(bf)
        f = jnp.dot(h2, w1_ref[l], preferred_element_type=jnp.float32) + b1_ref[l]
        f = jnp.maximum(f, 0.0).astype(bf)
        x = x + jnp.dot(f, w2_ref[l], preferred_element_type=jnp.float32) + b2

    # ---- heads (lane-dense padded outputs) ----------------------------------
    xb = x.astype(bf)
    logits_ref[0] = (jnp.dot(xb, wp_ref[...],
                             preferred_element_type=jnp.float32)
                     + bp_ref[...]).astype(bf)
    # per-batch-element mean over the N gate rows via a tiny pooling matmul
    pooled = jnp.dot(pool_ref[...], xb, preferred_element_type=jnp.float32)
    vh1 = jnp.maximum(
        jnp.dot(pooled.astype(bf), wv1_ref[...],
                preferred_element_type=jnp.float32) + bv1_ref[...], 0.0)
    value_ref[0] = jnp.dot(vh1.astype(bf), wv2_ref[...],
                           preferred_element_type=jnp.float32) + bv2_ref[...]


# ------------------------------- wrapper --------------------------------------
def _const_spec(arr):
    zeros = (0,) * arr.ndim
    return pl.BlockSpec(arr.shape, lambda g, _z=zeros: _z)


def _prepare_kernel_params(p, b_blk):
    """Layout / precision transforms done once per call (outside the kernel)."""
    bf = jnp.bfloat16
    scale = 1.0 / math.sqrt(HEAD_DIM)
    m_rows = b_blk * NUM_BLOCKS
    kp = {}

    # fuse scalar embedding into an augmented history weight (bf16 for the MXU);
    # fold gate table, history bias and scalar bias into one (M, d) bias slab.
    kp["hist_w_aug"] = jnp.concatenate([p["hist_w"], p["scal_w"]], axis=0).astype(bf)
    kp["emb_bias"] = (jnp.tile(p["gate_tab"], (b_blk, 1))
                      + p["hist_b"] + p["scal_b"])                   # (M, d) f32

    # additive block-diagonal mask (rows only attend within their own batch elt)
    rows = jnp.arange(m_rows) // NUM_BLOCKS
    kp["mask"] = jnp.where(rows[:, None] == rows[None, :],
                           0.0, -1e30).astype(jnp.float32)           # (M, M)

    # per-layer d-wide vectors packed into one slab: ln1_g, ln1_b, ln2_g, ln2_b, bo, b2
    kp["ln_slab"] = jnp.concatenate(
        [p["ln1_g"], p["ln1_b"], p["ln2_g"], p["ln2_b"], p["bo"], p["b2"]],
        axis=1)                                                      # (L, 6, d)

    # fused QKV with the attention scale folded into the Q weights & bias
    kp["wqkv"] = jnp.concatenate(
        [p["wq"] * scale, p["wk"], p["wv"]], axis=-1).astype(bf)     # (L, d, 3d)
    kp["bqkv"] = jnp.concatenate(
        [p["bq"] * scale, p["bk"], p["bv"]], axis=-1)                # (L, 1, 3d)

    kp["wo"] = p["wo"].astype(bf)
    kp["w1"] = p["w1"].astype(bf)
    kp["b1"] = p["b1"]
    kp["w2"] = p["w2"].astype(bf)

    # per-batch-element mean-pool matrix (1/N on the block diagonal)
    cols = jnp.arange(m_rows) // NUM_BLOCKS
    pool = (cols[None, :] == jnp.arange(b_blk)[:, None]).astype(jnp.float32)
    kp["pool"] = (pool / NUM_BLOCKS).astype(bf)                      # (B_BLK, M)

    # lane-dense padded heads
    kp["wp_pad"] = jnp.pad(p["wp"], ((0, 0), (0, LANE - NUM_OPS))).astype(bf)
    kp["bp_pad"] = jnp.pad(p["bp"], ((0, 0), (0, LANE - NUM_OPS)))
    kp["wv1"] = p["wv1"].astype(bf)
    kp["bv1"] = p["bv1"]
    kp["wv2_pad"] = jnp.pad(p["wv2"], ((0, 0), (0, LANE - 1))).astype(bf)
    kp["bv2_pad"] = jnp.pad(p["bv2"], ((0, 0), (0, LANE - 1)))
    return kp


@jax.jit
def prune_model_forward(encoded_state, scalars, params):
    B, T, N = encoded_state.shape
    assert N == NUM_BLOCKS and T == HISTORY_LEN

    b_blk = _pick_b_blk(B)
    m_rows = b_blk * NUM_BLOCKS
    G = pl.cdiv(B, b_blk)
    Bp = G * b_blk
    pad = Bp - B

    # (B, T, N) -> (B, N, T), pad batch, append the scalar as an extra
    # "history feature" column so the embedding is a single matmul.
    gate_hist = jnp.transpose(encoded_state, (0, 2, 1)).astype(jnp.float32)
    gate_hist = jnp.pad(gate_hist, ((0, pad), (0, 0), (0, 0)))
    scal = jnp.pad(scalars.astype(jnp.float32).reshape(B, 1), ((0, pad), (0, 0)))
    scal_col = jnp.broadcast_to(scal[:, None, :], (Bp, NUM_BLOCKS, 1))
    enc_aug = jnp.concatenate([gate_hist, scal_col], axis=-1)       # (Bp, N, T+1)
    enc_aug = enc_aug.reshape(G, m_rows, T + 1)

    kp = _prepare_kernel_params(params, b_blk)
    args = [enc_aug] + [kp[k] for k in KP_ORDER]

    in_specs = [pl.BlockSpec((1, m_rows, T + 1), lambda g: (g, 0, 0))] + \
               [_const_spec(kp[k]) for k in KP_ORDER]

    out_shape = (jax.ShapeDtypeStruct((G, m_rows, LANE), jnp.bfloat16),
                 jax.ShapeDtypeStruct((G, b_blk, LANE), jnp.float32))
    out_specs = (pl.BlockSpec((1, m_rows, LANE), lambda g: (g, 0, 0)),
                 pl.BlockSpec((1, b_blk, LANE), lambda g: (g, 0, 0)))

    logits_pad, value_pad = pl.pallas_call(
        prune_model_kernel,
        out_shape=out_shape,
        grid=(G,),
        in_specs=in_specs,
        out_specs=out_specs,
        compiler_params=pltpu.CompilerParams(dimension_semantics=("parallel",)),
    )(*args)

    logits = logits_pad.reshape(Bp, NUM_BLOCKS, LANE)[:B, :, :NUM_OPS]
    logits = logits.astype(jnp.float32)
    value = value_pad.reshape(Bp, LANE)[:B, 0]
    return logits, value


# ------------------------- deterministic parameter init -----------------------
def init_params(key):
    keys = iter(jax.random.split(key, 32))

    def xavier(fan_in, fan_out):
        lim = math.sqrt(6.0 / (fan_in + fan_out))
        # stored already transposed: x @ W, W shape (in, out)
        return jax.random.uniform(next(keys), (fan_in, fan_out),
                                  jnp.float32, -lim, lim)

    p = {}
    p["hist_w"] = xavier(HISTORY_LEN, D_MODEL)                     # (T, d)
    p["hist_b"] = jnp.zeros((1, D_MODEL), jnp.float32)
    p["gate_tab"] = 0.02 * jax.random.normal(next(keys),
                                             (NUM_BLOCKS, D_MODEL), jnp.float32)
    p["scal_w"] = xavier(1, D_MODEL)                               # (1, d)
    p["scal_b"] = jnp.zeros((1, D_MODEL), jnp.float32)

    def stack(fn):
        return jnp.stack([fn() for _ in range(N_LAYERS)], axis=0)

    p["ln1_g"] = jnp.ones((N_LAYERS, 1, D_MODEL), jnp.float32)
    p["ln1_b"] = jnp.zeros((N_LAYERS, 1, D_MODEL), jnp.float32)
    p["ln2_g"] = jnp.ones((N_LAYERS, 1, D_MODEL), jnp.float32)
    p["ln2_b"] = jnp.zeros((N_LAYERS, 1, D_MODEL), jnp.float32)

    p["wq"] = stack(lambda: xavier(D_MODEL, D_MODEL))
    p["wk"] = stack(lambda: xavier(D_MODEL, D_MODEL))
    p["wv"] = stack(lambda: xavier(D_MODEL, D_MODEL))
    p["bq"] = jnp.zeros((N_LAYERS, 1, D_MODEL), jnp.float32)
    p["bk"] = jnp.zeros((N_LAYERS, 1, D_MODEL), jnp.float32)
    p["bv"] = jnp.zeros((N_LAYERS, 1, D_MODEL), jnp.float32)
    p["wo"] = stack(lambda: xavier(D_MODEL, D_MODEL))
    p["bo"] = jnp.zeros((N_LAYERS, 1, D_MODEL), jnp.float32)
    p["w1"] = stack(lambda: xavier(D_MODEL, DIM_FF))
    p["b1"] = jnp.zeros((N_LAYERS, 1, DIM_FF), jnp.float32)
    p["w2"] = stack(lambda: xavier(DIM_FF, D_MODEL))
    p["b2"] = jnp.zeros((N_LAYERS, 1, D_MODEL), jnp.float32)

    p["wp"] = xavier(D_MODEL, NUM_OPS)                             # (d, 3)
    p["bp"] = jnp.zeros((1, NUM_OPS), jnp.float32)
    p["wv1"] = xavier(D_MODEL, DIM_FF)
    p["bv1"] = jnp.zeros((1, DIM_FF), jnp.float32)
    p["wv2"] = xavier(DIM_FF, 1)
    p["bv2"] = jnp.zeros((1, 1), jnp.float32)
    return p


# ----------------------------- plain-JAX reference ----------------------------
def reference_forward(encoded_state, scalars, p):
    x = jnp.transpose(encoded_state, (0, 2, 1)) @ p["hist_w"] + p["hist_b"]
    x = x + p["gate_tab"][None]
    x = x + (scalars @ p["scal_w"] + p["scal_b"])[:, None, :]

    def ln(y, g, b):
        mu = y.mean(-1, keepdims=True)
        var = ((y - mu) ** 2).mean(-1, keepdims=True)
        return (y - mu) / jnp.sqrt(var + LN_EPS) * g + b

    for l in range(N_LAYERS):
        h = ln(x, p["ln1_g"][l], p["ln1_b"][l])
        q = h @ p["wq"][l] + p["bq"][l]
        k = h @ p["wk"][l] + p["bk"][l]
        v = h @ p["wv"][l] + p["bv"][l]
        B_, N_, _ = q.shape
        qh = q.reshape(B_, N_, N_HEADS, HEAD_DIM).transpose(0, 2, 1, 3)
        kh = k.reshape(B_, N_, N_HEADS, HEAD_DIM).transpose(0, 2, 1, 3)
        vh = v.reshape(B_, N_, N_HEADS, HEAD_DIM).transpose(0, 2, 1, 3)
        s = qh @ kh.transpose(0, 1, 3, 2) / math.sqrt(HEAD_DIM)
        a = jax.nn.softmax(s, axis=-1)
        o = (a @ vh).transpose(0, 2, 1, 3).reshape(B_, N_, D_MODEL)
        x = x + o @ p["wo"][l] + p["bo"][l]
        h2 = ln(x, p["ln2_g"][l], p["ln2_b"][l])
        x = x + jax.nn.relu(h2 @ p["w1"][l] + p["b1"][l]) @ p["w2"][l] + p["b2"][l]

    logits = x @ p["wp"] + p["bp"]
    pooled = x.mean(axis=1)
    value = (jax.nn.relu(pooled @ p["wv1"] + p["bv1"]) @ p["wv2"] + p["bv2"])[:, 0]
    return logits, value


# ----------------------------------- main -------------------------------------
if __name__ == "__main__":
    key = jax.random.PRNGKey(0)
    pkey, k1, k2, k3, k4 = jax.random.split(key, 5)
    params = init_params(pkey)

    # small batch (1 grid step, padded) and a batch that exercises multiple
    # grid steps with ragged padding.
    for B, ka, kb in [(2, k1, k2), (37, k3, k4)]:
        encoded_state = jax.random.normal(ka, (B, HISTORY_LEN, NUM_BLOCKS), jnp.float32)
        scalars = jax.random.normal(kb, (B, 1), jnp.float32)

        logits, value = prune_model_forward(encoded_state, scalars, params)
        jax.block_until_ready((logits, value))

        assert logits.shape == (B, NUM_BLOCKS, NUM_OPS)
        assert value.shape == (B,)

        ref_logits, ref_value = reference_forward(encoded_state, scalars, params)
        # bf16 MXU inputs / bf16 logits slab with f32 accumulation -> looser tol
        np.testing.assert_allclose(np.asarray(logits), np.asarray(ref_logits),
                                   rtol=3e-2, atol=3e-2)
        np.testing.assert_allclose(np.asarray(value), np.asarray(ref_value),
                                   rtol=3e-2, atol=3e-2)
    print("KERNEL_OK")
</pallas_src>

<mosaic_0001>
module attributes {stable_mosaic.version = 11 : i64} {
  func.func @prune_model_kernel(%arg0: i32, %arg1: memref<1x128x9xf32, #tpu.memory_space<vmem>>, %arg2: memref<9x128xbf16, #tpu.memory_space<vmem>>, %arg3: memref<128x128xf32, #tpu.memory_space<vmem>>, %arg4: memref<128x128xf32, #tpu.memory_space<vmem>>, %arg5: memref<2x6x128xf32, #tpu.memory_space<vmem>>, %arg6: memref<2x128x384xbf16, #tpu.memory_space<vmem>>, %arg7: memref<2x1x384xf32, #tpu.memory_space<vmem>>, %arg8: memref<2x128x128xbf16, #tpu.memory_space<vmem>>, %arg9: memref<2x128x256xbf16, #tpu.memory_space<vmem>>, %arg10: memref<2x1x256xf32, #tpu.memory_space<vmem>>, %arg11: memref<2x256x128xbf16, #tpu.memory_space<vmem>>, %arg12: memref<16x128xbf16, #tpu.memory_space<vmem>>, %arg13: memref<128x128xbf16, #tpu.memory_space<vmem>>, %arg14: memref<1x128xf32, #tpu.memory_space<vmem>>, %arg15: memref<128x256xbf16, #tpu.memory_space<vmem>>, %arg16: memref<1x256xf32, #tpu.memory_space<vmem>>, %arg17: memref<256x128xbf16, #tpu.memory_space<vmem>>, %arg18: memref<1x128xf32, #tpu.memory_space<vmem>>, %arg19: memref<1x128x128xbf16, #tpu.memory_space<vmem>>, %arg20: memref<1x16x128xf32, #tpu.memory_space<vmem>>) attributes {dimension_semantics = [#tpu.dimension_semantics<parallel>], iteration_bounds = array<i64: 1>, scalar_prefetch = 0 : i64, scratch_operands = 0 : i64, tpu.core_type = #tpu.core_type<tc>, window_params = [{transform_indices = @transform_0, window_bounds = array<i64: 1, 128, 9>}, {pipeline_mode = #tpu.pipeline_mode<synchronous>, transform_indices = @transform_1, window_bounds = array<i64: 9, 128>}, {pipeline_mode = #tpu.pipeline_mode<synchronous>, transform_indices = @transform_2, window_bounds = array<i64: 128, 128>}, {pipeline_mode = #tpu.pipeline_mode<synchronous>, transform_indices = @transform_3, window_bounds = array<i64: 128, 128>}, {pipeline_mode = #tpu.pipeline_mode<synchronous>, transform_indices = @transform_4, window_bounds = array<i64: 2, 6, 128>}, {pipeline_mode = #tpu.pipeline_mode<synchronous>, transform_indices = @transform_5, window_bounds = array<i64: 2, 128, 384>}, {pipeline_mode = #tpu.pipeline_mode<synchronous>, transform_indices = @transform_6, window_bounds = array<i64: 2, 1, 384>}, {pipeline_mode = #tpu.pipeline_mode<synchronous>, transform_indices = @transform_7, window_bounds = array<i64: 2, 128, 128>}, {pipeline_mode = #tpu.pipeline_mode<synchronous>, transform_indices = @transform_8, window_bounds = array<i64: 2, 128, 256>}, {pipeline_mode = #tpu.pipeline_mode<synchronous>, transform_indices = @transform_9, window_bounds = array<i64: 2, 1, 256>}, {pipeline_mode = #tpu.pipeline_mode<synchronous>, transform_indices = @transform_10, window_bounds = array<i64: 2, 256, 128>}, {pipeline_mode = #tpu.pipeline_mode<synchronous>, transform_indices = @transform_11, window_bounds = array<i64: 16, 128>}, {pipeline_mode = #tpu.pipeline_mode<synchronous>, transform_indices = @transform_12, window_bounds = array<i64: 128, 128>}, {pipeline_mode = #tpu.pipeline_mode<synchronous>, transform_indices = @transform_13, window_bounds = array<i64: 1, 128>}, {pipeline_mode = #tpu.pipeline_mode<synchronous>, transform_indices = @transform_14, window_bounds = array<i64: 128, 256>}, {pipeline_mode = #tpu.pipeline_mode<synchronous>, transform_indices = @transform_15, window_bounds = array<i64: 1, 256>}, {pipeline_mode = #tpu.pipeline_mode<synchronous>, transform_indices = @transform_16, window_bounds = array<i64: 256, 128>}, {pipeline_mode = #tpu.pipeline_mode<synchronous>, transform_indices = @transform_17, window_bounds = array<i64: 1, 128>}, {transform_indices = @transform_18, window_bounds = array<i64: 1, 128, 128>}, {transform_indices = @transform_19, window_bounds = array<i64: 1, 16, 128>}]} {
    %c0 = arith.constant 0 : index
    %c0_0 = arith.constant 0 : index
    %c0_1 = arith.constant 0 : index
    %0 = vector.load %arg1[%c0, %c0_0, %c0_1] : memref<1x128x9xf32, #tpu.memory_space<vmem>>, vector<1x128x9xf32>
    %1 = vector.shape_cast %0 : vector<1x128x9xf32> to vector<128x9xf32>
    %2 = arith.truncf %1 : vector<128x9xf32> to vector<128x9xbf16>
    %c0_2 = arith.constant 0 : index
    %c0_3 = arith.constant 0 : index
    %3 = vector.load %arg2[%c0_2, %c0_3] : memref<9x128xbf16, #tpu.memory_space<vmem>>, vector<9x128xbf16>
    %cst = arith.constant dense<0.000000e+00> : vector<128x128xf32>
    %4 = tpu.matmul %2, %3, %cst {dimension_numbers = #tpu.dot_dimension_numbers<[1], [0], [0], [1], [0, 0, 1, 1], [], []>} : vector<128x9xbf16>, vector<9x128xbf16>, vector<128x128xf32> -> vector<128x128xf32>
    %c0_4 = arith.constant 0 : index
    %c0_5 = arith.constant 0 : index
    %5 = vector.load %arg3[%c0_4, %c0_5] : memref<128x128xf32, #tpu.memory_space<vmem>>, vector<128x128xf32>
    %6 = arith.addf %4, %5 : vector<128x128xf32>
    %c0_6 = arith.constant 0 : index
    %c0_7 = arith.constant 0 : index
    %7 = vector.load %arg4[%c0_6, %c0_7] : memref<128x128xf32, #tpu.memory_space<vmem>>, vector<128x128xf32>
    %c0_8 = arith.constant 0 : index
    %c0_9 = arith.constant 0 : index
    %c0_10 = arith.constant 0 : index
    %8 = vector.load %arg5[%c0_8, %c0_9, %c0_10] : memref<2x6x128xf32, #tpu.memory_space<vmem>>, vector<1x6x128xf32>
    %9 = vector.shape_cast %8 : vector<1x6x128xf32> to vector<6x128xf32>
    %10 = vector.extract_strided_slice %9 {offsets = [0, 0], sizes = [1, 128], strides = [1, 1]} : vector<6x128xf32> to vector<1x128xf32>
    %11 = vector.extract_strided_slice %9 {offsets = [1, 0], sizes = [1, 128], strides = [1, 1]} : vector<6x128xf32> to vector<1x128xf32>
    %12 = vector.extract_strided_slice %9 {offsets = [2, 0], sizes = [1, 128], strides = [1, 1]} : vector<6x128xf32> to vector<1x128xf32>
    %13 = vector.extract_strided_slice %9 {offsets = [3, 0], sizes = [1, 128], strides = [1, 1]} : vector<6x128xf32> to vector<1x128xf32>
    %14 = vector.extract_strided_slice %9 {offsets = [4, 0], sizes = [1, 128], strides = [1, 1]} : vector<6x128xf32> to vector<1x128xf32>
    %15 = vector.extract_strided_slice %9 {offsets = [5, 0], sizes = [1, 128], strides = [1, 1]} : vector<6x128xf32> to vector<1x128xf32>
    %cst_11 = arith.constant dense<0.000000e+00> : vector<128xf32>
    %16 = vector.multi_reduction <add>, %6, %cst_11 [1] : vector<128x128xf32> to vector<128xf32>
    %17 = vector.shape_cast %16 : vector<128xf32> to vector<128x1xf32>
    %cst_12 = arith.constant 1.280000e+02 : f32
    %18 = vector.broadcast %cst_12 : f32 to vector<128x1xf32>
    %19 = arith.divf %17, %18 : vector<128x1xf32>
    %20 = vector.broadcast %19 : vector<128x1xf32> to vector<128x128xf32>
    %21 = arith.subf %6, %20 : vector<128x128xf32>
    %22 = arith.mulf %21, %21 : vector<128x128xf32>
    %cst_13 = arith.constant dense<0.000000e+00> : vector<128xf32>
    %23 = vector.multi_reduction <add>, %22, %cst_13 [1] : vector<128x128xf32> to vector<128xf32>
    %24 = vector.shape_cast %23 : vector<128xf32> to vector<128x1xf32>
    %cst_14 = arith.constant 1.280000e+02 : f32
    %25 = vector.broadcast %cst_14 : f32 to vector<128x1xf32>
    %26 = arith.divf %24, %25 : vector<128x1xf32>
    %cst_15 = arith.constant 9.99999974E-6 : f32
    %27 = vector.broadcast %cst_15 : f32 to vector<128x1xf32>
    %28 = arith.addf %26, %27 : vector<128x1xf32>
    %29 = math.rsqrt %28 : vector<128x1xf32>
    %30 = vector.broadcast %29 : vector<128x1xf32> to vector<128x128xf32>
    %31 = arith.mulf %21, %30 : vector<128x128xf32>
    %32 = vector.broadcast %10 : vector<1x128xf32> to vector<128x128xf32>
    %33 = arith.mulf %31, %32 : vector<128x128xf32>
    %34 = vector.broadcast %11 : vector<1x128xf32> to vector<128x128xf32>
    %35 = arith.addf %33, %34 : vector<128x128xf32>
    %36 = arith.truncf %35 : vector<128x128xf32> to vector<128x128xbf16>
    %c0_16 = arith.constant 0 : index
    %c0_17 = arith.constant 0 : index
    %c0_18 = arith.constant 0 : index
    %37 = vector.load %arg6[%c0_16, %c0_17, %c0_18] : memref<2x128x384xbf16, #tpu.memory_space<vmem>>, vector<1x128x384xbf16>
    %38 = vector.shape_cast %37 : vector<1x128x384xbf16> to vector<128x384xbf16>
    %cst_19 = arith.constant dense<0.000000e+00> : vector<128x384xf32>
    %39 = tpu.matmul %36, %38, %cst_19 {dimension_numbers = #tpu.dot_dimension_numbers<[1], [0], [0], [1], [0, 0, 1, 1], [], []>} : vector<128x128xbf16>, vector<128x384xbf16>, vector<128x384xf32> -> vector<128x384xf32>
    %c0_20 = arith.constant 0 : index
    %c0_21 = arith.constant 0 : index
    %c0_22 = arith.constant 0 : index
    %40 = vector.load %arg7[%c0_20, %c0_21, %c0_22] : memref<2x1x384xf32, #tpu.memory_space<vmem>>, vector<1x1x384xf32>
    %41 = vector.shape_cast %40 : vector<1x1x384xf32> to vector<1x384xf32>
    %42 = vector.broadcast %41 : vector<1x384xf32> to vector<128x384xf32>
    %43 = arith.addf %39, %42 : vector<128x384xf32>
    %44 = arith.truncf %43 : vector<128x384xf32> to vector<128x384xbf16>
    %45 = vector.extract_strided_slice %44 {offsets = [0, 0], sizes = [128, 32], strides = [1, 1]} : vector<128x384xbf16> to vector<128x32xbf16>
    %46 = vector.extract_strided_slice %44 {offsets = [0, 128], sizes = [128, 32], strides = [1, 1]} : vector<128x384xbf16> to vector<128x32xbf16>
    %cst_23 = arith.constant dense<0.000000e+00> : vector<128x128xf32>
    %47 = tpu.matmul %45, %46, %cst_23 {dimension_numbers = #tpu.dot_dimension_numbers<[1], [1], [0], [0], [0, 0, 1, 0], [], []>} : vector<128x32xbf16>, vector<128x32xbf16>, vector<128x128xf32> -> vector<128x128xf32>
    %48 = arith.addf %47, %7 : vector<128x128xf32>
    %cst_24 = arith.constant dense<0xFF800000> : vector<128xf32>
    %49 = vector.multi_reduction <maximumf>, %48, %cst_24 [1] : vector<128x128xf32> to vector<128xf32>
    %50 = vector.shape_cast %49 : vector<128xf32> to vector<128x1xf32>
    %51 = vector.broadcast %50 : vector<128x1xf32> to vector<128x128xf32>
    %52 = arith.subf %48, %51 : vector<128x128xf32>
    %53 = math.exp %52 : vector<128x128xf32>
    %cst_25 = arith.constant dense<0.000000e+00> : vector<128xf32>
    %54 = vector.multi_reduction <add>, %53, %cst_25 [1] : vector<128x128xf32> to vector<128xf32>
    %55 = vector.shape_cast %54 : vector<128xf32> to vector<128x1xf32>
    %56 = tpu.reciprocal %55 {approx = true} : vector<128x1xf32> -> vector<128x1xf32>
    %57 = vector.broadcast %56 : vector<128x1xf32> to vector<128x128xf32>
    %58 = arith.mulf %53, %57 : vector<128x128xf32>
    %59 = arith.truncf %58 : vector<128x128xf32> to vector<128x128xbf16>
    %60 = vector.extract_strided_slice %44 {offsets = [0, 256], sizes = [128, 32], strides = [1, 1]} : vector<128x384xbf16> to vector<128x32xbf16>
    %cst_26 = arith.constant dense<0.000000e+00> : vector<128x32xf32>
    %61 = tpu.matmul %59, %60, %cst_26 {dimension_numbers = #tpu.dot_dimension_numbers<[1], [0], [0], [1], [0, 0, 1, 1], [], []>} : vector<128x128xbf16>, vector<128x32xbf16>, vector<128x32xf32> -> vector<128x32xf32>
    %62 = vector.extract_strided_slice %44 {offsets = [0, 32], sizes = [128, 32], strides = [1, 1]} : vector<128x384xbf16> to vector<128x32xbf16>
    %63 = vector.extract_strided_slice %44 {offsets = [0, 160], sizes = [128, 32], strides = [1, 1]} : vector<128x384xbf16> to vector<128x32xbf16>
    %cst_27 = arith.constant dense<0.000000e+00> : vector<128x128xf32>
    %64 = tpu.matmul %62, %63, %cst_27 {dimension_numbers = #tpu.dot_dimension_numbers<[1], [1], [0], [0], [0, 0, 1, 0], [], []>} : vector<128x32xbf16>, vector<128x32xbf16>, vector<128x128xf32> -> vector<128x128xf32>
    %65 = arith.addf %64, %7 : vector<128x128xf32>
    %cst_28 = arith.constant dense<0xFF800000> : vector<128xf32>
    %66 = vector.multi_reduction <maximumf>, %65, %cst_28 [1] : vector<128x128xf32> to vector<128xf32>
    %67 = vector.shape_cast %66 : vector<128xf32> to vector<128x1xf32>
    %68 = vector.broadcast %67 : vector<128x1xf32> to vector<128x128xf32>
    %69 = arith.subf %65, %68 : vector<128x128xf32>
    %70 = math.exp %69 : vector<128x128xf32>
    %cst_29 = arith.constant dense<0.000000e+00> : vector<128xf32>
    %71 = vector.multi_reduction <add>, %70, %cst_29 [1] : vector<128x128xf32> to vector<128xf32>
    %72 = vector.shape_cast %71 : vector<128xf32> to vector<128x1xf32>
    %73 = tpu.reciprocal %72 {approx = true} : vector<128x1xf32> -> vector<128x1xf32>
    %74 = vector.broadcast %73 : vector<128x1xf32> to vector<128x128xf32>
    %75 = arith.mulf %70, %74 : vector<128x128xf32>
    %76 = arith.truncf %75 : vector<128x128xf32> to vector<128x128xbf16>
    %77 = vector.extract_strided_slice %44 {offsets = [0, 288], sizes = [128, 32], strides = [1, 1]} : vector<128x384xbf16> to vector<128x32xbf16>
    %cst_30 = arith.constant dense<0.000000e+00> : vector<128x32xf32>
    %78 = tpu.matmul %76, %77, %cst_30 {dimension_numbers = #tpu.dot_dimension_numbers<[1], [0], [0], [1], [0, 0, 1, 1], [], []>} : vector<128x128xbf16>, vector<128x32xbf16>, vector<128x32xf32> -> vector<128x32xf32>
    %79 = vector.extract_strided_slice %44 {offsets = [0, 64], sizes = [128, 32], strides = [1, 1]} : vector<128x384xbf16> to vector<128x32xbf16>
    %80 = vector.extract_strided_slice %44 {offsets = [0, 192], sizes = [128, 32], strides = [1, 1]} : vector<128x384xbf16> to vector<128x32xbf16>
    %cst_31 = arith.constant dense<0.000000e+00> : vector<128x128xf32>
    %81 = tpu.matmul %79, %80, %cst_31 {dimension_numbers = #tpu.dot_dimension_numbers<[1], [1], [0], [0], [0, 0, 1, 0], [], []>} : vector<128x32xbf16>, vector<128x32xbf16>, vector<128x128xf32> -> vector<128x128xf32>
    %82 = arith.addf %81, %7 : vector<128x128xf32>
    %cst_32 = arith.constant dense<0xFF800000> : vector<128xf32>
    %83 = vector.multi_reduction <maximumf>, %82, %cst_32 [1] : vector<128x128xf32> to vector<128xf32>
    %84 = vector.shape_cast %83 : vector<128xf32> to vector<128x1xf32>
    %85 = vector.broadcast %84 : vector<128x1xf32> to vector<128x128xf32>
    %86 = arith.subf %82, %85 : vector<128x128xf32>
    %87 = math.exp %86 : vector<128x128xf32>
    %cst_33 = arith.constant dense<0.000000e+00> : vector<128xf32>
    %88 = vector.multi_reduction <add>, %87, %cst_33 [1] : vector<128x128xf32> to vector<128xf32>
    %89 = vector.shape_cast %88 : vector<128xf32> to vector<128x1xf32>
    %90 = tpu.reciprocal %89 {approx = true} : vector<128x1xf32> -> vector<128x1xf32>
    %91 = vector.broadcast %90 : vector<128x1xf32> to vector<128x128xf32>
    %92 = arith.mulf %87, %91 : vector<128x128xf32>
    %93 = arith.truncf %92 : vector<128x128xf32> to vector<128x128xbf16>
    %94 = vector.extract_strided_slice %44 {offsets = [0, 320], sizes = [128, 32], strides = [1, 1]} : vector<128x384xbf16> to vector<128x32xbf16>
    %cst_34 = arith.constant dense<0.000000e+00> : vector<128x32xf32>
    %95 = tpu.matmul %93, %94, %cst_34 {dimension_numbers = #tpu.dot_dimension_numbers<[1], [0], [0], [1], [0, 0, 1, 1], [], []>} : vector<128x128xbf16>, vector<128x32xbf16>, vector<128x32xf32> -> vector<128x32xf32>
    %96 = vector.extract_strided_slice %44 {offsets = [0, 96], sizes = [128, 32], strides = [1, 1]} : vector<128x384xbf16> to vector<128x32xbf16>
    %97 = vector.extract_strided_slice %44 {offsets = [0, 224], sizes = [128, 32], strides = [1, 1]} : vector<128x384xbf16> to vector<128x32xbf16>
    %cst_35 = arith.constant dense<0.000000e+00> : vector<128x128xf32>
    %98 = tpu.matmul %96, %97, %cst_35 {dimension_numbers = #tpu.dot_dimension_numbers<[1], [1], [0], [0], [0, 0, 1, 0], [], []>} : vector<128x32xbf16>, vector<128x32xbf16>, vector<128x128xf32> -> vector<128x128xf32>
    %99 = arith.addf %98, %7 : vector<128x128xf32>
    %cst_36 = arith.constant dense<0xFF800000> : vector<128xf32>
    %100 = vector.multi_reduction <maximumf>, %99, %cst_36 [1] : vector<128x128xf32> to vector<128xf32>
    %101 = vector.shape_cast %100 : vector<128xf32> to vector<128x1xf32>
    %102 = vector.broadcast %101 : vector<128x1xf32> to vector<128x128xf32>
    %103 = arith.subf %99, %102 : vector<128x128xf32>
    %104 = math.exp %103 : vector<128x128xf32>
    %cst_37 = arith.constant dense<0.000000e+00> : vector<128xf32>
    %105 = vector.multi_reduction <add>, %104, %cst_37 [1] : vector<128x128xf32> to vector<128xf32>
    %106 = vector.shape_cast %105 : vector<128xf32> to vector<128x1xf32>
    %107 = tpu.reciprocal %106 {approx = true} : vector<128x1xf32> -> vector<128x1xf32>
    %108 = vector.broadcast %107 : vector<128x1xf32> to vector<128x128xf32>
    %109 = arith.mulf %104, %108 : vector<128x128xf32>
    %110 = arith.truncf %109 : vector<128x128xf32> to vector<128x128xbf16>
    %111 = vector.extract_strided_slice %44 {offsets = [0, 352], sizes = [128, 32], strides = [1, 1]} : vector<128x384xbf16> to vector<128x32xbf16>
    %cst_38 = arith.constant dense<0.000000e+00> : vector<128x32xf32>
    %112 = tpu.matmul %110, %111, %cst_38 {dimension_numbers = #tpu.dot_dimension_numbers<[1], [0], [0], [1], [0, 0, 1, 1], [], []>} : vector<128x128xbf16>, vector<128x32xbf16>, vector<128x32xf32> -> vector<128x32xf32>
    %113 = tpu.concatenate %61, %78, %95, %112 in 1 : vector<128x32xf32>, vector<128x32xf32>, vector<128x32xf32>, vector<128x32xf32> -> vector<128x128xf32>
    %114 = arith.truncf %113 : vector<128x128xf32> to vector<128x128xbf16>
    %c0_39 = arith.constant 0 : index
    %c0_40 = arith.constant 0 : index
    %c0_41 = arith.constant 0 : index
    %115 = vector.load %arg8[%c0_39, %c0_40, %c0_41] : memref<2x128x128xbf16, #tpu.memory_space<vmem>>, vector<1x128x128xbf16>
    %116 = vector.shape_cast %115 : vector<1x128x128xbf16> to vector<128x128xbf16>
    %cst_42 = arith.constant dense<0.000000e+00> : vector<128x128xf32>
    %117 = tpu.matmul %114, %116, %cst_42 {dimension_numbers = #tpu.dot_dimension_numbers<[1], [0], [0], [1], [0, 0, 1, 1], [], []>} : vector<128x128xbf16>, vector<128x128xbf16>, vector<128x128xf32> -> vector<128x128xf32>
    %118 = arith.addf %6, %117 : vector<128x128xf32>
    %119 = vector.broadcast %14 : vector<1x128xf32> to vector<128x128xf32>
    %120 = arith.addf %118, %119 : vector<128x128xf32>
    %cst_43 = arith.constant dense<0.000000e+00> : vector<128xf32>
    %121 = vector.multi_reduction <add>, %120, %cst_43 [1] : vector<128x128xf32> to vector<128xf32>
    %122 = vector.shape_cast %121 : vector<128xf32> to vector<128x1xf32>
    %cst_44 = arith.constant 1.280000e+02 : f32
    %123 = vector.broadcast %cst_44 : f32 to vector<128x1xf32>
    %124 = arith.divf %122, %123 : vector<128x1xf32>
    %125 = vector.broadcast %124 : vector<128x1xf32> to vector<128x128xf32>
    %126 = arith.subf %120, %125 : vector<128x128xf32>
    %127 = arith.mulf %126, %126 : vector<128x128xf32>
    %cst_45 = arith.constant dense<0.000000e+00> : vector<128xf32>
    %128 = vector.multi_reduction <add>, %127, %cst_45 [1] : vector<128x128xf32> to vector<128xf32>
    %129 = vector.shape_cast %128 : vector<128xf32> to vector<128x1xf32>
    %cst_46 = arith.constant 1.280000e+02 : f32
    %130 = vector.broadcast %cst_46 : f32 to vector<128x1xf32>
    %131 = arith.divf %129, %130 : vector<128x1xf32>
    %cst_47 = arith.constant 9.99999974E-6 : f32
    %132 = vector.broadcast %cst_47 : f32 to vector<128x1xf32>
    %133 = arith.addf %131, %132 : vector<128x1xf32>
    %134 = math.rsqrt %133 : vector<128x1xf32>
    %135 = vector.broadcast %134 : vector<128x1xf32> to vector<128x128xf32>
    %136 = arith.mulf %126, %135 : vector<128x128xf32>
    %137 = vector.broadcast %12 : vector<1x128xf32> to vector<128x128xf32>
    %138 = arith.mulf %136, %137 : vector<128x128xf32>
    %139 = vector.broadcast %13 : vector<1x128xf32> to vector<128x128xf32>
    %140 = arith.addf %138, %139 : vector<128x128xf32>
    %141 = arith.truncf %140 : vector<128x128xf32> to vector<128x128xbf16>
    %c0_48 = arith.constant 0 : index
    %c0_49 = arith.constant 0 : index
    %c0_50 = arith.constant 0 : index
    %142 = vector.load %arg9[%c0_48, %c0_49, %c0_50] : memref<2x128x256xbf16, #tpu.memory_space<vmem>>, vector<1x128x256xbf16>
    %143 = vector.shape_cast %142 : vector<1x128x256xbf16> to vector<128x256xbf16>
    %cst_51 = arith.constant dense<0.000000e+00> : vector<128x256xf32>
    %144 = tpu.matmul %141, %143, %cst_51 {dimension_numbers = #tpu.dot_dimension_numbers<[1], [0], [0], [1], [0, 0, 1, 1], [], []>} : vector<128x128xbf16>, vector<128x256xbf16>, vector<128x256xf32> -> vector<128x256xf32>
    %c0_52 = arith.constant 0 : index
    %c0_53 = arith.constant 0 : index
    %c0_54 = arith.constant 0 : index
    %145 = vector.load %arg10[%c0_52, %c0_53, %c0_54] : memref<2x1x256xf32, #tpu.memory_space<vmem>>, vector<1x1x256xf32>
    %146 = vector.shape_cast %145 : vector<1x1x256xf32> to vector<1x256xf32>
    %147 = vector.broadcast %146 : vector<1x256xf32> to vector<128x256xf32>
    %148 = arith.addf %144, %147 : vector<128x256xf32>
    %cst_55 = arith.constant 0.000000e+00 : f32
    %149 = vector.broadcast %cst_55 : f32 to vector<128x256xf32>
    %150 = arith.maximumf %148, %149 : vector<128x256xf32>
    %151 = arith.truncf %150 : vector<128x256xf32> to vector<128x256xbf16>
    %c0_56 = arith.constant 0 : index
    %c0_57 = arith.constant 0 : index
    %c0_58 = arith.constant 0 : index
    %152 = vector.load %arg11[%c0_56, %c0_57, %c0_58] : memref<2x256x128xbf16, #tpu.memory_space<vmem>>, vector<1x256x128xbf16>
    %153 = vector.shape_cast %152 : vector<1x256x128xbf16> to vector<256x128xbf16>
    %cst_59 = arith.constant dense<0.000000e+00> : vector<128x128xf32>
    %154 = tpu.matmul %151, %153, %cst_59 {dimension_numbers = #tpu.dot_dimension_numbers<[1], [0], [0], [1], [0, 0, 1, 1], [], []>} : vector<128x256xbf16>, vector<256x128xbf16>, vector<128x128xf32> -> vector<128x128xf32>
    %155 = arith.addf %120, %154 : vector<128x128xf32>
    %156 = vector.broadcast %15 : vector<1x128xf32> to vector<128x128xf32>
    %157 = arith.addf %155, %156 : vector<128x128xf32>
    %c1 = arith.constant 1 : index
    %c0_60 = arith.constant 0 : index
    %c0_61 = arith.constant 0 : index
    %158 = vector.load %arg5[%c1, %c0_60, %c0_61] : memref<2x6x128xf32, #tpu.memory_space<vmem>>, vector<1x6x128xf32>
    %159 = vector.shape_cast %158 : vector<1x6x128xf32> to vector<6x128xf32>
    %160 = vector.extract_strided_slice %159 {offsets = [0, 0], sizes = [1, 128], strides = [1, 1]} : vector<6x128xf32> to vector<1x128xf32>
    %161 = vector.extract_strided_slice %159 {offsets = [1, 0], sizes = [1, 128], strides = [1, 1]} : vector<6x128xf32> to vector<1x128xf32>
    %162 = vector.extract_strided_slice %159 {offsets = [2, 0], sizes = [1, 128], strides = [1, 1]} : vector<6x128xf32> to vector<1x128xf32>
    %163 = vector.extract_strided_slice %159 {offsets = [3, 0], sizes = [1, 128], strides = [1, 1]} : vector<6x128xf32> to vector<1x128xf32>
    %164 = vector.extract_strided_slice %159 {offsets = [4, 0], sizes = [1, 128], strides = [1, 1]} : vector<6x128xf32> to vector<1x128xf32>
    %165 = vector.extract_strided_slice %159 {offsets = [5, 0], sizes = [1, 128], strides = [1, 1]} : vector<6x128xf32> to vector<1x128xf32>
    %cst_62 = arith.constant dense<0.000000e+00> : vector<128xf32>
    %166 = vector.multi_reduction <add>, %157, %cst_62 [1] : vector<128x128xf32> to vector<128xf32>
    %167 = vector.shape_cast %166 : vector<128xf32> to vector<128x1xf32>
    %cst_63 = arith.constant 1.280000e+02 : f32
    %168 = vector.broadcast %cst_63 : f32 to vector<128x1xf32>
    %169 = arith.divf %167, %168 : vector<128x1xf32>
    %170 = vector.broadcast %169 : vector<128x1xf32> to vector<128x128xf32>
    %171 = arith.subf %157, %170 : vector<128x128xf32>
    %172 = arith.mulf %171, %171 : vector<128x128xf32>
    %cst_64 = arith.constant dense<0.000000e+00> : vector<128xf32>
    %173 = vector.multi_reduction <add>, %172, %cst_64 [1] : vector<128x128xf32> to vector<128xf32>
    %174 = vector.shape_cast %173 : vector<128xf32> to vector<128x1xf32>
    %cst_65 = arith.constant 1.280000e+02 : f32
    %175 = vector.broadcast %cst_65 : f32 to vector<128x1xf32>
    %176 = arith.divf %174, %175 : vector<128x1xf32>
    %cst_66 = arith.constant 9.99999974E-6 : f32
    %177 = vector.broadcast %cst_66 : f32 to vector<128x1xf32>
    %178 = arith.addf %176, %177 : vector<128x1xf32>
    %179 = math.rsqrt %178 : vector<128x1xf32>
    %180 = vector.broadcast %179 : vector<128x1xf32> to vector<128x128xf32>
    %181 = arith.mulf %171, %180 : vector<128x128xf32>
    %182 = vector.broadcast %160 : vector<1x128xf32> to vector<128x128xf32>
    %183 = arith.mulf %181, %182 : vector<128x128xf32>
    %184 = vector.broadcast %161 : vector<1x128xf32> to vector<128x128xf32>
    %185 = arith.addf %183, %184 : vector<128x128xf32>
    %186 = arith.truncf %185 : vector<128x128xf32> to vector<128x128xbf16>
    %c1_67 = arith.constant 1 : index
    %c0_68 = arith.constant 0 : index
    %c0_69 = arith.constant 0 : index
    %187 = vector.load %arg6[%c1_67, %c0_68, %c0_69] : memref<2x128x384xbf16, #tpu.memory_space<vmem>>, vector<1x128x384xbf16>
    %188 = vector.shape_cast %187 : vector<1x128x384xbf16> to vector<128x384xbf16>
    %cst_70 = arith.constant dense<0.000000e+00> : vector<128x384xf32>
    %189 = tpu.matmul %186, %188, %cst_70 {dimension_numbers = #tpu.dot_dimension_numbers<[1], [0], [0], [1], [0, 0, 1, 1], [], []>} : vector<128x128xbf16>, vector<128x384xbf16>, vector<128x384xf32> -> vector<128x384xf32>
    %c1_71 = arith.constant 1 : index
    %c0_72 = arith.constant 0 : index
    %c0_73 = arith.constant 0 : index
    %190 = vector.load %arg7[%c1_71, %c0_72, %c0_73] : memref<2x1x384xf32, #tpu.memory_space<vmem>>, vector<1x1x384xf32>
    %191 = vector.shape_cast %190 : vector<1x1x384xf32> to vector<1x384xf32>
    %192 = vector.broadcast %191 : vector<1x384xf32> to vector<128x384xf32>
    %193 = arith.addf %189, %192 : vector<128x384xf32>
    %194 = arith.truncf %193 : vector<128x384xf32> to vector<128x384xbf16>
    %195 = vector.extract_strided_slice %194 {offsets = [0, 0], sizes = [128, 32], strides = [1, 1]} : vector<128x384xbf16> to vector<128x32xbf16>
    %196 = vector.extract_strided_slice %194 {offsets = [0, 128], sizes = [128, 32], strides = [1, 1]} : vector<128x384xbf16> to vector<128x32xbf16>
    %cst_74 = arith.constant dense<0.000000e+00> : vector<128x128xf32>
    %197 = tpu.matmul %195, %196, %cst_74 {dimension_numbers = #tpu.dot_dimension_numbers<[1], [1], [0], [0], [0, 0, 1, 0], [], []>} : vector<128x32xbf16>, vector<128x32xbf16>, vector<128x128xf32> -> vector<128x128xf32>
    %198 = arith.addf %197, %7 : vector<128x128xf32>
    %cst_75 = arith.constant dense<0xFF800000> : vector<128xf32>
    %199 = vector.multi_reduction <maximumf>, %198, %cst_75 [1] : vector<128x128xf32> to vector<128xf32>
    %200 = vector.shape_cast %199 : vector<128xf32> to vector<128x1xf32>
    %201 = vector.broadcast %200 : vector<128x1xf32> to vector<128x128xf32>
    %202 = arith.subf %198, %201 : vector<128x128xf32>
    %203 = math.exp %202 : vector<128x128xf32>
    %cst_76 = arith.constant dense<0.000000e+00> : vector<128xf32>
    %204 = vector.multi_reduction <add>, %203, %cst_76 [1] : vector<128x128xf32> to vector<128xf32>
    %205 = vector.shape_cast %204 : vector<128xf32> to vector<128x1xf32>
    %206 = tpu.reciprocal %205 {approx = true} : vector<128x1xf32> -> vector<128x1xf32>
    %207 = vector.broadcast %206 : vector<128x1xf32> to vector<128x128xf32>
    %208 = arith.mulf %203, %207 : vector<128x128xf32>
    %209 = arith.truncf %208 : vector<128x128xf32> to vector<128x128xbf16>
    %210 = vector.extract_strided_slice %194 {offsets = [0, 256], sizes = [128, 32], strides = [1, 1]} : vector<128x384xbf16> to vector<128x32xbf16>
    %cst_77 = arith.constant dense<0.000000e+00> : vector<128x32xf32>
    %211 = tpu.matmul %209, %210, %cst_77 {dimension_numbers = #tpu.dot_dimension_numbers<[1], [0], [0], [1], [0, 0, 1, 1], [], []>} : vector<128x128xbf16>, vector<128x32xbf16>, vector<128x32xf32> -> vector<128x32xf32>
    %212 = vector.extract_strided_slice %194 {offsets = [0, 32], sizes = [128, 32], strides = [1, 1]} : vector<128x384xbf16> to vector<128x32xbf16>
    %213 = vector.extract_strided_slice %194 {offsets = [0, 160], sizes = [128, 32], strides = [1, 1]} : vector<128x384xbf16> to vector<128x32xbf16>
    %cst_78 = arith.constant dense<0.000000e+00> : vector<128x128xf32>
    %214 = tpu.matmul %212, %213, %cst_78 {dimension_numbers = #tpu.dot_dimension_numbers<[1], [1], [0], [0], [0, 0, 1, 0], [], []>} : vector<128x32xbf16>, vector<128x32xbf16>, vector<128x128xf32> -> vector<128x128xf32>
    %215 = arith.addf %214, %7 : vector<128x128xf32>
    %cst_79 = arith.constant dense<0xFF800000> : vector<128xf32>
    %216 = vector.multi_reduction <maximumf>, %215, %cst_79 [1] : vector<128x128xf32> to vector<128xf32>
    %217 = vector.shape_cast %216 : vector<128xf32> to vector<128x1xf32>
    %218 = vector.broadcast %217 : vector<128x1xf32> to vector<128x128xf32>
    %219 = arith.subf %215, %218 : vector<128x128xf32>
    %220 = math.exp %219 : vector<128x128xf32>
    %cst_80 = arith.constant dense<0.000000e+00> : vector<128xf32>
    %221 = vector.multi_reduction <add>, %220, %cst_80 [1] : vector<128x128xf32> to vector<128xf32>
    %222 = vector.shape_cast %221 : vector<128xf32> to vector<128x1xf32>
    %223 = tpu.reciprocal %222 {approx = true} : vector<128x1xf32> -> vector<128x1xf32>
    %224 = vector.broadcast %223 : vector<128x1xf32> to vector<128x128xf32>
    %225 = arith.mulf %220, %224 : vector<128x128xf32>
    %226 = arith.truncf %225 : vector<128x128xf32> to vector<128x128xbf16>
    %227 = vector.extract_strided_slice %194 {offsets = [0, 288], sizes = [128, 32], strides = [1, 1]} : vector<128x384xbf16> to vector<128x32xbf16>
    %cst_81 = arith.constant dense<0.000000e+00> : vector<128x32xf32>
    %228 = tpu.matmul %226, %227, %cst_81 {dimension_numbers = #tpu.dot_dimension_numbers<[1], [0], [0], [1], [0, 0, 1, 1], [], []>} : vector<128x128xbf16>, vector<128x32xbf16>, vector<128x32xf32> -> vector<128x32xf32>
    %229 = vector.extract_strided_slice %194 {offsets = [0, 64], sizes = [128, 32], strides = [1, 1]} : vector<128x384xbf16> to vector<128x32xbf16>
    %230 = vector.extract_strided_slice %194 {offsets = [0, 192], sizes = [128, 32], strides = [1, 1]} : vector<128x384xbf16> to vector<128x32xbf16>
    %cst_82 = arith.constant dense<0.000000e+00> : vector<128x128xf32>
    %231 = tpu.matmul %229, %230, %cst_82 {dimension_numbers = #tpu.dot_dimension_numbers<[1], [1], [0], [0], [0, 0, 1, 0], [], []>} : vector<128x32xbf16>, vector<128x32xbf16>, vector<128x128xf32> -> vector<128x128xf32>
    %232 = arith.addf %231, %7 : vector<128x128xf32>
    %cst_83 = arith.constant dense<0xFF800000> : vector<128xf32>
    %233 = vector.multi_reduction <maximumf>, %232, %cst_83 [1] : vector<128x128xf32> to vector<128xf32>
    %234 = vector.shape_cast %233 : vector<128xf32> to vector<128x1xf32>
    %235 = vector.broadcast %234 : vector<128x1xf32> to vector<128x128xf32>
    %236 = arith.subf %232, %235 : vector<128x128xf32>
    %237 = math.exp %236 : vector<128x128xf32>
    %cst_84 = arith.constant dense<0.000000e+00> : vector<128xf32>
    %238 = vector.multi_reduction <add>, %237, %cst_84 [1] : vector<128x128xf32> to vector<128xf32>
    %239 = vector.shape_cast %238 : vector<128xf32> to vector<128x1xf32>
    %240 = tpu.reciprocal %239 {approx = true} : vector<128x1xf32> -> vector<128x1xf32>
    %241 = vector.broadcast %240 : vector<128x1xf32> to vector<128x128xf32>
    %242 = arith.mulf %237, %241 : vector<128x128xf32>
    %243 = arith.truncf %242 : vector<128x128xf32> to vector<128x128xbf16>
    %244 = vector.extract_strided_slice %194 {offsets = [0, 320], sizes = [128, 32], strides = [1, 1]} : vector<128x384xbf16> to vector<128x32xbf16>
    %cst_85 = arith.constant dense<0.000000e+00> : vector<128x32xf32>
    %245 = tpu.matmul %243, %244, %cst_85 {dimension_numbers = #tpu.dot_dimension_numbers<[1], [0], [0], [1], [0, 0, 1, 1], [], []>} : vector<128x128xbf16>, vector<128x32xbf16>, vector<128x32xf32> -> vector<128x32xf32>
    %246 = vector.extract_strided_slice %194 {offsets = [0, 96], sizes = [128, 32], strides = [1, 1]} : vector<128x384xbf16> to vector<128x32xbf16>
    %247 = vector.extract_strided_slice %194 {offsets = [0, 224], sizes = [128, 32], strides = [1, 1]} : vector<128x384xbf16> to vector<128x32xbf16>
    %cst_86 = arith.constant dense<0.000000e+00> : vector<128x128xf32>
    %248 = tpu.matmul %246, %247, %cst_86 {dimension_numbers = #tpu.dot_dimension_numbers<[1], [1], [0], [0], [0, 0, 1, 0], [], []>} : vector<128x32xbf16>, vector<128x32xbf16>, vector<128x128xf32> -> vector<128x128xf32>
    %249 = arith.addf %248, %7 : vector<128x128xf32>
    %cst_87 = arith.constant dense<0xFF800000> : vector<128xf32>
    %250 = vector.multi_reduction <maximumf>, %249, %cst_87 [1] : vector<128x128xf32> to vector<128xf32>
    %251 = vector.shape_cast %250 : vector<128xf32> to vector<128x1xf32>
    %252 = vector.broadcast %251 : vector<128x1xf32> to vector<128x128xf32>
    %253 = arith.subf %249, %252 : vector<128x128xf32>
    %254 = math.exp %253 : vector<128x128xf32>
    %cst_88 = arith.constant dense<0.000000e+00> : vector<128xf32>
    %255 = vector.multi_reduction <add>, %254, %cst_88 [1] : vector<128x128xf32> to vector<128xf32>
    %256 = vector.shape_cast %255 : vector<128xf32> to vector<128x1xf32>
    %257 = tpu.reciprocal %256 {approx = true} : vector<128x1xf32> -> vector<128x1xf32>
    %258 = vector.broadcast %257 : vector<128x1xf32> to vector<128x128xf32>
    %259 = arith.mulf %254, %258 : vector<128x128xf32>
    %260 = arith.truncf %259 : vector<128x128xf32> to vector<128x128xbf16>
    %261 = vector.extract_strided_slice %194 {offsets = [0, 352], sizes = [128, 32], strides = [1, 1]} : vector<128x384xbf16> to vector<128x32xbf16>
    %cst_89 = arith.constant dense<0.000000e+00> : vector<128x32xf32>
    %262 = tpu.matmul %260, %261, %cst_89 {dimension_numbers = #tpu.dot_dimension_numbers<[1], [0], [0], [1], [0, 0, 1, 1], [], []>} : vector<128x128xbf16>, vector<128x32xbf16>, vector<128x32xf32> -> vector<128x32xf32>
    %263 = tpu.concatenate %211, %228, %245, %262 in 1 : vector<128x32xf32>, vector<128x32xf32>, vector<128x32xf32>, vector<128x32xf32> -> vector<128x128xf32>
    %264 = arith.truncf %263 : vector<128x128xf32> to vector<128x128xbf16>
    %c1_90 = arith.constant 1 : index
    %c0_91 = arith.constant 0 : index
    %c0_92 = arith.constant 0 : index
    %265 = vector.load %arg8[%c1_90, %c0_91, %c0_92] : memref<2x128x128xbf16, #tpu.memory_space<vmem>>, vector<1x128x128xbf16>
    %266 = vector.shape_cast %265 : vector<1x128x128xbf16> to vector<128x128xbf16>
    %cst_93 = arith.constant dense<0.000000e+00> : vector<128x128xf32>
    %267 = tpu.matmul %264, %266, %cst_93 {dimension_numbers = #tpu.dot_dimension_numbers<[1], [0], [0], [1], [0, 0, 1, 1], [], []>} : vector<128x128xbf16>, vector<128x128xbf16>, vector<128x128xf32> -> vector<128x128xf32>
    %268 = arith.addf %157, %267 : vector<128x128xf32>
    %269 = vector.broadcast %164 : vector<1x128xf32> to vector<128x128xf32>
    %270 = arith.addf %268, %269 : vector<128x128xf32>
    %cst_94 = arith.constant dense<0.000000e+00> : vector<128xf32>
    %271 = vector.multi_reduction <add>, %270, %cst_94 [1] : vector<128x128xf32> to vector<128xf32>
    %272 = vector.shape_cast %271 : vector<128xf32> to vector<128x1xf32>
    %cst_95 = arith.constant 1.280000e+02 : f32
    %273 = vector.broadcast %cst_95 : f32 to vector<128x1xf32>
    %274 = arith.divf %272, %273 : vector<128x1xf32>
    %275 = vector.broadcast %274 : vector<128x1xf32> to vector<128x128xf32>
    %276 = arith.subf %270, %275 : vector<128x128xf32>
    %277 = arith.mulf %276, %276 : vector<128x128xf32>
    %cst_96 = arith.constant dense<0.000000e+00> : vector<128xf32>
    %278 = vector.multi_reduction <add>, %277, %cst_96 [1] : vector<128x128xf32> to vector<128xf32>
    %279 = vector.shape_cast %278 : vector<128xf32> to vector<128x1xf32>
    %cst_97 = arith.constant 1.280000e+02 : f32
    %280 = vector.broadcast %cst_97 : f32 to vector<128x1xf32>
    %281 = arith.divf %279, %280 : vector<128x1xf32>
    %cst_98 = arith.constant 9.99999974E-6 : f32
    %282 = vector.broadcast %cst_98 : f32 to vector<128x1xf32>
    %283 = arith.addf %281, %282 : vector<128x1xf32>
    %284 = math.rsqrt %283 : vector<128x1xf32>
    %285 = vector.broadcast %284 : vector<128x1xf32> to vector<128x128xf32>
    %286 = arith.mulf %276, %285 : vector<128x128xf32>
    %287 = vector.broadcast %162 : vector<1x128xf32> to vector<128x128xf32>
    %288 = arith.mulf %286, %287 : vector<128x128xf32>
    %289 = vector.broadcast %163 : vector<1x128xf32> to vector<128x128xf32>
    %290 = arith.addf %288, %289 : vector<128x128xf32>
    %291 = arith.truncf %290 : vector<128x128xf32> to vector<128x128xbf16>
    %c1_99 = arith.constant 1 : index
    %c0_100 = arith.constant 0 : index
    %c0_101 = arith.constant 0 : index
    %292 = vector.load %arg9[%c1_99, %c0_100, %c0_101] : memref<2x128x256xbf16, #tpu.memory_space<vmem>>, vector<1x128x256xbf16>
    %293 = vector.shape_cast %292 : vector<1x128x256xbf16> to vector<128x256xbf16>
    %cst_102 = arith.constant dense<0.000000e+00> : vector<128x256xf32>
    %294 = tpu.matmul %291, %293, %cst_102 {dimension_numbers = #tpu.dot_dimension_numbers<[1], [0], [0], [1], [0, 0, 1, 1], [], []>} : vector<128x128xbf16>, vector<128x256xbf16>, vector<128x256xf32> -> vector<128x256xf32>
    %c1_103 = arith.constant 1 : index
    %c0_104 = arith.constant 0 : index
    %c0_105 = arith.constant 0 : index
    %295 = vector.load %arg10[%c1_103, %c0_104, %c0_105] : memref<2x1x256xf32, #tpu.memory_space<vmem>>, vector<1x1x256xf32>
    %296 = vector.shape_cast %295 : vector<1x1x256xf32> to vector<1x256xf32>
    %297 = vector.broadcast %296 : vector<1x256xf32> to vector<128x256xf32>
    %298 = arith.addf %294, %297 : vector<128x256xf32>
    %cst_106 = arith.constant 0.000000e+00 : f32
    %299 = vector.broadcast %cst_106 : f32 to vector<128x256xf32>
    %300 = arith.maximumf %298, %299 : vector<128x256xf32>
    %301 = arith.truncf %300 : vector<128x256xf32> to vector<128x256xbf16>
    %c1_107 = arith.constant 1 : index
    %c0_108 = arith.constant 0 : index
    %c0_109 = arith.constant 0 : index
    %302 = vector.load %arg11[%c1_107, %c0_108, %c0_109] : memref<2x256x128xbf16, #tpu.memory_space<vmem>>, vector<1x256x128xbf16>
    %303 = vector.shape_cast %302 : vector<1x256x128xbf16> to vector<256x128xbf16>
    %cst_110 = arith.constant dense<0.000000e+00> : vector<128x128xf32>
    %304 = tpu.matmul %301, %303, %cst_110 {dimension_numbers = #tpu.dot_dimension_numbers<[1], [0], [0], [1], [0, 0, 1, 1], [], []>} : vector<128x256xbf16>, vector<256x128xbf16>, vector<128x128xf32> -> vector<128x128xf32>
    %305 = arith.addf %270, %304 : vector<128x128xf32>
    %306 = vector.broadcast %165 : vector<1x128xf32> to vector<128x128xf32>
    %307 = arith.addf %305, %306 : vector<128x128xf32>
    %308 = arith.truncf %307 : vector<128x128xf32> to vector<128x128xbf16>
    %c0_111 = arith.constant 0 : index
    %c0_112 = arith.constant 0 : index
    %309 = vector.load %arg13[%c0_111, %c0_112] : memref<128x128xbf16, #tpu.memory_space<vmem>>, vector<128x128xbf16>
    %cst_113 = arith.constant dense<0.000000e+00> : vector<128x128xf32>
    %310 = tpu.matmul %308, %309, %cst_113 {dimension_numbers = #tpu.dot_dimension_numbers<[1], [0], [0], [1], [0, 0, 1, 1], [], []>} : vector<128x128xbf16>, vector<128x128xbf16>, vector<128x128xf32> -> vector<128x128xf32>
    %c0_114 = arith.constant 0 : index
    %c0_115 = arith.constant 0 : index
    %311 = vector.load %arg14[%c0_114, %c0_115] : memref<1x128xf32, #tpu.memory_space<vmem>>, vector<1x128xf32>
    %312 = vector.broadcast %311 : vector<1x128xf32> to vector<128x128xf32>
    %313 = arith.addf %310, %312 : vector<128x128xf32>
    %314 = arith.truncf %313 : vector<128x128xf32> to vector<128x128xbf16>
    %c0_116 = arith.constant 0 : index
    %c0_117 = arith.constant 0 : index
    %c0_118 = arith.constant 0 : index
    %315 = vector.load %arg19[%c0_116, %c0_117, %c0_118] : memref<1x128x128xbf16, #tpu.memory_space<vmem>>, vector<1x128x128xbf16>
    %316 = vector.shape_cast %315 : vector<1x128x128xbf16> to vector<128x128xbf16>
    %317 = vector.shape_cast %314 : vector<128x128xbf16> to vector<1x128x128xbf16>
    tpu.vector_store %arg19[%c0_116, %c0_117, %c0_118], %317 {strides = array<i32>} : memref<1x128x128xbf16, #tpu.memory_space<vmem>>, vector<1x128x128xbf16>,
    %c0_119 = arith.constant 0 : index
    %c0_120 = arith.constant 0 : index
    %318 = vector.load %arg12[%c0_119, %c0_120] : memref<16x128xbf16, #tpu.memory_space<vmem>>, vector<16x128xbf16>
    %cst_121 = arith.constant dense<0.000000e+00> : vector<16x128xf32>
    %319 = tpu.matmul %318, %308, %cst_121 {dimension_numbers = #tpu.dot_dimension_numbers<[1], [0], [0], [1], [0, 0, 1, 1], [], []>} : vector<16x128xbf16>, vector<128x128xbf16>, vector<16x128xf32> -> vector<16x128xf32>
    %320 = arith.truncf %319 : vector<16x128xf32> to vector<16x128xbf16>
    %c0_122 = arith.constant 0 : index
    %c0_123 = arith.constant 0 : index
    %321 = vector.load %arg15[%c0_122, %c0_123] : memref<128x256xbf16, #tpu.memory_space<vmem>>, vector<128x256xbf16>
    %cst_124 = arith.constant dense<0.000000e+00> : vector<16x256xf32>
    %322 = tpu.matmul %320, %321, %cst_124 {dimension_numbers = #tpu.dot_dimension_numbers<[1], [0], [0], [1], [0, 0, 1, 1], [], []>} : vector<16x128xbf16>, vector<128x256xbf16>, vector<16x256xf32> -> vector<16x256xf32>
    %c0_125 = arith.constant 0 : index
    %c0_126 = arith.constant 0 : index
    %323 = vector.load %arg16[%c0_125, %c0_126] : memref<1x256xf32, #tpu.memory_space<vmem>>, vector<1x256xf32>
    %324 = vector.broadcast %323 : vector<1x256xf32> to vector<16x256xf32>
    %325 = arith.addf %322, %324 : vector<16x256xf32>
    %cst_127 = arith.constant 0.000000e+00 : f32
    %326 = vector.broadcast %cst_127 : f32 to vector<16x256xf32>
    %327 = arith.maximumf %325, %326 : vector<16x256xf32>
    %328 = arith.truncf %327 : vector<16x256xf32> to vector<16x256xbf16>
    %c0_128 = arith.constant 0 : index
    %c0_129 = arith.constant 0 : index
    %329 = vector.load %arg17[%c0_128, %c0_129] : memref<256x128xbf16, #tpu.memory_space<vmem>>, vector<256x128xbf16>
    %cst_130 = arith.constant dense<0.000000e+00> : vector<16x128xf32>
    %330 = tpu.matmul %328, %329, %cst_130 {dimension_numbers = #tpu.dot_dimension_numbers<[1], [0], [0], [1], [0, 0, 1, 1], [], []>} : vector<16x256xbf16>, vector<256x128xbf16>, vector<16x128xf32> -> vector<16x128xf32>
    %c0_131 = arith.constant 0 : index
    %c0_132 = arith.constant 0 : index
    %331 = vector.load %arg18[%c0_131, %c0_132] : memref<1x128xf32, #tpu.memory_space<vmem>>, vector<1x128xf32>
    %332 = vector.broadcast %331 : vector<1x128xf32> to vector<16x128xf32>
    %333 = arith.addf %330, %332 : vector<16x128xf32>
    %c0_133 = arith.constant 0 : index
    %c0_134 = arith.constant 0 : index
    %c0_135 = arith.constant 0 : index
    %334 = vector.load %arg20[%c0_133, %c0_134, %c0_135] : memref<1x16x128xf32, #tpu.memory_space<vmem>>, vector<1x16x128xf32>
    %335 = vector.shape_cast %334 : vector<1x16x128xf32> to vector<16x128xf32>
    %336 = vector.shape_cast %333 : vector<16x128xf32> to vector<1x16x128xf32>
    tpu.vector_store %arg20[%c0_133, %c0_134, %c0_135], %336 {strides = array<i32>} : memref<1x16x128xf32, #tpu.memory_space<vmem>>, vector<1x16x128xf32>,
    return
  }
  func.func @transform_0(%arg0: i32) -> (i32, i32, i32) {
    %c0_i32 = arith.constant 0 : i32
    %c0_i32_0 = arith.constant 0 : i32
    %c0_i32_1 = arith.constant 0 : i32
    return %arg0, %c0_i32, %c0_i32_0 : i32, i32, i32
  }
  func.func @transform_1(%arg0: i32) -> (i32, i32) {
    %c0_i32 = arith.constant 0 : i32
    %c0_i32_0 = arith.constant 0 : i32
    %c0_i32_1 = arith.constant 0 : i32
    return %c0_i32, %c0_i32_0 : i32, i32
  }
  func.func @transform_2(%arg0: i32) -> (i32, i32) {
    %c0_i32 = arith.constant 0 : i32
    %c0_i32_0 = arith.constant 0 : i32
    %c0_i32_1 = arith.constant 0 : i32
    return %c0_i32, %c0_i32_0 : i32, i32
  }
  func.func @transform_3(%arg0: i32) -> (i32, i32) {
    %c0_i32 = arith.constant 0 : i32
    %c0_i32_0 = arith.constant 0 : i32
    %c0_i32_1 = arith.constant 0 : i32
    return %c0_i32, %c0_i32_0 : i32, i32
  }
  func.func @transform_4(%arg0: i32) -> (i32, i32, i32) {
    %c0_i32 = arith.constant 0 : i32
    %c0_i32_0 = arith.constant 0 : i32
    %c0_i32_1 = arith.constant 0 : i32
    %c0_i32_2 = arith.constant 0 : i32
    return %c0_i32, %c0_i32_0, %c0_i32_1 : i32, i32, i32
  }
  func.func @transform_5(%arg0: i32) -> (i32, i32, i32) {
    %c0_i32 = arith.constant 0 : i32
    %c0_i32_0 = arith.constant 0 : i32
    %c0_i32_1 = arith.constant 0 : i32
    %c0_i32_2 = arith.constant 0 : i32
    return %c0_i32, %c0_i32_0, %c0_i32_1 : i32, i32, i32
  }
  func.func @transform_6(%arg0: i32) -> (i32, i32, i32) {
    %c0_i32 = arith.constant 0 : i32
    %c0_i32_0 = arith.constant 0 : i32
    %c0_i32_1 = arith.constant 0 : i32
    %c0_i32_2 = arith.constant 0 : i32
    return %c0_i32, %c0_i32_0, %c0_i32_1 : i32, i32, i32
  }
  func.func @transform_7(%arg0: i32) -> (i32, i32, i32) {
    %c0_i32 = arith.constant 0 : i32
    %c0_i32_0 = arith.constant 0 : i32
    %c0_i32_1 = arith.constant 0 : i32
    %c0_i32_2 = arith.constant 0 : i32
    return %c0_i32, %c0_i32_0, %c0_i32_1 : i32, i32, i32
  }
  func.func @transform_8(%arg0: i32) -> (i32, i32, i32) {
    %c0_i32 = arith.constant 0 : i32
    %c0_i32_0 = arith.constant 0 : i32
    %c0_i32_1 = arith.constant 0 : i32
    %c0_i32_2 = arith.constant 0 : i32
    return %c0_i32, %c0_i32_0, %c0_i32_1 : i32, i32, i32
  }
  func.func @transform_9(%arg0: i32) -> (i32, i32, i32) {
    %c0_i32 = arith.constant 0 : i32
    %c0_i32_0 = arith.constant 0 : i32
    %c0_i32_1 = arith.constant 0 : i32
    %c0_i32_2 = arith.constant 0 : i32
    return %c0_i32, %c0_i32_0, %c0_i32_1 : i32, i32, i32
  }
  func.func @transform_10(%arg0: i32) -> (i32, i32, i32) {
    %c0_i32 = arith.constant 0 : i32
    %c0_i32_0 = arith.constant 0 : i32
    %c0_i32_1 = arith.constant 0 : i32
    %c0_i32_2 = arith.constant 0 : i32
    return %c0_i32, %c0_i32_0, %c0_i32_1 : i32, i32, i32
  }
  func.func @transform_11(%arg0: i32) -> (i32, i32) {
    %c0_i32 = arith.constant 0 : i32
    %c0_i32_0 = arith.constant 0 : i32
    %c0_i32_1 = arith.constant 0 : i32
    return %c0_i32, %c0_i32_0 : i32, i32
  }
  func.func @transform_12(%arg0: i32) -> (i32, i32) {
    %c0_i32 = arith.constant 0 : i32
    %c0_i32_0 = arith.constant 0 : i32
    %c0_i32_1 = arith.constant 0 : i32
    return %c0_i32, %c0_i32_0 : i32, i32
  }
  func.func @transform_13(%arg0: i32) -> (i32, i32) {
    %c0_i32 = arith.constant 0 : i32
    %c0_i32_0 = arith.constant 0 : i32
    %c0_i32_1 = arith.constant 0 : i32
    return %c0_i32, %c0_i32_0 : i32, i32
  }
  func.func @transform_14(%arg0: i32) -> (i32, i32) {
    %c0_i32 = arith.constant 0 : i32
    %c0_i32_0 = arith.constant 0 : i32
    %c0_i32_1 = arith.constant 0 : i32
    return %c0_i32, %c0_i32_0 : i32, i32
  }
  func.func @transform_15(%arg0: i32) -> (i32, i32) {
    %c0_i32 = arith.constant 0 : i32
    %c0_i32_0 = arith.constant 0 : i32
    %c0_i32_1 = arith.constant 0 : i32
    return %c0_i32, %c0_i32_0 : i32, i32
  }
  func.func @transform_16(%arg0: i32) -> (i32, i32) {
    %c0_i32 = arith.constant 0 : i32
    %c0_i32_0 = arith.constant 0 : i32
    %c0_i32_1 = arith.constant 0 : i32
    return %c0_i32, %c0_i32_0 : i32, i32
  }
  func.func @transform_17(%arg0: i32) -> (i32, i32) {
    %c0_i32 = arith.constant 0 : i32
    %c0_i32_0 = arith.constant 0 : i32
    %c0_i32_1 = arith.constant 0 : i32
    return %c0_i32, %c0_i32_0 : i32, i32
  }
  func.func @transform_18(%arg0: i32) -> (i32, i32, i32) {
    %c0_i32 = arith.constant 0 : i32
    %c0_i32_0 = arith.constant 0 : i32
    %c0_i32_1 = arith.constant 0 : i32
    return %arg0, %c0_i32, %c0_i32_0 : i32, i32, i32
  }
  func.func @transform_19(%arg0: i32) -> (i32, i32, i32) {
    %c0_i32 = arith.constant 0 : i32
    %c0_i32_0 = arith.constant 0 : i32
    %c0_i32_1 = arith.constant 0 : i32
    return %arg0, %c0_i32, %c0_i32_0 : i32, i32, i32
  }
}

</mosaic_0001>

<bundles_post_ra>
// kernel: prune_model_forward.1
= control target key start
LH: loop header
LB: loop body
LE: loop exit
PB: predicated region body
PF: predicated region fallthrough
CT: control target
= control target key end

     0   :  { %vm134_vm0 = vcmask 1043456   ;;  %vm135_vm1 = vcmask 1044480   ;;  %v9592_v2 = vmov 65535   ;;  %vm109_vm2 = vcmask 72704   ;;  %s9595_s26 = smov 32   ;;  %s9596_s27 = smov 64   ;;  %s14686_s1 = inlined_call_operand.vmem [shape: bf16[9,128], index: 1, kind: input, shape index: {}]   ;;  %s14687_s0 = inlined_call_operand.vmem [shape: f32[1,128,9], index: 0, kind: input, shape index: {}]   ;;  %s14688_s2 = inlined_call_operand.vmem [shape: f32[128,128], index: 2, kind: input, shape index: {}]   ;;  %s14689_s5 = inlined_call_operand.vmem [shape: bf16[2,128,384], index: 5, kind: input, shape index: {}]   ;;  %s14690_s4 = inlined_call_operand.vmem [shape: f32[2,6,128], index: 4, kind: input, shape index: {}]   ;;  %s14691_s6 = inlined_call_operand.vmem [shape: f32[2,1,384], index: 6, kind: input, shape index: {}]   ;;  %s14692_s3 = inlined_call_operand.vmem [shape: f32[128,128], index: 3, kind: input, shape index: {}]   ;;  %s14693_s7 = inlined_call_operand.vmem [shape: bf16[2,128,128], index: 7, kind: input, shape index: {}]   ;;  %s14694_s8 = inlined_call_operand.vmem [shape: bf16[2,128,256], index: 8, kind: input, shape index: {}]   ;;  %s14695_s10 = inlined_call_operand.vmem [shape: bf16[2,256,128], index: 10, kind: input, shape index: {}]   ;;  %s14696_s9 = inlined_call_operand.vmem [shape: f32[2,1,256], index: 9, kind: input, shape index: {}]   ;;  %s14697_s12 = inlined_call_operand.vmem [shape: bf16[128,128], index: 12, kind: input, shape index: {}]   ;;  %s14698_s13 = inlined_call_operand.vmem [shape: f32[1,128], index: 13, kind: input, shape index: {}]   ;;  %s14699_s18 = inlined_call_operand.vmem [shape: bf16[1,128,128], index: 18, kind: output, shape index: {0}]   ;;  %s14700_s11 = inlined_call_operand.vmem [shape: bf16[16,128], index: 11, kind: input, shape index: {}]   ;;  %s14701_s14 = inlined_call_operand.vmem [shape: bf16[128,256], index: 14, kind: input, shape index: {}]   ;;  %s14702_s16 = inlined_call_operand.vmem [shape: bf16[256,128], index: 16, kind: input, shape index: {}]   ;;  %s14703_s17 = inlined_call_operand.vmem [shape: f32[1,128], index: 17, kind: input, shape index: {}]   ;;  %s14704_s15 = inlined_call_operand.vmem [shape: f32[1,256], index: 15, kind: input, shape index: {}]   ;;  %s14705_s19 = inlined_call_operand.vmem [shape: f32[1,16,128], index: 19, kind: output, shape index: {1}]  }
   0x1   :  { %14773 = sst [smem:[#allocation33_spill]] %s14686_s1  ;;  %v136_v3 = vsel %vm134_vm0, 4294967295, %v9592_v2  ;;  %v9593_v52 = vmov 128.0  }
   0x2   :  { %14774 = sst [smem:[#allocation34_spill]] %s14687_s0  ;;  %v137_v5 = vsel %vm135_vm1, %v136_v3, 0  ;;  %8922 = vrcp.f32 %v9593_v52  ;;  %s9594_s0 = smov 96  }
   0x3   :  { %14775 = sst [smem:[#allocation35_spill]] %s14688_s2 }
   0x4   :  { %14776 = sst [smem:[#allocation36_spill]] %s14689_s5 }
   0x5   :  { %s14777_s20 = sld [smem:[#allocation33_spill]] }
   0x6   :  { %s14778_s23 = sld [smem:[#allocation34_spill]] }
   0x7   :  { %s14779_s21 = sld [smem:[#allocation35_spill]] }
   0x8   :  { %v8923_v53 = vpop.eup %8922  ;;  %s14796_s1 = sld [smem:[#allocation36_spill]] }
   0x9   :  { %v240_v54 = vmul.f32 128.0, %v8923_v53  ;;  %vm244_vm3 = vweird.f32 %v8923_v53 }
   0xb   :  { %v7601_v0 = vld [vmem:[%s14777_s20] sm:$0xf]  ;;  %v8450_v1 = vld [vmem:[%s14777_s20] sm:$0x10]  ;;  %v241_v55 = vsub.f32 1.0, %v240_v54 }
   0xc   :  { %v7602_v4 = vor.u32 %v8450_v1, %v7601_v0  ;;  %v62_v6 = vld [vmem:[%s14778_s23] sm:$0xff]  ;;  %v63_v7 = vld [vmem:[%s14778_s23 + $0x8] sm:$0xff]  ;;  %v64_v10 = vld [vmem:[%s14778_s23 + $0x10] sm:$0xff] }
   0xd   :  { %v78_v9 = vpack.c.bf16 %v63_v7, %v62_v6  ;;  %v65_v11 = vld [vmem:[%s14778_s23 + $0x18] sm:$0xff]  ;;  %v66_v13 = vld [vmem:[%s14778_s23 + $0x20] sm:$0xff]  ;;  %v67_v14 = vld [vmem:[%s14778_s23 + $0x28] sm:$0xff]  ;;  %v242_v56 = vmul.f32 %v8923_v53, %v241_v55 }
   0xe   :  { %v139_v8 = vand.u32 %v7602_v4, %v137_v5  ;;  %v79_v12 = vpack.c.bf16 %v65_v11, %v64_v10  ;;  %v80_v15 = vpack.c.bf16 %v67_v14, %v66_v13  ;;  %v68_v16 = vld [vmem:[%s14778_s23 + $0x30] sm:$0xff]  ;;  %v69_v17 = vld [vmem:[%s14778_s23 + $0x38] sm:$0xff]  ;;  %v70_v19 = vld [vmem:[%s14778_s23 + $0x40] sm:$0xff] }
   0xf   :  { %v81_v18 = vpack.c.bf16 %v69_v17, %v68_v16  ;;  %v71_v20 = vld [vmem:[%s14778_s23 + $0x48] sm:$0xff]  ;;  %v72_v22 = vld [vmem:[%s14778_s23 + $0x50] sm:$0xff]  ;;  %v73_v23 = vld [vmem:[%s14778_s23 + $0x58] sm:$0xff]  ;;  %v243_v57 = vadd.f32 %v8923_v53, %v242_v56 }
  0x10   :  { %148 = vmatpush.bf16.msra.mxu0 %v139_v8  ;;  %v82_v21 = vpack.c.bf16 %v71_v20, %v70_v19  ;;  %v83_v24 = vpack.c.bf16 %v73_v23, %v72_v22  ;;  %v88_v25 = vld [vmem:[%s14779_s21] sm:$0xff]  ;;  %v89_v28 = vld [vmem:[%s14779_s21 + $0x8] sm:$0xff]  ;;  %v90_v34 = vld [vmem:[%s14779_s21 + $0x10] sm:$0xff] }
  0x11   :  { %v74_v31 = vld [vmem:[%s14778_s23 + $0x60] sm:$0xff]  ;;  %v75_v32 = vld [vmem:[%s14778_s23 + $0x68] sm:$0xff]  ;;  %v91_v37 = vld [vmem:[%s14779_s21 + $0x18] sm:$0xff]  ;;  %v9801_v59 = vsel %vm244_vm3, %v8923_v53, %v243_v57 }
  0x12   :  { %v84_v33 = vpack.c.bf16 %v75_v32, %v74_v31  ;;  %v76_v38 = vld [vmem:[%s14778_s23 + $0x70] sm:$0xff]  ;;  %v77_v39 = vld [vmem:[%s14778_s23 + $0x78] sm:$0xff]  ;;  %v92_v43 = vld [vmem:[%s14779_s21 + $0x20] sm:$0xff]  ;;  %14787 = vst [vmem:[#allocation9_spill] sm:$0xff] %v9801_v59 }
  0x13   :  { %7603 = vmatmul.msk.bf16.vlgmr.msra.gmra.mxu0 %vm109_vm2, %v78_v9  ;;  %v85_v42 = vpack.c.bf16 %v77_v39, %v76_v38  ;;  %v93_v46 = vld [vmem:[%s14779_s21 + $0x28] sm:$0xff]  ;;  %v94_v49 = vld [vmem:[%s14779_s21 + $0x30] sm:$0xff]  ;;  %v95_v3 = vld [vmem:[%s14779_s21 + $0x38] sm:$0xff] }
  0x14   :  { %v96_v7 = vld [vmem:[%s14779_s21 + $0x40] sm:$0xff]  ;;  %v97_v17 = vld [vmem:[%s14779_s21 + $0x48] sm:$0xff]  ;;  %v98_v22 = vld [vmem:[%s14779_s21 + $0x50] sm:$0xff] }
  0x15   :  { %v99_v31 = vld [vmem:[%s14779_s21 + $0x58] sm:$0xff]  ;;  %v100_v39 = vld [vmem:[%s14779_s21 + $0x60] sm:$0xff]  ;;  %v7697_v54 = vld [vmem:[%s14796_s1 + $0xa8] sm:$0xf] }
  0x16   :  { %v8473_v55 = vld [vmem:[%s14796_s1 + $0xb0] sm:$0xf0]  ;;  %v8472_v56 = vld [vmem:[%s14796_s1 + $0xac] sm:$0xf] }
  0x17   :  { %v7698_v57 = vor.u32 %v8473_v55, %v7697_v54 }
  0x19   :  { %744 = vmatpush.bf16.msra.mxu1 %v7698_v57  ;;  %8667 = vmatpush.bf16.msra.mxu3 %v7698_v57  ;;  %v7613_v57 = vld [vmem:[%s14796_s1] sm:$0xf] }
  0x23   :  { %7604 = vmatmul.msk.bf16.gmra.mxu0 %vm109_vm2, %v79_v12 }
  0x33   :  { %7605 = vmatmul.msk.bf16.gmra.mxu0 %vm109_vm2, %v80_v15 }
  0x43   :  { %7606 = vmatmul.msk.bf16.gmra.mxu0 %vm109_vm2, %v81_v18 }
  0x53   :  { %7607 = vmatmul.msk.bf16.gmra.mxu0 %vm109_vm2, %v82_v21 }
  0x63   :  { %7608 = vmatmul.msk.bf16.gmra.mxu0 %vm109_vm2, %v83_v24 }
  0x73   :  { %7609 = vmatmul.msk.bf16.gmra.mxu0 %vm109_vm2, %v84_v33 }
  0x83   :  { %7610 = vmatmul.msk.bf16.gmra.mxu0 %vm109_vm2, %v85_v42 }
  0x90   :  { %v150_v26 = vpop.f32.mrf.mxu0 }
  0x91   :  { %v9748_v27 = vadd.f32 %v150_v26, %v88_v25 }
  0x93   :  { %14780 = vst [vmem:[#allocation2_spill] sm:$0xff] %v9748_v27  ;;  %207 = vadd.xlane.f32.xlu0 %v9748_v27 }
  0x98   :  { %v152_v29 = vpop.f32.mrf.mxu0 }
  0x99   :  { %v9754_v30 = vadd.f32 %v152_v29, %v89_v28 }
  0x9b   :  { %14781 = vst [vmem:[#allocation3_spill] sm:$0xff] %v9754_v30  ;;  %209 = vadd.xlane.f32.xlu0 %v9754_v30 }
  0xa0   :  { %v155_v35 = vpop.f32.mrf.mxu0 }
  0xa1   :  { %v9767_v36 = vadd.f32 %v155_v35, %v90_v34 }
  0xa3   :  { %14782 = vst [vmem:[#allocation4_spill] sm:$0xff] %v9767_v36  ;;  %211 = vadd.xlane.f32.xlu1 %v9767_v36 }
  0xa8   :  { %v157_v40 = vpop.f32.mrf.mxu0 }
  0xa9   :  { %v9779_v41 = vadd.f32 %v157_v40, %v91_v37 }
  0xab   :  { %14783 = vst [vmem:[#allocation5_spill] sm:$0xff] %v9779_v41  ;;  %213 = vadd.xlane.f32.xlu1 %v9779_v41 }
  0xb0   :  { %v160_v44 = vpop.f32.mrf.mxu0 }
  0xb1   :  { %v9786_v45 = vadd.f32 %v160_v44, %v92_v43 }
  0xb3   :  { %14784 = vst [vmem:[#allocation6_spill] sm:$0xff] %v9786_v45  ;;  %215 = vadd.xlane.f32.xlu2 %v9786_v45 }
  0xb8   :  { %v162_v47 = vpop.f32.mrf.mxu0 }
  0xb9   :  { %v9792_v48 = vadd.f32 %v162_v47, %v93_v46  ;;  %v101_v47 = vld [vmem:[%s14779_s21 + $0x68] sm:$0xff] }
  0xbb   :  { %14785 = vst [vmem:[#allocation7_spill] sm:$0xff] %v9792_v48  ;;  %217 = vadd.xlane.f32.xlu2 %v9792_v48 }
  0xc0   :  { %v165_v50 = vpop.f32.mrf.mxu0 }
  0xc1   :  { %v9798_v51 = vadd.f32 %v165_v50, %v94_v49  ;;  %v102_v50 = vld [vmem:[%s14779_s21 + $0x70] sm:$0xff] }
  0xc3   :  { %14786 = vst [vmem:[#allocation8_spill] sm:$0xff] %v9798_v51  ;;  %219 = vadd.xlane.f32.xlu2 %v9798_v51 }
  0xc8   :  { %v167_v58 = vpop.f32.mrf.mxu0 }
  0xc9   :  { %v9816_v5 = vadd.f32 %v167_v58, %v95_v3  ;;  %v7699_v58 = vld [vmem:[%s14796_s1 + $0xb4] sm:$0xf0] }
  0xcb   :  { %14788 = vst [vmem:[#allocation10_spill] sm:$0xff] %v9816_v5 }
  0xd0   :  { %v170_v0 = vpop.f32.mrf.mxu0 }
  0xd1   :  { %v9825_v11 = vadd.f32 %v170_v0, %v96_v7  ;;  %v8469_v0 = vld [vmem:[%s14796_s1 + $0x94] sm:$0xf]  ;;  %v8467_v7 = vld [vmem:[%s14796_s1 + $0x80] sm:$0xf0] }
  0xd3   :  { %14789 = vst [vmem:[#allocation11_spill] sm:$0xff] %v9825_v11 }
  0xd8   :  { %v172_v9 = vpop.f32.mrf.mxu0 }
  0xd9   :  { %v9840_v19 = vadd.f32 %v172_v9, %v97_v17 }
  0xdb   :  { %14790 = vst [vmem:[#allocation12_spill] sm:$0xff] %v9840_v19 }
  0xe0   :  { %v175_v15 = vpop.f32.mrf.mxu0 }
  0xe1   :  { %v9849_v25 = vadd.f32 %v175_v15, %v98_v22  ;;  %v8464_v15 = vld [vmem:[%s14796_s1 + $0x68] sm:$0xf0]  ;;  %v7649_v22 = vld [vmem:[%s14796_s1 + $0x48] sm:$0xf] }
  0xe3   :  { %14791 = vst [vmem:[#allocation13_spill] sm:$0xff] %v9849_v25 }
  0xe8   :  { %v177_v24 = vpop.f32.mrf.mxu0 }
  0xe9   :  { %v9861_v33 = vadd.f32 %v177_v24, %v99_v31  ;;  %v8460_v24 = vld [vmem:[%s14796_s1 + $0x4c] sm:$0xf] }
  0xeb   :  { %14792 = vst [vmem:[#allocation14_spill] sm:$0xff] %v9861_v33 }
  0xf0   :  { %v180_v35 = vpop.f32.mrf.mxu0 }
  0xf1   :  { %v9873_v42 = vadd.f32 %v180_v35, %v100_v39  ;;  %v8458_v35 = vld [vmem:[%s14796_s1 + $0x38] sm:$0xf0]  ;;  %v7639_v39 = vld [vmem:[%s14796_s1 + $0x3c] sm:$0xf0] }
  0xf3   :  { %14793 = vst [vmem:[#allocation15_spill] sm:$0xff] %v9873_v42 }
  0xf8   :  { %v182_v46 = vpop.f32.mrf.mxu0 }
  0xf9   :  { %v9884_v49 = vadd.f32 %v182_v46, %v101_v47  ;;  %v8455_v46 = vld [vmem:[%s14796_s1 + $0x20] sm:$0xf0]  ;;  %v8454_v47 = vld [vmem:[%s14796_s1 + $0x1c] sm:$0xf] }
  0xfb   :  { %14794 = vst [vmem:[#allocation16_spill] sm:$0xff] %v9884_v49 }
 0x100   :  { %v185_v52 = vpop.f32.mrf.mxu0 }
 0x101   :  { %v9890_v53 = vadd.f32 %v185_v52, %v102_v50  ;;  %v7627_v52 = vld [vmem:[%s14796_s1 + $0x24] sm:$0xf0] }
 0x102   :  { %v7630_v54 = vor.u32 %v8454_v47, %v7627_v52  ;;  %v206_v47 = vld [vmem:[%s14690_s4] sm:$0x3f] }
 0x103   :  { %14795 = vst [vmem:[#allocation17_spill] sm:$0xff] %v9890_v53 }
 0x106   :  { %v208_v60 = vpop.xlane.xlu0 %207 }
 0x107   :  { %v246_v61 = vmul.f32 %v9801_v59, %v208_v60  ;;  %v7702_v60 = vor.u32 %v8472_v56, %v7699_v58  ;;  %v8452_v58 = vld [vmem:[%s14796_s1 + $0x8] sm:$0xf0] }
 0x109   :  { %v9805_v62 = vsub.f32 %v9748_v27, %v246_v61  ;;  %793 = vmatpush.bf16.msra.mxu2 %v7702_v60  ;;  %v7685_v61 = vld [vmem:[%s14796_s1 + $0x90] sm:$0xf]  ;;  %v8451_v60 = vld [vmem:[%s14796_s1 + $0x4] sm:$0xf] }
 0x10b   :  { %v278_v63 = vmul.f32 %v9805_v62, %v9805_v62 }
 0x10d   :  { %294 = vadd.xlane.f32.xlu0 %v278_v63  ;;  %v8470_v63 = vld [vmem:[%s14796_s1 + $0x98] sm:$0xf0] }
 0x10e   :  { %v210_v1 = vpop.xlane.xlu0 %209 }
 0x10f   :  { %v247_v2 = vmul.f32 %v9801_v59, %v210_v1  ;;  %v7686_v1 = vor.u32 %v8470_v63, %v7685_v61  ;;  %v7614_v61 = vor.u32 %v8452_v58, %v7613_v57  ;;  %v7615_v63 = vld [vmem:[%s14796_s1 + $0xc] sm:$0xf0] }
 0x111   :  { %v9814_v4 = vsub.f32 %v9754_v30, %v247_v2  ;;  %v7687_v2 = vld [vmem:[%s14796_s1 + $0x9c] sm:$0xf0]  ;;  %745 = vmatpush.bf16.msra.mxu1 %v7686_v1  ;;  %8668 = vmatpush.bf16.msra.mxu3 %v7686_v1  ;;  %v7618_v1 = vor.u32 %v8451_v60, %v7615_v63  ;;  %v10022_v63 = vperm.slane %v206_v47, 0 }
 0x112   :  { %v7690_v3 = vor.u32 %v8469_v0, %v7687_v2 }
 0x113   :  { %v279_v6 = vmul.f32 %v9814_v4, %v9814_v4 }
 0x114   :  { %794 = vmatpush.bf16.msra.mxu2 %v7690_v3 }
 0x115   :  { %221 = vadd.xlane.f32.xlu0 %v9816_v5  ;;  %296 = vadd.xlane.f32.xlu1 %v279_v6  ;;  %v7673_v6 = vld [vmem:[%s14796_s1 + $0x78] sm:$0xf] }
 0x116   :  { %v212_v8 = vpop.xlane.xlu1 %211  ;;  %v7674_v9 = vor.u32 %v8467_v7, %v7673_v6 }
 0x117   :  { %v248_v10 = vmul.f32 %v9801_v59, %v212_v8  ;;  %v8466_v8 = vld [vmem:[%s14796_s1 + $0x7c] sm:$0xf] }
 0x118   :  { %746 = vmatpush.bf16.msra.mxu1 %v7674_v9  ;;  %8669 = vmatpush.bf16.msra.mxu3 %v7674_v9 }
 0x119   :  { %v9828_v12 = vsub.f32 %v9767_v36, %v248_v10  ;;  %v7675_v10 = vld [vmem:[%s14796_s1 + $0x84] sm:$0xf0] }
 0x11b   :  { %v280_v13 = vmul.f32 %v9828_v12, %v9828_v12 }
 0x11d   :  { %223 = vadd.xlane.f32.xlu0 %v9825_v11  ;;  %298 = vadd.xlane.f32.xlu1 %v280_v13  ;;  %v7678_v13 = vor.u32 %v8466_v8, %v7675_v10 }
 0x11e   :  { %v214_v14 = vpop.xlane.xlu1 %213 }
 0x11f   :  { %v249_v16 = vmul.f32 %v9801_v59, %v214_v14  ;;  %795 = vmatpush.bf16.msra.mxu2 %v7678_v13  ;;  %v7661_v14 = vld [vmem:[%s14796_s1 + $0x60] sm:$0xf] }
 0x120   :  { %v7662_v17 = vor.u32 %v8464_v15, %v7661_v14 }
 0x121   :  { %v9838_v18 = vsub.f32 %v9779_v41, %v249_v16  ;;  %v8463_v16 = vld [vmem:[%s14796_s1 + $0x64] sm:$0xf] }
 0x122   :  { %747 = vmatpush.bf16.msra.mxu1 %v7662_v17  ;;  %8670 = vmatpush.bf16.msra.mxu3 %v7662_v17 }
 0x123   :  { %v281_v20 = vmul.f32 %v9838_v18, %v9838_v18 }
 0x125   :  { %300 = vadd.xlane.f32.xlu2 %v281_v20  ;;  %225 = vadd.xlane.f32.xlu1 %v9840_v19  ;;  %v7663_v20 = vld [vmem:[%s14796_s1 + $0x6c] sm:$0xf0] }
 0x126   :  { %v216_v21 = vpop.xlane.xlu2 %215 }
 0x127   :  { %v250_v23 = vmul.f32 %v9801_v59, %v216_v21  ;;  %v7666_v21 = vor.u32 %v8463_v16, %v7663_v20 }
 0x129   :  { %v9852_v26 = vsub.f32 %v9786_v45, %v250_v23  ;;  %796 = vmatpush.bf16.msra.mxu2 %v7666_v21  ;;  %v8461_v23 = vld [vmem:[%s14796_s1 + $0x50] sm:$0xf0] }
 0x12b   :  { %v282_v28 = vmul.f32 %v9852_v26, %v9852_v26 }
 0x12d   :  { %302 = vadd.xlane.f32.xlu2 %v282_v28  ;;  %227 = vadd.xlane.f32.xlu1 %v9849_v25  ;;  %v7650_v28 = vor.u32 %v8461_v23, %v7649_v22 }
 0x12e   :  { %v218_v29 = vpop.xlane.xlu2 %217 }
 0x12f   :  { %v251_v32 = vmul.f32 %v9801_v59, %v218_v29  ;;  %v7651_v29 = vld [vmem:[%s14796_s1 + $0x54] sm:$0xf0]  ;;  %748 = vmatpush.bf16.msra.mxu1 %v7650_v28  ;;  %8671 = vmatpush.bf16.msra.mxu3 %v7650_v28 }
 0x130   :  { %v7654_v31 = vor.u32 %v8460_v24, %v7651_v29 }
 0x131   :  { %v9864_v34 = vsub.f32 %v9792_v48, %v251_v32  ;;  %v7637_v32 = vld [vmem:[%s14796_s1 + $0x30] sm:$0xf] }
 0x132   :  { %797 = vmatpush.bf16.msra.mxu2 %v7654_v31 }
 0x133   :  { %v283_v37 = vmul.f32 %v9864_v34, %v9864_v34 }
 0x135   :  { %229 = vadd.xlane.f32.xlu2 %v9861_v33  ;;  %304 = vadd.xlane.f32.xlu0 %v283_v37  ;;  %v8457_v37 = vld [vmem:[%s14796_s1 + $0x34] sm:$0xf] }
 0x136   :  { %v220_v38 = vpop.xlane.xlu2 %219 }
 0x137   :  { %v252_v40 = vmul.f32 %v9801_v59, %v220_v38  ;;  %v7638_v38 = vor.u32 %v8458_v35, %v7637_v32 }
 0x139   :  { %v9876_v43 = vsub.f32 %v9798_v51, %v252_v40  ;;  %v7642_v40 = vor.u32 %v8457_v37, %v7639_v39  ;;  %749 = vmatpush.bf16.msra.mxu1 %v7638_v38  ;;  %8672 = vmatpush.bf16.msra.mxu3 %v7638_v38 }
 0x13b   :  { %v284_v44 = vmul.f32 %v9876_v43, %v9876_v43  ;;  %798 = vmatpush.bf16.msra.mxu2 %v7642_v40 }
 0x13d   :  { %231 = vadd.xlane.f32.xlu2 %v9873_v42  ;;  %306 = vadd.xlane.f32.xlu0 %v284_v44  ;;  %v7625_v44 = vld [vmem:[%s14796_s1 + $0x18] sm:$0xf] }
 0x13e   :  { %v7626_v50 = vor.u32 %v8455_v46, %v7625_v44 }
 0x13f   :  { %799 = vmatpush.bf16.msra.mxu2 %v7630_v54 }
 0x140   :  { %750 = vmatpush.bf16.msra.mxu1 %v7626_v50  ;;  %8673 = vmatpush.bf16.msra.mxu3 %v7626_v50 }
 0x143   :  { %800 = vmatpush.bf16.msra.mxu2 %v7618_v1 }
 0x144   :  { %751 = vmatpush.bf16.msra.mxu1 %v7614_v61  ;;  %8674 = vmatpush.bf16.msra.mxu3 %v7614_v61 }
 0x145   :  { %233 = vadd.xlane.f32.xlu0 %v9884_v49 }
 0x14d   :  { %235 = vadd.xlane.f32.xlu0 %v9890_v53 }
 0x180   :  { %v295_v55 = vpop.xlane.xlu0 %294 }
 0x181   :  { %v326_v56 = vmul.f32 %v295_v55, %v9801_v59  ;;  %v103_v55 = vld [vmem:[%s14779_s21 + $0x78] sm:$0xff] }
 0x183   :  { %v342_v0 = vadd.f32 1e-05, %v326_v56  ;;  %v187_v56 = vpop.f32.mrf.mxu0 }
 0x185   :  { %8924 = vrsqrt.f32 %v342_v0  ;;  %vm364_vm5 = vweird.f32 %v342_v0 }
 0x188   :  { %v297_v2 = vpop.xlane.xlu1 %296  ;;  %v222_v3 = vpop.xlane.xlu0 %221 }
 0x189   :  { %v327_v6 = vmul.f32 %v297_v2, %v9801_v59  ;;  %v253_v7 = vmul.f32 %v9801_v59, %v222_v3  ;;  %v10024_v2 = vadd.f32 %v187_v56, %v103_v55 }
 0x18b   :  { %v8925_v8 = vpop.eup %8924  ;;  %v343_v9 = vadd.f32 1e-05, %v327_v6  ;;  %v9993_v10 = vsub.f32 %v9816_v5, %v253_v7  ;;  %14799 = vst [vmem:[#allocation18_spill] sm:$0xff] %v10024_v2 }
 0x18c   :  { %v359_v13 = vmul.f32 %v8925_v8, %v342_v0  ;;  %vm365_vm4 = vweird.f32 %v8925_v8 }
 0x18d   :  { %8926 = vrsqrt.f32 %v343_v9  ;;  %v285_v14 = vmul.f32 %v9993_v10, %v9993_v10  ;;  %vm10004_vm6 = vmor %vm364_vm5, %vm365_vm4  ;;  %vm374_vm8 = vweird.f32 %v343_v9 }
 0x18e   :  { %v360_v15 = vmul.f32 %v8925_v8, %v359_v13  ;;  %v10031_v13 = vperm.slane %v206_v47, 1 }
 0x18f   :  { %308 = vadd.xlane.f32.xlu1 %v285_v14 }
 0x190   :  { %v361_v16 = vmul.f32 0.5, %v360_v15  ;;  %v299_v17 = vpop.xlane.xlu1 %298  ;;  %v224_v20 = vpop.xlane.xlu0 %223 }
 0x191   :  { %v328_v21 = vmul.f32 %v299_v17, %v9801_v59  ;;  %v254_v22 = vmul.f32 %v9801_v59, %v224_v20 }
 0x192   :  { %v362_v23 = vsub.f32 1.5, %v361_v16 }
 0x193   :  { %v8927_v24 = vpop.eup %8926  ;;  %v344_v28 = vadd.f32 1e-05, %v328_v21  ;;  %v10000_v29 = vsub.f32 %v9825_v11, %v254_v22 }
 0x194   :  { %v363_v31 = vmul.f32 %v8925_v8, %v362_v23  ;;  %v369_v32 = vmul.f32 %v8927_v24, %v343_v9  ;;  %vm375_vm7 = vweird.f32 %v8927_v24 }
 0x195   :  { %8928 = vrsqrt.f32 %v344_v28  ;;  %v286_v35 = vmul.f32 %v10000_v29, %v10000_v29  ;;  %vm376_vm9 = vmor %vm374_vm8, %vm375_vm7  ;;  %vm384_vm11 = vweird.f32 %v344_v28 }
 0x196   :  { %v370_v37 = vmul.f32 %v8927_v24, %v369_v32  ;;  %v367_v39 = vsel %vm10004_vm6, %v8925_v8, %v363_v31 }
 0x197   :  { %310 = vadd.xlane.f32.xlu1 %v286_v35  ;;  %v518_v61 = vmul.f32 %v367_v39, %v9805_v62 }
 0x198   :  { %v371_v40 = vmul.f32 0.5, %v370_v37  ;;  %v301_v44 = vpop.xlane.xlu2 %300  ;;  %v226_v46 = vpop.xlane.xlu1 %225 }
 0x199   :  { %v329_v50 = vmul.f32 %v301_v44, %v9801_v59  ;;  %v255_v52 = vmul.f32 %v9801_v59, %v226_v46  ;;  %v535_v62 = vmul.f32 %v10022_v63, %v518_v61 }
 0x19a   :  { %v372_v54 = vsub.f32 1.5, %v371_v40 }
 0x19b   :  { %v8929_v57 = vpop.eup %8928  ;;  %v345_v58 = vadd.f32 1e-05, %v329_v50  ;;  %v10019_v60 = vsub.f32 %v9840_v19, %v255_v52 }
 0x19c   :  { %v373_v0 = vmul.f32 %v8927_v24, %v372_v54  ;;  %v379_v1 = vmul.f32 %v8929_v57, %v344_v28  ;;  %vm385_vm10 = vweird.f32 %v8929_v57 }
 0x19d   :  { %8930 = vrsqrt.f32 %v345_v58  ;;  %v287_v3 = vmul.f32 %v10019_v60, %v10019_v60  ;;  %vm386_vm12 = vmor %vm384_vm11, %vm385_vm10  ;;  %vm394_vm14 = vweird.f32 %v345_v58 }
 0x19e   :  { %v377_v6 = vsel %vm376_vm9, %v8927_v24, %v373_v0  ;;  %v380_v7 = vmul.f32 %v8929_v57, %v379_v1 }
 0x19f   :  { %312 = vadd.xlane.f32.xlu2 %v287_v3  ;;  %237 = vadd.xlane.f32.xlu1 %v10024_v2  ;;  %v519_v8 = vmul.f32 %v377_v6, %v9814_v4  ;;  %v552_v4 = vadd.f32 %v10031_v13, %v535_v62 }
 0x1a0   :  { %v381_v9 = vmul.f32 0.5, %v380_v7  ;;  %v303_v14 = vpop.xlane.xlu2 %302  ;;  %v228_v15 = vpop.xlane.xlu1 %227 }
 0x1a1   :  { %v330_v16 = vmul.f32 %v303_v14, %v9801_v59  ;;  %v256_v17 = vmul.f32 %v9801_v59, %v228_v15  ;;  %v536_v20 = vmul.f32 %v10022_v63, %v519_v8 }
 0x1a2   :  { %v382_v21 = vsub.f32 1.5, %v381_v9 }
 0x1a3   :  { %v8931_v22 = vpop.eup %8930  ;;  %v346_v23 = vadd.f32 1e-05, %v330_v16  ;;  %v10037_v24 = vsub.f32 %v9849_v25, %v256_v17  ;;  %v553_v31 = vadd.f32 %v10031_v13, %v536_v20 }
 0x1a4   :  { %v383_v32 = vmul.f32 %v8929_v57, %v382_v21  ;;  %v389_v35 = vmul.f32 %v8931_v22, %v345_v58  ;;  %vm395_vm13 = vweird.f32 %v8931_v22 }
 0x1a5   :  { %8932 = vrsqrt.f32 %v346_v23  ;;  %v288_v37 = vmul.f32 %v10037_v24, %v10037_v24  ;;  %v10043_v38 = vpack.c.bf16 %v553_v31, %v552_v4  ;;  %vm396_vm15 = vmor %vm394_vm14, %vm395_vm13  ;;  %vm404_vm1 = vweird.f32 %v346_v23 }
 0x1a6   :  { %v390_v39 = vmul.f32 %v8931_v22, %v389_v35  ;;  %v387_v40 = vsel %vm386_vm12, %v8929_v57, %v383_v32 }
 0x1a7   :  { %314 = vadd.xlane.f32.xlu2 %v288_v37  ;;  %752 = vmatmul.bf16.vlgmr.msra.gmra.mxu1 %v10043_v38  ;;  %v520_v61 = vmul.f32 %v387_v40, %v9828_v12 }
 0x1a8   :  { %v391_v44 = vmul.f32 0.5, %v390_v39  ;;  %801 = vmatmul.bf16.vlgmr.msra.gmra.mxu2 %v10043_v38  ;;  %v230_v46 = vpop.xlane.xlu2 %229  ;;  %v305_v47 = vpop.xlane.xlu0 %304 }
 0x1a9   :  { %v257_v50 = vmul.f32 %v9801_v59, %v230_v46  ;;  %v331_v52 = vmul.f32 %v305_v47, %v9801_v59  ;;  %v537_v8 = vmul.f32 %v10022_v63, %v520_v61 }
 0x1aa   :  { %v392_v54 = vsub.f32 1.5, %v391_v44 }
 0x1ab   :  { %v8933_v55 = vpop.eup %8932  ;;  %v347_v56 = vadd.f32 1e-05, %v331_v52  ;;  %v10050_v28 = vsub.f32 %v9861_v33, %v257_v50  ;;  %v554_v17 = vadd.f32 %v10031_v13, %v537_v8 }
 0x1ac   :  { %v393_v0 = vmul.f32 %v8931_v22, %v392_v54  ;;  %v399_v57 = vmul.f32 %v8933_v55, %v346_v23  ;;  %vm405_vm0 = vweird.f32 %v8933_v55 }
 0x1ad   :  { %8934 = vrsqrt.f32 %v347_v56  ;;  %v289_v1 = vmul.f32 %v10050_v28, %v10050_v28  ;;  %vm406_vm2 = vmor %vm404_vm1, %vm405_vm0  ;;  %vm414_vm4 = vweird.f32 %v347_v56 }
 0x1ae   :  { %v397_v3 = vsel %vm396_vm15, %v8931_v22, %v393_v0  ;;  %v400_v6 = vmul.f32 %v8933_v55, %v399_v57 }
 0x1af   :  { %316 = vadd.xlane.f32.xlu0 %v289_v1  ;;  %v521_v7 = vmul.f32 %v397_v3, %v9838_v18 }
 0x1b0   :  { %v401_v62 = vmul.f32 0.5, %v400_v6  ;;  %v232_v9 = vpop.xlane.xlu2 %231  ;;  %v307_v14 = vpop.xlane.xlu0 %306 }
 0x1b1   :  { %v258_v12 = vmul.f32 %v9801_v59, %v232_v9  ;;  %v538_v58 = vmul.f32 %v10022_v63, %v521_v7 }
 0x1b2   :  { %v402_v15 = vsub.f32 1.5, %v401_v62 }
 0x1b3   :  { %v8935_v16 = vpop.eup %8934  ;;  %v555_v20 = vadd.f32 %v10031_v13, %v538_v58  ;;  %v10062_v21 = vsub.f32 %v9873_v42, %v258_v12 }
 0x1b4   :  { %v403_v22 = vmul.f32 %v8933_v55, %v402_v15  ;;  %v409_v18 = vmul.f32 %v8935_v16, %v347_v56  ;;  %vm415_vm3 = vweird.f32 %v8935_v16 }
 0x1b5   :  { %v10064_v4 = vpack.c.bf16 %v555_v20, %v554_v17  ;;  %v290_v31 = vmul.f32 %v10062_v21, %v10062_v21  ;;  %vm416_vm5 = vmor %vm414_vm4, %vm415_vm3 }
 0x1b6   :  { %v410_v32 = vmul.f32 %v8935_v16, %v409_v18  ;;  %v407_v35 = vsel %vm406_vm2, %v8933_v55, %v403_v22 }
 0x1b7   :  { %757 = vmatmul.bf16.gmra.mxu1 %v10064_v4  ;;  %318 = vadd.xlane.f32.xlu1 %v290_v31  ;;  %v522_v47 = vmul.f32 %v407_v35, %v9852_v26 }
 0x1b8   :  { %v411_v37 = vmul.f32 0.5, %v410_v32  ;;  %806 = vmatmul.bf16.gmra.mxu2 %v10064_v4  ;;  %v234_v39 = vpop.xlane.xlu0 %233 }
 0x1b9   :  { %v259_v40 = vmul.f32 %v9801_v59, %v234_v39  ;;  %v539_v55 = vmul.f32 %v10022_v63, %v522_v47 }
 0x1ba   :  { %v412_v44 = vsub.f32 1.5, %v411_v37 }
 0x1bb   :  { %v10072_v46 = vsub.f32 %v9884_v49, %v259_v40  ;;  %v556_v1 = vadd.f32 %v10031_v13, %v539_v55 }
 0x1bc   :  { %v413_v23 = vmul.f32 %v8935_v16, %v412_v44 }
 0x1bd   :  { %v291_v50 = vmul.f32 %v10072_v46, %v10072_v46 }
 0x1be   :  { %v417_v52 = vsel %vm416_vm5, %v8935_v16, %v413_v23 }
 0x1bf   :  { %320 = vadd.xlane.f32.xlu2 %v291_v50  ;;  %v523_v54 = vmul.f32 %v417_v52, %v9864_v34  ;;  %v332_v34 = vmul.f32 %v307_v14, %v9801_v59 }
 0x1c0   :  { %v236_v61 = vpop.xlane.xlu0 %235 }
 0x1c1   :  { %v260_v0 = vmul.f32 %v9801_v59, %v236_v61  ;;  %v540_v57 = vmul.f32 %v10022_v63, %v523_v54  ;;  %v348_v7 = vadd.f32 1e-05, %v332_v34 }
 0x1c3   :  { %v557_v26 = vadd.f32 %v10031_v13, %v540_v57  ;;  %v10084_v56 = vsub.f32 %v9890_v53, %v260_v0  ;;  %8936 = vrsqrt.f32 %v348_v7  ;;  %vm424_vm7 = vweird.f32 %v348_v7 }
 0x1c5   :  { %v10086_v3 = vpack.c.bf16 %v557_v26, %v556_v1  ;;  %v292_v6 = vmul.f32 %v10084_v56, %v10084_v56 }
 0x1c7   :  { %762 = vmatmul.bf16.gmra.mxu1 %v10086_v3  ;;  %322 = vadd.xlane.f32.xlu0 %v292_v6 }
 0x1c8   :  { %811 = vmatmul.bf16.gmra.mxu2 %v10086_v3 }
 0x1c9   :  { %v8937_v8 = vpop.eup %8936 }
 0x1ca   :  { %v419_v62 = vmul.f32 %v8937_v8, %v348_v7  ;;  %vm425_vm6 = vweird.f32 %v8937_v8 }
 0x1cb   :  { %vm426_vm8 = vmor %vm424_vm7, %vm425_vm6 }
 0x1cc   :  { %v420_v9 = vmul.f32 %v8937_v8, %v419_v62 }
 0x1ce   :  { %v421_v16 = vmul.f32 0.5, %v420_v9 }
 0x1d0   :  { %v422_v17 = vsub.f32 1.5, %v421_v16 }
 0x1d2   :  { %v423_v32 = vmul.f32 %v8937_v8, %v422_v17 }
 0x1d4   :  { %v427_v37 = vsel %vm426_vm8, %v8937_v8, %v423_v32 }
 0x1d5   :  { %v524_v61 = vmul.f32 %v427_v37, %v9876_v43 }
 0x1d7   :  { %v541_v7 = vmul.f32 %v10022_v63, %v524_v61 }
 0x1d9   :  { %v558_v16 = vadd.f32 %v10031_v13, %v541_v7 }
 0x202   :  { %v309_v12 = vpop.xlane.xlu1 %308 }
 0x203   :  { %v333_v58 = vmul.f32 %v309_v12, %v9801_v59 }
 0x205   :  { %v349_v15 = vadd.f32 1e-05, %v333_v58 }
 0x207   :  { %8938 = vrsqrt.f32 %v349_v15  ;;  %vm434_vm10 = vweird.f32 %v349_v15 }
 0x20a   :  { %v311_v20 = vpop.xlane.xlu1 %310 }
 0x20b   :  { %v334_v22 = vmul.f32 %v311_v20, %v9801_v59 }
 0x20d   :  { %v8939_v18 = vpop.eup %8938  ;;  %v350_v31 = vadd.f32 1e-05, %v334_v22 }
 0x20e   :  { %v429_v14 = vmul.f32 %v8939_v18, %v349_v15  ;;  %vm435_vm9 = vweird.f32 %v8939_v18 }
 0x20f   :  { %8940 = vrsqrt.f32 %v350_v31  ;;  %vm436_vm11 = vmor %vm434_vm10, %vm435_vm9  ;;  %vm444_vm13 = vweird.f32 %v350_v31 }
 0x210   :  { %v430_v35 = vmul.f32 %v8939_v18, %v429_v14 }
 0x212   :  { %v431_v39 = vmul.f32 0.5, %v430_v35  ;;  %v313_v40 = vpop.xlane.xlu2 %312  ;;  %v238_v44 = vpop.xlane.xlu1 %237 }
 0x213   :  { %v335_v47 = vmul.f32 %v313_v40, %v9801_v59  ;;  %v261_v23 = vmul.f32 %v9801_v59, %v238_v44 }
 0x214   :  { %v432_v50 = vsub.f32 1.5, %v431_v39 }
 0x215   :  { %v8941_v52 = vpop.eup %8940  ;;  %v351_v54 = vadd.f32 1e-05, %v335_v47  ;;  %v10098_v55 = vsub.f32 %v10024_v2, %v261_v23 }
 0x216   :  { %v433_v0 = vmul.f32 %v8939_v18, %v432_v50  ;;  %v439_v57 = vmul.f32 %v8941_v52, %v350_v31  ;;  %vm445_vm12 = vweird.f32 %v8941_v52 }
 0x217   :  { %8942 = vrsqrt.f32 %v351_v54  ;;  %v293_v1 = vmul.f32 %v10098_v55, %v10098_v55  ;;  %vm446_vm14 = vmor %vm444_vm13, %vm445_vm12  ;;  %vm454_vm0 = vweird.f32 %v351_v54 }
 0x218   :  { %v437_v26 = vsel %vm436_vm11, %v8939_v18, %v433_v0  ;;  %v440_v6 = vmul.f32 %v8941_v52, %v439_v57 }
 0x219   :  { %324 = vadd.xlane.f32.xlu1 %v293_v1  ;;  %v525_v34 = vmul.f32 %v437_v26, %v9993_v10  ;;  %v10120_v26 = vld [vmem:[%s14691_s6] sm:$0x7] }
 0x21a   :  { %v441_v8 = vmul.f32 0.5, %v440_v6  ;;  %v315_v62 = vpop.xlane.xlu2 %314 }
 0x21b   :  { %v336_v9 = vmul.f32 %v315_v62, %v9801_v59  ;;  %v542_v43 = vmul.f32 %v10022_v63, %v525_v34 }
 0x21c   :  { %v442_v12 = vsub.f32 1.5, %v441_v8 }
 0x21d   :  { %v8943_v58 = vpop.eup %8942  ;;  %v352_v15 = vadd.f32 1e-05, %v336_v9  ;;  %v559_v17 = vadd.f32 %v10031_v13, %v542_v43  ;;  %v10128_v9 = vperm.slane %v10120_v26, 0 }
 0x21e   :  { %v443_v20 = vmul.f32 %v8941_v52, %v442_v12  ;;  %v449_v22 = vmul.f32 %v8943_v58, %v351_v54  ;;  %vm455_vm15 = vweird.f32 %v8943_v58 }
 0x21f   :  { %8944 = vrsqrt.f32 %v352_v15  ;;  %v10109_v10 = vpack.c.bf16 %v559_v17, %v558_v16  ;;  %vm456_vm1 = vmor %vm454_vm0, %vm455_vm15  ;;  %vm464_vm3 = vweird.f32 %v352_v15 }
 0x220   :  { %v450_v18 = vmul.f32 %v8943_v58, %v449_v22  ;;  %v447_v32 = vsel %vm446_vm14, %v8941_v52, %v443_v20 }
 0x221   :  { %767 = vmatmul.bf16.gmra.mxu1 %v10109_v10  ;;  %816 = vmatmul.bf16.gmra.mxu2 %v10109_v10  ;;  %v526_v23 = vmul.f32 %v447_v32, %v10000_v29  ;;  %v10123_v29 = vperm.slane %v10120_v26, 1 }
 0x222   :  { %v451_v14 = vmul.f32 0.5, %v450_v18  ;;  %v317_v35 = vpop.xlane.xlu0 %316 }
 0x223   :  { %v337_v37 = vmul.f32 %v317_v35, %v9801_v59  ;;  %v543_v57 = vmul.f32 %v10022_v63, %v526_v23 }
 0x224   :  { %v452_v39 = vsub.f32 1.5, %v451_v14  ;;  %v753_v40 = vpop.f32.mrf.mxu1 }
 0x225   :  { %v8945_v44 = vpop.eup %8944  ;;  %v353_v47 = vadd.f32 1e-05, %v337_v37  ;;  %v560_v12 = vadd.f32 %v10031_v13, %v543_v57  ;;  %v754_v14 = vadd.f32 %v753_v40, %v10128_v9 }
 0x226   :  { %v453_v50 = vmul.f32 %v8943_v58, %v452_v39  ;;  %v459_v31 = vmul.f32 %v8945_v44, %v352_v15  ;;  %vm465_vm2 = vweird.f32 %v8945_v44 }
 0x227   :  { %8946 = vrsqrt.f32 %v353_v47  ;;  %vm10138_vm4 = vmor %vm464_vm3, %vm465_vm2  ;;  %vm474_vm6 = vweird.f32 %v353_v47 }
 0x228   :  { %v457_v61 = vsel %vm456_vm1, %v8943_v58, %v453_v50  ;;  %v460_v0 = vmul.f32 %v8945_v44, %v459_v31 }
 0x229   :  { %v527_v52 = vmul.f32 %v457_v61, %v10019_v60 }
 0x22a   :  { %v461_v1 = vmul.f32 0.5, %v460_v0  ;;  %v319_v6 = vpop.xlane.xlu1 %318 }
 0x22b   :  { %v802_v54 = vpop.f32.mrf.mxu2  ;;  %v338_v34 = vmul.f32 %v319_v6, %v9801_v59  ;;  %v544_v7 = vmul.f32 %v10022_v63, %v527_v52 }
 0x22c   :  { %v462_v8 = vsub.f32 1.5, %v461_v1  ;;  %v755_v62 = vpop.f32.mrf.mxu1  ;;  %v803_v20 = vadd.f32 %v802_v54, %v10123_v29 }
 0x22d   :  { %v8947_v60 = vpop.eup %8946  ;;  %v10130_v43 = vadd.f32 1e-05, %v338_v34  ;;  %v561_v58 = vadd.f32 %v10031_v13, %v544_v7  ;;  %v756_v61 = vadd.f32 %v755_v62, %v10128_v9 }
 0x22e   :  { %v463_v16 = vmul.f32 %v8945_v44, %v462_v8  ;;  %v469_v17 = vmul.f32 %v8947_v60, %v353_v47  ;;  %v891_v23 = vpack.c.bf16 %v803_v20, %v754_v14  ;;  %vm475_vm5 = vweird.f32 %v8947_v60 }
 0x22f   :  { %8948 = vrsqrt.f32 %v10130_v43  ;;  %v10136_v22 = vpack.c.bf16 %v561_v58, %v560_v12  ;;  %vm476_vm7 = vmor %vm474_vm6, %vm475_vm5  ;;  %vm484_vm9 = vweird.f32 %v10130_v43  ;;  %vm2604_vm5 = vcmask 523264  }
 0x230   :  { %v470_v18 = vmul.f32 %v8947_v60, %v469_v17  ;;  %v467_v35 = vsel %vm10138_vm4, %v8945_v44, %v463_v16  ;;  %v939_v34 = vunpack.c.l.b16 %v891_v23  ;;  %v963_v7 = vunpack.c.h.b16 %v891_v23 }
 0x231   :  { %772 = vmatmul.bf16.gmra.mxu1 %v10136_v22  ;;  %821 = vmatmul.bf16.gmra.mxu2 %v10136_v22  ;;  %v528_v1 = vmul.f32 %v467_v35, %v10037_v24  ;;  %vm987_vm4 = vcmask 261120   ;;  %vm2621_vm6 = vcmask 785408  }
 0x232   :  { %v471_v37 = vmul.f32 0.5, %v470_v18  ;;  %v321_v39 = vpop.xlane.xlu2 %320 }
 0x233   :  { %v804_v50 = vpop.f32.mrf.mxu2  ;;  %v339_v15 = vmul.f32 %v321_v39, %v9801_v59  ;;  %v545_v17 = vmul.f32 %v10022_v63, %v528_v1 }
 0x234   :  { %v472_v31 = vsub.f32 1.5, %v471_v37  ;;  %v805_v0 = vadd.f32 %v804_v50, %v10123_v29  ;;  %v758_v40 = vpop.f32.mrf.mxu1 }
 0x235   :  { %v8949_v52 = vpop.eup %8948  ;;  %v355_v57 = vadd.f32 1e-05, %v339_v15  ;;  %v562_v35 = vadd.f32 %v10031_v13, %v545_v17  ;;  %v759_v1 = vadd.f32 %v758_v40, %v10128_v9 }
 0x236   :  { %v473_v6 = vmul.f32 %v8947_v60, %v472_v31  ;;  %v479_v44 = vmul.f32 %v8949_v52, %v10130_v43  ;;  %v893_v54 = vpack.c.bf16 %v805_v0, %v756_v61  ;;  %vm485_vm8 = vweird.f32 %v8949_v52 }
 0x237   :  { %8950 = vrsqrt.f32 %v355_v57  ;;  %vm486_vm10 = vmor %vm484_vm9, %vm485_vm8  ;;  %vm494_vm12 = vweird.f32 %v355_v57 }
 0x238   :  { %v477_v8 = vsel %vm476_vm7, %v8947_v60, %v473_v6  ;;  %v480_v12 = vmul.f32 %v8949_v52, %v479_v44  ;;  %v940_v58 = vunpack.c.l.b16 %v893_v54  ;;  %v964_v62 = vunpack.c.h.b16 %v893_v54 }
 0x239   :  { %v529_v16 = vmul.f32 %v477_v8, %v10050_v28 }
 0x23a   :  { %v481_v20 = vmul.f32 0.5, %v480_v12  ;;  %v10154_v18 = vpack.c.b16 %v940_v58, %v939_v34  ;;  %v10156_v24 = vpack.c.b16 %v964_v62, %v963_v7 }
 0x23b   :  { %v807_v47 = vpop.f32.mrf.mxu2  ;;  %v546_v32 = vmul.f32 %v10022_v63, %v529_v16 }
 0x23c   :  { %v482_v14 = vsub.f32 1.5, %v481_v20  ;;  %1334 = vrot.lane.b32.xlu2 %v10154_v18, %s9594_s0  ;;  %1350 = vrot.lane.b32.xlu0 %v10156_v24, %s9594_s0  ;;  %v760_v28 = vpop.f32.mrf.mxu1  ;;  %v808_v31 = vadd.f32 %v807_v47, %v10123_v29 }
 0x23d   :  { %v8951_v60 = vpop.eup %8950  ;;  %v563_v37 = vadd.f32 %v10031_v13, %v546_v32  ;;  %v761_v6 = vadd.f32 %v760_v28, %v10128_v9 }
 0x23e   :  { %v483_v39 = vmul.f32 %v8949_v52, %v482_v14  ;;  %v489_v23 = vmul.f32 %v8951_v60, %v355_v57  ;;  %vm495_vm11 = vweird.f32 %v8951_v60  ;;  %v895_v34 = vpack.c.bf16 %v808_v31, %v759_v1 }
 0x23f   :  { %v10165_v50 = vpack.c.bf16 %v563_v37, %v562_v35  ;;  %vm496_vm13 = vmor %vm494_vm12, %vm495_vm11 }
 0x240   :  { %v490_v15 = vmul.f32 %v8951_v60, %v489_v23  ;;  %v487_v61 = vsel %vm486_vm10, %v8949_v52, %v483_v39  ;;  %v965_v52 = vunpack.c.h.b16 %v895_v34  ;;  %v941_v28 = vunpack.c.l.b16 %v895_v34 }
 0x241   :  { %777 = vmatmul.bf16.gmra.mxu1 %v10165_v50  ;;  %826 = vmatmul.bf16.gmra.mxu2 %v10165_v50  ;;  %v530_v7 = vmul.f32 %v487_v61, %v10062_v21 }
 0x242   :  { %v491_v0 = vmul.f32 0.5, %v490_v15 }
 0x243   :  { %v809_v44 = vpop.f32.mrf.mxu2  ;;  %v547_v17 = vmul.f32 %v10022_v63, %v530_v7  ;;  %v323_v7 = vpop.xlane.xlu0 %322 }
 0x244   :  { %v492_v54 = vsub.f32 1.5, %v491_v0  ;;  %v810_v43 = vadd.f32 %v809_v44, %v10123_v29  ;;  %v763_v58 = vpop.f32.mrf.mxu1 }
 0x245   :  { %v564_v21 = vadd.f32 %v10031_v13, %v547_v17  ;;  %v764_v37 = vadd.f32 %v763_v58, %v10128_v9  ;;  %v8474_v58 = vld [vmem:[%s14796_s1 + $0xb8] sm:$0xf0] }
 0x246   :  { %v493_v8 = vmul.f32 %v8951_v60, %v492_v54  ;;  %v897_v12 = vpack.c.bf16 %v810_v43, %v761_v6 }
 0x248   :  { %v497_v62 = vsel %vm496_vm13, %v8951_v60, %v493_v8  ;;  %v966_v16 = vunpack.c.h.b16 %v897_v12  ;;  %v942_v14 = vunpack.c.l.b16 %v897_v12  ;;  %v340_v8 = vmul.f32 %v323_v7, %v9801_v59  ;;  %v7705_v12 = vld [vmem:[%s14796_s1 + $0xb0] sm:$0xf] }
 0x249   :  { %v531_v40 = vmul.f32 %v497_v62, %v10072_v46 }
 0x24a   :  { %v10177_v20 = vpack.c.b16 %v966_v16, %v965_v52  ;;  %v10190_v39 = vpack.c.b16 %v942_v14, %v941_v28  ;;  %v356_v62 = vadd.f32 1e-05, %v340_v8  ;;  %v7706_v52 = vor.u32 %v8474_v58, %v7705_v12  ;;  %v7693_v16 = vld [vmem:[%s14796_s1 + $0x98] sm:$0xf]  ;;  %v7669_v14 = vld [vmem:[%s14796_s1 + $0x68] sm:$0xf] }
 0x24b   :  { %v812_v47 = vpop.f32.mrf.mxu2  ;;  %v548_v32 = vmul.f32 %v10022_v63, %v531_v40  ;;  %v8471_v40 = vld [vmem:[%s14796_s1 + $0xa0] sm:$0xf0]  ;;  %v8465_v28 = vld [vmem:[%s14796_s1 + $0x70] sm:$0xf0]  ;;  %v7633_v8 = vld [vmem:[%s14796_s1 + $0x20] sm:$0xf] }
 0x24c   :  { %1352 = vrot.lane.b32.xlu1 %v10177_v20, %s9594_s0  ;;  %v813_v46 = vadd.f32 %v812_v47, %v10123_v29  ;;  %v765_v35 = vpop.f32.mrf.mxu1  ;;  %842 = vmatpush.bf16.msrb.mxu3 %v7706_v52  ;;  %8952 = vrsqrt.f32 %v356_v62  ;;  %v7694_v17 = vor.u32 %v8471_v40, %v7693_v16  ;;  %v7681_v47 = vld [vmem:[%s14796_s1 + $0x80] sm:$0xf]  ;;  %v8456_v12 = vld [vmem:[%s14796_s1 + $0x28] sm:$0xf0]  ;;  %v7621_v16 = vld [vmem:[%s14796_s1 + $0x8] sm:$0xf]  ;;  %vm504_vm15 = vweird.f32 %v356_v62 }
 0x24d   :  { %v565_v57 = vadd.f32 %v10031_v13, %v548_v32  ;;  %v766_v31 = vadd.f32 %v765_v35, %v10128_v9  ;;  %v8468_v32 = vld [vmem:[%s14796_s1 + $0x88] sm:$0xf0]  ;;  %v7634_v58 = vor.u32 %v8456_v12, %v7633_v8  ;;  %v8453_v40 = vld [vmem:[%s14796_s1 + $0x10] sm:$0xf0] }
 0x24e   :  { %v899_v15 = vpack.c.bf16 %v813_v46, %v764_v37  ;;  %v7670_v46 = vor.u32 %v8465_v28, %v7669_v14  ;;  %v7657_v37 = vld [vmem:[%s14796_s1 + $0x50] sm:$0xf] }
 0x24f   :  { %v10184_v60 = vpack.c.bf16 %v565_v57, %v564_v21  ;;  %v7682_v21 = vor.u32 %v8468_v32, %v7681_v47  ;;  %v7622_v47 = vor.u32 %v8453_v40, %v7621_v16 }
 0x250   :  { %v943_v1 = vunpack.c.l.b16 %v899_v15  ;;  %v967_v6 = vunpack.c.h.b16 %v899_v15  ;;  %843 = vmatpush.bf16.msrb.mxu3 %v7694_v17 }
 0x251   :  { %782 = vmatmul.bf16.vlgmr.msra.gmra.mxu3 %v10184_v60  ;;  %831 = vmatmul.bf16.gmra.mxu2 %v10184_v60 }
 0x252   :  { %v8953_v57 = vpop.eup %8952 }
 0x253   :  { %v814_v23 = vpop.f32.mrf.mxu2  ;;  %v499_v35 = vmul.f32 %v8953_v57, %v356_v62  ;;  %vm505_vm14 = vweird.f32 %v8953_v57 }
 0x254   :  { %v815_v61 = vadd.f32 %v814_v23, %v10123_v29  ;;  %1336 = vrot.lane.b32.xlu1 %v10190_v39, %s9594_s0  ;;  %844 = vmatpush.bf16.msrb.mxu3 %v7682_v21  ;;  %v8462_v23 = vld [vmem:[%s14796_s1 + $0x58] sm:$0xf0]  ;;  %vm506_vm0 = vmor %vm504_vm15, %vm505_vm14 }
 0x255   :  { %v7658_v15 = vor.u32 %v8462_v23, %v7657_v37 }
 0x256   :  { %v901_v0 = vpack.c.bf16 %v815_v61, %v766_v31  ;;  %v500_v31 = vmul.f32 %v8953_v57, %v499_v35 }
 0x258   :  { %v944_v44 = vunpack.c.l.b16 %v901_v0  ;;  %v968_v54 = vunpack.c.h.b16 %v901_v0  ;;  %845 = vmatpush.bf16.msrb.mxu3 %v7670_v46  ;;  %v501_v7 = vmul.f32 0.5, %v500_v31 }
 0x25a   :  { %v10196_v34 = vpack.c.b16 %v968_v54, %v967_v6  ;;  %v10198_v43 = vpack.c.b16 %v944_v44, %v943_v1  ;;  %v7645_v1 = vld [vmem:[%s14796_s1 + $0x38] sm:$0xf]  ;;  %v8459_v6 = vld [vmem:[%s14796_s1 + $0x40] sm:$0xf0]  ;;  %v502_v52 = vsub.f32 1.5, %v501_v7 }
 0x25b   :  { %v7646_v54 = vor.u32 %v8459_v6, %v7645_v1 }
 0x25c   :  { %1354 = vrot.lane.b32.xlu2 %v10196_v34, %s9594_s0  ;;  %1338 = vrot.lane.b32.xlu0 %v10198_v43, %s9594_s0  ;;  %v503_v32 = vmul.f32 %v8953_v57, %v502_v52 }
 0x25d   :  { %846 = vmatpush.bf16.msrb.mxu3 %v7658_v15 }
 0x25e   :  { %v507_v28 = vsel %vm506_vm0, %v8953_v57, %v503_v32 }
 0x25f   :  { %v532_v23 = vmul.f32 %v507_v28, %v10084_v56 }
 0x261   :  { %847 = vmatpush.bf16.msrb.mxu3 %v7646_v54 }
 0x265   :  { %848 = vmatpush.bf16.msrb.mxu3 %v7634_v58 }
 0x269   :  { %849 = vmatpush.bf16.msrb.mxu3 %v7622_v47 }
 0x28c   :  { %v325_v61 = vpop.xlane.xlu1 %324 }
 0x28d   :  { %v341_v0 = vmul.f32 %v325_v61, %v9801_v59 }
 0x28f   :  { %v357_v44 = vadd.f32 1e-05, %v341_v0  ;;  %v549_v0 = vmul.f32 %v10022_v63, %v532_v23 }
 0x291   :  { %8954 = vrsqrt.f32 %v357_v44  ;;  %vm514_vm2 = vweird.f32 %v357_v44  ;;  %v566_v57 = vadd.f32 %v10031_v13, %v549_v0 }
 0x297   :  { %v8955_v17 = vpop.eup %8954 }
 0x298   :  { %v509_v21 = vmul.f32 %v8955_v17, %v357_v44  ;;  %vm515_vm1 = vweird.f32 %v8955_v17 }
 0x299   :  { %vm516_vm3 = vmor %vm514_vm2, %vm515_vm1 }
 0x29a   :  { %v510_v14 = vmul.f32 %v8955_v17, %v509_v21 }
 0x29c   :  { %v511_v46 = vmul.f32 0.5, %v510_v14 }
 0x29e   :  { %v512_v35 = vsub.f32 1.5, %v511_v46  ;;  %v768_v37 = vpop.f32.mrf.mxu1 }
 0x29f   :  { %v769_v56 = vadd.f32 %v768_v37, %v10128_v9 }
 0x2a0   :  { %v513_v15 = vmul.f32 %v8955_v17, %v512_v35 }
 0x2a2   :  { %v517_v31 = vsel %vm516_vm3, %v8955_v17, %v513_v15 }
 0x2a3   :  { %v533_v61 = vmul.f32 %v517_v31, %v10098_v55 }
 0x2a4   :  { %v817_v1 = vpop.f32.mrf.mxu2 }
 0x2a5   :  { %v550_v62 = vmul.f32 %v10022_v63, %v533_v61  ;;  %v818_v7 = vadd.f32 %v817_v1, %v10123_v29 }
 0x2a6   :  { %v770_v6 = vpop.f32.mrf.mxu1 }
 0x2a7   :  { %v567_v54 = vadd.f32 %v10031_v13, %v550_v62  ;;  %v903_v44 = vpack.c.bf16 %v818_v7, %v769_v56  ;;  %v771_v12 = vadd.f32 %v770_v6, %v10128_v9 }
 0x2a9   :  { %v10261_v8 = vpack.c.bf16 %v567_v54, %v566_v57  ;;  %v945_v16 = vunpack.c.l.b16 %v903_v44  ;;  %v969_v13 = vunpack.c.h.b16 %v903_v44 }
 0x2ab   :  { %787 = vmatmul.bf16.gmra.mxu3 %v10261_v8  ;;  %836 = vmatmul.bf16.gmra.mxu2 %v10261_v8 }
 0x2ac   :  { %v819_v55 = vpop.f32.mrf.mxu2 }
 0x2ad   :  { %v820_v63 = vadd.f32 %v819_v55, %v10123_v29 }
 0x2ae   :  { %v773_v58 = vpop.f32.mrf.mxu1 }
 0x2af   :  { %v905_v52 = vpack.c.bf16 %v820_v63, %v771_v12  ;;  %v774_v46 = vadd.f32 %v773_v58, %v10128_v9 }
 0x2b1   :  { %v946_v40 = vunpack.c.l.b16 %v905_v52  ;;  %v970_v17 = vunpack.c.h.b16 %v905_v52 }
 0x2b3   :  { %v10268_v47 = vpack.c.b16 %v946_v40, %v945_v16  ;;  %v10270_v32 = vpack.c.b16 %v970_v17, %v969_v13 }
 0x2b4   :  { %v822_v21 = vpop.f32.mrf.mxu2 }
 0x2b5   :  { %1340 = vrot.lane.b32.xlu2 %v10268_v47, %s9594_s0  ;;  %1356 = vrot.lane.b32.xlu0 %v10270_v32, %s9594_s0  ;;  %v823_v28 = vadd.f32 %v822_v21, %v10123_v29 }
 0x2b6   :  { %v775_v14 = vpop.f32.mrf.mxu1 }
 0x2b7   :  { %v907_v37 = vpack.c.bf16 %v823_v28, %v774_v46  ;;  %v776_v23 = vadd.f32 %v775_v14, %v10128_v9 }
 0x2b9   :  { %v947_v0 = vunpack.c.l.b16 %v907_v37  ;;  %v971_v1 = vunpack.c.h.b16 %v907_v37 }
 0x2bb   :  { %850 = vmatmul.bf16.vlgmr.msrb.gmra.mxu3 %v10043_v38 }
 0x2bc   :  { %v824_v35 = vpop.f32.mrf.mxu2 }
 0x2bd   :  { %v825_v15 = vadd.f32 %v824_v35, %v10123_v29 }
 0x2be   :  { %v778_v61 = vpop.f32.mrf.mxu1 }
 0x2bf   :  { %v909_v31 = vpack.c.bf16 %v825_v15, %v776_v23  ;;  %v779_v55 = vadd.f32 %v778_v61, %v10128_v9 }
 0x2c1   :  { %v948_v62 = vunpack.c.l.b16 %v909_v31  ;;  %v972_v6 = vunpack.c.h.b16 %v909_v31 }
 0x2c3   :  { %v10281_v57 = vpack.c.b16 %v948_v62, %v947_v0  ;;  %v10283_v54 = vpack.c.b16 %v972_v6, %v971_v1 }
 0x2c4   :  { %v827_v7 = vpop.f32.mrf.mxu2 }
 0x2c5   :  { %1342 = vrot.lane.b32.xlu1 %v10281_v57, %s9594_s0  ;;  %1358 = vrot.lane.b32.xlu2 %v10283_v54, %s9594_s0  ;;  %v828_v38 = vadd.f32 %v827_v7, %v10123_v29 }
 0x2c6   :  { %v780_v56 = vpop.f32.mrf.mxu1 }
 0x2c7   :  { %v911_v12 = vpack.c.bf16 %v828_v38, %v779_v55  ;;  %v781_v63 = vadd.f32 %v780_v56, %v10128_v9 }
 0x2c9   :  { %v949_v16 = vunpack.c.l.b16 %v911_v12  ;;  %v973_v13 = vunpack.c.h.b16 %v911_v12 }
 0x2cb   :  { %855 = vmatmul.bf16.gmra.mxu3 %v10064_v4 }
 0x2cc   :  { %v829_v44 = vpop.f32.mrf.mxu2 }
 0x2cd   :  { %v830_v58 = vadd.f32 %v829_v44, %v10123_v29 }
 0x2cf   :  { %v913_v52 = vpack.c.bf16 %v830_v58, %v781_v63 }
 0x2d1   :  { %v950_v40 = vunpack.c.l.b16 %v913_v52  ;;  %v974_v17 = vunpack.c.h.b16 %v913_v52 }
 0x2d3   :  { %v10294_v21 = vpack.c.b16 %v974_v17, %v973_v13  ;;  %v10296_v14 = vpack.c.b16 %v950_v40, %v949_v16 }
 0x2d4   :  { %v783_v28 = vpop.f32.mrf.mxu3  ;;  %v832_v46 = vpop.f32.mrf.mxu2 }
 0x2d5   :  { %2068 = vrot.lane.b32.xlu2 %v10294_v21, %s9595_s26  ;;  %1360 = vrot.lane.b32.xlu1 %v10294_v21, %s9594_s0  ;;  %v784_v4 = vadd.f32 %v783_v28, %v10128_v9  ;;  %v833_v35 = vadd.f32 %v832_v46, %v10123_v29  ;;  %v10359_v46 = vpop.permute.xlu1 %1352 }
 0x2d6   :  { %1344 = vrot.lane.b32.xlu0 %v10296_v14, %s9594_s0 }
 0x2d7   :  { %v915_v15 = vpack.c.bf16 %v833_v35, %v784_v4  ;;  %v10362_v4 = vperm.slane %v10120_v26, 2 }
 0x2d9   :  { %v975_v1 = vunpack.c.h.b16 %v915_v15  ;;  %v951_v7 = vunpack.c.l.b16 %v915_v15 }
 0x2db   :  { %860 = vmatmul.bf16.gmra.mxu3 %v10086_v3 }
 0x2dc   :  { %v785_v37 = vpop.f32.mrf.mxu3  ;;  %v834_v23 = vpop.f32.mrf.mxu2 }
 0x2dd   :  { %v786_v31 = vadd.f32 %v785_v37, %v10128_v9  ;;  %v835_v61 = vadd.f32 %v834_v23, %v10123_v29  ;;  %1714 = vrot.lane.b32.xlu2 %v10294_v21, %s9596_s27  ;;  %2062 = vrot.lane.b32.xlu1 %v10196_v34, %s9595_s26  ;;  %v10373_v26 = vpop.permute.xlu1 %1336 }
 0x2df   :  { %v917_v0 = vpack.c.bf16 %v835_v61, %v786_v31 }
 0x2e1   :  { %v976_v62 = vunpack.c.h.b16 %v917_v0  ;;  %v952_v3 = vunpack.c.l.b16 %v917_v0 }
 0x2e3   :  { %v985_v6 = vpack.c.b16 %v976_v62, %v975_v1  ;;  %v10323_v38 = vpack.c.b16 %v952_v3, %v951_v7  ;;  %v1028_v3 = vsel %vm987_vm4, %v10294_v21, 0  ;;  %v10393_v21 = vpop.permute.xlu0 %1350 }
 0x2e5   :  { %1712 = vrot.lane.b32.xlu2 %v10283_v54, %s9596_s27  ;;  %2060 = vrot.lane.b32.xlu1 %v10177_v20, %s9595_s26  ;;  %v1031_v15 = vsel %vm987_vm4, %v985_v6, 0 }
 0x2e6   :  { %1362 = vrot.lane.b32.xlu0 %v985_v6, %s9594_s0 }
 0x2eb   :  { %865 = vmatmul.bf16.gmra.mxu3 %v10109_v10 }
 0x2ed   :  { %2070 = vrot.lane.b32.xlu2 %v985_v6, %s9595_s26  ;;  %1716 = vrot.lane.b32.xlu1 %v985_v6, %s9596_s27 }
 0x2ee   :  { %2066 = vrot.lane.b32.xlu0 %v10283_v54, %s9595_s26 }
 0x2f5   :  { %1346 = vrot.lane.b32.xlu1 %v10323_v38, %s9594_s0 }
 0x2f6   :  { %2064 = vrot.lane.b32.xlu0 %v10270_v32, %s9595_s26 }
 0x2fb   :  { %870 = vmatmul.bf16.gmra.mxu3 %v10136_v22 }
 0x2fd   :  { %1706 = vrot.lane.b32.xlu1 %v10177_v20, %s9596_s27 }
 0x2fe   :  { %1710 = vrot.lane.b32.xlu0 %v10270_v32, %s9596_s27 }
 0x305   :  { %1688 = vrot.lane.b32.xlu1 %v10154_v18, %s9596_s27 }
 0x306   :  { %1708 = vrot.lane.b32.xlu0 %v10196_v34, %s9596_s27 }
 0x30b   :  { %875 = vmatmul.bf16.gmra.mxu3 %v10165_v50 }
 0x30d   :  { %2046 = vrot.lane.b32.xlu1 %v10198_v43, %s9595_s26 }
 0x30e   :  { %2042 = vrot.lane.b32.xlu0 %v10154_v18, %s9595_s26 }
 0x315   :  { %2052 = vrot.lane.b32.xlu1 %v10296_v14, %s9595_s26 }
 0x316   :  { %2044 = vrot.lane.b32.xlu0 %v10190_v39, %s9595_s26 }
 0x31b   :  { %880 = vmatmul.bf16.gmra.mxu3 %v10184_v60 }
 0x31e   :  { %1692 = vrot.lane.b32.xlu0 %v10198_v43, %s9596_s27 }
 0x326   :  { %1694 = vrot.lane.b32.xlu0 %v10268_v47, %s9596_s27 }
 0x32b   :  { %885 = vmatmul.bf16.gmra.mxu3 %v10261_v8 }
 0x32e   :  { %v788_v10 = vpop.f32.mrf.mxu3  ;;  %v837_v22 = vpop.f32.mrf.mxu2 }
 0x32f   :  { %v789_v50 = vadd.f32 %v788_v10, %v10128_v9  ;;  %v838_v56 = vadd.f32 %v837_v22, %v10123_v29  ;;  %v10386_v10 = vpop.permute.xlu2 %1334 }
 0x331   :  { %v919_v12 = vpack.c.bf16 %v838_v56, %v789_v50 }
 0x333   :  { %v953_v52 = vunpack.c.l.b16 %v919_v12  ;;  %v977_v16 = vunpack.c.h.b16 %v919_v12 }
 0x336   :  { %v790_v55 = vpop.f32.mrf.mxu3  ;;  %v839_v44 = vpop.f32.mrf.mxu2 }
 0x337   :  { %v791_v63 = vadd.f32 %v790_v55, %v10128_v9  ;;  %v840_v60 = vadd.f32 %v839_v44, %v10123_v29  ;;  %v10383_v6 = vpop.permute.xlu1 %1342  ;;  %v1025_v55 = vsel %vm987_vm4, %v10283_v54, 0  ;;  %v1022_v54 = vsel %vm987_vm4, %v10270_v32, 0 }
 0x339   :  { %v921_v58 = vpack.c.bf16 %v840_v60, %v791_v63 }
 0x33b   :  { %v954_v13 = vunpack.c.l.b16 %v921_v58  ;;  %v978_v40 = vunpack.c.h.b16 %v921_v58  ;;  %v10397_v58 = vpop.permute.xlu2 %1354 }
 0x33d   :  { %v986_v17 = vpack.c.b16 %v978_v40, %v977_v16  ;;  %v10357_v8 = vpack.c.b16 %v954_v13, %v953_v52  ;;  %v10407_v13 = vpop.permute.xlu0 %1338 }
 0x33e   :  { %v851_v28 = vpop.f32.mrf.mxu3 }
 0x33f   :  { %1718 = vrot.lane.b32.xlu1 %v986_v17, %s9596_s27  ;;  %2072 = vrot.lane.b32.xlu0 %v986_v17, %s9595_s26  ;;  %v1034_v29 = vsel %vm987_vm4, %v986_v17, 0  ;;  %v852_v9 = vadd.f32 %v851_v28, %v10362_v4 }
 0x340   :  { %1364 = vrot.lane.b32.xlu2 %v986_v17, %s9594_s0  ;;  %1036 = vmatpush.bf16.xpose.msrb.mxu0 %v1034_v29 }
 0x341   :  { %v892_v37 = vpack.c.bf16 %v852_v9, %v852_v9 }
 0x343   :  { %v1253_v61 = vunpack.c.l.b16 %v892_v37  ;;  %v10412_v28 = vpop.permute.xlu2 %1340  ;;  %v1019_v37 = vsel %vm987_vm4, %v10196_v34, 0  ;;  %v1016_v34 = vsel %vm987_vm4, %v10177_v20, 0 }
 0x345   :  { %v10419_v32 = vpop.permute.xlu0 %1356 }
 0x346   :  { %v853_v35 = vpop.f32.mrf.mxu3 }
 0x347   :  { %v854_v23 = vadd.f32 %v853_v35, %v10362_v4  ;;  %v10395_v44 = vpop.permute.xlu1 %1360 }
 0x348   :  { %2058 = vrot.lane.b32.xlu2 %v10156_v24, %s9595_s26  ;;  %1037 = vmatpush.bf16.xpose.msrb.mxu0 %v1031_v15 }
 0x349   :  { %v894_v31 = vpack.c.bf16 %v854_v23, %v854_v23 }
 0x34b   :  { %v1254_v0 = vunpack.c.l.b16 %v894_v31 }
 0x34d   :  { %v10375_v1 = vpack.c.b16 %v1254_v0, %v1253_v61  ;;  %v10421_v61 = vpop.permute.xlu2 %1358 }
 0x34e   :  { %v856_v62 = vpop.f32.mrf.mxu3 }
 0x34f   :  { %14802 = vst [vmem:[#allocation19_spill] sm:$0xff] %v10375_v1  ;;  %1615 = vrot.lane.b32.xlu0 %v10375_v1, %s9594_s0  ;;  %v857_v7 = vadd.f32 %v856_v62, %v10362_v4  ;;  %v10409_v40 = vpop.permute.xlu1 %2062 }
 0x350   :  { %1704 = vrot.lane.b32.xlu2 %v10156_v24, %s9596_s27  ;;  %1038 = vmatpush.bf16.xpose.msrb.mxu0 %v1028_v3 }
 0x351   :  { %v896_v50 = vpack.c.bf16 %v857_v7, %v857_v7  ;;  %v10433_v7 = vpop.permute.xlu0 %1344 }
 0x353   :  { %v1255_v63 = vunpack.c.l.b16 %v896_v50 }
 0x355   :  { %v10436_v50 = vpop.permute.xlu2 %2068 }
 0x356   :  { %v858_v22 = vpop.f32.mrf.mxu3 }
 0x357   :  { %v859_v56 = vadd.f32 %v858_v22, %v10362_v4  ;;  %v10423_v0 = vpop.permute.xlu1 %2060 }
 0x358   :  { %1690 = vrot.lane.b32.xlu2 %v10190_v39, %s9596_s27  ;;  %1039 = vmatpush.bf16.xpose.msrb.mxu0 %v1025_v55 }
 0x359   :  { %v898_v12 = vpack.c.bf16 %v859_v56, %v859_v56  ;;  %v1363_v20 = vpop.permute.xlu0 %1362 }
 0x35b   :  { %v1256_v60 = vunpack.c.l.b16 %v898_v12 }
 0x35d   :  { %v10399_v52 = vpack.c.b16 %v1256_v60, %v1255_v63  ;;  %v1013_v60 = vsel %vm987_vm4, %v10156_v24, 0 }
 0x35e   :  { %v861_v16 = vpop.f32.mrf.mxu3 }
 0x35f   :  { %1617 = vrot.lane.b32.xlu1 %v10399_v52, %s9594_s0  ;;  %v862_v17 = vadd.f32 %v861_v16, %v10362_v4  ;;  %v10438_v55 = vpop.permute.xlu1 %1716 }
 0x360   :  { %2048 = vrot.lane.b32.xlu2 %v10268_v47, %s9595_s26  ;;  %1040 = vmatpush.bf16.xpose.msrb.mxu0 %v1022_v54 }
 0x361   :  { %v900_v9 = vpack.c.bf16 %v862_v17, %v862_v17 }
 0x363   :  { %v1257_v15 = vunpack.c.l.b16 %v900_v9  ;;  %v10447_v9 = vpop.permute.xlu2 %1714 }
 0x366   :  { %v863_v29 = vpop.f32.mrf.mxu3 }
 0x367   :  { %v864_v35 = vadd.f32 %v863_v29, %v10362_v4  ;;  %v10457_v24 = vpop.permute.xlu1 %1346 }
 0x368   :  { %2050 = vrot.lane.b32.xlu2 %v10281_v57, %s9595_s26  ;;  %1041 = vmatpush.bf16.xpose.msrb.mxu0 %v1019_v37  ;;  %v10459_v37 = vpop.permute.xlu0 %2066 }
 0x369   :  { %v902_v23 = vpack.c.bf16 %v864_v35, %v864_v35 }
 0x36b   :  { %v1258_v31 = vunpack.c.l.b16 %v902_v23 }
 0x36d   :  { %v10425_v62 = vpack.c.b16 %v1258_v31, %v1257_v15 }
 0x36e   :  { %v866_v3 = vpop.f32.mrf.mxu3 }
 0x36f   :  { %1619 = vrot.lane.b32.xlu0 %v10425_v62, %s9594_s0  ;;  %v867_v22 = vadd.f32 %v866_v3, %v10362_v4 }
 0x370   :  { %1696 = vrot.lane.b32.xlu2 %v10281_v57, %s9596_s27  ;;  %1042 = vmatpush.bf16.xpose.msrb.mxu0 %v1016_v34  ;;  %v10463_v34 = vpop.permute.xlu2 %1712 }
 0x371   :  { %v904_v12 = vpack.c.bf16 %v867_v22, %v867_v22 }
 0x373   :  { %v1259_v54 = vunpack.c.l.b16 %v904_v12 }
 0x376   :  { %v868_v56 = vpop.f32.mrf.mxu3 }
 0x377   :  { %v869_v63 = vadd.f32 %v868_v56, %v10362_v4  ;;  %v10467_v56 = vpop.permute.xlu1 %1706 }
 0x378   :  { %1698 = vrot.lane.b32.xlu2 %v10296_v14, %s9596_s27  ;;  %1043 = vmatpush.bf16.xpose.msrb.mxu0 %v1013_v60 }
 0x379   :  { %v906_v16 = vpack.c.bf16 %v869_v63, %v869_v63  ;;  %v10469_v63 = vpop.permute.xlu0 %2064 }
 0x37b   :  { %v1260_v17 = vunpack.c.l.b16 %v906_v16 }
 0x37d   :  { %v10445_v29 = vpack.c.b16 %v1260_v17, %v1259_v54  ;;  %v10479_v54 = vpop.permute.xlu2 %2070 }
 0x37e   :  { %v871_v35 = vpop.f32.mrf.mxu3 }
 0x37f   :  { %1621 = vrot.lane.b32.xlu1 %v10445_v29, %s9594_s0  ;;  %2329 = vrot.lane.b32.xlu0 %v10445_v29, %s9595_s26  ;;  %v872_v23 = vadd.f32 %v871_v35, %v10362_v4  ;;  %v10482_v35 = vpop.permute.xlu1 %1688 }
 0x380   :  { %2054 = vrot.lane.b32.xlu2 %v10323_v38, %s9595_s26  ;;  %7707 = vmatmul.msk.bf16.vlgmr.msrb.gmra.mxu0 %vm987_vm4, %v10154_v18 }
 0x381   :  { %v908_v31 = vpack.c.bf16 %v872_v23, %v872_v23 }
 0x383   :  { %v1261_v12 = vunpack.c.l.b16 %v908_v31 }
 0x386   :  { %v873_v15 = vpop.f32.mrf.mxu3 }
 0x387   :  { %v874_v3 = vadd.f32 %v873_v15, %v10362_v4  ;;  %v10484_v15 = vpop.permute.xlu0 %1710  ;;  %v10490_v49 = vpop.permute.xlu1 %2046 }
 0x388   :  { %1700 = vrot.lane.b32.xlu2 %v10323_v38, %s9596_s27 }
 0x389   :  { %v910_v22 = vpack.c.bf16 %v874_v3, %v874_v3 }
 0x38b   :  { %v1262_v18 = vunpack.c.l.b16 %v910_v22 }
 0x38d   :  { %v10471_v60 = vpack.c.b16 %v1262_v18, %v1261_v12 }
 0x38e   :  { %v876_v16 = vpop.f32.mrf.mxu3 }
 0x38f   :  { %1977 = vrot.lane.b32.xlu0 %v10471_v60, %s9596_s27  ;;  %v877_v17 = vadd.f32 %v876_v16, %v10362_v4 }
 0x390   :  { %7708 = vmatmul.msk.bf16.gmra.mxu0 %vm987_vm4, %v10190_v39  ;;  %1348 = vrot.lane.b32.xlu2 %v10357_v8, %s9594_s0 }
 0x391   :  { %v912_v31 = vpack.c.bf16 %v877_v17, %v877_v17  ;;  %v10497_v17 = vpop.permute.xlu0 %1708 }
 0x393   :  { %v1263_v12 = vunpack.c.l.b16 %v912_v31 }
 0x396   :  { %v878_v23 = vpop.f32.mrf.mxu3 }
 0x397   :  { %v879_v3 = vadd.f32 %v878_v23, %v10362_v4 }
 0x398   :  { %2056 = vrot.lane.b32.xlu2 %v10357_v8, %s9595_s26 }
 0x399   :  { %v914_v22 = vpack.c.bf16 %v879_v3, %v879_v3  ;;  %v10510_v42 = vpop.permute.xlu0 %2042 }
 0x39a   :  { %v1365_v39 = vpop.permute.xlu2 %1364 }
 0x39b   :  { %v1264_v18 = vunpack.c.l.b16 %v914_v22  ;;  %v1412_v2 = vsel %vm987_vm4, %v1365_v39, 0 }
 0x39c   :  { %1414 = vmatpush.bf16.xpose.msrb.mxu2 %v1412_v2  ;;  %v1409_v2 = vsel %vm987_vm4, %v1363_v20, 0  ;;  %v1406_v20 = vsel %vm987_vm4, %v10395_v44, 0 }
 0x39d   :  { %v1274_v53 = vpack.c.b16 %v1264_v18, %v1263_v12 }
 0x39e   :  { %v881_v16 = vpop.f32.mrf.mxu3 }
 0x39f   :  { %1625 = vrot.lane.b32.xlu1 %v1274_v53, %s9594_s0  ;;  %v882_v31 = vadd.f32 %v881_v16, %v10362_v4 }
 0x3a0   :  { %7709 = vmatmul.msk.bf16.gmra.mxu0 %vm987_vm4, %v10198_v43  ;;  %1702 = vrot.lane.b32.xlu2 %v10357_v8, %s9596_s27  ;;  %v10506_v43 = vpop.permute.xlu1 %2052 }
 0x3a1   :  { %v916_v22 = vpack.c.bf16 %v882_v31, %v882_v31 }
 0x3a2   :  { %v10499_v23 = vpop.permute.xlu2 %2058 }
 0x3a3   :  { %v1265_v33 = vunpack.c.l.b16 %v916_v22 }
 0x3a4   :  { %1415 = vmatpush.bf16.xpose.msrb.mxu2 %v1409_v2 }
 0x3a6   :  { %v883_v3 = vpop.f32.mrf.mxu3 }
 0x3a7   :  { %v884_v39 = vadd.f32 %v883_v3, %v10362_v4 }
 0x3a8   :  { %1623 = vrot.lane.b32.xlu2 %v10471_v60, %s9594_s0 }
 0x3a9   :  { %v918_v12 = vpack.c.bf16 %v884_v39, %v884_v39 }
 0x3aa   :  { %v10508_v18 = vpop.permute.xlu2 %1704 }
 0x3ab   :  { %v1266_v25 = vunpack.c.l.b16 %v918_v12 }
 0x3ac   :  { %1416 = vmatpush.bf16.xpose.msrb.mxu2 %v1406_v20 }
 0x3ad   :  { %v1275_v16 = vpack.c.b16 %v1266_v25, %v1265_v33  ;;  %v1403_v25 = vsel %vm987_vm4, %v10421_v61, 0  ;;  %v10526_v33 = vpop.permute.xlu0 %2044  ;;  %v1400_v61 = vsel %vm987_vm4, %v10419_v32, 0  ;;  %v1397_v32 = vsel %vm987_vm4, %v10397_v58, 0 }
 0x3ae   :  { %v886_v31 = vpop.f32.mrf.mxu3 }
 0x3af   :  { %1981 = vrot.lane.b32.xlu1 %v1275_v16, %s9596_s27  ;;  %2335 = vrot.lane.b32.xlu0 %v1275_v16, %s9595_s26  ;;  %v887_v44 = vadd.f32 %v886_v31, %v10362_v4 }
 0x3b0   :  { %7710 = vmatmul.msk.bf16.gmra.mxu0 %vm987_vm4, %v10268_v47  ;;  %2331 = vrot.lane.b32.xlu2 %v10471_v60, %s9595_s26 }
 0x3b1   :  { %v1719_v2 = vpop.permute.xlu1 %1718  ;;  %v920_v12 = vpack.c.bf16 %v887_v44, %v887_v44 }
 0x3b2   :  { %v1766_v3 = vsel %vm987_vm4, %v1719_v2, 0  ;;  %v10521_v22 = vpop.permute.xlu2 %1690  ;;  %v1763_v2 = vsel %vm987_vm4, %v10438_v55, 0  ;;  %v1760_v55 = vsel %vm987_vm4, %v10447_v9, 0  ;;  %v1394_v9 = vsel %vm987_vm4, %v10359_v46, 0 }
 0x3b3   :  { %1768 = vmatpush.bf16.xpose.msra.mxu0 %v1766_v3  ;;  %v1267_v31 = vunpack.c.l.b16 %v920_v12  ;;  %v1391_v46 = vsel %vm987_vm4, %v10393_v21, 0  ;;  %v2117_v21 = vsel %vm987_vm4, %v10479_v54, 0  ;;  %v1745_v54 = vsel %vm987_vm4, %v10508_v18, 0 }
 0x3b4   :  { %1417 = vmatpush.bf16.xpose.msrb.mxu2 %v1403_v25 }
 0x3b5   :  { %v10536_v25 = vpop.permute.xlu0 %1692 }
 0x3b6   :  { %v888_v39 = vpop.f32.mrf.mxu3 }
 0x3b7   :  { %v889_v47 = vadd.f32 %v888_v39, %v10362_v4  ;;  %v1748_v39 = vsel %vm987_vm4, %v10467_v56, 0 }
 0x3b8   :  { %2333 = vrot.lane.b32.xlu2 %v1274_v53, %s9595_s26 }
 0x3b9   :  { %v922_v20 = vpack.c.bf16 %v889_v47, %v889_v47 }
 0x3ba   :  { %v10530_v19 = vpop.permute.xlu2 %2048 }
 0x3bb   :  { %v1268_v11 = vunpack.c.l.b16 %v922_v20  ;;  %1769 = vmatpush.bf16.xpose.msra.mxu0 %v1763_v2 }
 0x3bc   :  { %1418 = vmatpush.bf16.xpose.msrb.mxu2 %v1400_v61 }
 0x3bd   :  { %v1276_v3 = vpack.c.b16 %v1268_v11, %v1267_v31  ;;  %v10549_v11 = vpop.permute.xlu0 %1694  ;;  %v10642_v31 = vld [vmem:[%s14692_s3 + $0x10] sm:$0xff] }
 0x3bf   :  { %1285 = vmatpush.bf16.msrb.mxu1 %v1276_v3  ;;  %1629 = vrot.lane.b32.xlu0 %v1276_v3, %s9594_s0 }
 0x3c0   :  { %7711 = vmatmul.msk.bf16.gmra.mxu0 %vm987_vm4, %v10281_v57  ;;  %1979 = vrot.lane.b32.xlu2 %v1274_v53, %s9596_s27  ;;  %v1757_v57 = vsel %vm987_vm4, %v10463_v34, 0  ;;  %v1754_v34 = vsel %vm987_vm4, %v10484_v15, 0  ;;  %v1751_v15 = vsel %vm987_vm4, %v10497_v17, 0 }
 0x3c2   :  { %v10542_v4 = vpop.permute.xlu2 %2050 }
 0x3c3   :  { %1286 = vmatpush.bf16.msrb.mxu1 %v1275_v16  ;;  %1770 = vmatpush.bf16.xpose.msra.mxu0 %v1760_v55 }
 0x3c4   :  { %1419 = vmatpush.bf16.xpose.msrb.mxu2 %v1397_v32  ;;  %v10657_v32 = vld [vmem:[%s14692_s3 + $0x18] sm:$0xff] }
 0x3c7   :  { %1287 = vmatpush.bf16.msrb.mxu1 %v1274_v53  ;;  %v2073_v53 = vpop.permute.xlu0 %2072 }
 0x3c8   :  { %1627 = vrot.lane.b32.xlu2 %v1275_v16, %s9594_s0 }
 0x3ca   :  { %v10551_v44 = vpop.permute.xlu2 %1696 }
 0x3cb   :  { %1288 = vmatpush.bf16.msrb.mxu1 %v10471_v60  ;;  %1771 = vmatpush.bf16.xpose.msra.mxu0 %v1757_v57  ;;  %v2120_v60 = vsel %vm987_vm4, %v2073_v53, 0 }
 0x3cc   :  { %1420 = vmatpush.bf16.xpose.msrb.mxu2 %v1394_v9 }
 0x3cf   :  { %1289 = vmatpush.bf16.msrb.mxu1 %v10445_v29 }
 0x3d0   :  { %7712 = vmatmul.msk.bf16.gmra.mxu0 %vm987_vm4, %v10296_v14  ;;  %2337 = vrot.lane.b32.xlu2 %v1276_v3, %s9595_s26 }
 0x3d2   :  { %v10562_v58 = vpop.permute.xlu2 %1698 }
 0x3d3   :  { %1290 = vmatpush.bf16.msrb.mxu1 %v10425_v62  ;;  %1772 = vmatpush.bf16.xpose.msra.mxu0 %v1754_v34 }
 0x3d4   :  { %1421 = vmatpush.bf16.xpose.msrb.mxu2 %v1391_v46  ;;  %v1618_v46 = vpop.permute.xlu1 %1617 }
 0x3d7   :  { %1291 = vmatpush.bf16.msrb.mxu1 %v10399_v52 }
 0x3d8   :  { %1983 = vrot.lane.b32.xlu2 %v1276_v3, %s9596_s27 }
 0x3da   :  { %v10572_v14 = vpop.permute.xlu2 %2054 }
 0x3db   :  { %7715 = vmatmul.msk.bf16.vlgmr.msrb.gmra.mxu2 %vm987_vm4, %v10386_v10  ;;  %1292 = vmatpush.bf16.msrb.mxu1 %v10375_v1  ;;  %v2114_v10 = vsel %vm987_vm4, %v10436_v50, 0  ;;  %v2108_v50 = vsel %vm987_vm4, %v10469_v63, 0 }
 0x3dc   :  { %2122 = vmatpush.bf16.xpose.msra.mxu2 %v2120_v60  ;;  %1773 = vmatpush.bf16.xpose.msra.mxu0 %v1751_v15 }
 0x3e0   :  { %7713 = vmatmul.msk.bf16.gmra.mxu0 %vm987_vm4, %v10323_v38  ;;  %v2111_v38 = vsel %vm987_vm4, %v10459_v37, 0  ;;  %v2105_v37 = vsel %vm987_vm4, %v10409_v40, 0  ;;  %v2102_v40 = vsel %vm987_vm4, %v10423_v0, 0  ;;  %v2099_v0 = vsel %vm987_vm4, %v10499_v23, 0 }
 0x3e2   :  { %v10583_v16 = vpop.permute.xlu2 %1700 }
 0x3e4   :  { %2123 = vmatpush.bf16.xpose.msra.mxu2 %v2117_v21  ;;  %1774 = vmatpush.bf16.xpose.msra.mxu0 %v1748_v39 }
 0x3ea   :  { %v10589_v12 = vpop.permute.xlu2 %1348 }
 0x3eb   :  { %7716 = vmatmul.msk.bf16.gmra.mxu2 %vm987_vm4, %v10373_v26  ;;  %v10610_v26 = vld [vmem:[%s14692_s3] sm:$0xff] }
 0x3ec   :  { %2124 = vmatpush.bf16.xpose.msra.mxu2 %v2114_v10  ;;  %1775 = vmatpush.bf16.xpose.msra.mxu0 %v1745_v54 }
 0x3f0   :  { %7714 = vmatmul.msk.bf16.gmra.mxu0 %vm987_vm4, %v10357_v8 }
 0x3f1   :  { %v1622_v10 = vpop.permute.xlu1 %1621 }
 0x3f2   :  { %v10599_v56 = vpop.permute.xlu2 %2056 }
 0x3f4   :  { %2125 = vmatpush.bf16.xpose.msra.mxu2 %v2111_v38 }
 0x3fa   :  { %v10603_v17 = vpop.permute.xlu2 %1702 }
 0x3fb   :  { %7717 = vmatmul.msk.bf16.gmra.mxu2 %vm987_vm4, %v10407_v13  ;;  %v10625_v13 = vld [vmem:[%s14692_s3 + $0x8] sm:$0xff] }
 0x3fc   :  { %2126 = vmatpush.bf16.xpose.msra.mxu2 %v2108_v50 }
 0x3fd   :  { %v1045_v8 = vpop.f32.mrf.mxu0 }
 0x3fe   :  { %v10615_v18 = vadd.f32 %v1045_v8, %v10610_v26 }
 0x400   :  { %7723 = vmatmul.msk.bf16.vlgmr.msra.gmra.mxu0 %vm987_vm4, %v10482_v35  ;;  %v10633_v35 = vpop.permute.xlu0 %1615 }
 0x401   :  { %1085 = vmax.xlane.f32.xlu2 %v10615_v18 }
 0x402   :  { %v10620_v63 = vpop.permute.xlu2 %1623 }
 0x404   :  { %2127 = vmatpush.bf16.xpose.msra.mxu2 %v2105_v37 }
 0x405   :  { %v1047_v47 = vpop.f32.mrf.mxu0 }
 0x406   :  { %v10630_v20 = vadd.f32 %v1047_v47, %v10625_v13 }
 0x408   :  { %1087 = vmax.xlane.f32.xlu1 %v10630_v20  ;;  %v1620_v55 = vpop.permute.xlu0 %1619 }
 0x40a   :  { %v10635_v2 = vpop.permute.xlu2 %2331 }
 0x40b   :  { %7718 = vmatmul.msk.bf16.gmra.mxu2 %vm987_vm4, %v10412_v28 }
 0x40c   :  { %2128 = vmatpush.bf16.xpose.msra.mxu2 %v2102_v40 }
 0x40d   :  { %v1050_v61 = vpop.f32.mrf.mxu0 }
 0x40e   :  { %v10647_v3 = vadd.f32 %v1050_v61, %v10642_v31 }
 0x410   :  { %1089 = vmax.xlane.f32.xlu0 %v10647_v3  ;;  %7724 = vmatmul.msk.bf16.gmra.mxu0 %vm987_vm4, %v10521_v22  ;;  %v10663_v9 = vpop.permute.xlu0 %2329  ;;  %v10670_v22 = vld [vmem:[%s14692_s3 + $0x20] sm:$0xff] }
 0x411   :  { %v1626_v8 = vpop.permute.xlu1 %1625 }
 0x412   :  { %v10652_v28 = vpop.permute.xlu2 %2333 }
 0x414   :  { %2129 = vmatpush.bf16.xpose.msra.mxu2 %v2099_v0 }
 0x415   :  { %v1052_v57 = vpop.f32.mrf.mxu0 }
 0x416   :  { %v10660_v23 = vadd.f32 %v1052_v57, %v10657_v32 }
 0x418   :  { %1091 = vmax.xlane.f32.xlu1 %v10660_v23  ;;  %v1978_v15 = vpop.permute.xlu0 %1977 }
 0x41a   :  { %v1980_v53 = vpop.permute.xlu2 %1979 }
 0x41b   :  { %7719 = vmatmul.msk.bf16.gmra.mxu2 %vm987_vm4, %v10383_v6  ;;  %v10681_v6 = vld [vmem:[%s14692_s3 + $0x28] sm:$0xff] }
 0x41d   :  { %v1055_v34 = vpop.f32.mrf.mxu0 }
 0x41e   :  { %v10673_v60 = vadd.f32 %v1055_v34, %v10670_v22 }
 0x420   :  { %1093 = vmax.xlane.f32.xlu0 %v10673_v60  ;;  %7725 = vmatmul.msk.bf16.gmra.mxu0 %vm987_vm4, %v10536_v25  ;;  %v10692_v25 = vld [vmem:[%s14692_s3 + $0x30] sm:$0xff] }
 0x421   :  { %v2336_v38 = vpop.permute.xlu0 %2335  ;;  %v1982_v57 = vpop.permute.xlu1 %1981 }
 0x422   :  { %v1628_v21 = vpop.permute.xlu2 %1627 }
 0x425   :  { %v1057_v39 = vpop.f32.mrf.mxu0 }
 0x426   :  { %v10684_v54 = vadd.f32 %v1057_v39, %v10681_v6 }
 0x428   :  { %1095 = vmax.xlane.f32.xlu1 %v10684_v54 }
 0x42a   :  { %v2338_v50 = vpop.permute.xlu2 %2337 }
 0x42b   :  { %7720 = vmatmul.msk.bf16.gmra.mxu2 %vm987_vm4, %v10433_v7  ;;  %v10703_v7 = vld [vmem:[%s14692_s3 + $0x38] sm:$0xff] }
 0x42d   :  { %v1060_v37 = vpop.f32.mrf.mxu0 }
 0x42e   :  { %v10695_v40 = vadd.f32 %v1060_v37, %v10692_v25 }
 0x430   :  { %1097 = vmax.xlane.f32.xlu0 %v10695_v40  ;;  %7726 = vmatmul.msk.bf16.gmra.mxu0 %vm987_vm4, %v10549_v11  ;;  %v10714_v11 = vld [vmem:[%s14692_s3 + $0x40] sm:$0xff] }
 0x431   :  { %v1630_v47 = vpop.permute.xlu0 %1629 }
 0x432   :  { %v1984_v0 = vpop.permute.xlu2 %1983  ;;  %1639 = vmatpush.bf16.msra.mxu3 %v1630_v47 }
 0x433   :  { %1993 = vmatpush.bf16.msra.mxu1 %v1984_v0  ;;  %v10796_v0 = vld [vmem:[%s14692_s3 + $0x78] sm:$0xff] }
 0x435   :  { %v1062_v61 = vpop.f32.mrf.mxu0 }
 0x436   :  { %1640 = vmatpush.bf16.msra.mxu3 %v1628_v21  ;;  %v10706_v34 = vadd.f32 %v1062_v61, %v10703_v7 }
 0x437   :  { %1994 = vmatpush.bf16.msra.mxu1 %v1982_v57 }
 0x438   :  { %1099 = vmax.xlane.f32.xlu2 %v10706_v34 }
 0x43a   :  { %1641 = vmatpush.bf16.msra.mxu3 %v1626_v8 }
 0x43b   :  { %7721 = vmatmul.msk.bf16.gmra.mxu2 %vm987_vm4, %v10457_v24  ;;  %1995 = vmatpush.bf16.msra.mxu1 %v1980_v53  ;;  %v10726_v24 = vld [vmem:[%s14692_s3 + $0x48] sm:$0xff] }
 0x43d   :  { %v1065_v39 = vpop.f32.mrf.mxu0 }
 0x43e   :  { %v10717_v37 = vadd.f32 %v1065_v39, %v10714_v11  ;;  %1642 = vmatpush.bf16.msra.mxu3 %v10620_v63 }
 0x43f   :  { %1996 = vmatpush.bf16.msra.mxu1 %v1978_v15 }
 0x440   :  { %1101 = vmax.xlane.f32.xlu2 %v10717_v37  ;;  %7727 = vmatmul.msk.bf16.gmra.mxu0 %vm987_vm4, %v10551_v44  ;;  %v10737_v44 = vld [vmem:[%s14692_s3 + $0x50] sm:$0xff] }
 0x441   :  { %14803 = vst [vmem:[#allocation20_spill] sm:$0xff] %v10737_v44 }
 0x442   :  { %1643 = vmatpush.bf16.msra.mxu3 %v1622_v10 }
 0x445   :  { %v1067_v53 = vpop.f32.mrf.mxu0 }
 0x446   :  { %1644 = vmatpush.bf16.msra.mxu3 %v1620_v55  ;;  %v10729_v21 = vadd.f32 %v1067_v53, %v10726_v24 }
 0x448   :  { %1103 = vmax.xlane.f32.xlu1 %v10729_v21 }
 0x44a   :  { %1645 = vmatpush.bf16.msra.mxu3 %v1618_v46 }
 0x44b   :  { %7722 = vmatmul.msk.bf16.gmra.mxu2 %vm987_vm4, %v10589_v12  ;;  %v10749_v12 = vld [vmem:[%s14692_s3 + $0x58] sm:$0xff] }
 0x44d   :  { %v1070_v63 = vpop.f32.mrf.mxu0 }
 0x44e   :  { %v10740_v15 = vadd.f32 %v1070_v63, %v10737_v44  ;;  %1646 = vmatpush.bf16.msra.mxu3 %v10633_v35 }
 0x450   :  { %1105 = vmax.xlane.f32.xlu2 %v10740_v15  ;;  %7728 = vmatmul.msk.bf16.gmra.mxu0 %vm987_vm4, %v10562_v58  ;;  %v10762_v58 = vld [vmem:[%s14692_s3 + $0x60] sm:$0xff] }
 0x451   :  { %14804 = vst [vmem:[#allocation21_spill] sm:$0xff] %v10762_v58 }
 0x452   :  { %2347 = vmatpush.bf16.msrb.mxu3 %v2338_v50 }
 0x455   :  { %v1072_v55 = vpop.f32.mrf.mxu0 }
 0x456   :  { %2348 = vmatpush.bf16.msrb.mxu3 %v2336_v38  ;;  %v10752_v46 = vadd.f32 %v1072_v55, %v10749_v12 }
 0x458   :  { %1107 = vmax.xlane.f32.xlu0 %v10752_v46 }
 0x45a   :  { %2349 = vmatpush.bf16.msrb.mxu3 %v10652_v28 }
 0x45b   :  { %7731 = vmatmul.msk.bf16.vlgmr.msra.gmra.mxu2 %vm987_vm4, %v10510_v42  ;;  %v10774_v42 = vld [vmem:[%s14692_s3 + $0x68] sm:$0xff] }
 0x45c   :  { %14805 = vst [vmem:[#allocation22_spill] sm:$0xff] %v10774_v42 }
 0x45d   :  { %v1075_v35 = vpop.f32.mrf.mxu0 }
 0x45e   :  { %2350 = vmatpush.bf16.msrb.mxu3 %v10635_v2  ;;  %v10765_v10 = vadd.f32 %v1075_v35, %v10762_v58  ;;  %v1423_v38 = vpop.f32.mrf.mxu2 }
 0x45f   :  { %v10800_v39 = vadd.f32 %v1423_v38, %v10610_v26 }
 0x460   :  { %1109 = vmax.xlane.f32.xlu1 %v10765_v10  ;;  %7729 = vmatmul.msk.bf16.gmra.mxu0 %vm987_vm4, %v10583_v16 }
 0x462   :  { %2351 = vmatpush.bf16.msrb.mxu3 %v10663_v9  ;;  %v10785_v9 = vld [vmem:[%s14692_s3 + $0x70] sm:$0xff] }
 0x465   :  { %v1077_v2 = vpop.f32.mrf.mxu0 }
 0x466   :  { %v1425_v28 = vpop.f32.mrf.mxu2  ;;  %v10777_v50 = vadd.f32 %v1077_v2, %v10774_v42 }
 0x468   :  { %1111 = vmax.xlane.f32.xlu0 %v10777_v50 }
 0x46b   :  { %7732 = vmatmul.msk.bf16.gmra.mxu2 %vm987_vm4, %v10526_v33 }
 0x46d   :  { %v1080_v16 = vpop.f32.mrf.mxu0 }
 0x46e   :  { %v10788_v8 = vadd.f32 %v1080_v16, %v10785_v9  ;;  %v1428_v47 = vpop.f32.mrf.mxu2 }
 0x470   :  { %1113 = vmax.xlane.f32.xlu1 %v10788_v8  ;;  %7730 = vmatmul.msk.bf16.gmra.mxu0 %vm987_vm4, %v10603_v17 }
 0x474   :  { %v1086_v33 = vpop.xlane.xlu2 %1085 }
 0x475   :  { %v1117_v61 = vsub.f32 %v10615_v18, %v1086_v33  ;;  %v1082_v57 = vpop.f32.mrf.mxu0 }
 0x476   :  { %v1430_v53 = vpop.f32.mrf.mxu2  ;;  %v10803_v63 = vadd.f32 %v1082_v57, %v10796_v0 }
 0x477   :  { %v1133_v55 = vmul.f32 1.442695, %v1117_v61  ;;  %v10860_v36 = vadd.f32 %v1430_v53, %v10657_v32 }
 0x478   :  { %1115 = vmax.xlane.f32.xlu2 %v10803_v63  ;;  %1463 = vmax.xlane.f32.xlu1 %v10800_v39 }
 0x479   :  { %8956 = vpow2.f32 %v1133_v55 }
 0x47b   :  { %v1088_v17 = vpop.xlane.xlu1 %1087  ;;  %7733 = vmatmul.msk.bf16.gmra.mxu2 %vm987_vm4, %v10490_v49 }
 0x47c   :  { %v1118_v18 = vsub.f32 %v10630_v20, %v1088_v17 }
 0x47d   :  { %v1777_v35 = vpop.f32.mrf.mxu0 }
 0x47e   :  { %v1135_v2 = vmul.f32 1.442695, %v1118_v18  ;;  %v10811_v38 = vadd.f32 %v1777_v35, %v10610_v26  ;;  %v1433_v16 = vpop.f32.mrf.mxu2  ;;  %v10823_v18 = vadd.f32 %v1425_v28, %v10625_v13 }
 0x47f   :  { %v10813_v33 = vpop.eup %8956  ;;  %v10844_v5 = vadd.f32 %v1433_v16, %v10670_v22 }
 0x480   :  { %8958 = vpow2.f32 %v1135_v2  ;;  %1165 = vadd.xlane.f32.xlu1 %v10813_v33  ;;  %1817 = vmax.xlane.f32.xlu0 %v10811_v38 }
 0x483   :  { %v1090_v61 = vpop.xlane.xlu0 %1089 }
 0x484   :  { %v1119_v57 = vsub.f32 %v10647_v3, %v1090_v61 }
 0x485   :  { %v1779_v55 = vpop.f32.mrf.mxu0 }
 0x486   :  { %v10818_v49 = vpop.eup %8958  ;;  %v1137_v20 = vmul.f32 1.442695, %v1119_v57  ;;  %v10820_v17 = vpop.f32.mrf.mxu2  ;;  %v10835_v57 = vadd.f32 %v1779_v55, %v10625_v13 }
 0x488   :  { %8960 = vpow2.f32 %v1137_v20  ;;  %1167 = vadd.xlane.f32.xlu1 %v10818_v49  ;;  %1465 = vmax.xlane.f32.xlu0 %v10823_v18 }
 0x48b   :  { %7734 = vmatmul.msk.bf16.gmra.mxu2 %vm987_vm4, %v10530_v19  ;;  %v1092_v28 = vpop.xlane.xlu1 %1091  ;;  %v10841_v19 = vadd.f32 %v1428_v47, %v10642_v31 }
 0x48c   :  { %v1120_v55 = vsub.f32 %v10660_v23, %v1092_v28 }
 0x48d   :  { %v1782_v35 = vpop.f32.mrf.mxu0 }
 0x48e   :  { %v10829_v2 = vpop.eup %8960  ;;  %v10832_v3 = vadd.f32 %v1782_v35, %v10642_v31  ;;  %v1438_v61 = vpop.f32.mrf.mxu2  ;;  %v1139_v16 = vmul.f32 1.442695, %v1120_v55 }
 0x490   :  { %1821 = vmax.xlane.f32.xlu2 %v10832_v3  ;;  %1819 = vmax.xlane.f32.xlu1 %v10835_v57 }
 0x491   :  { %1169 = vadd.xlane.f32.xlu0 %v10829_v2 }
 0x493   :  { %v1094_v48 = vpop.xlane.xlu0 %1093 }
 0x495   :  { %v1784_v20 = vpop.f32.mrf.mxu0 }
 0x496   :  { %v1440_v35 = vpop.f32.mrf.mxu2  ;;  %v10847_v59 = vadd.f32 %v1784_v20, %v10657_v32 }
 0x497   :  { %v10857_v20 = vadd.f32 %v1440_v35, %v10703_v7  ;;  %v10875_v35 = vadd.f32 %v1438_v61, %v10692_v25 }
 0x498   :  { %1471 = vmax.xlane.f32.xlu2 %v10844_v5  ;;  %1467 = vmax.xlane.f32.xlu1 %v10841_v19 }
 0x499   :  { %1823 = vmax.xlane.f32.xlu0 %v10847_v59 }
 0x49b   :  { %v1096_v51 = vpop.xlane.xlu1 %1095  ;;  %7735 = vmatmul.msk.bf16.gmra.mxu2 %vm987_vm4, %v10542_v4  ;;  %v1121_v4 = vsub.f32 %v10673_v60, %v1094_v48 }
 0x49c   :  { %v1122_v47 = vsub.f32 %v10684_v54, %v1096_v51 }
 0x49d   :  { %v1141_v23 = vmul.f32 1.442695, %v1121_v4 }
 0x49e   :  { %v1143_v45 = vmul.f32 1.442695, %v1122_v47  ;;  %v1443_v41 = vpop.f32.mrf.mxu2  ;;  %v1787_v47 = vpop.f32.mrf.mxu0 }
 0x4a0   :  { %8962 = vpow2.f32 %v1143_v45  ;;  %1477 = vmax.xlane.f32.xlu2 %v10857_v20  ;;  %1469 = vmax.xlane.f32.xlu1 %v10860_v36 }
 0x4a1   :  { %8964 = vpow2.f32 %v1139_v16 }
 0x4a2   :  { %8966 = vpow2.f32 %v1141_v23 }
 0x4a6   :  { %v10865_v51 = vpop.eup %8962  ;;  %v1445_v54 = vpop.f32.mrf.mxu2 }
 0x4a7   :  { %v10867_v28 = vpop.eup %8964  ;;  %1175 = vadd.xlane.f32.xlu0 %v10865_v51 }
 0x4a8   :  { %1171 = vadd.xlane.f32.xlu1 %v10867_v28  ;;  %v10877_v55 = vpop.eup %8966 }
 0x4ab   :  { %v1100_v53 = vpop.xlane.xlu2 %1099  ;;  %7736 = vmatmul.msk.bf16.gmra.mxu2 %vm987_vm4, %v10506_v43  ;;  %v10885_v43 = vadd.f32 %v1787_v47, %v10670_v22 }
 0x4ac   :  { %v1124_v45 = vsub.f32 %v10706_v34, %v1100_v53  ;;  %v10892_v53 = vadd.f32 %v1443_v41, %v10714_v11 }
 0x4ad   :  { %14806 = vst [vmem:[#allocation23_spill] sm:$0xff] %v10885_v43 }
 0x4ae   :  { %v1147_v48 = vmul.f32 1.442695, %v1124_v45  ;;  %v1448_v60 = vpop.f32.mrf.mxu2 }
 0x4af   :  { %1475 = vmax.xlane.f32.xlu0 %v10875_v35  ;;  %v10906_v30 = vadd.f32 %v1448_v60, %v10737_v44 }
 0x4b0   :  { %8968 = vpow2.f32 %v1147_v48  ;;  %1173 = vadd.xlane.f32.xlu1 %v10877_v55  ;;  %v10898_v48 = vadd.f32 %v10820_v17, %v10681_v6 }
 0x4b1   :  { %14807 = vst [vmem:[#allocation24_spill] sm:$0xff] %v10906_v30 }
 0x4b3   :  { %v1102_v16 = vpop.xlane.xlu2 %1101 }
 0x4b4   :  { %v1125_v4 = vsub.f32 %v10717_v37, %v1102_v16  ;;  %v1098_v37 = vpop.xlane.xlu0 %1097 }
 0x4b5   :  { %v1123_v47 = vsub.f32 %v10695_v40, %v1098_v37 }
 0x4b6   :  { %v10882_v23 = vpop.eup %8968  ;;  %v1149_v34 = vmul.f32 1.442695, %v1125_v4  ;;  %v1450_v61 = vpop.f32.mrf.mxu2 }
 0x4b7   :  { %1179 = vadd.xlane.f32.xlu2 %v10882_v23 }
 0x4b8   :  { %8970 = vpow2.f32 %v1149_v34  ;;  %1825 = vmax.xlane.f32.xlu1 %v10885_v43  ;;  %v1145_v34 = vmul.f32 1.442695, %v1123_v47  ;;  %v10926_v43 = vadd.f32 %v1445_v54, %v10726_v24 }
 0x4bb   :  { %7737 = vmatmul.msk.bf16.gmra.mxu2 %vm987_vm4, %v10572_v14  ;;  %v1789_v14 = vpop.f32.mrf.mxu0  ;;  %v1104_v60 = vpop.xlane.xlu1 %1103 }
 0x4bc   :  { %v10909_v17 = vadd.f32 %v1789_v14, %v10681_v6 }
 0x4be   :  { %v10894_v45 = vpop.eup %8970  ;;  %v1453_v16 = vpop.f32.mrf.mxu2  ;;  %14808 = vst [vmem:[#allocation25_spill] sm:$0xff] %v10909_v17 }
 0x4bf   :  { %1479 = vmax.xlane.f32.xlu2 %v10892_v53  ;;  %1181 = vadd.xlane.f32.xlu0 %v10894_v45 }
 0x4c0   :  { %1473 = vmax.xlane.f32.xlu1 %v10898_v48 }
 0x4c3   :  { %v1106_v4 = vpop.xlane.xlu2 %1105 }
 0x4c4   :  { %v1127_v41 = vsub.f32 %v10740_v15, %v1106_v4 }
 0x4c6   :  { %v1153_v27 = vmul.f32 1.442695, %v1127_v41  ;;  %v1455_v37 = vpop.f32.mrf.mxu2 }
 0x4c7   :  { %1483 = vmax.xlane.f32.xlu0 %v10906_v30 }
 0x4c8   :  { %8972 = vpow2.f32 %v1153_v27  ;;  %1827 = vmax.xlane.f32.xlu1 %v10909_v17  ;;  %v1126_v27 = vsub.f32 %v10729_v21, %v1104_v60 }
 0x4c9   :  { %8974 = vpow2.f32 %v1145_v34 }
 0x4ca   :  { %v1151_v14 = vmul.f32 1.442695, %v1126_v27 }
 0x4cb   :  { %7738 = vmatmul.msk.bf16.gmra.mxu2 %vm987_vm4, %v10599_v56  ;;  %v1108_v40 = vpop.xlane.xlu0 %1107 }
 0x4cc   :  { %v1128_v15 = vsub.f32 %v10752_v46, %v1108_v40 }
 0x4ce   :  { %v10916_v47 = vpop.eup %8972  ;;  %v1155_v4 = vmul.f32 1.442695, %v1128_v15  ;;  %v1458_v56 = vpop.f32.mrf.mxu2 }
 0x4cf   :  { %v10918_v41 = vpop.eup %8974  ;;  %1185 = vadd.xlane.f32.xlu2 %v10916_v47 }
 0x4d0   :  { %8976 = vpow2.f32 %v1155_v4  ;;  %1177 = vadd.xlane.f32.xlu1 %v10918_v41  ;;  %v10932_v4 = vadd.f32 %v1455_v37, %v10774_v42  ;;  %v10945_v37 = vadd.f32 %v1450_v61, %v10749_v12  ;;  %v10958_v61 = vadd.f32 %v1453_v16, %v10762_v58 }
 0x4d1   :  { %8978 = vpow2.f32 %v1151_v14  ;;  %v10940_v14 = vadd.f32 %v1458_v56, %v10785_v9 }
 0x4d2   :  { %14809 = vst [vmem:[#allocation26_spill] sm:$0xff] %v10932_v4 }
 0x4d3   :  { %v1110_v46 = vpop.xlane.xlu1 %1109 }
 0x4d6   :  { %v10923_v34 = vpop.eup %8976  ;;  %v1460_v27 = vpop.f32.mrf.mxu2 }
 0x4d7   :  { %1187 = vadd.xlane.f32.xlu0 %v10923_v34  ;;  %v10934_v60 = vpop.eup %8978 }
 0x4d8   :  { %1481 = vmax.xlane.f32.xlu1 %v10926_v43 }
 0x4db   :  { %v1112_v40 = vpop.xlane.xlu0 %1111 }
 0x4dc   :  { %v1130_v15 = vsub.f32 %v10777_v50, %v1112_v40  ;;  %v1129_v40 = vsub.f32 %v10765_v10, %v1110_v46 }
 0x4de   :  { %v1159_v21 = vmul.f32 1.442695, %v1130_v15  ;;  %v2131_v15 = vpop.f32.mrf.mxu2 }
 0x4df   :  { %1489 = vmax.xlane.f32.xlu0 %v10932_v4  ;;  %v10953_v56 = vadd.f32 %v2131_v15, %v10610_v26 }
 0x4e0   :  { %8980 = vpow2.f32 %v1159_v21  ;;  %1183 = vadd.xlane.f32.xlu1 %v10934_v60  ;;  %v1157_v21 = vmul.f32 1.442695, %v1129_v40 }
 0x4e3   :  { %v1114_v54 = vpop.xlane.xlu1 %1113 }
 0x4e4   :  { %v1131_v1 = vsub.f32 %v10788_v8, %v1114_v54 }
 0x4e6   :  { %v10942_v44 = vpop.eup %8980  ;;  %v1161_v50 = vmul.f32 1.442695, %v1131_v1  ;;  %v2133_v40 = vpop.f32.mrf.mxu2 }
 0x4e7   :  { %1491 = vmax.xlane.f32.xlu0 %v10940_v14  ;;  %1191 = vadd.xlane.f32.xlu2 %v10942_v44 }
 0x4e8   :  { %8982 = vpow2.f32 %v1161_v50  ;;  %1485 = vmax.xlane.f32.xlu1 %v10945_v37 }
 0x4e9   :  { %8984 = vpow2.f32 %v1157_v21  ;;  %v10973_v21 = vadd.f32 %v1460_v27, %v10796_v0 }
 0x4eb   :  { %v1464_v8 = vpop.xlane.xlu1 %1463  ;;  %v1116_v26 = vpop.xlane.xlu2 %1115  ;;  %14810 = vst [vmem:[#allocation27_spill] sm:$0xff] %v10973_v21 }
 0x4ec   :  { %v1495_v9 = vsub.f32 %v10800_v39, %v1464_v8  ;;  %v1132_v16 = vsub.f32 %v10803_v63, %v1116_v26 }
 0x4ee   :  { %v10955_v1 = vpop.eup %8982  ;;  %v1511_v54 = vmul.f32 1.442695, %v1495_v9  ;;  %v1163_v8 = vmul.f32 1.442695, %v1132_v16  ;;  %v10976_v9 = vadd.f32 %v2133_v40, %v10625_v13  ;;  %v2136_v58 = vpop.f32.mrf.mxu2 }
 0x4ef   :  { %1193 = vadd.xlane.f32.xlu0 %v10955_v1  ;;  %2171 = vmax.xlane.f32.xlu2 %v10953_v56  ;;  %v10965_v39 = vpop.eup %8984 }
 0x4f0   :  { %1487 = vmax.xlane.f32.xlu1 %v10958_v61  ;;  %8986 = vpow2.f32 %v1511_v54 }
 0x4f3   :  { %v1166_v10 = vpop.xlane.xlu1 %1165  ;;  %v10963_v46 = vpop.xlane.xlu0 %1817 }
 0x4f4   :  { %8988 = vrcp.f32 %v1166_v10 }
 0x4f6   :  { %v10967_v50 = vpop.eup %8986 }
 0x4f7   :  { %1543 = vadd.xlane.f32.xlu0 %v10967_v50 }
 0x4f8   :  { %1189 = vadd.xlane.f32.xlu1 %v10965_v39 }
 0x4fa   :  { %v8989_v4 = vpop.eup %8988 }
 0x4fb   :  { %v1168_v15 = vpop.xlane.xlu1 %1167  ;;  %v1466_v54 = vpop.xlane.xlu0 %1465  ;;  %v1213_v0 = vmul.f32 %v8989_v4, %v10813_v33 }
 0x4fc   :  { %8990 = vrcp.f32 %v1168_v15  ;;  %v1496_v63 = vsub.f32 %v10823_v18, %v1466_v54 }
 0x4fd   :  { %8992 = vpow2.f32 %v1163_v8 }
 0x4fe   :  { %v1513_v13 = vmul.f32 1.442695, %v1496_v63 }
 0x4ff   :  { %2173 = vmax.xlane.f32.xlu0 %v10976_v9 }
 0x500   :  { %1493 = vmax.xlane.f32.xlu1 %v10973_v21  ;;  %8994 = vpow2.f32 %v1513_v13 }
 0x502   :  { %v8991_v10 = vpop.eup %8990 }
 0x503   :  { %v10981_v26 = vpop.xlane.xlu2 %1821  ;;  %v10983_v15 = vpop.xlane.xlu1 %1819  ;;  %v1214_v27 = vmul.f32 %v8991_v10, %v10818_v49 }
 0x504   :  { %v10987_v40 = vpop.eup %8992  ;;  %v1170_v10 = vpop.xlane.xlu0 %1169 }
 0x505   :  { %v1229_v16 = vpack.c.bf16 %v1214_v27, %v1213_v0  ;;  %v10997_v0 = vadd.f32 %v2136_v58, %v10642_v31 }
 0x506   :  { %v10991_v42 = vpop.eup %8994 }
 0x507   :  { %1293 = vmatmul.bf16.vlgmr.msrb.gmra.mxu1 %v1229_v16 }
 0x508   :  { %1195 = vadd.xlane.f32.xlu1 %v10987_v40 }
 0x50b   :  { %v1468_v8 = vpop.xlane.xlu1 %1467  ;;  %v1472_v54 = vpop.xlane.xlu2 %1471 }
 0x50c   :  { %v1497_v18 = vsub.f32 %v10841_v19, %v1468_v8  ;;  %v1499_v33 = vsub.f32 %v10844_v5, %v1472_v54  ;;  %v11003_v5 = vpop.f32.mrf.mxu2  ;;  %v11012_v8 = vpop.xlane.xlu0 %1823 }
 0x50e   :  { %v1515_v21 = vmul.f32 1.442695, %v1497_v18  ;;  %v1519_v4 = vmul.f32 1.442695, %v1499_v33 }
 0x510   :  { %1545 = vadd.xlane.f32.xlu1 %v10991_v42  ;;  %8996 = vpow2.f32 %v1515_v21  ;;  %v1792_v21 = vpop.f32.mrf.mxu0 }
 0x511   :  { %8998 = vpow2.f32 %v1519_v4  ;;  %v11010_v58 = vadd.f32 %v1792_v21, %v10692_v25 }
 0x513   :  { %v1470_v49 = vpop.xlane.xlu1 %1469  ;;  %v1478_v16 = vpop.xlane.xlu2 %1477 }
 0x514   :  { %v1498_v63 = vsub.f32 %v10860_v36, %v1470_v49  ;;  %v1502_v54 = vsub.f32 %v10857_v20, %v1478_v16  ;;  %v2141_v49 = vpop.f32.mrf.mxu2  ;;  %v1850_v20 = vsub.f32 %v10835_v57, %v10983_v15 }
 0x515   :  { %v11021_v17 = vadd.f32 %v2141_v49, %v10670_v22 }
 0x516   :  { %v1517_v27 = vmul.f32 1.442695, %v1498_v63  ;;  %v10999_v19 = vpop.eup %8996  ;;  %v1525_v21 = vmul.f32 1.442695, %v1502_v54 }
 0x517   :  { %1547 = vadd.xlane.f32.xlu0 %v10999_v19  ;;  %v11005_v36 = vpop.eup %8998 }
 0x518   :  { %2175 = vmax.xlane.f32.xlu1 %v10997_v0  ;;  %9000 = vpow2.f32 %v1517_v27  ;;  %14811 = vst [vmem:[#allocation28_spill] sm:$0xff] %v11005_v36  ;;  %v1794_v27 = vpop.f32.mrf.mxu0 }
 0x519   :  { %9002 = vrcp.f32 %v1170_v10 }
 0x51a   :  { %v1176_v30 = vpop.xlane.xlu0 %1175 }
 0x51b   :  { %v1172_v13 = vpop.xlane.xlu1 %1171 }
 0x51c   :  { %9004 = vrcp.f32 %v1172_v13 }
 0x51e   :  { %v11007_v31 = vpop.eup %9000 }
 0x51f   :  { %v9003_v18 = vpop.eup %9002  ;;  %1551 = vadd.xlane.f32.xlu0 %v11005_v36  ;;  %1549 = vadd.xlane.f32.xlu2 %v11007_v31  ;;  %v11024_v36 = vadd.f32 %v1794_v27, %v10703_v7 }
 0x520   :  { %1829 = vmax.xlane.f32.xlu1 %v11010_v58  ;;  %v1215_v63 = vmul.f32 %v9003_v18, %v10829_v2 }
 0x522   :  { %v9005_v33 = vpop.eup %9004 }
 0x523   :  { %v1174_v4 = vpop.xlane.xlu1 %1173  ;;  %v1216_v10 = vmul.f32 %v9005_v33, %v10867_v28  ;;  %v1867_v28 = vmul.f32 1.442695, %v1850_v20 }
 0x524   :  { %9006 = vrcp.f32 %v1174_v4 }
 0x525   :  { %v1230_v13 = vpack.c.bf16 %v1216_v10, %v1215_v63  ;;  %9008 = vpow2.f32 %v1525_v21 }
 0x526   :  { %9010 = vrcp.f32 %v1176_v30  ;;  %v11042_v30 = vpop.xlane.xlu0 %1475 }
 0x527   :  { %1298 = vmatmul.bf16.gmra.mxu1 %v1230_v13  ;;  %2179 = vmax.xlane.f32.xlu0 %v11021_v17  ;;  %9012 = vpow2.f32 %v1867_v28 }
 0x528   :  { %1831 = vmax.xlane.f32.xlu1 %v11024_v36 }
 0x52a   :  { %v9007_v22 = vpop.eup %9006  ;;  %v1180_v63 = vpop.xlane.xlu2 %1179 }
 0x52b   :  { %v11030_v2 = vpop.xlane.xlu1 %1825  ;;  %v11032_v16 = vpop.eup %9008  ;;  %v1217_v54 = vmul.f32 %v9007_v22, %v10877_v55  ;;  %9014 = vrcp.f32 %v1180_v63 }
 0x52c   :  { %v9011_v18 = vpop.eup %9010 }
 0x52d   :  { %v1218_v49 = vmul.f32 %v9011_v18, %v10865_v51  ;;  %v11037_v15 = vpop.eup %9012 }
 0x52f   :  { %1557 = vadd.xlane.f32.xlu0 %v11032_v16  ;;  %v1231_v57 = vpack.c.bf16 %v1218_v49, %v1217_v54 }
 0x531   :  { %v9015_v10 = vpop.eup %9014 }
 0x532   :  { %v1182_v55 = vpop.xlane.xlu0 %1181  ;;  %v1220_v20 = vmul.f32 %v9015_v10, %v10882_v23  ;;  %v1480_v63 = vpop.xlane.xlu2 %1479 }
 0x533   :  { %v1474_v33 = vpop.xlane.xlu1 %1473  ;;  %v2143_v23 = vpop.f32.mrf.mxu2 }
 0x537   :  { %1303 = vmatmul.bf16.gmra.mxu1 %v1231_v57  ;;  %1899 = vadd.xlane.f32.xlu0 %v11037_v15 }
 0x538   :  { %2327 = vrot.lane.b32.xlu2 %v10425_v62, %s9595_s26 }
 0x53a   :  { %v11051_v22 = vpop.xlane.xlu0 %1483 }
 0x53b   :  { %v11044_v4 = vpop.xlane.xlu1 %1827 }
 0x541   :  { %1975 = vrot.lane.b32.xlu1 %v10445_v29, %s9596_s27 }
 0x543   :  { %v1178_v51 = vpop.xlane.xlu1 %1177 }
 0x544   :  { %9016 = vrcp.f32 %v1178_v51 }
 0x54a   :  { %v9017_v27 = vpop.eup %9016  ;;  %v1188_v49 = vpop.xlane.xlu0 %1187 }
 0x54b   :  { %v1482_v21 = vpop.xlane.xlu1 %1481  ;;  %v1219_v13 = vmul.f32 %v9017_v27, %v10918_v41 }
 0x54c   :  { %v1504_v28 = vsub.f32 %v10926_v43, %v1482_v21  ;;  %v1500_v21 = vsub.f32 %v10898_v48, %v1474_v33 }
 0x54d   :  { %v1232_v18 = vpack.c.bf16 %v1220_v20, %v1219_v13  ;;  %v1186_v20 = vpop.xlane.xlu2 %1185 }
 0x54e   :  { %v1529_v54 = vmul.f32 1.442695, %v1504_v28 }
 0x54f   :  { %1308 = vmatmul.bf16.gmra.mxu1 %v1232_v18  ;;  %v1521_v18 = vmul.f32 1.442695, %v1500_v21 }
 0x550   :  { %9018 = vpow2.f32 %v1529_v54  ;;  %v1503_v54 = vsub.f32 %v10892_v53, %v1480_v63 }
 0x551   :  { %9020 = vrcp.f32 %v1182_v55  ;;  %v11061_v55 = vadd.f32 %v11003_v5, %v10657_v32 }
 0x552   :  { %v11063_v28 = vpop.xlane.xlu0 %1489 }
 0x553   :  { %v1184_v29 = vpop.xlane.xlu1 %1183 }
 0x554   :  { %9022 = vrcp.f32 %v1184_v29  ;;  %v1527_v29 = vmul.f32 1.442695, %v1503_v54 }
 0x555   :  { %9024 = vrcp.f32 %v1188_v49  ;;  %v1849_v49 = vsub.f32 %v10811_v38, %v10963_v46 }
 0x556   :  { %v11053_v57 = vpop.eup %9018  ;;  %9026 = vrcp.f32 %v1186_v20 }
 0x557   :  { %1561 = vadd.xlane.f32.xlu0 %v11053_v57  ;;  %v9021_v41 = vpop.eup %9020  ;;  %9028 = vpow2.f32 %v1521_v18 }
 0x558   :  { %v1221_v43 = vmul.f32 %v9021_v41, %v10894_v45 }
 0x55a   :  { %v9023_v51 = vpop.eup %9022  ;;  %v1192_v46 = vpop.xlane.xlu2 %1191 }
 0x55b   :  { %v1486_v10 = vpop.xlane.xlu1 %1485  ;;  %v1222_v27 = vmul.f32 %v9023_v51, %v10934_v60  ;;  %v2146_v60 = vpop.f32.mrf.mxu2 }
 0x55c   :  { %v9025_v33 = vpop.eup %9024  ;;  %v11069_v5 = vadd.f32 %v2146_v60, %v10692_v25  ;;  %v11073_v51 = vpop.xlane.xlu0 %1491  ;;  %v1865_v25 = vmul.f32 1.442695, %v1849_v49 }
 0x55d   :  { %v1233_v13 = vpack.c.bf16 %v1222_v27, %v1221_v43  ;;  %v9027_v41 = vpop.eup %9026  ;;  %v1224_v53 = vmul.f32 %v9025_v33, %v10923_v34  ;;  %v1501_v27 = vsub.f32 %v10875_v35, %v11042_v30  ;;  %v1506_v35 = vsub.f32 %v10945_v37, %v1486_v10 }
 0x55e   :  { %v1223_v43 = vmul.f32 %v9027_v41, %v10916_v47  ;;  %v11090_v47 = vadd.f32 %v2143_v23, %v10681_v6 }
 0x55f   :  { %1313 = vmatmul.bf16.gmra.mxu1 %v1233_v13  ;;  %v1523_v20 = vmul.f32 1.442695, %v1501_v27 }
 0x560   :  { %v1234_v21 = vpack.c.bf16 %v1224_v53, %v1223_v43 }
 0x561   :  { %2177 = vmax.xlane.f32.xlu2 %v11061_v55 }
 0x563   :  { %v1488_v45 = vpop.xlane.xlu1 %1487  ;;  %v2148_v13 = vpop.f32.mrf.mxu2 }
 0x564   :  { %v1507_v48 = vsub.f32 %v10958_v61, %v1488_v45  ;;  %v11077_v61 = vpop.eup %9028  ;;  %v1194_v30 = vpop.xlane.xlu0 %1193  ;;  %v1533_v45 = vmul.f32 1.442695, %v1506_v35 }
 0x566   :  { %v1535_v32 = vmul.f32 1.442695, %v1507_v48 }
 0x568   :  { %9030 = vpow2.f32 %v1535_v32 }
 0x569   :  { %2183 = vmax.xlane.f32.xlu2 %v11069_v5  ;;  %9032 = vpow2.f32 %v1527_v29 }
 0x56b   :  { %v1190_v63 = vpop.xlane.xlu1 %1189  ;;  %1553 = vadd.xlane.f32.xlu1 %v11077_v61  ;;  %v11100_v6 = vpop.f32.mrf.mxu2 }
 0x56c   :  { %9034 = vrcp.f32 %v1190_v63  ;;  %v1544_v29 = vpop.xlane.xlu0 %1543 }
 0x56d   :  { %9036 = vpow2.f32 %v1865_v25 }
 0x56e   :  { %v11083_v38 = vpop.eup %9030  ;;  %9038 = vrcp.f32 %v1192_v46  ;;  %v1797_v46 = vpop.f32.mrf.mxu0 }
 0x56f   :  { %1567 = vadd.xlane.f32.xlu0 %v11083_v38  ;;  %1318 = vmatmul.bf16.gmra.mxu1 %v1234_v21  ;;  %v11086_v34 = vpop.eup %9032  ;;  %9040 = vpow2.f32 %v1523_v20 }
 0x570   :  { %9042 = vpow2.f32 %v1533_v45  ;;  %v11124_v45 = vadd.f32 %v1797_v46, %v10714_v11 }
 0x571   :  { %1559 = vadd.xlane.f32.xlu2 %v11086_v34 }
 0x572   :  { %v9035_v54 = vpop.eup %9034 }
 0x573   :  { %v11093_v18 = vpop.xlane.xlu1 %1493  ;;  %2181 = vmax.xlane.f32.xlu1 %v11090_v47  ;;  %v11096_v60 = vpop.eup %9036  ;;  %v1225_v33 = vmul.f32 %v9035_v54, %v10965_v39  ;;  %v11110_v39 = vadd.f32 %v2148_v13, %v10703_v7 }
 0x574   :  { %v9039_v48 = vpop.eup %9038  ;;  %v2174_v25 = vpop.xlane.xlu0 %2173 }
 0x575   :  { %v11102_v23 = vpop.eup %9040  ;;  %v1226_v10 = vmul.f32 %v9039_v48, %v10942_v44  ;;  %v2153_v44 = vpop.f32.mrf.mxu2 }
 0x576   :  { %v11106_v41 = vpop.eup %9042  ;;  %v11116_v43 = vadd.f32 %v2153_v44, %v10726_v24  ;;  %v2172_v13 = vpop.xlane.xlu2 %2171 }
 0x577   :  { %v1235_v32 = vpack.c.bf16 %v1226_v10, %v1225_v33 }
 0x579   :  { %1897 = vadd.xlane.f32.xlu2 %v11096_v60 }
 0x57b   :  { %v1196_v37 = vpop.xlane.xlu1 %1195  ;;  %1555 = vadd.xlane.f32.xlu1 %v11102_v23 }
 0x57c   :  { %9044 = vrcp.f32 %v1196_v37 }
 0x57d   :  { %9046 = vrcp.f32 %v1194_v30 }
 0x57e   :  { %9048 = vrcp.f32 %v1544_v29 }
 0x57f   :  { %1323 = vmatmul.bf16.gmra.mxu1 %v1235_v32  ;;  %v1852_v32 = vsub.f32 %v10847_v59, %v11012_v8 }
 0x581   :  { %1565 = vadd.xlane.f32.xlu2 %v11106_v41  ;;  %v1871_v44 = vmul.f32 1.442695, %v1852_v32 }
 0x582   :  { %v9045_v53 = vpop.eup %9044 }
 0x583   :  { %1973 = vrot.lane.b32.xlu0 %v10425_v62, %s9596_s27  ;;  %v1546_v49 = vpop.xlane.xlu1 %1545  ;;  %2185 = vmax.xlane.f32.xlu1 %v11110_v39  ;;  %v9047_v63 = vpop.eup %9046  ;;  %v1228_v7 = vmul.f32 %v9045_v53, %v10987_v40  ;;  %v1851_v40 = vsub.f32 %v10832_v3, %v10981_v26  ;;  %v1509_v53 = vsub.f32 %v10940_v14, %v11073_v51 }
 0x584   :  { %9050 = vrcp.f32 %v1546_v49  ;;  %v9049_v27 = vpop.eup %9048  ;;  %v1227_v35 = vmul.f32 %v9047_v63, %v10955_v1  ;;  %v2204_v51 = vsub.f32 %v10976_v9, %v2174_v25  ;;  %v14812_v25 = vld [vmem:[#allocation24_spill] sm:$0xff] }
 0x585   :  { %v1591_v62 = vmul.f32 %v9049_v27, %v10967_v50  ;;  %v1799_v50 = vpop.f32.mrf.mxu0  ;;  %v1539_v59 = vmul.f32 1.442695, %v1509_v53 }
 0x586   :  { %v1236_v30 = vpack.c.bf16 %v1228_v7, %v1227_v35  ;;  %v11130_v1 = vadd.f32 %v1799_v50, %v10726_v24  ;;  %v2156_v7 = vpop.f32.mrf.mxu2  ;;  %v14813_v50 = vld [vmem:[#allocation25_spill] sm:$0xff] }
 0x589   :  { %2189 = vmax.xlane.f32.xlu2 %v11116_v43 }
 0x58a   :  { %v9051_v21 = vpop.eup %9050  ;;  %v1548_v48 = vpop.xlane.xlu0 %1547 }
 0x58b   :  { %v1592_v20 = vmul.f32 %v9051_v21, %v10991_v42  ;;  %9052 = vrcp.f32 %v1548_v48  ;;  %v1869_v42 = vmul.f32 1.442695, %v1851_v40  ;;  %v2176_v10 = vpop.xlane.xlu1 %2175  ;;  %v1505_v48 = vsub.f32 %v14812_v25, %v11051_v22 }
 0x58d   :  { %v1607_v54 = vpack.c.bf16 %v1592_v20, %v1591_v62  ;;  %v11160_v62 = vadd.f32 %v11100_v6, %v10714_v11  ;;  %v1531_v11 = vmul.f32 1.442695, %v1505_v48 }
 0x58e   :  { %v2158_v20 = vpop.f32.mrf.mxu2 }
 0x58f   :  { %1328 = vmatmul.bf16.gmra.mxu1 %v1236_v30  ;;  %1647 = vmatmul.bf16.vlgmr.msra.gmra.mxu3 %v1607_v54  ;;  %v1802_v30 = vpop.f32.mrf.mxu0  ;;  %v11164_v9 = vadd.f32 %v2158_v20, %v10749_v12 }
 0x591   :  { %1833 = vmax.xlane.f32.xlu2 %v11124_v45  ;;  %v9053_v37 = vpop.eup %9052 }
 0x592   :  { %v1550_v33 = vpop.xlane.xlu2 %1549  ;;  %v1593_v3 = vmul.f32 %v9053_v37, %v10999_v19  ;;  %v2203_v19 = vsub.f32 %v10953_v56, %v2172_v13  ;;  %v2221_v56 = vmul.f32 1.442695, %v2204_v51  ;;  %v2205_v13 = vsub.f32 %v10997_v0, %v2176_v10  ;;  %v1552_v6 = vpop.xlane.xlu0 %1551  ;;  %v14814_v37 = vld [vmem:[#allocation20_spill] sm:$0xff] }
 0x593   :  { %9054 = vrcp.f32 %v1550_v33  ;;  %v1830_v8 = vpop.xlane.xlu1 %1829  ;;  %v11178_v22 = vadd.f32 %v2156_v7, %v14814_v37  ;;  %v11184_v32 = vadd.f32 %v1802_v30, %v14814_v37 }
 0x594   :  { %9056 = vpow2.f32 %v1869_v42  ;;  %v2223_v54 = vmul.f32 1.442695, %v2205_v13  ;;  %v1854_v42 = vsub.f32 %v14813_v50, %v11044_v4 }
 0x595   :  { %9058 = vpow2.f32 %v1871_v44 }
 0x596   :  { %9060 = vpow2.f32 %v1539_v59  ;;  %v2161_v44 = vpop.f32.mrf.mxu2  ;;  %v14815_v59 = vld [vmem:[#allocation21_spill] sm:$0xff] }
 0x597   :  { %v1804_v33 = vpop.f32.mrf.mxu0 }
 0x598   :  { %v11191_v4 = vadd.f32 %v1804_v33, %v10749_v12  ;;  %v1855_v12 = vsub.f32 %v11010_v58, %v1830_v8  ;;  %v14817_v8 = vld [vmem:[#allocation19_spill] sm:$0xff] }
 0x599   :  { %1835 = vmax.xlane.f32.xlu2 %v11130_v1  ;;  %v9055_v29 = vpop.eup %9054 }
 0x59a   :  { %v2328_v49 = vpop.permute.xlu2 %2327  ;;  %v1594_v26 = vmul.f32 %v9055_v29, %v11007_v31  ;;  %v11141_v63 = vpop.eup %9056  ;;  %v2219_v31 = vmul.f32 1.442695, %v2203_v19  ;;  %v1875_v29 = vmul.f32 1.442695, %v1854_v42  ;;  %v11199_v19 = vadd.f32 %v2161_v44, %v14815_v59 }
 0x59b   :  { %2352 = vmatpush.bf16.msrb.mxu3 %v2328_v49  ;;  %v11145_v27 = vpop.eup %9058  ;;  %v11150_v14 = vpop.xlane.xlu1 %1831  ;;  %v1877_v13 = vmul.f32 1.442695, %v1855_v12  ;;  %v9564_v12 = vld [vmem:[%s14692_s3 + $0x70] sm:$0xff] }
 0x59c   :  { %2325 = vrot.lane.b32.xlu1 %v10399_v52, %s9595_s26  ;;  %v1608_v24 = vpack.c.bf16 %v1594_v26, %v1593_v3  ;;  %9062 = vpow2.f32 %v2219_v31  ;;  %v11148_v21 = vpop.eup %9060  ;;  %v2180_v49 = vpop.xlane.xlu0 %2179 }
 0x59d   :  { %9064 = vpow2.f32 %v2221_v56  ;;  %v2207_v26 = vsub.f32 %v11021_v17, %v2180_v49  ;;  %v14816_v56 = vld [vmem:[#allocation22_spill] sm:$0xff] }
 0x59e   :  { %9066 = vpow2.f32 %v2223_v54  ;;  %v11217_v48 = vpop.f32.mrf.mxu2 }
 0x59f   :  { %1652 = vmatmul.bf16.gmra.mxu3 %v1608_v24  ;;  %9068 = vpow2.f32 %v1531_v11  ;;  %v11188_v3 = vpop.f32.mrf.mxu0  ;;  %v2227_v53 = vmul.f32 1.442695, %v2207_v26 }
 0x5a0   :  { %9070 = vpow2.f32 %v1875_v29  ;;  %v14818_v29 = vld [vmem:[#allocation28_spill] sm:$0xff] }
 0x5a1   :  { %1901 = vadd.xlane.f32.xlu2 %v11141_v63  ;;  %9072 = vpow2.f32 %v2227_v53 }
 0x5a2   :  { %v11154_v46 = vpop.eup %9062  ;;  %9074 = vrcp.f32 %v1552_v6 }
 0x5a3   :  { %v11169_v0 = vpop.eup %9064  ;;  %9076 = vpow2.f32 %v1877_v13 }
 0x5a4   :  { %v11172_v40 = vpop.eup %9066  ;;  %v1558_v31 = vpop.xlane.xlu0 %1557 }
 0x5a5   :  { %v11181_v10 = vpop.eup %9068 }
 0x5a6   :  { %v11195_v24 = vpop.eup %9070  ;;  %v2166_v53 = vpop.f32.mrf.mxu2 }
 0x5a7   :  { %v1809_v7 = vpop.f32.mrf.mxu0  ;;  %v11209_v20 = vpop.eup %9072 }
 0x5a8   :  { %v11206_v17 = vadd.f32 %v1809_v7, %v14816_v56  ;;  %v9075_v11 = vpop.eup %9074  ;;  %v11238_v56 = vadd.f32 %v9564_v12, %v2166_v53 }
 0x5a9   :  { %1903 = vadd.xlane.f32.xlu2 %v11145_v27  ;;  %v11219_v33 = vpop.eup %9076  ;;  %v1595_v49 = vmul.f32 %v9075_v11, %v14818_v29 }
 0x5ac   :  { %v11211_v30 = vpop.xlane.xlu0 %1899 }
 0x5ad   :  { %1571 = vadd.xlane.f32.xlu0 %v11148_v21 }
 0x5b1   :  { %2251 = vadd.xlane.f32.xlu2 %v11154_v46 }
 0x5b3   :  { %v1976_v35 = vpop.permute.xlu1 %1975 }
 0x5b4   :  { %1997 = vmatpush.bf16.msra.mxu1 %v1976_v35 }
 0x5b5   :  { %2187 = vmax.xlane.f32.xlu0 %v11160_v62 }
 0x5b9   :  { %2193 = vmax.xlane.f32.xlu2 %v11164_v9 }
 0x5bd   :  { %2253 = vadd.xlane.f32.xlu0 %v11169_v0 }
 0x5c1   :  { %2255 = vadd.xlane.f32.xlu2 %v11172_v40 }
 0x5c5   :  { %2191 = vmax.xlane.f32.xlu0 %v11178_v22 }
 0x5c6   :  { %1563 = vadd.xlane.f32.xlu1 %v11181_v10 }
 0x5c9   :  { %1837 = vmax.xlane.f32.xlu2 %v11184_v32 }
 0x5ca   :  { %v1562_v50 = vpop.xlane.xlu0 %1561 }
 0x5cd   :  { %1839 = vmax.xlane.f32.xlu0 %v11191_v4 }
 0x5d1   :  { %1907 = vadd.xlane.f32.xlu2 %v11195_v24 }
 0x5d4   :  { %v11201_v51 = vpop.xlane.xlu2 %2177 }
 0x5d5   :  { %2195 = vmax.xlane.f32.xlu0 %v11199_v19 }
 0x5d9   :  { %1843 = vmax.xlane.f32.xlu2 %v11206_v17 }
 0x5dc   :  { %v2184_v35 = vpop.xlane.xlu2 %2183 }
 0x5dd   :  { %v2209_v54 = vsub.f32 %v11069_v5, %v2184_v35  ;;  %2259 = vadd.xlane.f32.xlu0 %v11209_v20 }
 0x5de   :  { %v1554_v58 = vpop.xlane.xlu1 %1553 }
 0x5df   :  { %v2231_v25 = vmul.f32 1.442695, %v2209_v54  ;;  %9078 = vrcp.f32 %v1554_v58  ;;  %2323 = vrot.lane.b32.xlu1 %v14817_v8, %s9595_s26 }
 0x5e1   :  { %9080 = vpow2.f32 %v2231_v25 }
 0x5e2   :  { %v11233_v7 = vpop.xlane.xlu0 %1567  ;;  %9082 = vrcp.f32 %v1558_v31 }
 0x5e4   :  { %v1560_v6 = vpop.xlane.xlu2 %1559 }
 0x5e5   :  { %1909 = vadd.xlane.f32.xlu0 %v11219_v33  ;;  %v9079_v5 = vpop.eup %9078 }
 0x5e6   :  { %v11224_v37 = vpop.xlane.xlu1 %2181  ;;  %v1596_v26 = vmul.f32 %v9079_v5, %v11077_v61 }
 0x5e7   :  { %v11222_v42 = vpop.eup %9080  ;;  %1971 = vrot.lane.b32.xlu1 %v10399_v52, %s9596_s27 }
 0x5e8   :  { %2263 = vadd.xlane.f32.xlu2 %v11222_v42  ;;  %v1609_v44 = vpack.c.bf16 %v1596_v26, %v1595_v49  ;;  %v9083_v13 = vpop.eup %9082 }
 0x5e9   :  { %v1598_v11 = vmul.f32 %v9083_v13, %v11032_v16 }
 0x5ea   :  { %1657 = vmatmul.bf16.gmra.mxu3 %v1609_v44 }
 0x5ec   :  { %v11231_v59 = vpop.xlane.xlu2 %1897 }
 0x5ee   :  { %v1556_v61 = vpop.xlane.xlu1 %1555 }
 0x5ef   :  { %9084 = vrcp.f32 %v1556_v61 }
 0x5f0   :  { %2199 = vmax.xlane.f32.xlu2 %v11238_v56  ;;  %9086 = vrcp.f32 %v1560_v6 }
 0x5f4   :  { %v11241_v52 = vpop.xlane.xlu2 %1565 }
 0x5f5   :  { %v1974_v35 = vpop.permute.xlu0 %1973  ;;  %v9085_v54 = vpop.eup %9084 }
 0x5f6   :  { %1998 = vmatpush.bf16.msra.mxu1 %v1974_v35  ;;  %v2186_v25 = vpop.xlane.xlu1 %2185  ;;  %v1597_v58 = vmul.f32 %v9085_v54, %v11102_v23  ;;  %v9087_v53 = vpop.eup %9086  ;;  %v14819_v23 = vld [vmem:[#allocation26_spill] sm:$0xff] }
 0x5f7   :  { %v2210_v5 = vsub.f32 %v11110_v39, %v2186_v25  ;;  %v1508_v35 = vsub.f32 %v14819_v23, %v11063_v28  ;;  %v1599_v13 = vmul.f32 %v9087_v53, %v11086_v34  ;;  %v2168_v54 = vpop.f32.mrf.mxu2  ;;  %v11261_v28 = vld [vmem:[%s14692_s3 + $0x78] sm:$0xff]  ;;  %v14820_v34 = vld [vmem:[#allocation27_spill] sm:$0xff] }
 0x5f8   :  { %v1610_v29 = vpack.c.bf16 %v1598_v11, %v1597_v58  ;;  %v11264_v11 = vadd.f32 %v11261_v28, %v2168_v54 }
 0x5f9   :  { %v2233_v49 = vmul.f32 1.442695, %v2210_v5  ;;  %v1510_v5 = vsub.f32 %v14820_v34, %v11093_v18 }
 0x5fa   :  { %1662 = vmatmul.bf16.gmra.mxu3 %v1610_v29 }
 0x5fb   :  { %9088 = vpow2.f32 %v2233_v49  ;;  %v1812_v49 = vpop.f32.mrf.mxu0 }
 0x5fc   :  { %v2190_v31 = vpop.xlane.xlu2 %2189  ;;  %9090 = vrcp.f32 %v1562_v50 }
 0x5fd   :  { %v2212_v26 = vsub.f32 %v11116_v43, %v2190_v31  ;;  %v1537_v43 = vmul.f32 1.442695, %v1508_v35  ;;  %v11275_v35 = vadd.f32 %v9564_v12, %v1812_v49 }
 0x5ff   :  { %v2237_v44 = vmul.f32 1.442695, %v2212_v26  ;;  %v1541_v26 = vmul.f32 1.442695, %v1510_v5 }
 0x601   :  { %9092 = vpow2.f32 %v2237_v44  ;;  %v11247_v61 = vpop.eup %9088 }
 0x602   :  { %2265 = vadd.xlane.f32.xlu0 %v11247_v61  ;;  %v9091_v16 = vpop.eup %9090 }
 0x603   :  { %v1600_v58 = vmul.f32 %v9091_v16, %v11053_v57 }
 0x604   :  { %v1834_v39 = vpop.xlane.xlu2 %1833 }
 0x605   :  { %v1857_v6 = vsub.f32 %v11124_v45, %v1834_v39  ;;  %v1611_v45 = vpack.c.bf16 %v1600_v58, %v1599_v13 }
 0x607   :  { %v11254_v25 = vpop.eup %9092  ;;  %v1881_v50 = vmul.f32 1.442695, %v1857_v6 }
 0x608   :  { %2269 = vadd.xlane.f32.xlu2 %v11254_v25 }
 0x609   :  { %9094 = vpow2.f32 %v1881_v50 }
 0x60a   :  { %9096 = vpow2.f32 %v1537_v43  ;;  %2201 = vmax.xlane.f32.xlu0 %v11264_v11  ;;  %1667 = vmatmul.bf16.gmra.mxu3 %v1611_v45 }
 0x60b   :  { %9098 = vpow2.f32 %v1541_v26 }
 0x60c   :  { %v1836_v57 = vpop.xlane.xlu2 %1835 }
 0x60d   :  { %v1858_v29 = vsub.f32 %v11130_v1, %v1836_v57 }
 0x60e   :  { %v2326_v44 = vpop.permute.xlu1 %2325 }
 0x60f   :  { %v11270_v31 = vpop.eup %9094  ;;  %v1883_v53 = vmul.f32 1.442695, %v1858_v29  ;;  %2353 = vmatpush.bf16.msrb.mxu3 %v2326_v44 }
 0x610   :  { %1913 = vadd.xlane.f32.xlu2 %v11270_v31  ;;  %v11273_v23 = vpop.eup %9096 }
 0x611   :  { %1569 = vadd.xlane.f32.xlu1 %v11273_v23  ;;  %9100 = vpow2.f32 %v1883_v53  ;;  %v11281_v1 = vpop.eup %9098 }
 0x612   :  { %1845 = vmax.xlane.f32.xlu0 %v11275_v35 }
 0x614   :  { %v11279_v18 = vpop.xlane.xlu2 %1901 }
 0x617   :  { %v11283_v16 = vpop.eup %9100 }
 0x619   :  { %1573 = vadd.xlane.f32.xlu1 %v11281_v1 }
 0x61a   :  { %1915 = vadd.xlane.f32.xlu0 %v11283_v16 }
 0x61c   :  { %v11287_v39 = vpop.xlane.xlu2 %1903 }
 0x620   :  { %v11289_v12 = vpop.xlane.xlu0 %1571 }
 0x624   :  { %v11291_v6 = vpop.xlane.xlu2 %2251 }
 0x628   :  { %v11293_v13 = vpop.xlane.xlu0 %2187 }
 0x62c   :  { %v2194_v54 = vpop.xlane.xlu2 %2193 }
 0x62d   :  { %v2214_v43 = vsub.f32 %v11164_v9, %v2194_v54 }
 0x62f   :  { %v2241_v50 = vmul.f32 1.442695, %v2214_v43 }
 0x630   :  { %v11296_v58 = vpop.xlane.xlu0 %2253 }
 0x631   :  { %9102 = vpow2.f32 %v2241_v50 }
 0x632   :  { %1969 = vrot.lane.b32.xlu1 %v14817_v8, %s9596_s27  ;;  %9104 = vrcp.f32 %v11241_v52 }
 0x634   :  { %v11300_v45 = vpop.xlane.xlu2 %2255 }
 0x637   :  { %v11302_v34 = vpop.eup %9102 }
 0x638   :  { %2273 = vadd.xlane.f32.xlu2 %v11302_v34  ;;  %v11305_v5 = vpop.xlane.xlu0 %2191  ;;  %v9105_v49 = vpop.eup %9104 }
 0x639   :  { %v1564_v57 = vpop.xlane.xlu1 %1563  ;;  %v1602_v54 = vmul.f32 %v9105_v49, %v11106_v41 }
 0x63a   :  { %9106 = vrcp.f32 %v1564_v57 }
 0x63c   :  { %v1838_v9 = vpop.xlane.xlu2 %1837 }
 0x63d   :  { %v1859_v29 = vsub.f32 %v11184_v32, %v1838_v9 }
 0x63f   :  { %v1885_v26 = vmul.f32 1.442695, %v1859_v29 }
 0x640   :  { %v11309_v44 = vpop.xlane.xlu0 %1839  ;;  %v9107_v8 = vpop.eup %9106 }
 0x641   :  { %9108 = vpow2.f32 %v1885_v26  ;;  %v1601_v53 = vmul.f32 %v9107_v8, %v11181_v10  ;;  %v2206_v10 = vsub.f32 %v11061_v55, %v11201_v51  ;;  %v2208_v55 = vsub.f32 %v11090_v47, %v11224_v37 }
 0x642   :  { %v1856_v37 = vsub.f32 %v11024_v36, %v11150_v14 }
 0x643   :  { %v1612_v50 = vpack.c.bf16 %v1602_v54, %v1601_v53  ;;  %v2225_v49 = vmul.f32 1.442695, %v2206_v10  ;;  %v14821_v54 = vld [vmem:[#allocation23_spill] sm:$0xff]  ;;  %v2229_v51 = vmul.f32 1.442695, %v2208_v55 }
 0x644   :  { %v11313_v43 = vpop.xlane.xlu2 %1907  ;;  %v9566_v10 = vld [vmem:[%s14692_s3 + $0x68] sm:$0xff] }
 0x645   :  { %1672 = vmatmul.bf16.gmra.mxu3 %v1612_v50  ;;  %v11349_v47 = vadd.f32 %v9566_v10, %v11217_v48 }
 0x647   :  { %v11315_v52 = vpop.eup %9108 }
 0x648   :  { %1917 = vadd.xlane.f32.xlu0 %v11315_v52  ;;  %v2196_v57 = vpop.xlane.xlu0 %2195 }
 0x649   :  { %v2215_v32 = vsub.f32 %v11199_v19, %v2196_v57  ;;  %v1853_v19 = vsub.f32 %v14821_v54, %v11030_v2 }
 0x64b   :  { %v2243_v9 = vmul.f32 1.442695, %v2215_v32  ;;  %v1873_v50 = vmul.f32 1.442695, %v1853_v19  ;;  %v2211_v19 = vsub.f32 %v11160_v62, %v11293_v13 }
 0x64c   :  { %v1844_v29 = vpop.xlane.xlu2 %1843 }
 0x64d   :  { %9110 = vpow2.f32 %v2243_v9  ;;  %v1862_v26 = vsub.f32 %v11206_v17, %v1844_v29 }
 0x64f   :  { %v1891_v41 = vmul.f32 1.442695, %v1862_v26 }
 0x650   :  { %v11337_v2 = vpop.xlane.xlu0 %2259 }
 0x651   :  { %v2324_v8 = vpop.permute.xlu1 %2323  ;;  %9112 = vpow2.f32 %v1891_v41 }
 0x652   :  { %2354 = vmatpush.bf16.msrb.mxu3 %v2324_v8  ;;  %9114 = vpow2.f32 %v2225_v49  ;;  %v1879_v49 = vmul.f32 1.442695, %v1856_v37  ;;  %v9567_v8 = vld [vmem:[%s14692_s3 + $0x60] sm:$0xff] }
 0x653   :  { %v11322_v53 = vpop.eup %9110  ;;  %9116 = vpow2.f32 %v1873_v50  ;;  %v11360_v54 = vadd.f32 %v9567_v8, %v11188_v3  ;;  %v2235_v50 = vmul.f32 1.442695, %v2211_v19 }
 0x654   :  { %2275 = vadd.xlane.f32.xlu2 %v11322_v53  ;;  %9118 = vpow2.f32 %v2229_v51  ;;  %v11374_v51 = vpop.f32.mrf.mxu1 }
 0x655   :  { %9120 = vpow2.f32 %v1879_v49  ;;  %v2213_v49 = vsub.f32 %v11178_v22, %v11305_v5  ;;  %v1860_v22 = vsub.f32 %v11191_v4, %v11309_v44 }
 0x656   :  { %9122 = vrcp.f32 %v11233_v7 }
 0x657   :  { %v11327_v32 = vpop.eup %9112  ;;  %9124 = vpow2.f32 %v2235_v50 }
 0x658   :  { %v11329_v17 = vpop.eup %9114  ;;  %v11343_v26 = vpop.xlane.xlu0 %1909 }
 0x659   :  { %v1972_v57 = vpop.permute.xlu1 %1971  ;;  %v11335_v9 = vpop.eup %9116 }
 0x65a   :  { %1999 = vmatpush.bf16.msra.mxu1 %v1972_v57  ;;  %v11340_v29 = vpop.eup %9118 }
 0x65b   :  { %v11367_v36 = vpop.eup %9120 }
 0x65c   :  { %1923 = vadd.xlane.f32.xlu2 %v11327_v32  ;;  %2257 = vadd.xlane.f32.xlu1 %v11329_v17  ;;  %v9123_v62 = vpop.eup %9122 }
 0x65d   :  { %v11372_v13 = vpop.eup %9124  ;;  %v1603_v7 = vmul.f32 %v9123_v62, %v11083_v38  ;;  %v11388_v38 = vpop.f32.mrf.mxu1 }
 0x664   :  { %1905 = vadd.xlane.f32.xlu1 %v11335_v9 }
 0x66c   :  { %2261 = vadd.xlane.f32.xlu1 %v11340_v29 }
 0x674   :  { %2197 = vmax.xlane.f32.xlu1 %v11349_v47 }
 0x675   :  { %v11354_v41 = vpop.xlane.xlu0 %2265 }
 0x67c   :  { %1841 = vmax.xlane.f32.xlu1 %v11360_v54 }
 0x67d   :  { %v11365_v48 = vpop.xlane.xlu0 %2201 }
 0x684   :  { %1911 = vadd.xlane.f32.xlu1 %v11367_v36  ;;  %v1570_v14 = vpop.xlane.xlu1 %1569 }
 0x685   :  { %9126 = vrcp.f32 %v1570_v14  ;;  %v1846_v3 = vpop.xlane.xlu0 %1845  ;;  %v2239_v14 = vmul.f32 1.442695, %v2213_v49 }
 0x686   :  { %v1863_v57 = vsub.f32 %v11275_v35, %v1846_v3  ;;  %v1814_v35 = vpop.f32.mrf.mxu0 }
 0x687   :  { %v11385_v3 = vadd.f32 %v11261_v28, %v1814_v35  ;;  %v11398_v28 = vpop.f32.mrf.mxu1 }
 0x688   :  { %v1893_v55 = vmul.f32 1.442695, %v1863_v57  ;;  %v1887_v57 = vmul.f32 1.442695, %v1860_v22 }
 0x68a   :  { %9128 = vpow2.f32 %v1893_v55 }
 0x68b   :  { %v9127_v10 = vpop.eup %9126 }
 0x68c   :  { %2267 = vadd.xlane.f32.xlu1 %v11372_v13  ;;  %v1604_v37 = vmul.f32 %v9127_v10, %v11273_v23  ;;  %v1574_v8 = vpop.xlane.xlu1 %1573 }
 0x68d   :  { %9130 = vrcp.f32 %v1574_v8 }
 0x68e   :  { %v1613_v19 = vpack.c.bf16 %v1604_v37, %v1603_v7  ;;  %9132 = vrcp.f32 %v11289_v12  ;;  %v11402_v7 = vpop.f32.mrf.mxu3 }
 0x68f   :  { %9134 = vpow2.f32 %v2239_v14 }
 0x690   :  { %v11381_v50 = vpop.eup %9128  ;;  %1677 = vmatmul.bf16.gmra.mxu3 %v1613_v19  ;;  %9136 = vrcp.f32 %v11231_v59 }
 0x691   :  { %1925 = vadd.xlane.f32.xlu2 %v11381_v50  ;;  %9138 = vrcp.f32 %v11211_v30 }
 0x692   :  { %9140 = vpow2.f32 %v1887_v57 }
 0x693   :  { %v9131_v23 = vpop.eup %9130  ;;  %9142 = vrcp.f32 %v11296_v58 }
 0x694   :  { %1847 = vmax.xlane.f32.xlu1 %v11385_v3  ;;  %v9133_v5 = vpop.eup %9132  ;;  %v1606_v55 = vmul.f32 %v9131_v23, %v11281_v1  ;;  %9144 = vrcp.f32 %v11291_v6 }
 0x695   :  { %v11395_v62 = vpop.eup %9134  ;;  %v1605_v12 = vmul.f32 %v9133_v5, %v11148_v21  ;;  %v11411_v21 = vpop.f32.mrf.mxu1  ;;  %9146 = vrcp.f32 %v11287_v39 }
 0x696   :  { %v9137_v4 = vpop.eup %9136  ;;  %9148 = vrcp.f32 %v11279_v18  ;;  %v11416_v58 = vpop.f32.mrf.mxu3 }
 0x697   :  { %v1614_v10 = vpack.c.bf16 %v1606_v55, %v1605_v12  ;;  %v9139_v44 = vpop.eup %9138  ;;  %v1945_v59 = vmul.f32 %v9137_v4, %v11096_v60  ;;  %9150 = vrcp.f32 %v11300_v45 }
 0x698   :  { %v11406_v1 = vpop.eup %9140  ;;  %v1946_v30 = vmul.f32 %v9139_v44, %v11037_v15 }
 0x699   :  { %v9143_v8 = vpop.eup %9142 }
 0x69a   :  { %v1961_v49 = vpack.c.bf16 %v1946_v30, %v1945_v59  ;;  %v9145_v19 = vpop.eup %9144  ;;  %v2300_v60 = vmul.f32 %v9143_v8, %v11169_v0 }
 0x69b   :  { %v2299_v15 = vmul.f32 %v9145_v19, %v11154_v46  ;;  %v9147_v35 = vpop.eup %9146 }
 0x69c   :  { %2271 = vadd.xlane.f32.xlu1 %v11395_v62  ;;  %v9149_v22 = vpop.eup %9148  ;;  %v1948_v23 = vmul.f32 %v9147_v35, %v11145_v27 }
 0x69d   :  { %v2315_v6 = vpack.c.bf16 %v2300_v60, %v2299_v15  ;;  %v11419_v14 = vpop.f32.mrf.mxu1  ;;  %v1947_v5 = vmul.f32 %v9149_v22, %v11141_v63  ;;  %v9151_v63 = vpop.eup %9150 }
 0x69e   :  { %v11423_v57 = vpop.f32.mrf.mxu3  ;;  %v2301_v30 = vmul.f32 %v9151_v63, %v11172_v40  ;;  %v2264_v60 = vpop.xlane.xlu2 %2263 }
 0x69f   :  { %v1962_v39 = vpack.c.bf16 %v1948_v23, %v1947_v5 }
 0x6a0   :  { %1682 = vmatmul.bf16.gmra.mxu3 %v1614_v10 }
 0x6a4   :  { %v1970_v37 = vpop.permute.xlu1 %1969  ;;  %1919 = vadd.xlane.f32.xlu1 %v11406_v1 }
 0x6a5   :  { %2000 = vmatpush.bf16.msra.mxu1 %v1970_v37  ;;  %v11425_v0 = vpop.f32.mrf.mxu1 }
 0x6a6   :  { %v11427_v18 = vpop.f32.mrf.mxu3 }
 0x6a8   :  { %2001 = vmatmul.bf16.vlgmr.msra.gmra.mxu1 %v1961_v49 }
 0x6ad   :  { %v11429_v55 = vpop.f32.mrf.mxu1 }
 0x6ae   :  { %v11431_v46 = vpop.f32.mrf.mxu3 }
 0x6b0   :  { %2355 = vmatmul.bf16.vlgmr.msrb.gmra.mxu3 %v2315_v6 }
 0x6b5   :  { %v11433_v12 = vpop.f32.mrf.mxu1 }
 0x6b6   :  { %v11436_v27 = vpop.f32.mrf.mxu3 }
 0x6b8   :  { %2006 = vmatmul.bf16.gmra.mxu1 %v1962_v39 }
 0x6bd   :  { %v11438_v44 = vpop.f32.mrf.mxu1 }
 0x6be   :  { %v11443_v8 = vpop.f32.mrf.mxu3 }
 0x6c5   :  { %v11448_v35 = vpop.f32.mrf.mxu1 }
 0x6c6   :  { %v11450_v22 = vpop.f32.mrf.mxu3 }
 0x6cf   :  { %v2258_v10 = vpop.xlane.xlu1 %2257 }
 0x6d0   :  { %9152 = vrcp.f32 %v2258_v10  ;;  %v2200_v10 = vpop.xlane.xlu2 %2199 }
 0x6d1   :  { %9154 = vrcp.f32 %v11313_v43 }
 0x6d6   :  { %v9153_v4 = vpop.eup %9152 }
 0x6d7   :  { %v1906_v59 = vpop.xlane.xlu1 %1905  ;;  %v2302_v37 = vmul.f32 %v9153_v4, %v11329_v17  ;;  %v9155_v45 = vpop.eup %9154 }
 0x6d8   :  { %9156 = vrcp.f32 %v1906_v59  ;;  %v1950_v43 = vmul.f32 %v9155_v45, %v11195_v24  ;;  %v11455_v4 = vpop.f32.mrf.mxu1  ;;  %v2217_v59 = vsub.f32 %v11238_v56, %v2200_v10  ;;  %v2218_v56 = vsub.f32 %v11264_v11, %v11365_v48 }
 0x6d9   :  { %v2316_v49 = vpack.c.bf16 %v2302_v37, %v2301_v30  ;;  %9158 = vrcp.f32 %v11337_v2  ;;  %v11459_v37 = vpop.f32.mrf.mxu3 }
 0x6da   :  { %v2247_v30 = vmul.f32 1.442695, %v2217_v59 }
 0x6db   :  { %2360 = vmatmul.bf16.gmra.mxu3 %v2316_v49 }
 0x6de   :  { %v9157_v19 = vpop.eup %9156 }
 0x6df   :  { %v2262_v15 = vpop.xlane.xlu1 %2261  ;;  %v1949_v6 = vmul.f32 %v9157_v19, %v11335_v9  ;;  %v9159_v17 = vpop.eup %9158 }
 0x6e0   :  { %9160 = vrcp.f32 %v2262_v15  ;;  %v2303_v39 = vmul.f32 %v9159_v17, %v11209_v20  ;;  %v11465_v19 = vpop.f32.mrf.mxu1 }
 0x6e1   :  { %v1963_v40 = vpack.c.bf16 %v1950_v43, %v1949_v6  ;;  %v11474_v17 = vpop.f32.mrf.mxu3 }
 0x6e3   :  { %2011 = vmatmul.bf16.gmra.mxu1 %v1963_v40  ;;  %v2270_v40 = vpop.xlane.xlu2 %2269 }
 0x6e6   :  { %v9161_v23 = vpop.eup %9160 }
 0x6e7   :  { %v2198_v5 = vpop.xlane.xlu1 %2197  ;;  %v2304_v2 = vmul.f32 %v9161_v23, %v11340_v29 }
 0x6e8   :  { %v2216_v63 = vsub.f32 %v11349_v47, %v2198_v5 }
 0x6e9   :  { %v2317_v9 = vpack.c.bf16 %v2304_v2, %v2303_v39  ;;  %v1916_v2 = vpop.xlane.xlu0 %1915  ;;  %v11484_v10 = vpop.f32.mrf.mxu3 }
 0x6ea   :  { %v2245_v24 = vmul.f32 1.442695, %v2216_v63 }
 0x6eb   :  { %2365 = vmatmul.bf16.gmra.mxu3 %v2317_v9 }
 0x6ec   :  { %9162 = vpow2.f32 %v2245_v24  ;;  %v1914_v24 = vpop.xlane.xlu2 %1913 }
 0x6ed   :  { %9164 = vrcp.f32 %v11354_v41 }
 0x6ee   :  { %9166 = vrcp.f32 %v2264_v60 }
 0x6ef   :  { %v1842_v20 = vpop.xlane.xlu1 %1841  ;;  %9168 = vpow2.f32 %v2247_v30 }
 0x6f0   :  { %v1861_v29 = vsub.f32 %v11360_v54, %v1842_v20  ;;  %v2249_v54 = vmul.f32 1.442695, %v2218_v56 }
 0x6f2   :  { %v11462_v49 = vpop.eup %9162  ;;  %v1889_v47 = vmul.f32 1.442695, %v1861_v29 }
 0x6f3   :  { %v9165_v45 = vpop.eup %9164  ;;  %2277 = vadd.xlane.f32.xlu0 %v11462_v49 }
 0x6f4   :  { %9170 = vpow2.f32 %v1889_v47  ;;  %v9167_v41 = vpop.eup %9166  ;;  %v2306_v60 = vmul.f32 %v9165_v45, %v11247_v61 }
 0x6f5   :  { %9172 = vrcp.f32 %v11343_v26  ;;  %v2305_v6 = vmul.f32 %v9167_v41, %v11222_v42  ;;  %v11472_v43 = vpop.eup %9168  ;;  %v11480_v26 = vpop.f32.mrf.mxu1 }
 0x6f7   :  { %v1912_v15 = vpop.xlane.xlu1 %1911  ;;  %v2318_v5 = vpack.c.bf16 %v2306_v60, %v2305_v6  ;;  %v2274_v60 = vpop.xlane.xlu2 %2273 }
 0x6f8   :  { %9174 = vrcp.f32 %v1912_v15  ;;  %v1675_v15 = vpop.f32.mrf.mxu3 }
 0x6f9   :  { %9176 = vpow2.f32 %v2249_v54 }
 0x6fa   :  { %v11476_v23 = vpop.eup %9170  ;;  %9178 = vrcp.f32 %v2270_v40 }
 0x6fb   :  { %2279 = vadd.xlane.f32.xlu0 %v11472_v43  ;;  %1921 = vadd.xlane.f32.xlu1 %v11476_v23  ;;  %v9173_v11 = vpop.eup %9172 }
 0x6fc   :  { %2370 = vmatmul.bf16.gmra.mxu3 %v2318_v5  ;;  %v1951_v48 = vmul.f32 %v9173_v11, %v11219_v33 }
 0x6fd   :  { %v11491_v29 = vpop.f32.mrf.mxu1 }
 0x6fe   :  { %v9175_v61 = vpop.eup %9174 }
 0x6ff   :  { %v2268_v42 = vpop.xlane.xlu1 %2267  ;;  %v1952_v39 = vmul.f32 %v9175_v61, %v11367_v36  ;;  %v11486_v9 = vpop.eup %9176 }
 0x700   :  { %9180 = vrcp.f32 %v2268_v42  ;;  %v9179_v59 = vpop.eup %9178 }
 0x701   :  { %v1964_v63 = vpack.c.bf16 %v1952_v39, %v1951_v48  ;;  %9182 = vrcp.f32 %v1916_v2  ;;  %v2308_v36 = vmul.f32 %v9179_v59, %v11254_v25 }
 0x702   :  { %9184 = vrcp.f32 %v1914_v24 }
 0x703   :  { %2016 = vmatmul.bf16.gmra.mxu1 %v1964_v63  ;;  %2281 = vadd.xlane.f32.xlu1 %v11486_v9  ;;  %v8680_v63 = vpack.i.bf16 %v11416_v58, %v11402_v7  ;;  %v8710_v58 = vpack.i.bf16 %v11436_v27, %v11431_v46  ;;  %v8755_v27 = vpack.i.bf16 %v1675_v15, %v11484_v10 }
 0x705   :  { %v11498_v11 = vpop.f32.mrf.mxu1 }
 0x706   :  { %v9181_v30 = vpop.eup %9180 }
 0x707   :  { %v1848_v20 = vpop.xlane.xlu1 %1847  ;;  %v2307_v33 = vmul.f32 %v9181_v30, %v11372_v13  ;;  %v9183_v56 = vpop.eup %9182 }
 0x708   :  { %v1864_v47 = vsub.f32 %v11385_v3, %v1848_v20  ;;  %v9185_v54 = vpop.eup %9184  ;;  %v1954_v6 = vmul.f32 %v9183_v56, %v11283_v16  ;;  %v1918_v3 = vpop.xlane.xlu0 %1917 }
 0x709   :  { %v2319_v45 = vpack.c.bf16 %v2308_v36, %v2307_v33  ;;  %v1953_v13 = vmul.f32 %v9185_v54, %v11270_v31 }
 0x70a   :  { %v1895_v41 = vmul.f32 1.442695, %v1864_v47 }
 0x70b   :  { %v1965_v25 = vpack.c.bf16 %v1954_v6, %v1953_v13 }
 0x70c   :  { %9186 = vpow2.f32 %v1895_v41  ;;  %2375 = vmatmul.bf16.gmra.mxu3 %v2319_v45 }
 0x70d   :  { %9188 = vrcp.f32 %v2274_v60  ;;  %v11506_v30 = vpop.f32.mrf.mxu1 }
 0x70f   :  { %v2272_v40 = vpop.xlane.xlu1 %2271 }
 0x710   :  { %9190 = vrcp.f32 %v2272_v40 }
 0x711   :  { %9192 = vrcp.f32 %v1918_v3 }
 0x712   :  { %v11496_v5 = vpop.eup %9186 }
 0x713   :  { %v1678_v61 = vpop.f32.mrf.mxu3  ;;  %1927 = vadd.xlane.f32.xlu0 %v11496_v5  ;;  %2021 = vmatmul.bf16.gmra.mxu1 %v1965_v25  ;;  %v9189_v42 = vpop.eup %9188 }
 0x714   :  { %v2310_v2 = vmul.f32 %v9189_v42, %v11302_v34  ;;  %v8695_v34 = vpack.i.bf16 %v11427_v18, %v11423_v57  ;;  %v8740_v18 = vpack.i.bf16 %v11474_v17, %v11459_v37  ;;  %v2276_v17 = vpop.xlane.xlu2 %2275 }
 0x716   :  { %v9191_v48 = vpop.eup %9190 }
 0x717   :  { %v1920_v39 = vpop.xlane.xlu1 %1919  ;;  %v2309_v16 = vmul.f32 %v9191_v48, %v11395_v62  ;;  %v9193_v59 = vpop.eup %9192 }
 0x718   :  { %9194 = vrcp.f32 %v1920_v39  ;;  %v1955_v33 = vmul.f32 %v9193_v59, %v11315_v52  ;;  %v8725_v52 = vpack.i.bf16 %v11450_v22, %v11443_v8 }
 0x719   :  { %v2320_v31 = vpack.c.bf16 %v2310_v2, %v2309_v16  ;;  %9196 = vrcp.f32 %v2276_v17 }
 0x71b   :  { %v1680_v24 = vpop.f32.mrf.mxu3 }
 0x71c   :  { %2380 = vmatmul.bf16.gmra.mxu3 %v2320_v31  ;;  %8681 = vrot.lane.b32.xlu1 %v8680_v63, %s9595_s26  ;;  %v8770_v8 = vpack.i.bf16 %v1680_v24, %v1678_v61  ;;  %v1924_v42 = vpop.xlane.xlu2 %1923 }
 0x71e   :  { %v9195_v20 = vpop.eup %9194 }
 0x71f   :  { %v1956_v36 = vmul.f32 %v9195_v20, %v11406_v1  ;;  %v9197_v48 = vpop.eup %9196 }
 0x720   :  { %v2311_v2 = vmul.f32 %v9197_v48, %v11322_v53 }
 0x721   :  { %v1966_v62 = vpack.c.bf16 %v1956_v36, %v1955_v33 }
 0x723   :  { %v1683_v47 = vpop.f32.mrf.mxu3  ;;  %2026 = vmatmul.bf16.gmra.mxu1 %v1966_v62 }
 0x724   :  { %8696 = vrot.lane.b32.xlu1 %v8695_v34, %s9595_s26 }
 0x725   :  { %v2002_v7 = vpop.f32.mrf.mxu1 }
 0x72b   :  { %v1685_v45 = vpop.f32.mrf.mxu3 }
 0x72c   :  { %8711 = vrot.lane.b32.xlu1 %v8710_v58, %s9595_s26  ;;  %v8785_v22 = vpack.i.bf16 %v1685_v45, %v1683_v47  ;;  %v8482_v47 = vld [vmem:[%s14693_s7 + $0x38] sm:$0xff] }
 0x72d   :  { %v2004_v56 = vpop.f32.mrf.mxu1  ;;  %2710 = vmatpush.bf16.msrb.mxu0 %v8482_v47 }
 0x72e   :  { %v8685_v41 = vpack.i.bf16 %v2004_v56, %v2002_v7  ;;  %v8481_v7 = vld [vmem:[%s14693_s7 + $0x30] sm:$0xff]  ;;  %v8480_v56 = vld [vmem:[%s14693_s7 + $0x28] sm:$0xff] }
 0x730   :  { %8686 = vrot.lane.b32.xlu2 %v8685_v41, %s9596_s27 }
 0x731   :  { %2711 = vmatpush.bf16.msrb.mxu0 %v8481_v7 }
 0x733   :  { %v2356_v1 = vpop.f32.mrf.mxu3 }
 0x734   :  { %8726 = vrot.lane.b32.xlu1 %v8725_v52, %s9595_s26 }
 0x735   :  { %v2007_v57 = vpop.f32.mrf.mxu1  ;;  %2712 = vmatpush.bf16.msrb.mxu0 %v8480_v56 }
 0x73b   :  { %v2358_v60 = vpop.f32.mrf.mxu3 }
 0x73c   :  { %v8690_v54 = vpack.i.bf16 %v2358_v60, %v2356_v1  ;;  %8741 = vrot.lane.b32.xlu1 %v8740_v18, %s9595_s26  ;;  %v1926_v18 = vpop.xlane.xlu2 %1925 }
 0x73d   :  { %v2009_v46 = vpop.f32.mrf.mxu1 }
 0x73e   :  { %8691 = vrot.lane.b32.xlu0 %v8690_v54, %s9594_s0  ;;  %v8700_v6 = vpack.i.bf16 %v2009_v46, %v2007_v57  ;;  %v8479_v57 = vld [vmem:[%s14693_s7 + $0x20] sm:$0xff] }
 0x73f   :  { %2713 = vmatpush.bf16.msrb.mxu0 %v8479_v57 }
 0x744   :  { %8756 = vrot.lane.b32.xlu1 %v8755_v27, %s9595_s26 }
 0x746   :  { %8701 = vrot.lane.b32.xlu0 %v8700_v6, %s9596_s27  ;;  %v8477_v6 = vld [vmem:[%s14693_s7 + $0x10] sm:$0xff] }
 0x74c   :  { %8771 = vrot.lane.b32.xlu1 %v8770_v8, %s9595_s26 }
 0x754   :  { %8786 = vrot.lane.b32.xlu1 %v8785_v22, %s9595_s26 }
 0x75e   :  { %v2361_v37 = vpop.f32.mrf.mxu3 }
 0x760   :  { %v2012_v40 = vpop.f32.mrf.mxu1 }
 0x766   :  { %v2363_v13 = vpop.f32.mrf.mxu3  ;;  %v2278_v25 = vpop.xlane.xlu0 %2277 }
 0x767   :  { %v8705_v3 = vpack.i.bf16 %v2363_v13, %v2361_v37  ;;  %9198 = vrcp.f32 %v2278_v25 }
 0x768   :  { %v2014_v10 = vpop.f32.mrf.mxu1  ;;  %9200 = vrcp.f32 %v1924_v42 }
 0x769   :  { %v8715_v15 = vpack.i.bf16 %v2014_v10, %v2012_v40  ;;  %8706 = vrot.lane.b32.xlu2 %v8705_v3, %s9594_s0  ;;  %v8476_v40 = vld [vmem:[%s14693_s7 + $0x8] sm:$0xff]  ;;  %v8475_v10 = vld [vmem:[%s14693_s7] sm:$0xff] }
 0x76b   :  { %8716 = vrot.lane.b32.xlu0 %v8715_v15, %s9596_s27 }
 0x76d   :  { %v9199_v61 = vpop.eup %9198 }
 0x76e   :  { %v1922_v39 = vpop.xlane.xlu1 %1921  ;;  %v2366_v16 = vpop.f32.mrf.mxu3  ;;  %v2312_v31 = vmul.f32 %v9199_v61, %v11462_v49 }
 0x76f   :  { %9202 = vrcp.f32 %v1922_v39  ;;  %v2280_v24 = vpop.xlane.xlu0 %2279  ;;  %v9201_v59 = vpop.eup %9200 }
 0x770   :  { %v2321_v63 = vpack.c.bf16 %v2312_v31, %v2311_v2  ;;  %9204 = vrcp.f32 %v2280_v24  ;;  %v1958_v34 = vmul.f32 %v9201_v59, %v11327_v32 }
 0x772   :  { %2385 = vmatmul.bf16.gmra.mxu3 %v2321_v63 }
 0x775   :  { %v9203_v20 = vpop.eup %9202 }
 0x776   :  { %v2368_v33 = vpop.f32.mrf.mxu3  ;;  %v2282_v36 = vpop.xlane.xlu1 %2281  ;;  %v1957_v62 = vmul.f32 %v9203_v20, %v11476_v23 }
 0x777   :  { %v8720_v53 = vpack.i.bf16 %v2368_v33, %v2366_v16  ;;  %9206 = vrcp.f32 %v2282_v36  ;;  %v9205_v58 = vpop.eup %9204 }
 0x778   :  { %v1967_v49 = vpack.c.bf16 %v1958_v34, %v1957_v62  ;;  %v2313_v32 = vmul.f32 %v9205_v58, %v11472_v43  ;;  %9208 = vrcp.f32 %v1926_v18  ;;  %v8478_v43 = vld [vmem:[%s14693_s7 + $0x18] sm:$0xff] }
 0x779   :  { %8721 = vrot.lane.b32.xlu2 %v8720_v53, %s9594_s0  ;;  %2714 = vmatpush.bf16.msrb.mxu0 %v8478_v43 }
 0x77a   :  { %2031 = vmatmul.bf16.gmra.mxu1 %v1967_v49 }
 0x77d   :  { %v9207_v23 = vpop.eup %9206  ;;  %2715 = vmatpush.bf16.msrb.mxu0 %v8477_v6 }
 0x77e   :  { %v2314_v45 = vmul.f32 %v9207_v23, %v11486_v9  ;;  %v9209_v8 = vpop.eup %9208 }
 0x77f   :  { %v2371_v41 = vpop.f32.mrf.mxu3  ;;  %v1959_v37 = vmul.f32 %v9209_v8, %v11381_v50 }
 0x780   :  { %v2017_v52 = vpop.f32.mrf.mxu1  ;;  %v2322_v1 = vpack.c.bf16 %v2314_v45, %v2313_v32 }
 0x781   :  { %2716 = vmatpush.bf16.msrb.mxu0 %v8476_v40 }
 0x782   :  { %2390 = vmatmul.bf16.gmra.mxu3 %v2322_v1 }
 0x785   :  { %2717 = vmatpush.bf16.msrb.mxu0 %v8475_v10 }
 0x786   :  { %v1928_v60 = vpop.xlane.xlu0 %1927 }
 0x787   :  { %v2373_v9 = vpop.f32.mrf.mxu3  ;;  %9210 = vrcp.f32 %v1928_v60 }
 0x788   :  { %v8735_v54 = vpack.i.bf16 %v2373_v9, %v2371_v41  ;;  %v2019_v46 = vpop.f32.mrf.mxu1 }
 0x789   :  { %v8730_v27 = vpack.i.bf16 %v2019_v46, %v2017_v52 }
 0x78a   :  { %8736 = vrot.lane.b32.xlu2 %v8735_v54, %s9594_s0  ;;  %v8687_v20 = vpop.permute.xlu2 %8686 }
 0x78b   :  { %8731 = vrot.lane.b32.xlu0 %v8730_v27, %s9596_s27  ;;  %v8689_v62 = vunpack.i.h.bf16 %v8687_v20  ;;  %v8688_v34 = vunpack.i.l.bf16 %v8687_v20 }
 0x78d   :  { %v9211_v22 = vpop.eup %9210 }
 0x78e   :  { %v1960_v17 = vmul.f32 %v9211_v22, %v11496_v5  ;;  %v8682_v16 = vpop.permute.xlu1 %8681 }
 0x78f   :  { %v2376_v13 = vpop.f32.mrf.mxu3  ;;  %v8684_v24 = vunpack.i.h.bf16 %v8682_v16  ;;  %v8683_v59 = vunpack.i.l.bf16 %v8682_v16 }
 0x790   :  { %v2022_v25 = vpop.f32.mrf.mxu1  ;;  %v1968_v3 = vpack.c.bf16 %v1960_v17, %v1959_v37 }
 0x791   :  { %v2589_v33 = vsel %vm987_vm4, %v11388_v38, %v8684_v24  ;;  %v2588_v36 = vsel %vm987_vm4, %v11374_v51, %v8683_v59 }
 0x792   :  { %2036 = vmatmul.bf16.gmra.mxu1 %v1968_v3  ;;  %v2605_v7 = vsel %vm2604_vm5, %v2588_v36, %v8688_v34  ;;  %v2606_v58 = vsel %vm2604_vm5, %v2589_v33, %v8689_v62 }
 0x796   :  { %v8697_v38 = vpop.permute.xlu1 %8696 }
 0x797   :  { %v2378_v15 = vpop.f32.mrf.mxu3  ;;  %v8699_v51 = vunpack.i.h.bf16 %v8697_v38  ;;  %v8698_v41 = vunpack.i.l.bf16 %v8697_v38 }
 0x798   :  { %v8750_v42 = vpack.i.bf16 %v2378_v15, %v2376_v13  ;;  %v2024_v48 = vpop.f32.mrf.mxu1 }
 0x799   :  { %v8745_v50 = vpack.i.bf16 %v2024_v48, %v2022_v25  ;;  %v2591_v18 = vsel %vm987_vm4, %v11411_v21, %v8699_v51  ;;  %v2590_v60 = vsel %vm987_vm4, %v11398_v28, %v8698_v41 }
 0x79a   :  { %8751 = vrot.lane.b32.xlu2 %v8750_v42, %s9594_s0 }
 0x79b   :  { %8746 = vrot.lane.b32.xlu0 %v8745_v50, %s9596_s27 }
 0x79e   :  { %v8712_v22 = vpop.permute.xlu1 %8711 }
 0x79f   :  { %v2381_v5 = vpop.f32.mrf.mxu3  ;;  %v8714_v37 = vunpack.i.h.bf16 %v8712_v22  ;;  %v8713_v17 = vunpack.i.l.bf16 %v8712_v22 }
 0x7a0   :  { %v2027_v61 = vpop.f32.mrf.mxu1 }
 0x7a1   :  { %v2593_v28 = vsel %vm987_vm4, %v11425_v0, %v8714_v37  ;;  %v2592_v3 = vsel %vm987_vm4, %v11419_v14, %v8713_v17 }
 0x7a7   :  { %v2383_v39 = vpop.f32.mrf.mxu3 }
 0x7a8   :  { %v8765_v2 = vpack.i.bf16 %v2383_v39, %v2381_v5  ;;  %v2029_v31 = vpop.f32.mrf.mxu1 }
 0x7a9   :  { %v8760_v63 = vpack.i.bf16 %v2029_v31, %v2027_v61 }
 0x7aa   :  { %8766 = vrot.lane.b32.xlu2 %v8765_v2, %s9594_s0  ;;  %v8727_v2 = vpop.permute.xlu1 %8726 }
 0x7ab   :  { %8761 = vrot.lane.b32.xlu0 %v8760_v63, %s9596_s27  ;;  %v8729_v31 = vunpack.i.h.bf16 %v8727_v2  ;;  %v8728_v0 = vunpack.i.l.bf16 %v8727_v2  ;;  %v11625_v2 = vld [vmem:[%s14690_s4] sm:$0x3f] }
 0x7ad   :  { %v2595_v36 = vsel %vm987_vm4, %v11433_v12, %v8729_v31  ;;  %v2594_v62 = vsel %vm987_vm4, %v11429_v55, %v8728_v0  ;;  %v14822_v31 = vld [vmem:[#allocation2_spill] sm:$0xff] }
 0x7b0   :  { %v8692_v47 = vpop.permute.xlu0 %8691 }
 0x7b1   :  { %v8694_v53 = vunpack.i.h.bf16 %v8692_v47  ;;  %v8693_v49 = vunpack.i.l.bf16 %v8692_v47 }
 0x7b2   :  { %v8742_v55 = vpop.permute.xlu1 %8741 }
 0x7b3   :  { %v2623_v23 = vsel %vm2621_vm6, %v2606_v58, %v8694_v53  ;;  %v2622_v32 = vsel %vm2621_vm6, %v2605_v7, %v8693_v49  ;;  %v8744_v38 = vunpack.i.h.bf16 %v8742_v55 }
 0x7b4   :  { %v2638_v45 = vpack.c.bf16 %v2623_v23, %v2622_v32 }
 0x7b6   :  { %2718 = vmatmul.bf16.vlgmr.msrb.gmra.mxu0 %v2638_v45 }
 0x7b8   :  { %v8702_v56 = vpop.permute.xlu0 %8701 }
 0x7b9   :  { %v8704_v52 = vunpack.i.h.bf16 %v8702_v56  ;;  %v8703_v1 = vunpack.i.l.bf16 %v8702_v56  ;;  %v8743_v56 = vunpack.i.l.bf16 %v8742_v55  ;;  %v14827_v55 = vld [vmem:[#allocation7_spill] sm:$0xff] }
 0x7bb   :  { %v2607_v54 = vsel %vm2604_vm5, %v2590_v60, %v8703_v1  ;;  %v2608_v46 = vsel %vm2604_vm5, %v2591_v18, %v8704_v52  ;;  %v2597_v60 = vsel %vm987_vm4, %v11448_v35, %v8744_v38  ;;  %v8757_v35 = vpop.permute.xlu1 %8756 }
 0x7c3   :  { %v8707_v57 = vpop.permute.xlu2 %8706 }
 0x7c4   :  { %v8709_v43 = vunpack.i.h.bf16 %v8707_v57  ;;  %v8708_v9 = vunpack.i.l.bf16 %v8707_v57 }
 0x7c6   :  { %v2624_v27 = vsel %vm2621_vm6, %v2607_v54, %v8708_v9  ;;  %v2625_v6 = vsel %vm2621_vm6, %v2608_v46, %v8709_v43  ;;  %v2596_v43 = vsel %vm987_vm4, %v11438_v44, %v8743_v56  ;;  %v8759_v44 = vunpack.i.h.bf16 %v8757_v35 }
 0x7c7   :  { %v2639_v8 = vpack.c.bf16 %v2625_v6, %v2624_v27 }
 0x7c9   :  { %2723 = vmatmul.bf16.gmra.mxu0 %v2639_v8 }
 0x7d3   :  { %v8722_v40 = vpop.permute.xlu2 %8721 }
 0x7d4   :  { %v8724_v10 = vunpack.i.h.bf16 %v8722_v40  ;;  %v8723_v15 = vunpack.i.l.bf16 %v8722_v40 }
 0x7dd   :  { %v8717_v21 = vpop.permute.xlu0 %8716 }
 0x7de   :  { %v8719_v13 = vunpack.i.h.bf16 %v8717_v21  ;;  %v8718_v25 = vunpack.i.l.bf16 %v8717_v21  ;;  %v8758_v21 = vunpack.i.l.bf16 %v8757_v35  ;;  %v14828_v35 = vld [vmem:[#allocation8_spill] sm:$0xff] }
 0x7e0   :  { %v2609_v42 = vsel %vm2604_vm5, %v2592_v3, %v8718_v25  ;;  %v2610_v48 = vsel %vm2604_vm5, %v2593_v28, %v8719_v13 }
 0x7e1   :  { %v2626_v50 = vsel %vm2621_vm6, %v2609_v42, %v8723_v15  ;;  %v2627_v5 = vsel %vm2621_vm6, %v2610_v48, %v8724_v10  ;;  %v2599_v10 = vsel %vm987_vm4, %v11465_v19, %v8759_v44  ;;  %v2598_v15 = vsel %vm987_vm4, %v11455_v4, %v8758_v21 }
 0x7e2   :  { %v2640_v61 = vpack.c.bf16 %v2627_v5, %v2626_v50  ;;  %v11628_v19 = vperm.slane %v11625_v2, 4 }
 0x7e4   :  { %2728 = vmatmul.bf16.gmra.mxu0 %v2640_v61  ;;  %v8737_v63 = vpop.permute.xlu2 %8736 }
 0x7e5   :  { %v8739_v34 = vunpack.i.h.bf16 %v8737_v63  ;;  %v8738_v47 = vunpack.i.l.bf16 %v8737_v63 }
 0x7f4   :  { %v8752_v51 = vpop.permute.xlu2 %8751 }
 0x7f5   :  { %v2386_v39 = vpop.f32.mrf.mxu3  ;;  %v8754_v9 = vunpack.i.h.bf16 %v8752_v51  ;;  %v8753_v54 = vunpack.i.l.bf16 %v8752_v51  ;;  %v8772_v51 = vpop.permute.xlu1 %8771 }
 0x7f7   :  { %v2032_v16 = vpop.f32.mrf.mxu1 }
 0x7fd   :  { %v2388_v24 = vpop.f32.mrf.mxu3  ;;  %v8732_v14 = vpop.permute.xlu0 %8731 }
 0x7fe   :  { %v8780_v59 = vpack.i.bf16 %v2388_v24, %v2386_v39  ;;  %v8734_v20 = vunpack.i.h.bf16 %v8732_v14  ;;  %v8733_v33 = vunpack.i.l.bf16 %v8732_v14  ;;  %v14823_v14 = vld [vmem:[#allocation3_spill] sm:$0xff] }
 0x7ff   :  { %v2034_v53 = vpop.f32.mrf.mxu1 }
 0x800   :  { %v8775_v49 = vpack.i.bf16 %v2034_v53, %v2032_v16  ;;  %8781 = vrot.lane.b32.xlu2 %v8780_v59, %s9594_s0  ;;  %v2611_v7 = vsel %vm2604_vm5, %v2594_v62, %v8733_v33  ;;  %v2612_v58 = vsel %vm2604_vm5, %v2595_v36, %v8734_v20  ;;  %v14824_v36 = vld [vmem:[#allocation4_spill] sm:$0xff]  ;;  %v14825_v53 = vld [vmem:[#allocation5_spill] sm:$0xff] }
 0x801   :  { %v2628_v23 = vsel %vm2621_vm6, %v2611_v7, %v8738_v47  ;;  %v2629_v32 = vsel %vm2621_vm6, %v2612_v58, %v8739_v34 }
 0x802   :  { %8776 = vrot.lane.b32.xlu0 %v8775_v49, %s9596_s27  ;;  %v2641_v12 = vpack.c.bf16 %v2629_v32, %v2628_v23  ;;  %v14826_v23 = vld [vmem:[#allocation6_spill] sm:$0xff] }
 0x804   :  { %2733 = vmatmul.bf16.gmra.mxu0 %v2641_v12  ;;  %v8767_v13 = vpop.permute.xlu2 %8766 }
 0x805   :  { %v2391_v45 = vpop.f32.mrf.mxu3  ;;  %v8769_v42 = vunpack.i.h.bf16 %v8767_v13  ;;  %v8768_v48 = vunpack.i.l.bf16 %v8767_v13 }
 0x80d   :  { %v2393_v41 = vpop.f32.mrf.mxu3  ;;  %v8747_v52 = vpop.permute.xlu0 %8746 }
 0x80e   :  { %v8795_v1 = vpack.i.bf16 %v2393_v41, %v2391_v45  ;;  %v8749_v57 = vunpack.i.h.bf16 %v8747_v52  ;;  %v8748_v18 = vunpack.i.l.bf16 %v8747_v52  ;;  %v8774_v41 = vunpack.i.h.bf16 %v8772_v51 }
 0x80f   :  { %v2037_v46 = vpop.f32.mrf.mxu1  ;;  %v8773_v52 = vunpack.i.l.bf16 %v8772_v51 }
 0x810   :  { %8796 = vrot.lane.b32.xlu2 %v8795_v1, %s9594_s0  ;;  %v2613_v27 = vsel %vm2604_vm5, %v2596_v43, %v8748_v18  ;;  %v2614_v6 = vsel %vm2604_vm5, %v2597_v60, %v8749_v57  ;;  %v2601_v43 = vsel %vm987_vm4, %v11491_v29, %v8774_v41 }
 0x811   :  { %v2630_v8 = vsel %vm2621_vm6, %v2613_v27, %v8753_v54  ;;  %v2631_v22 = vsel %vm2621_vm6, %v2614_v6, %v8754_v9  ;;  %v2600_v9 = vsel %vm987_vm4, %v11480_v26, %v8773_v52  ;;  %v8787_v26 = vpop.permute.xlu1 %8786 }
 0x812   :  { %v2642_v37 = vpack.c.bf16 %v2631_v22, %v2630_v8  ;;  %v8789_v44 = vunpack.i.h.bf16 %v8787_v26  ;;  %v8788_v21 = vunpack.i.l.bf16 %v8787_v26  ;;  %v14834_v26 = vld [vmem:[#allocation14_spill] sm:$0xff] }
 0x814   :  { %2738 = vmatmul.bf16.gmra.mxu0 %v2642_v37 }
 0x817   :  { %v2039_v17 = vpop.f32.mrf.mxu1 }
 0x818   :  { %v8790_v40 = vpack.i.bf16 %v2039_v17, %v2037_v46 }
 0x81a   :  { %8791 = vrot.lane.b32.xlu0 %v8790_v40, %s9596_s27 }
 0x81d   :  { %v8762_v25 = vpop.permute.xlu0 %8761 }
 0x81e   :  { %v8764_v28 = vunpack.i.h.bf16 %v8762_v25  ;;  %v8763_v3 = vunpack.i.l.bf16 %v8762_v25 }
 0x820   :  { %v2615_v50 = vsel %vm2604_vm5, %v2598_v15, %v8763_v3  ;;  %v2616_v5 = vsel %vm2604_vm5, %v2599_v10, %v8764_v28  ;;  %v2603_v10 = vsel %vm987_vm4, %v11506_v30, %v8789_v44  ;;  %v2602_v15 = vsel %vm987_vm4, %v11498_v11, %v8788_v21 }
 0x821   :  { %v2632_v61 = vsel %vm2621_vm6, %v2615_v50, %v8768_v48  ;;  %v2633_v39 = vsel %vm2621_vm6, %v2616_v5, %v8769_v42 }
 0x822   :  { %v2643_v16 = vpack.c.bf16 %v2633_v39, %v2632_v61 }
 0x824   :  { %2743 = vmatmul.bf16.gmra.mxu0 %v2643_v16 }
 0x833   :  { %v2719_v4 = vpop.f32.mrf.mxu0 }
 0x834   :  { %v2759_v0 = vadd.f32 %v2719_v4, %v14822_v31  ;;  %v14829_v31 = vld [vmem:[#allocation9_spill] sm:$0xff] }
 0x836   :  { %v11632_v63 = vadd.f32 %v11628_v19, %v2759_v0 }
 0x838   :  { %2792 = vadd.xlane.f32.xlu1 %v11632_v63 }
 0x83b   :  { %v2721_v24 = vpop.f32.mrf.mxu0 }
 0x83c   :  { %v2760_v59 = vadd.f32 %v2721_v24, %v14823_v14  ;;  %v14830_v14 = vld [vmem:[#allocation10_spill] sm:$0xff] }
 0x83e   :  { %v11637_v20 = vadd.f32 %v11628_v19, %v2760_v59 }
 0x844   :  { %2794 = vadd.xlane.f32.xlu0 %v11637_v20 }
 0x846   :  { %v2724_v33 = vpop.f32.mrf.mxu0 }
 0x847   :  { %v2761_v62 = vadd.f32 %v2724_v33, %v14824_v36 }
 0x849   :  { %v11642_v34 = vadd.f32 %v11628_v19, %v2761_v62 }
 0x84b   :  { %2796 = vadd.xlane.f32.xlu2 %v11642_v34 }
 0x84e   :  { %v2726_v47 = vpop.f32.mrf.mxu0 }
 0x84f   :  { %v2762_v49 = vadd.f32 %v2726_v47, %v14825_v53 }
 0x851   :  { %v11647_v7 = vadd.f32 %v11628_v19, %v2762_v49  ;;  %v14831_v49 = vld [vmem:[#allocation11_spill] sm:$0xff] }
 0x853   :  { %2798 = vadd.xlane.f32.xlu1 %v11647_v7 }
 0x85a   :  { %v8782_v1 = vpop.permute.xlu2 %8781 }
 0x85b   :  { %v8784_v54 = vunpack.i.h.bf16 %v8782_v1  ;;  %v8783_v46 = vunpack.i.l.bf16 %v8782_v1 }
 0x861   :  { %v2729_v58 = vpop.f32.mrf.mxu0 }
 0x862   :  { %v2763_v32 = vadd.f32 %v2729_v58, %v14826_v23 }
 0x864   :  { %v11652_v12 = vadd.f32 %v11628_v19, %v2763_v32 }
 0x866   :  { %2800 = vadd.xlane.f32.xlu0 %v11652_v12 }
 0x869   :  { %v2731_v45 = vpop.f32.mrf.mxu0 }
 0x86a   :  { %v2764_v38 = vadd.f32 %v2731_v45, %v14827_v55  ;;  %v8797_v13 = vpop.permute.xlu2 %8796 }
 0x86b   :  { %v8799_v42 = vunpack.i.h.bf16 %v8797_v13  ;;  %v8798_v48 = vunpack.i.l.bf16 %v8797_v13 }
 0x86c   :  { %v11657_v56 = vadd.f32 %v11628_v19, %v2764_v38 }
 0x86e   :  { %2802 = vadd.xlane.f32.xlu2 %v11657_v56 }
 0x874   :  { %v8777_v57 = vpop.permute.xlu0 %8776 }
 0x875   :  { %v8779_v18 = vunpack.i.h.bf16 %v8777_v57  ;;  %v8778_v60 = vunpack.i.l.bf16 %v8777_v57  ;;  %v14832_v57 = vld [vmem:[#allocation12_spill] sm:$0xff] }
 0x877   :  { %v2617_v27 = vsel %vm2604_vm5, %v2600_v9, %v8778_v60  ;;  %v2618_v6 = vsel %vm2604_vm5, %v2601_v43, %v8779_v18 }
 0x878   :  { %v2634_v8 = vsel %vm2621_vm6, %v2617_v27, %v8783_v46  ;;  %v2635_v22 = vsel %vm2621_vm6, %v2618_v6, %v8784_v54  ;;  %v14833_v46 = vld [vmem:[#allocation13_spill] sm:$0xff] }
 0x879   :  { %v2644_v37 = vpack.c.bf16 %v2635_v22, %v2634_v8 }
 0x87b   :  { %2748 = vmatmul.bf16.gmra.mxu0 %v2644_v37 }
 0x881   :  { %v2734_v17 = vpop.f32.mrf.mxu0 }
 0x882   :  { %v2765_v40 = vadd.f32 %v2734_v17, %v14828_v35 }
 0x884   :  { %v11670_v29 = vadd.f32 %v11628_v19, %v2765_v40 }
 0x886   :  { %2804 = vadd.xlane.f32.xlu2 %v11670_v29 }
 0x889   :  { %v2736_v24 = vpop.f32.mrf.mxu0 }
 0x88a   :  { %v2766_v59 = vadd.f32 %v2736_v24, %v14830_v14  ;;  %v7829_v24 = vld [vmem:[%s14694_s8 + $0x70] sm:$0xf]  ;;  %v8497_v14 = vld [vmem:[%s14694_s8 + $0x74] sm:$0xf] }
 0x88c   :  { %v8792_v25 = vpop.permute.xlu0 %8791  ;;  %v11689_v36 = vadd.f32 %v11628_v19, %v2766_v59 }
 0x88d   :  { %v8794_v28 = vunpack.i.h.bf16 %v8792_v25  ;;  %v8793_v3 = vunpack.i.l.bf16 %v8792_v25 }
 0x88f   :  { %v2619_v50 = vsel %vm2604_vm5, %v2602_v15, %v8793_v3  ;;  %v2620_v5 = vsel %vm2604_vm5, %v2603_v10, %v8794_v28  ;;  %v14835_v10 = vld [vmem:[#allocation15_spill] sm:$0xff] }
 0x890   :  { %v2636_v61 = vsel %vm2621_vm6, %v2619_v50, %v8798_v48  ;;  %v2637_v39 = vsel %vm2621_vm6, %v2620_v5, %v8799_v42 }
 0x891   :  { %v2645_v16 = vpack.c.bf16 %v2637_v39, %v2636_v61  ;;  %v2739_v47 = vpop.f32.mrf.mxu0 }
 0x892   :  { %v2767_v58 = vadd.f32 %v2739_v47, %v14831_v49  ;;  %v14837_v47 = vld [vmem:[#allocation17_spill] sm:$0xff] }
 0x893   :  { %2753 = vmatmul.bf16.gmra.mxu0 %v2645_v16  ;;  %v14836_v16 = vld [vmem:[#allocation16_spill] sm:$0xff] }
 0x894   :  { %v11701_v55 = vadd.f32 %v11628_v19, %v2767_v58 }
 0x899   :  { %v2741_v51 = vpop.f32.mrf.mxu0 }
 0x89a   :  { %v2768_v18 = vadd.f32 %v2741_v51, %v14832_v57  ;;  %v8495_v51 = vld [vmem:[%s14694_s8 + $0x64] sm:$0xf]  ;;  %v7813_v57 = vld [vmem:[%s14694_s8 + $0x50] sm:$0xf] }
 0x89c   :  { %v11717_v9 = vadd.f32 %v11628_v19, %v2768_v18  ;;  %v8494_v18 = vld [vmem:[%s14694_s8 + $0x54] sm:$0xf0] }
 0x8a1   :  { %v2744_v54 = vpop.f32.mrf.mxu0 }
 0x8a2   :  { %v2769_v27 = vadd.f32 %v2744_v54, %v14833_v46  ;;  %v7814_v54 = vor.u32 %v8494_v18, %v7813_v57  ;;  %v7815_v46 = vld [vmem:[%s14694_s8 + $0x58] sm:$0xf0] }
 0x8a4   :  { %v11722_v6 = vadd.f32 %v11628_v19, %v2769_v27 }
 0x8a9   :  { %v2746_v35 = vpop.f32.mrf.mxu0 }
 0x8aa   :  { %v2770_v44 = vadd.f32 %v2746_v35, %v14834_v26 }
 0x8ab   :  { %v2793_v4 = vpop.xlane.xlu1 %2792 }
 0x8ac   :  { %v2824_v0 = vmul.f32 %v2793_v4, %v14829_v31  ;;  %v11737_v25 = vadd.f32 %v11628_v19, %v2770_v44  ;;  %v7797_v44 = vld [vmem:[%s14694_s8 + $0x30] sm:$0xf] }
 0x8ae   :  { %v11683_v30 = vsub.f32 %v11632_v63, %v2824_v0 }
 0x8b0   :  { %v2856_v11 = vmul.f32 %v11683_v30, %v11683_v30 }
 0x8b2   :  { %2872 = vadd.xlane.f32.xlu1 %v2856_v11  ;;  %v8498_v11 = vld [vmem:[%s14694_s8 + $0x74] sm:$0xf0] }
 0x8b7   :  { %v2795_v33 = vpop.xlane.xlu0 %2794 }
 0x8b8   :  { %v2825_v62 = vmul.f32 %v2795_v33, %v14829_v31  ;;  %v7830_v33 = vor.u32 %v8498_v11, %v7829_v24 }
 0x8ba   :  { %v11693_v53 = vsub.f32 %v11637_v20, %v2825_v62  ;;  %2806 = vadd.xlane.f32.xlu1 %v11689_v36  ;;  %v7831_v62 = vld [vmem:[%s14694_s8 + $0x78] sm:$0xf0]  ;;  %3256 = vmatpush.bf16.msrb.mxu1 %v7830_v33  ;;  %v8485_v33 = vld [vmem:[%s14694_s8 + $0x14] sm:$0xf] }
 0x8bb   :  { %v7834_v58 = vor.u32 %v8497_v14, %v7831_v62  ;;  %v7781_v14 = vld [vmem:[%s14694_s8 + $0x10] sm:$0xf] }
 0x8bc   :  { %v2857_v23 = vmul.f32 %v11693_v53, %v11693_v53 }
 0x8bd   :  { %3305 = vmatpush.bf16.msrb.mxu2 %v7834_v58 }
 0x8be   :  { %v2797_v32 = vpop.xlane.xlu2 %2796  ;;  %2874 = vadd.xlane.f32.xlu0 %v2857_v23 }
 0x8bf   :  { %v2826_v45 = vmul.f32 %v2797_v32, %v14829_v31  ;;  %v7821_v32 = vld [vmem:[%s14694_s8 + $0x60] sm:$0xf] }
 0x8c1   :  { %v11704_v38 = vsub.f32 %v11642_v34, %v2826_v45  ;;  %v8496_v45 = vld [vmem:[%s14694_s8 + $0x64] sm:$0xf0] }
 0x8c2   :  { %2808 = vadd.xlane.f32.xlu1 %v11701_v55 }
 0x8c3   :  { %v2858_v41 = vmul.f32 %v11704_v38, %v11704_v38 }
 0x8c6   :  { %v2799_v52 = vpop.xlane.xlu1 %2798  ;;  %2876 = vadd.xlane.f32.xlu0 %v2858_v41  ;;  %v7822_v41 = vor.u32 %v8496_v45, %v7821_v32  ;;  %v7773_v32 = vld [vmem:[%s14694_s8] sm:$0xf]  ;;  %v8484_v45 = vld [vmem:[%s14694_s8 + $0x4] sm:$0xf0] }
 0x8c7   :  { %v2827_v1 = vmul.f32 %v2799_v52, %v14829_v31  ;;  %v7823_v52 = vld [vmem:[%s14694_s8 + $0x68] sm:$0xf0] }
 0x8c8   :  { %3257 = vmatpush.bf16.msrb.mxu1 %v7822_v41  ;;  %v7774_v41 = vor.u32 %v8484_v45, %v7773_v32  ;;  %v11880_v32 = vperm.slane %v11625_v2, 2 }
 0x8c9   :  { %v11712_v60 = vsub.f32 %v11647_v7, %v2827_v1  ;;  %v7826_v1 = vor.u32 %v8495_v51, %v7823_v52  ;;  %v8483_v51 = vld [vmem:[%s14694_s8 + $0x4] sm:$0xf]  ;;  %v7775_v52 = vld [vmem:[%s14694_s8 + $0x8] sm:$0xf0] }
 0x8ca   :  { %v7778_v57 = vor.u32 %v8483_v51, %v7775_v52 }
 0x8cb   :  { %v2859_v43 = vmul.f32 %v11712_v60, %v11712_v60  ;;  %3306 = vmatpush.bf16.msrb.mxu2 %v7826_v1 }
 0x8cc   :  { %3258 = vmatpush.bf16.msrb.mxu1 %v7814_v54 }
 0x8cd   :  { %2878 = vadd.xlane.f32.xlu2 %v2859_v43  ;;  %v8493_v43 = vld [vmem:[%s14694_s8 + $0x54] sm:$0xf] }
 0x8ce   :  { %2810 = vadd.xlane.f32.xlu0 %v11717_v9  ;;  %v7818_v27 = vor.u32 %v8493_v43, %v7815_v46 }
 0x8d0   :  { %3307 = vmatpush.bf16.msrb.mxu2 %v7818_v27 }
 0x8d6   :  { %2812 = vadd.xlane.f32.xlu0 %v11722_v6 }
 0x8d9   :  { %v2801_v8 = vpop.xlane.xlu0 %2800 }
 0x8da   :  { %v2828_v22 = vmul.f32 %v2801_v8, %v14829_v31  ;;  %v7805_v8 = vld [vmem:[%s14694_s8 + $0x40] sm:$0xf] }
 0x8dc   :  { %v11727_v37 = vsub.f32 %v11652_v12, %v2828_v22  ;;  %v8492_v22 = vld [vmem:[%s14694_s8 + $0x44] sm:$0xf0] }
 0x8dd   :  { %v7806_v35 = vor.u32 %v8492_v22, %v7805_v8 }
 0x8de   :  { %v2860_v17 = vmul.f32 %v11727_v37, %v11727_v37 }
 0x8df   :  { %3259 = vmatpush.bf16.msrb.mxu1 %v7806_v35 }
 0x8e0   :  { %2880 = vadd.xlane.f32.xlu2 %v2860_v17  ;;  %v8491_v17 = vld [vmem:[%s14694_s8 + $0x44] sm:$0xf] }
 0x8e1   :  { %v2803_v40 = vpop.xlane.xlu2 %2802 }
 0x8e2   :  { %v2829_v21 = vmul.f32 %v2803_v40, %v14829_v31  ;;  %v7807_v40 = vld [vmem:[%s14694_s8 + $0x48] sm:$0xf0] }
 0x8e3   :  { %v7810_v26 = vor.u32 %v8491_v17, %v7807_v40 }
 0x8e4   :  { %v11734_v13 = vsub.f32 %v11657_v56, %v2829_v21  ;;  %v8490_v21 = vld [vmem:[%s14694_s8 + $0x34] sm:$0xf0] }
 0x8e5   :  { %3308 = vmatpush.bf16.msrb.mxu2 %v7810_v26 }
 0x8e6   :  { %v2861_v28 = vmul.f32 %v11734_v13, %v11734_v13 }
 0x8e8   :  { %2882 = vadd.xlane.f32.xlu1 %v2861_v28  ;;  %2814 = vadd.xlane.f32.xlu2 %v11737_v25  ;;  %v8489_v28 = vld [vmem:[%s14694_s8 + $0x34] sm:$0xf] }
 0x8f8   :  { %v2749_v3 = vpop.f32.mrf.mxu0 }
 0x8f9   :  { %v2771_v15 = vadd.f32 %v2749_v3, %v14835_v10  ;;  %v2805_v42 = vpop.xlane.xlu2 %2804  ;;  %v7798_v3 = vor.u32 %v8490_v21, %v7797_v44  ;;  %v7799_v10 = vld [vmem:[%s14694_s8 + $0x38] sm:$0xf0] }
 0x8fa   :  { %v2830_v48 = vmul.f32 %v2805_v42, %v14829_v31  ;;  %v7789_v42 = vld [vmem:[%s14694_s8 + $0x20] sm:$0xf] }
 0x8fb   :  { %v11745_v50 = vadd.f32 %v11628_v19, %v2771_v15  ;;  %v7802_v15 = vor.u32 %v8489_v28, %v7799_v10  ;;  %3260 = vmatpush.bf16.msrb.mxu1 %v7798_v3 }
 0x8fc   :  { %v11748_v5 = vsub.f32 %v11670_v29, %v2830_v48  ;;  %v8488_v48 = vld [vmem:[%s14694_s8 + $0x24] sm:$0xf0] }
 0x8fd   :  { %2816 = vadd.xlane.f32.xlu2 %v11745_v50  ;;  %3309 = vmatpush.bf16.msrb.mxu2 %v7802_v15 }
 0x8fe   :  { %v2862_v61 = vmul.f32 %v11748_v5, %v11748_v5 }
 0x900   :  { %2884 = vadd.xlane.f32.xlu1 %v2862_v61  ;;  %v2751_v39 = vpop.f32.mrf.mxu0  ;;  %v8487_v61 = vld [vmem:[%s14694_s8 + $0x24] sm:$0xf] }
 0x901   :  { %v2772_v4 = vadd.f32 %v2751_v39, %v14836_v16  ;;  %v7790_v39 = vor.u32 %v8488_v48, %v7789_v42  ;;  %v7791_v16 = vld [vmem:[%s14694_s8 + $0x28] sm:$0xf0] }
 0x902   :  { %v7794_v24 = vor.u32 %v8487_v61, %v7791_v16 }
 0x903   :  { %v11755_v0 = vadd.f32 %v11628_v19, %v2772_v4  ;;  %3261 = vmatpush.bf16.msrb.mxu1 %v7790_v39 }
 0x904   :  { %3310 = vmatpush.bf16.msrb.mxu2 %v7794_v24 }
 0x908   :  { %2818 = vadd.xlane.f32.xlu1 %v11755_v0 }
 0x910   :  { %v2754_v59 = vpop.f32.mrf.mxu0 }
 0x911   :  { %v2773_v49 = vadd.f32 %v2754_v59, %v14837_v47  ;;  %v8486_v59 = vld [vmem:[%s14694_s8 + $0x14] sm:$0xf0] }
 0x912   :  { %v7782_v47 = vor.u32 %v8486_v59, %v7781_v14 }
 0x913   :  { %v11772_v23 = vadd.f32 %v11628_v19, %v2773_v49  ;;  %v7783_v49 = vld [vmem:[%s14694_s8 + $0x18] sm:$0xf0] }
 0x914   :  { %v7786_v58 = vor.u32 %v8485_v33, %v7783_v49  ;;  %3262 = vmatpush.bf16.msrb.mxu1 %v7782_v47 }
 0x915   :  { %2820 = vadd.xlane.f32.xlu1 %v11772_v23 }
 0x916   :  { %3311 = vmatpush.bf16.msrb.mxu2 %v7786_v58 }
 0x918   :  { %3263 = vmatpush.bf16.msrb.mxu1 %v7774_v41  ;;  %v2756_v42 = vpop.f32.mrf.mxu0 }
 0x91a   :  { %3312 = vmatpush.bf16.msrb.mxu2 %v7778_v57 }
 0x925   :  { %v2873_v4 = vpop.xlane.xlu1 %2872 }
 0x926   :  { %v2904_v11 = vmul.f32 %v2873_v4, %v14829_v31  ;;  %v14838_v4 = vld [vmem:[#allocation18_spill] sm:$0xff] }
 0x927   :  { %v2774_v24 = vadd.f32 %v2756_v42, %v14838_v4 }
 0x928   :  { %v2920_v62 = vadd.f32 1e-05, %v2904_v11 }
 0x929   :  { %v11877_v58 = vadd.f32 %v11628_v19, %v2774_v24 }
 0x92a   :  { %9212 = vrsqrt.f32 %v2920_v62  ;;  %vm2942_vm8 = vweird.f32 %v2920_v62 }
 0x92d   :  { %v2807_v1 = vpop.xlane.xlu1 %2806 }
 0x92e   :  { %v2831_v18 = vmul.f32 %v2807_v1, %v14829_v31 }
 0x930   :  { %v9213_v43 = vpop.eup %9212  ;;  %v11862_v54 = vsub.f32 %v11689_v36, %v2831_v18 }
 0x931   :  { %v2937_v46 = vmul.f32 %v9213_v43, %v2920_v62  ;;  %v2875_v27 = vpop.xlane.xlu0 %2874  ;;  %vm2943_vm7 = vweird.f32 %v9213_v43 }
 0x932   :  { %v2905_v8 = vmul.f32 %v2875_v27, %v14829_v31  ;;  %v2863_v22 = vmul.f32 %v11862_v54, %v11862_v54  ;;  %vm2944_vm9 = vmor %vm2942_vm8, %vm2943_vm7  ;;  %v11892_v27 = vperm.slane %v11625_v2, 3 }
 0x933   :  { %v2938_v17 = vmul.f32 %v9213_v43, %v2937_v46 }
 0x934   :  { %v2921_v35 = vadd.f32 1e-05, %v2905_v8  ;;  %2886 = vadd.xlane.f32.xlu0 %v2863_v22 }
 0x935   :  { %v2939_v40 = vmul.f32 0.5, %v2938_v17  ;;  %v2809_v26 = vpop.xlane.xlu1 %2808 }
 0x936   :  { %9214 = vrsqrt.f32 %v2921_v35  ;;  %v2832_v44 = vmul.f32 %v2809_v26, %v14829_v31  ;;  %vm2952_vm11 = vweird.f32 %v2921_v35 }
 0x937   :  { %v2940_v21 = vsub.f32 1.5, %v2939_v40 }
 0x938   :  { %v11869_v28 = vsub.f32 %v11701_v55, %v2832_v44 }
 0x939   :  { %v2877_v3 = vpop.xlane.xlu0 %2876  ;;  %v2941_v61 = vmul.f32 %v9213_v43, %v2940_v21 }
 0x93a   :  { %v2906_v10 = vmul.f32 %v2877_v3, %v14829_v31  ;;  %v2864_v15 = vmul.f32 %v11869_v28, %v11869_v28 }
 0x93b   :  { %v2945_v14 = vsel %vm2944_vm9, %v9213_v43, %v2941_v61 }
 0x93c   :  { %v9215_v48 = vpop.eup %9214  ;;  %v2922_v39 = vadd.f32 1e-05, %v2906_v10  ;;  %2888 = vadd.xlane.f32.xlu0 %v2864_v15  ;;  %v3096_v51 = vmul.f32 %v2945_v14, %v11683_v30 }
 0x93d   :  { %v2947_v16 = vmul.f32 %v9215_v48, %v2921_v35  ;;  %vm2953_vm10 = vweird.f32 %v9215_v48 }
 0x93e   :  { %9216 = vrsqrt.f32 %v2922_v39  ;;  %vm2954_vm12 = vmor %vm2952_vm11, %vm2953_vm10  ;;  %v3113_v43 = vmul.f32 %v11880_v32, %v3096_v51  ;;  %vm2962_vm14 = vweird.f32 %v2922_v39 }
 0x93f   :  { %v2948_v11 = vmul.f32 %v9215_v48, %v2947_v16 }
 0x940   :  { %v2879_v59 = vpop.xlane.xlu2 %2878  ;;  %v3130_v21 = vadd.f32 %v11892_v27, %v3113_v43 }
 0x941   :  { %v2949_v33 = vmul.f32 0.5, %v2948_v11  ;;  %v2907_v47 = vmul.f32 %v2879_v59, %v14829_v31  ;;  %v2811_v49 = vpop.xlane.xlu0 %2810 }
 0x942   :  { %v2833_v45 = vmul.f32 %v2811_v49, %v14829_v31 }
 0x943   :  { %v2950_v62 = vsub.f32 1.5, %v2949_v33  ;;  %v2923_v41 = vadd.f32 1e-05, %v2907_v47 }
 0x944   :  { %v9217_v52 = vpop.eup %9216  ;;  %v11885_v1 = vsub.f32 %v11717_v9, %v2833_v45  ;;  %2822 = vadd.xlane.f32.xlu0 %v11877_v58 }
 0x945   :  { %v2951_v57 = vmul.f32 %v9215_v48, %v2950_v62  ;;  %v2957_v19 = vmul.f32 %v9217_v52, %v2922_v39  ;;  %9218 = vrsqrt.f32 %v2923_v41  ;;  %vm2963_vm13 = vweird.f32 %v9217_v52 }
 0x946   :  { %v2865_v18 = vmul.f32 %v11885_v1, %v11885_v1  ;;  %vm2964_vm15 = vmor %vm2962_vm14, %vm2963_vm13  ;;  %vm2972_vm1 = vweird.f32 %v2923_v41 }
 0x947   :  { %v2955_v30 = vsel %vm2954_vm12, %v9215_v48, %v2951_v57  ;;  %v2958_v46 = vmul.f32 %v9217_v52, %v2957_v19 }
 0x948   :  { %v3097_v8 = vmul.f32 %v2955_v30, %v11693_v53  ;;  %2890 = vadd.xlane.f32.xlu2 %v2865_v18 }
 0x949   :  { %v2959_v22 = vmul.f32 0.5, %v2958_v46  ;;  %v2813_v17 = vpop.xlane.xlu0 %2812 }
 0x94a   :  { %v3114_v35 = vmul.f32 %v11880_v32, %v3097_v8  ;;  %v2834_v40 = vmul.f32 %v2813_v17, %v14829_v31 }
 0x94b   :  { %v9219_v26 = vpop.eup %9218  ;;  %v2960_v44 = vsub.f32 1.5, %v2959_v22 }
 0x94c   :  { %v2967_v3 = vmul.f32 %v9219_v26, %v2923_v41  ;;  %v11899_v10 = vsub.f32 %v11722_v6, %v2834_v40  ;;  %v3131_v2 = vadd.f32 %v11892_v27, %v3114_v35  ;;  %vm2973_vm0 = vweird.f32 %v9219_v26 }
 0x94d   :  { %v2961_v15 = vmul.f32 %v9217_v52, %v2960_v44  ;;  %vm2974_vm2 = vmor %vm2972_vm1, %vm2973_vm0 }
 0x94e   :  { %v2968_v53 = vmul.f32 %v9219_v26, %v2967_v3  ;;  %v3146_v42 = vpack.c.bf16 %v3131_v2, %v3130_v21  ;;  %v2866_v48 = vmul.f32 %v11899_v10, %v11899_v10 }
 0x94f   :  { %v2965_v61 = vsel %vm2964_vm15, %v9217_v52, %v2961_v15 }
 0x950   :  { %v2969_v16 = vmul.f32 0.5, %v2968_v53  ;;  %3264 = vmatmul.bf16.vlgmr.msrb.gmra.mxu1 %v3146_v42  ;;  %3313 = vmatmul.bf16.vlgmr.msrb.gmra.mxu2 %v3146_v42  ;;  %v3098_v11 = vmul.f32 %v2965_v61, %v11704_v38 }
 0x951   :  { %2892 = vadd.xlane.f32.xlu2 %v2866_v48 }
 0x952   :  { %v2970_v4 = vsub.f32 1.5, %v2969_v16  ;;  %v3115_v49 = vmul.f32 %v11880_v32, %v3098_v11 }
 0x953   :  { %v2881_v24 = vpop.xlane.xlu2 %2880 }
 0x954   :  { %v2971_v14 = vmul.f32 %v9219_v26, %v2970_v4  ;;  %v2908_v39 = vmul.f32 %v2881_v24, %v14829_v31  ;;  %v3132_v52 = vadd.f32 %v11892_v27, %v3115_v49 }
 0x956   :  { %v2975_v59 = vsel %vm2974_vm2, %v9219_v26, %v2971_v14  ;;  %v2924_v33 = vadd.f32 1e-05, %v2908_v39 }
 0x957   :  { %v3099_v47 = vmul.f32 %v2975_v59, %v11712_v60 }
 0x958   :  { %9220 = vrsqrt.f32 %v2924_v33  ;;  %vm2982_vm7 = vweird.f32 %v2924_v33 }
 0x959   :  { %v3116_v45 = vmul.f32 %v11880_v32, %v3099_v47 }
 0x95b   :  { %v2883_v51 = vpop.xlane.xlu1 %2882  ;;  %v2815_v62 = vpop.xlane.xlu2 %2814  ;;  %v3133_v38 = vadd.f32 %v11892_v27, %v3116_v45 }
 0x95c   :  { %v2909_v41 = vmul.f32 %v2883_v51, %v14829_v31  ;;  %v2835_v57 = vmul.f32 %v2815_v62, %v14829_v31 }
 0x95d   :  { %v3147_v19 = vpack.c.bf16 %v3133_v38, %v3132_v52 }
 0x95e   :  { %v9221_v18 = vpop.eup %9220  ;;  %v2925_v43 = vadd.f32 1e-05, %v2909_v41  ;;  %v11914_v60 = vsub.f32 %v11737_v25, %v2835_v57 }
 0x95f   :  { %v2977_v30 = vmul.f32 %v9221_v18, %v2924_v33  ;;  %vm2983_vm3 = vweird.f32 %v9221_v18 }
 0x960   :  { %9222 = vrsqrt.f32 %v2925_v43  ;;  %3269 = vmatmul.bf16.gmra.mxu1 %v3147_v19  ;;  %3318 = vmatmul.bf16.gmra.mxu2 %v3147_v19  ;;  %v2867_v46 = vmul.f32 %v11914_v60, %v11914_v60  ;;  %vm2984_vm8 = vmor %vm2982_vm7, %vm2983_vm3  ;;  %vm2992_vm10 = vweird.f32 %v2925_v43  ;;  %v8506_v19 = vld [vmem:[%s14695_s10 + $0x38] sm:$0xff] }
 0x961   :  { %v2978_v8 = vmul.f32 %v9221_v18, %v2977_v30  ;;  %3530 = vmatpush.bf16.msra.mxu3 %v8506_v19  ;;  %v8514_v30 = vld [vmem:[%s14695_s10 + $0x78] sm:$0xff] }
 0x962   :  { %2894 = vadd.xlane.f32.xlu1 %v2867_v46  ;;  %3579 = vmatpush.bf16.msra.mxu0 %v8514_v30 }
 0x963   :  { %v2979_v22 = vmul.f32 0.5, %v2978_v8  ;;  %v8504_v8 = vld [vmem:[%s14695_s10 + $0x28] sm:$0xff] }
 0x965   :  { %v2980_v17 = vsub.f32 1.5, %v2979_v22  ;;  %v8513_v22 = vld [vmem:[%s14695_s10 + $0x70] sm:$0xff] }
 0x966   :  { %v9223_v35 = vpop.eup %9222  ;;  %3580 = vmatpush.bf16.msra.mxu0 %v8513_v22 }
 0x967   :  { %v2981_v40 = vmul.f32 %v9221_v18, %v2980_v17  ;;  %v2987_v26 = vmul.f32 %v9223_v35, %v2925_v43  ;;  %vm2993_vm9 = vweird.f32 %v9223_v35  ;;  %v8505_v43 = vld [vmem:[%s14695_s10 + $0x30] sm:$0xff] }
 0x968   :  { %vm2994_vm11 = vmor %vm2992_vm10, %vm2993_vm9  ;;  %3531 = vmatpush.bf16.msra.mxu3 %v8505_v43 }
 0x969   :  { %v2988_v44 = vmul.f32 %v9223_v35, %v2987_v26  ;;  %v2985_v21 = vsel %vm2984_vm8, %v9221_v18, %v2981_v40  ;;  %v8503_v26 = vld [vmem:[%s14695_s10 + $0x20] sm:$0xff] }
 0x96a   :  { %v3100_v15 = vmul.f32 %v2985_v21, %v11727_v37  ;;  %v8512_v21 = vld [vmem:[%s14695_s10 + $0x68] sm:$0xff] }
 0x96b   :  { %v2989_v3 = vmul.f32 0.5, %v2988_v44  ;;  %3581 = vmatpush.bf16.msra.mxu0 %v8512_v21 }
 0x96c   :  { %v3117_v4 = vmul.f32 %v11880_v32, %v3100_v15  ;;  %3532 = vmatpush.bf16.msra.mxu3 %v8504_v8  ;;  %v8511_v15 = vld [vmem:[%s14695_s10 + $0x60] sm:$0xff] }
 0x96d   :  { %v2990_v2 = vsub.f32 1.5, %v2989_v3 }
 0x96e   :  { %v3134_v39 = vadd.f32 %v11892_v27, %v3117_v4 }
 0x96f   :  { %v2991_v53 = vmul.f32 %v9223_v35, %v2990_v2  ;;  %v8502_v2 = vld [vmem:[%s14695_s10 + $0x18] sm:$0xff]  ;;  %3582 = vmatpush.bf16.msra.mxu0 %v8511_v15 }
 0x970   :  { %v2817_v42 = vpop.xlane.xlu2 %2816  ;;  %3533 = vmatpush.bf16.msra.mxu3 %v8503_v26 }
 0x971   :  { %v2995_v48 = vsel %vm2994_vm11, %v9223_v35, %v2991_v53  ;;  %v2836_v61 = vmul.f32 %v2817_v42, %v14829_v31 }
 0x972   :  { %v3101_v16 = vmul.f32 %v2995_v48, %v11734_v13 }
 0x973   :  { %v11923_v24 = vsub.f32 %v11745_v50, %v2836_v61  ;;  %v2885_v11 = vpop.xlane.xlu1 %2884  ;;  %v8501_v61 = vld [vmem:[%s14695_s10 + $0x10] sm:$0xff] }
 0x974   :  { %v3118_v14 = vmul.f32 %v11880_v32, %v3101_v16  ;;  %v2910_v41 = vmul.f32 %v2885_v11, %v14829_v31  ;;  %3534 = vmatpush.bf16.msra.mxu3 %v8502_v2  ;;  %v8510_v11 = vld [vmem:[%s14695_s10 + $0x58] sm:$0xff] }
 0x975   :  { %v2868_v37 = vmul.f32 %v11923_v24, %v11923_v24  ;;  %3583 = vmatpush.bf16.msra.mxu0 %v8510_v11 }
 0x976   :  { %v3135_v59 = vadd.f32 %v11892_v27, %v3118_v14  ;;  %v2926_v57 = vadd.f32 1e-05, %v2910_v41 }
 0x977   :  { %2896 = vadd.xlane.f32.xlu0 %v2868_v37 }
 0x978   :  { %v3148_v33 = vpack.c.bf16 %v3135_v59, %v3134_v39  ;;  %9224 = vrsqrt.f32 %v2926_v57  ;;  %3535 = vmatpush.bf16.msra.mxu3 %v8501_v61  ;;  %v8500_v39 = vld [vmem:[%s14695_s10 + $0x8] sm:$0xff]  ;;  %vm3002_vm13 = vweird.f32 %v2926_v57 }
 0x97a   :  { %3274 = vmatmul.bf16.gmra.mxu1 %v3148_v33  ;;  %3323 = vmatmul.bf16.gmra.mxu2 %v3148_v33  ;;  %v8509_v33 = vld [vmem:[%s14695_s10 + $0x50] sm:$0xff] }
 0x97b   :  { %v2819_v13 = vpop.xlane.xlu1 %2818  ;;  %3584 = vmatpush.bf16.msra.mxu0 %v8509_v33 }
 0x97c   :  { %v2837_v47 = vmul.f32 %v2819_v13, %v14829_v31  ;;  %3536 = vmatpush.bf16.msra.mxu3 %v8500_v39 }
 0x97e   :  { %v11932_v49 = vsub.f32 %v11755_v0, %v2837_v47  ;;  %v9225_v18 = vpop.eup %9224 }
 0x97f   :  { %v2997_v46 = vmul.f32 %v9225_v18, %v2926_v57  ;;  %vm3003_vm12 = vweird.f32 %v9225_v18 }
 0x980   :  { %v2869_v45 = vmul.f32 %v11932_v49, %v11932_v49  ;;  %vm3004_vm14 = vmor %vm3002_vm13, %vm3003_vm12 }
 0x981   :  { %v2998_v17 = vmul.f32 %v9225_v18, %v2997_v46 }
 0x982   :  { %2898 = vadd.xlane.f32.xlu2 %v2869_v45 }
 0x983   :  { %v2999_v3 = vmul.f32 0.5, %v2998_v17 }
 0x985   :  { %v3000_v53 = vsub.f32 1.5, %v2999_v3 }
 0x987   :  { %v3001_v14 = vmul.f32 %v9225_v18, %v3000_v53 }
 0x988   :  { %v2821_v51 = vpop.xlane.xlu1 %2820 }
 0x989   :  { %v2838_v62 = vmul.f32 %v2821_v51, %v14829_v31  ;;  %v3005_v13 = vsel %vm3004_vm14, %v9225_v18, %v3001_v14  ;;  %v8508_v18 = vld [vmem:[%s14695_s10 + $0x48] sm:$0xff] }
 0x98a   :  { %v3102_v19 = vmul.f32 %v3005_v13, %v11748_v5  ;;  %3585 = vmatpush.bf16.msra.mxu0 %v8508_v18  ;;  %v3170_v13 = vld [vmem:[%s14696_s9] sm:$0x3] }
 0x98b   :  { %v11938_v52 = vsub.f32 %v11772_v23, %v2838_v62  ;;  %v8499_v62 = vld [vmem:[%s14695_s10] sm:$0xff] }
 0x98c   :  { %3537 = vmatpush.bf16.msra.mxu3 %v8499_v62  ;;  %v3119_v26 = vmul.f32 %v11880_v32, %v3102_v19 }
 0x98d   :  { %v2870_v38 = vmul.f32 %v11938_v52, %v11938_v52 }
 0x98e   :  { %v3136_v2 = vadd.f32 %v11892_v27, %v3119_v26 }
 0x98f   :  { %2900 = vadd.xlane.f32.xlu1 %v2870_v38 }
 0x9a7   :  { %v2887_v35 = vpop.xlane.xlu0 %2886 }
 0x9a8   :  { %v2911_v40 = vmul.f32 %v2887_v35, %v14829_v31 }
 0x9aa   :  { %v2927_v44 = vadd.f32 1e-05, %v2911_v40 }
 0x9ac   :  { %9226 = vrsqrt.f32 %v2927_v44  ;;  %vm3012_vm0 = vweird.f32 %v2927_v44 }
 0x9af   :  { %v2889_v42 = vpop.xlane.xlu0 %2888 }
 0x9b0   :  { %v2912_v48 = vmul.f32 %v2889_v42, %v14829_v31 }
 0x9b2   :  { %v9227_v16 = vpop.eup %9226  ;;  %v11975_v4 = vadd.f32 1e-05, %v2912_v48 }
 0x9b3   :  { %v3007_v37 = vmul.f32 %v9227_v16, %v2927_v44  ;;  %vm3013_vm15 = vweird.f32 %v9227_v16  ;;  %v8507_v44 = vld [vmem:[%s14695_s10 + $0x40] sm:$0xff] }
 0x9b4   :  { %9228 = vrsqrt.f32 %v11975_v4  ;;  %vm3014_vm1 = vmor %vm3012_vm0, %vm3013_vm15  ;;  %3586 = vmatpush.bf16.msra.mxu0 %v8507_v44  ;;  %vm3022_vm3 = vweird.f32 %v11975_v4 }
 0x9b5   :  { %v3008_v59 = vmul.f32 %v9227_v16, %v3007_v37 }
 0x9b7   :  { %v3009_v47 = vmul.f32 0.5, %v3008_v59  ;;  %v2823_v45 = vpop.xlane.xlu0 %2822 }
 0x9b8   :  { %v2839_v51 = vmul.f32 %v2823_v45, %v14829_v31 }
 0x9b9   :  { %v3010_v38 = vsub.f32 1.5, %v3009_v47 }
 0x9ba   :  { %v9229_v41 = vpop.eup %9228  ;;  %v11992_v57 = vsub.f32 %v11877_v58, %v2839_v51 }
 0x9bb   :  { %v3011_v43 = vmul.f32 %v9227_v16, %v3010_v38  ;;  %v3017_v30 = vmul.f32 %v9229_v41, %v11975_v4  ;;  %v2891_v46 = vpop.xlane.xlu2 %2890  ;;  %vm3023_vm2 = vweird.f32 %v9229_v41  ;;  %v12016_v38 = vperm.slane %v3170_v13, 0 }
 0x9bc   :  { %v2913_v8 = vmul.f32 %v2891_v46, %v14829_v31  ;;  %v2871_v22 = vmul.f32 %v11992_v57, %v11992_v57  ;;  %vm3024_vm7 = vmor %vm3022_vm3, %vm3023_vm2 }
 0x9bd   :  { %v3015_v17 = vsel %vm3014_vm1, %v9227_v16, %v3011_v43  ;;  %v3018_v35 = vmul.f32 %v9229_v41, %v3017_v30 }
 0x9be   :  { %v2929_v5 = vadd.f32 1e-05, %v2913_v8  ;;  %2902 = vadd.xlane.f32.xlu0 %v2871_v22  ;;  %v3103_v40 = vmul.f32 %v3015_v17, %v11862_v54 }
 0x9bf   :  { %v3019_v21 = vmul.f32 0.5, %v3018_v35  ;;  %v12022_v35 = vperm.slane %v3170_v13, 1 }
 0x9c0   :  { %9230 = vrsqrt.f32 %v2929_v5  ;;  %v3120_v3 = vmul.f32 %v11880_v32, %v3103_v40  ;;  %vm3032_vm9 = vweird.f32 %v2929_v5 }
 0x9c1   :  { %v3020_v53 = vsub.f32 1.5, %v3019_v21 }
 0x9c2   :  { %v3137_v15 = vadd.f32 %v11892_v27, %v3120_v3 }
 0x9c3   :  { %v3021_v14 = vmul.f32 %v9229_v41, %v3020_v53 }
 0x9c4   :  { %v2893_v42 = vpop.xlane.xlu2 %2892  ;;  %v3149_v48 = vpack.c.bf16 %v3137_v15, %v3136_v2 }
 0x9c5   :  { %v2914_v54 = vmul.f32 %v2893_v42, %v14829_v31  ;;  %v3025_v59 = vsel %vm3024_vm7, %v9229_v41, %v3021_v14 }
 0x9c6   :  { %v9231_v61 = vpop.eup %9230  ;;  %3279 = vmatmul.bf16.gmra.mxu1 %v3149_v48  ;;  %3328 = vmatmul.bf16.gmra.mxu2 %v3149_v48  ;;  %v3104_v62 = vmul.f32 %v3025_v59, %v11869_v28 }
 0x9c7   :  { %v3027_v16 = vmul.f32 %v9231_v61, %v2929_v5  ;;  %v2930_v11 = vadd.f32 1e-05, %v2914_v54  ;;  %vm3033_vm8 = vweird.f32 %v9231_v61 }
 0x9c8   :  { %vm3034_vm10 = vmor %vm3032_vm9, %vm3033_vm8  ;;  %v3121_v43 = vmul.f32 %v11880_v32, %v3104_v62 }
 0x9c9   :  { %v3028_v37 = vmul.f32 %v9231_v61, %v3027_v16  ;;  %9232 = vrsqrt.f32 %v2930_v11  ;;  %vm3042_vm12 = vweird.f32 %v2930_v11 }
 0x9ca   :  { %v3138_v40 = vadd.f32 %v11892_v27, %v3121_v43 }
 0x9cb   :  { %v3029_v39 = vmul.f32 0.5, %v3028_v37 }
 0x9cd   :  { %v3030_v33 = vsub.f32 1.5, %v3029_v39  ;;  %v3265_v47 = vpop.f32.mrf.mxu1 }
 0x9ce   :  { %v3266_v30 = vadd.f32 %v3265_v47, %v12016_v38 }
 0x9cf   :  { %v9233_v45 = vpop.eup %9232  ;;  %v3031_v51 = vmul.f32 %v9231_v61, %v3030_v33 }
 0x9d0   :  { %v3037_v4 = vmul.f32 %v9233_v45, %v2930_v11  ;;  %v3354_v26 = vmax.f32 %v3266_v30, 0.0  ;;  %vm3043_vm11 = vweird.f32 %v9233_v45 }
 0x9d1   :  { %v3035_v19 = vsel %vm3034_vm10, %v9231_v61, %v3031_v51  ;;  %vm3044_vm13 = vmor %vm3042_vm12, %vm3043_vm11 }
 0x9d2   :  { %v3105_v18 = vmul.f32 %v3035_v19, %v11885_v1  ;;  %v3038_v8 = vmul.f32 %v9233_v45, %v3037_v4 }
 0x9d3   :  { %v3314_v41 = vpop.f32.mrf.mxu2 }
 0x9d4   :  { %v3122_v46 = vmul.f32 %v11880_v32, %v3105_v18  ;;  %v3039_v3 = vmul.f32 0.5, %v3038_v8  ;;  %v3315_v15 = vadd.f32 %v3314_v41, %v12022_v35 }
 0x9d5   :  { %v3267_v22 = vpop.f32.mrf.mxu1  ;;  %v2895_v17 = vpop.xlane.xlu1 %2894 }
 0x9d6   :  { %v3268_v28 = vadd.f32 %v3267_v22, %v12016_v38  ;;  %v2915_v5 = vmul.f32 %v2895_v17, %v14829_v31  ;;  %v3139_v1 = vadd.f32 %v11892_v27, %v3122_v46  ;;  %v3040_v54 = vsub.f32 1.5, %v3039_v3 }
 0x9d7   :  { %v3355_v16 = vmax.f32 %v3315_v15, 0.0 }
 0x9d8   :  { %v3356_v44 = vmax.f32 %v3268_v28, 0.0  ;;  %v2931_v21 = vadd.f32 1e-05, %v2915_v5  ;;  %v3150_v2 = vpack.c.bf16 %v3139_v1, %v3138_v40  ;;  %v3041_v59 = vmul.f32 %v9233_v45, %v3040_v54 }
 0x9da   :  { %v3386_v53 = vpack.c.bf16 %v3356_v44, %v3354_v26  ;;  %9234 = vrsqrt.f32 %v2931_v21  ;;  %3284 = vmatmul.bf16.gmra.mxu1 %v3150_v2  ;;  %3333 = vmatmul.bf16.gmra.mxu2 %v3150_v2  ;;  %v3045_v62 = vsel %vm3044_vm13, %v9233_v45, %v3041_v59  ;;  %vm3052_vm15 = vweird.f32 %v2931_v21 }
 0x9db   :  { %v3316_v42 = vpop.f32.mrf.mxu2  ;;  %v3106_v46 = vmul.f32 %v3045_v62, %v11899_v10 }
 0x9dc   :  { %v3317_v48 = vadd.f32 %v3316_v42, %v12022_v35  ;;  %3538 = vmatmul.bf16.vlgmr.msra.gmra.mxu3 %v3386_v53 }
 0x9dd   :  { %v3270_v61 = vpop.f32.mrf.mxu1  ;;  %v3123_v26 = vmul.f32 %v11880_v32, %v3106_v46 }
 0x9de   :  { %v3357_v14 = vmax.f32 %v3317_v48, 0.0  ;;  %v3271_v51 = vadd.f32 %v3270_v61, %v12016_v38 }
 0x9df   :  { %v3140_v15 = vadd.f32 %v11892_v27, %v3123_v26 }
 0x9e0   :  { %v9235_v37 = vpop.eup %9234  ;;  %v3387_v39 = vpack.c.bf16 %v3357_v14, %v3355_v16  ;;  %v3358_v43 = vmax.f32 %v3271_v51, 0.0 }
 0x9e1   :  { %v3047_v33 = vmul.f32 %v9235_v37, %v2931_v21  ;;  %vm3053_vm14 = vweird.f32 %v9235_v37 }
 0x9e2   :  { %3587 = vmatmul.bf16.vlgmr.msra.gmra.mxu0 %v3387_v39  ;;  %vm3054_vm0 = vmor %vm3052_vm15, %vm3053_vm14 }
 0x9e3   :  { %v3048_v13 = vmul.f32 %v9235_v37, %v3047_v33  ;;  %v3319_v47 = vpop.f32.mrf.mxu2 }
 0x9e4   :  { %v3320_v11 = vadd.f32 %v3319_v47, %v12022_v35 }
 0x9e5   :  { %v3049_v19 = vmul.f32 0.5, %v3048_v13  ;;  %v3272_v4 = vpop.f32.mrf.mxu1 }
 0x9e6   :  { %v3273_v18 = vadd.f32 %v3272_v4, %v12016_v38  ;;  %v3359_v10 = vmax.f32 %v3320_v11, 0.0 }
 0x9e7   :  { %v3050_v41 = vsub.f32 1.5, %v3049_v19 }
 0x9e8   :  { %v3360_v30 = vmax.f32 %v3273_v18, 0.0 }
 0x9e9   :  { %v3051_v8 = vmul.f32 %v9235_v37, %v3050_v41 }
 0x9ea   :  { %v2897_v22 = vpop.xlane.xlu0 %2896  ;;  %v3388_v17 = vpack.c.bf16 %v3360_v30, %v3358_v43 }
 0x9eb   :  { %v3055_v28 = vsel %vm3054_vm0, %v9235_v37, %v3051_v8  ;;  %v2916_v45 = vmul.f32 %v2897_v22, %v14829_v31  ;;  %v3321_v5 = vpop.f32.mrf.mxu2 }
 0x9ec   :  { %v3322_v40 = vadd.f32 %v3321_v5, %v12022_v35  ;;  %3543 = vmatmul.bf16.gmra.mxu3 %v3388_v17  ;;  %v3107_v1 = vmul.f32 %v3055_v28, %v11914_v60 }
 0x9ed   :  { %v2932_v44 = vadd.f32 1e-05, %v2916_v45 }
 0x9ee   :  { %v3361_v3 = vmax.f32 %v3322_v40, 0.0  ;;  %v3124_v21 = vmul.f32 %v11880_v32, %v3107_v1 }
 0x9ef   :  { %9236 = vrsqrt.f32 %v2932_v44  ;;  %vm3062_vm2 = vweird.f32 %v2932_v44 }
 0x9f0   :  { %v3389_v2 = vpack.c.bf16 %v3361_v3, %v3359_v10  ;;  %v3141_v53 = vadd.f32 %v11892_v27, %v3124_v21 }
 0x9f2   :  { %3592 = vmatmul.bf16.gmra.mxu0 %v3389_v2  ;;  %v3151_v42 = vpack.c.bf16 %v3141_v53, %v3140_v15 }
 0x9f4   :  { %3289 = vmatmul.bf16.gmra.mxu1 %v3151_v42  ;;  %3338 = vmatmul.bf16.gmra.mxu2 %v3151_v42 }
 0x9f5   :  { %v9237_v48 = vpop.eup %9236  ;;  %v2899_v54 = vpop.xlane.xlu2 %2898 }
 0x9f6   :  { %v3057_v60 = vmul.f32 %v9237_v48, %v2932_v44  ;;  %v2917_v61 = vmul.f32 %v2899_v54, %v14829_v31  ;;  %vm3063_vm1 = vweird.f32 %v9237_v48 }
 0x9f7   :  { %v3275_v16 = vpop.f32.mrf.mxu1  ;;  %vm3064_vm3 = vmor %vm3062_vm2, %vm3063_vm1 }
 0x9f8   :  { %v3058_v14 = vmul.f32 %v9237_v48, %v3057_v60  ;;  %v2933_v37 = vadd.f32 1e-05, %v2917_v61  ;;  %v3276_v13 = vadd.f32 %v3275_v16, %v12016_v38 }
 0x9fa   :  { %v3059_v39 = vmul.f32 0.5, %v3058_v14  ;;  %9238 = vrsqrt.f32 %v2933_v37  ;;  %v3362_v18 = vmax.f32 %v3276_v13, 0.0  ;;  %vm3072_vm8 = vweird.f32 %v2933_v37 }
 0x9fc   :  { %v3060_v59 = vsub.f32 1.5, %v3059_v39 }
 0x9fd   :  { %v3324_v33 = vpop.f32.mrf.mxu2 }
 0x9fe   :  { %v3061_v19 = vmul.f32 %v9237_v48, %v3060_v59  ;;  %v3325_v30 = vadd.f32 %v3324_v33, %v12022_v35 }
 0x9ff   :  { %v3277_v47 = vpop.f32.mrf.mxu1 }
 0xa00   :  { %v9239_v51 = vpop.eup %9238  ;;  %v3278_v62 = vadd.f32 %v3277_v47, %v12016_v38  ;;  %v3065_v8 = vsel %vm3064_vm3, %v9237_v48, %v3061_v19  ;;  %v3363_v45 = vmax.f32 %v3325_v30, 0.0 }
 0xa01   :  { %v3067_v4 = vmul.f32 %v9239_v51, %v2933_v37  ;;  %vm3073_vm7 = vweird.f32 %v9239_v51  ;;  %v3108_v40 = vmul.f32 %v3065_v8, %v11923_v24 }
 0xa02   :  { %v3364_v41 = vmax.f32 %v3278_v62, 0.0  ;;  %vm3074_vm9 = vmor %vm3072_vm8, %vm3073_vm7  ;;  %v2901_v24 = vpop.xlane.xlu1 %2900 }
 0xa03   :  { %v3068_v43 = vmul.f32 %v9239_v51, %v3067_v4  ;;  %v3125_v3 = vmul.f32 %v11880_v32, %v3108_v40  ;;  %v2918_v42 = vmul.f32 %v2901_v24, %v14829_v31 }
 0xa04   :  { %v3390_v46 = vpack.c.bf16 %v3364_v41, %v3362_v18 }
 0xa05   :  { %v3069_v11 = vmul.f32 0.5, %v3068_v43  ;;  %v3326_v22 = vpop.f32.mrf.mxu2  ;;  %v3142_v2 = vadd.f32 %v11892_v27, %v3125_v3  ;;  %v2934_v48 = vadd.f32 1e-05, %v2918_v42 }
 0xa06   :  { %v3327_v17 = vadd.f32 %v3326_v22, %v12022_v35  ;;  %3548 = vmatmul.bf16.gmra.mxu3 %v3390_v46 }
 0xa07   :  { %v3070_v28 = vsub.f32 1.5, %v3069_v11  ;;  %9240 = vrsqrt.f32 %v2934_v48  ;;  %vm3082_vm11 = vweird.f32 %v2934_v48 }
 0xa08   :  { %v3365_v5 = vmax.f32 %v3327_v17, 0.0 }
 0xa09   :  { %v3071_v1 = vmul.f32 %v9239_v51, %v3070_v28 }
 0xa0a   :  { %v3391_v26 = vpack.c.bf16 %v3365_v5, %v3363_v45 }
 0xa0b   :  { %v3075_v44 = vsel %vm3074_vm9, %v9239_v51, %v3071_v1 }
 0xa0c   :  { %3597 = vmatmul.bf16.gmra.mxu0 %v3391_v26  ;;  %v3109_v10 = vmul.f32 %v3075_v44, %v11932_v49 }
 0xa0d   :  { %v9241_v54 = vpop.eup %9240 }
 0xa0e   :  { %v3126_v21 = vmul.f32 %v11880_v32, %v3109_v10  ;;  %v3077_v60 = vmul.f32 %v9241_v54, %v2934_v48  ;;  %vm3083_vm10 = vweird.f32 %v9241_v54 }
 0xa0f   :  { %vm3084_vm12 = vmor %vm3082_vm11, %vm3083_vm10 }
 0xa10   :  { %v3143_v15 = vadd.f32 %v11892_v27, %v3126_v21  ;;  %v3078_v61 = vmul.f32 %v9241_v54, %v3077_v60 }
 0xa12   :  { %v3152_v53 = vpack.c.bf16 %v3143_v15, %v3142_v2  ;;  %v3079_v37 = vmul.f32 0.5, %v3078_v61 }
 0xa14   :  { %3294 = vmatmul.bf16.gmra.mxu1 %v3152_v53  ;;  %3343 = vmatmul.bf16.gmra.mxu2 %v3152_v53  ;;  %v3080_v39 = vsub.f32 1.5, %v3079_v37 }
 0xa16   :  { %v3081_v33 = vmul.f32 %v9241_v54, %v3080_v39 }
 0xa18   :  { %v3085_v51 = vsel %vm3084_vm12, %v9241_v54, %v3081_v33  ;;  %v9569_v54 = vld [vmem:[%s14690_s4] sm:$0x3f] }
 0xa19   :  { %v3110_v18 = vmul.f32 %v3085_v51, %v11938_v52  ;;  %v12068_v60 = vperm.slane %v9569_v54, 5 }
 0xa1b   :  { %v3127_v46 = vmul.f32 %v11880_v32, %v3110_v18 }
 0xa1d   :  { %v3144_v45 = vadd.f32 %v11892_v27, %v3127_v46 }
 0xa31   :  { %v2903_v49 = vpop.xlane.xlu0 %2902 }
 0xa32   :  { %v2919_v16 = vmul.f32 %v2903_v49, %v14829_v31 }
 0xa34   :  { %v2935_v14 = vadd.f32 1e-05, %v2919_v16 }
 0xa36   :  { %9242 = vrsqrt.f32 %v2935_v14  ;;  %vm3092_vm14 = vweird.f32 %v2935_v14 }
 0xa3c   :  { %v9243_v59 = vpop.eup %9242 }
 0xa3d   :  { %v3087_v13 = vmul.f32 %v9243_v59, %v2935_v14  ;;  %vm3093_vm13 = vweird.f32 %v9243_v59 }
 0xa3e   :  { %vm3094_vm15 = vmor %vm3092_vm14, %vm3093_vm13 }
 0xa3f   :  { %v3088_v47 = vmul.f32 %v9243_v59, %v3087_v13 }
 0xa41   :  { %v3089_v62 = vmul.f32 0.5, %v3088_v47 }
 0xa43   :  { %v3090_v19 = vsub.f32 1.5, %v3089_v62  ;;  %v3280_v4 = vpop.f32.mrf.mxu1 }
 0xa44   :  { %v3281_v11 = vadd.f32 %v3280_v4, %v12016_v38 }
 0xa45   :  { %v3091_v41 = vmul.f32 %v9243_v59, %v3090_v19 }
 0xa46   :  { %v3366_v5 = vmax.f32 %v3281_v11, 0.0 }
 0xa47   :  { %v3095_v43 = vsel %vm3094_vm15, %v9243_v59, %v3091_v41 }
 0xa48   :  { %v3111_v30 = vmul.f32 %v3095_v43, %v11992_v57 }
 0xa49   :  { %v3329_v8 = vpop.f32.mrf.mxu2 }
 0xa4a   :  { %v3128_v22 = vmul.f32 %v11880_v32, %v3111_v30  ;;  %v3330_v26 = vadd.f32 %v3329_v8, %v12022_v35 }
 0xa4b   :  { %v3282_v17 = vpop.f32.mrf.mxu1 }
 0xa4c   :  { %v3283_v28 = vadd.f32 %v3282_v17, %v12016_v38  ;;  %v3145_v52 = vadd.f32 %v11892_v27, %v3128_v22  ;;  %v3367_v32 = vmax.f32 %v3330_v26, 0.0 }
 0xa4e   :  { %v3368_v40 = vmax.f32 %v3283_v28, 0.0  ;;  %v3153_v1 = vpack.c.bf16 %v3145_v52, %v3144_v45 }
 0xa50   :  { %3299 = vmatmul.bf16.gmra.mxu1 %v3153_v1  ;;  %3348 = vmatmul.bf16.gmra.mxu2 %v3153_v1  ;;  %v3392_v57 = vpack.c.bf16 %v3368_v40, %v3366_v5 }
 0xa51   :  { %v3331_v44 = vpop.f32.mrf.mxu2 }
 0xa52   :  { %v3332_v10 = vadd.f32 %v3331_v44, %v12022_v35  ;;  %3553 = vmatmul.bf16.gmra.mxu3 %v3392_v57 }
 0xa54   :  { %v3369_v3 = vmax.f32 %v3332_v10, 0.0 }
 0xa56   :  { %v3393_v21 = vpack.c.bf16 %v3369_v3, %v3367_v32 }
 0xa57   :  { %v3285_v2 = vpop.f32.mrf.mxu1 }
 0xa58   :  { %3602 = vmatmul.bf16.gmra.mxu0 %v3393_v21  ;;  %v3286_v27 = vadd.f32 %v3285_v2, %v12016_v38 }
 0xa5a   :  { %v3370_v16 = vmax.f32 %v3286_v27, 0.0 }
 0xa5d   :  { %v3334_v15 = vpop.f32.mrf.mxu2 }
 0xa5e   :  { %v3335_v39 = vadd.f32 %v3334_v15, %v12022_v35 }
 0xa5f   :  { %v3539_v53 = vpop.f32.mrf.mxu3  ;;  %v3588_v24 = vpop.f32.mrf.mxu0 }
 0xa60   :  { %v3287_v42 = vpop.f32.mrf.mxu1  ;;  %v3589_v48 = vadd.f32 %v3588_v24, %v3539_v53  ;;  %v3371_v19 = vmax.f32 %v3335_v39, 0.0 }
 0xa61   :  { %v3288_v61 = vadd.f32 %v3287_v42, %v12016_v38 }
 0xa62   :  { %v3628_v49 = vadd.f32 %v3589_v48, %v11632_v63 }
 0xa63   :  { %v3372_v14 = vmax.f32 %v3288_v61, 0.0 }
 0xa64   :  { %v12073_v37 = vadd.f32 %v12068_v60, %v3628_v49 }
 0xa65   :  { %v3394_v59 = vpack.c.bf16 %v3372_v14, %v3370_v16  ;;  %v3336_v33 = vpop.f32.mrf.mxu2 }
 0xa66   :  { %14839 = vst [vmem:[#allocation24_spill] sm:$0xff] %v12073_v37  ;;  %3663 = vadd.xlane.f32.xlu2 %v12073_v37  ;;  %v3337_v13 = vadd.f32 %v3336_v33, %v12022_v35 }
 0xa67   :  { %3558 = vmatmul.bf16.gmra.mxu3 %v3394_v59  ;;  %v3541_v47 = vpop.f32.mrf.mxu3  ;;  %v3590_v51 = vpop.f32.mrf.mxu0 }
 0xa68   :  { %v3591_v62 = vadd.f32 %v3590_v51, %v3541_v47  ;;  %v3373_v4 = vmax.f32 %v3337_v13, 0.0 }
 0xa6a   :  { %v3629_v63 = vadd.f32 %v3591_v62, %v11637_v20  ;;  %v3395_v18 = vpack.c.bf16 %v3373_v4, %v3371_v19 }
 0xa6c   :  { %v12080_v41 = vadd.f32 %v12068_v60, %v3629_v63  ;;  %3607 = vmatmul.bf16.gmra.mxu0 %v3395_v18 }
 0xa6e   :  { %14840 = vst [vmem:[#allocation25_spill] sm:$0xff] %v12080_v41  ;;  %3665 = vadd.xlane.f32.xlu1 %v12080_v41 }
 0xa6f   :  { %v3544_v43 = vpop.f32.mrf.mxu3  ;;  %v3593_v30 = vpop.f32.mrf.mxu0 }
 0xa70   :  { %v3594_v46 = vadd.f32 %v3593_v30, %v3544_v43 }
 0xa71   :  { %v3290_v8 = vpop.f32.mrf.mxu1 }
 0xa72   :  { %v3630_v11 = vadd.f32 %v3594_v46, %v11642_v34  ;;  %v3291_v28 = vadd.f32 %v3290_v8, %v12016_v38 }
 0xa74   :  { %v12085_v22 = vadd.f32 %v12068_v60, %v3630_v11  ;;  %v3374_v26 = vmax.f32 %v3291_v28, 0.0 }
 0xa76   :  { %14841 = vst [vmem:[#allocation20_spill] sm:$0xff] %v12085_v22  ;;  %3667 = vadd.xlane.f32.xlu0 %v12085_v22 }
 0xa77   :  { %v3339_v17 = vpop.f32.mrf.mxu2  ;;  %v3546_v20 = vpop.f32.mrf.mxu3 }
 0xa78   :  { %v3595_v45 = vpop.f32.mrf.mxu0  ;;  %v3340_v44 = vadd.f32 %v3339_v17, %v12022_v35 }
 0xa79   :  { %v3596_v52 = vadd.f32 %v3595_v45, %v3546_v20  ;;  %v3292_v5 = vpop.f32.mrf.mxu1 }
 0xa7a   :  { %v3293_v40 = vadd.f32 %v3292_v5, %v12016_v38  ;;  %v3375_v21 = vmax.f32 %v3340_v44, 0.0 }
 0xa7b   :  { %v3631_v1 = vadd.f32 %v3596_v52, %v11647_v7 }
 0xa7c   :  { %v3376_v57 = vmax.f32 %v3293_v40, 0.0 }
 0xa7d   :  { %v12092_v34 = vadd.f32 %v12068_v60, %v3631_v1 }
 0xa7e   :  { %v3396_v10 = vpack.c.bf16 %v3376_v57, %v3374_v26 }
 0xa7f   :  { %14842 = vst [vmem:[#allocation21_spill] sm:$0xff] %v12092_v34  ;;  %3669 = vadd.xlane.f32.xlu2 %v12092_v34  ;;  %v3341_v32 = vpop.f32.mrf.mxu2 }
 0xa80   :  { %v3342_v3 = vadd.f32 %v3341_v32, %v12022_v35  ;;  %3563 = vmatmul.bf16.gmra.mxu3 %v3396_v10 }
 0xa82   :  { %v3377_v2 = vmax.f32 %v3342_v3, 0.0 }
 0xa84   :  { %v3397_v15 = vpack.c.bf16 %v3377_v2, %v3375_v21 }
 0xa86   :  { %3612 = vmatmul.bf16.gmra.mxu0 %v3397_v15 }
 0xa89   :  { %v3549_v27 = vpop.f32.mrf.mxu3  ;;  %v3598_v7 = vpop.f32.mrf.mxu0 }
 0xa8a   :  { %v3599_v53 = vadd.f32 %v3598_v7, %v3549_v27 }
 0xa8c   :  { %v3632_v24 = vadd.f32 %v3599_v53, %v11652_v12 }
 0xa8e   :  { %v12099_v42 = vadd.f32 %v12068_v60, %v3632_v24 }
 0xa90   :  { %14843 = vst [vmem:[#allocation22_spill] sm:$0xff] %v12099_v42  ;;  %3671 = vadd.xlane.f32.xlu1 %v12099_v42 }
 0xa91   :  { %v3295_v48 = vpop.f32.mrf.mxu1  ;;  %v3551_v54 = vpop.f32.mrf.mxu3 }
 0xa92   :  { %v3600_v61 = vpop.f32.mrf.mxu0  ;;  %v3296_v59 = vadd.f32 %v3295_v48, %v12016_v38 }
 0xa93   :  { %v3601_v49 = vadd.f32 %v3600_v61, %v3551_v54 }
 0xa94   :  { %v3378_v13 = vmax.f32 %v3296_v59, 0.0 }
 0xa95   :  { %v3633_v16 = vadd.f32 %v3601_v49, %v11657_v56 }
 0xa97   :  { %v3344_v14 = vpop.f32.mrf.mxu2  ;;  %v12104_v39 = vadd.f32 %v12068_v60, %v3633_v16 }
 0xa98   :  { %v3345_v51 = vadd.f32 %v3344_v14, %v12022_v35 }
 0xa99   :  { %14844 = vst [vmem:[#allocation19_spill] sm:$0xff] %v12104_v39  ;;  %3673 = vadd.xlane.f32.xlu0 %v12104_v39  ;;  %v3297_v12 = vpop.f32.mrf.mxu1 }
 0xa9a   :  { %v3298_v33 = vadd.f32 %v3297_v12, %v12016_v38  ;;  %v3379_v56 = vmax.f32 %v3345_v51, 0.0 }
 0xa9c   :  { %v3380_v47 = vmax.f32 %v3298_v33, 0.0 }
 0xa9e   :  { %v3398_v62 = vpack.c.bf16 %v3380_v47, %v3378_v13 }
 0xa9f   :  { %v3346_v19 = vpop.f32.mrf.mxu2 }
 0xaa0   :  { %v3347_v4 = vadd.f32 %v3346_v19, %v12022_v35  ;;  %3568 = vmatmul.bf16.gmra.mxu3 %v3398_v62 }
 0xaa2   :  { %v3381_v63 = vmax.f32 %v3347_v4, 0.0 }
 0xaa4   :  { %v3399_v18 = vpack.c.bf16 %v3381_v63, %v3379_v56 }
 0xaa6   :  { %3617 = vmatmul.bf16.gmra.mxu0 %v3399_v18 }
 0xacd   :  { %v3300_v43 = vpop.f32.mrf.mxu1 }
 0xace   :  { %v3301_v46 = vadd.f32 %v3300_v43, %v12016_v38 }
 0xad0   :  { %v3382_v45 = vmax.f32 %v3301_v46, 0.0 }
 0xad3   :  { %v3349_v30 = vpop.f32.mrf.mxu2 }
 0xad4   :  { %v3350_v1 = vadd.f32 %v3349_v30, %v12022_v35 }
 0xad5   :  { %v3302_v8 = vpop.f32.mrf.mxu1  ;;  %v3554_v11 = vpop.f32.mrf.mxu3 }
 0xad6   :  { %v3303_v17 = vadd.f32 %v3302_v8, %v12016_v38  ;;  %v3603_v20 = vpop.f32.mrf.mxu0 }
 0xad7   :  { %v3604_v28 = vadd.f32 %v3603_v20, %v3554_v11 }
 0xad8   :  { %v3384_v52 = vmax.f32 %v3303_v17, 0.0 }
 0xad9   :  { %v3634_v5 = vadd.f32 %v3604_v28, %v11670_v29  ;;  %v3664_v40 = vpop.xlane.xlu2 %3663  ;;  %v3383_v29 = vmax.f32 %v3350_v1, 0.0 }
 0xada   :  { %v3695_v26 = vmul.f32 %v3664_v40, %v14829_v31  ;;  %v3400_v57 = vpack.c.bf16 %v3384_v52, %v3382_v45 }
 0xadb   :  { %v3351_v44 = vpop.f32.mrf.mxu2  ;;  %v12117_v10 = vadd.f32 %v12068_v60, %v3634_v5 }
 0xadc   :  { %v12120_v32 = vsub.f32 %v12073_v37, %v3695_v26  ;;  %v3352_v38 = vadd.f32 %v3351_v44, %v12022_v35  ;;  %3573 = vmatmul.bf16.gmra.mxu3 %v3400_v57 }
 0xadd   :  { %14845 = vst [vmem:[#allocation28_spill] sm:$0xff] %v12117_v10  ;;  %3675 = vadd.xlane.f32.xlu0 %v12117_v10  ;;  %v3556_v3 = vpop.f32.mrf.mxu3 }
 0xade   :  { %v3385_v21 = vmax.f32 %v3352_v38, 0.0  ;;  %v3605_v2 = vpop.f32.mrf.mxu0  ;;  %v3727_v15 = vmul.f32 %v12120_v32, %v12120_v32 }
 0xadf   :  { %v3606_v27 = vadd.f32 %v3605_v2, %v3556_v3 }
 0xae0   :  { %3743 = vadd.xlane.f32.xlu2 %v3727_v15  ;;  %v3401_v7 = vpack.c.bf16 %v3385_v21, %v3383_v29 }
 0xae1   :  { %v3666_v53 = vpop.xlane.xlu1 %3665  ;;  %v3635_v24 = vadd.f32 %v3606_v27, %v11689_v36  ;;  %v8537_v27 = vld [vmem:[%s14796_s1 + $0x170] sm:$0xf0] }
 0xae2   :  { %v3696_v48 = vmul.f32 %v3666_v53, %v14829_v31  ;;  %3622 = vmatmul.bf16.gmra.mxu0 %v3401_v7  ;;  %v8536_v7 = vld [vmem:[%s14796_s1 + $0x16c] sm:$0xf] }
 0xae3   :  { %v12134_v61 = vadd.f32 %v12068_v60, %v3635_v24  ;;  %v8027_v24 = vld [vmem:[%s14796_s1 + $0x170] sm:$0xf] }
 0xae4   :  { %v12129_v35 = vsub.f32 %v12080_v41, %v3696_v48  ;;  %v8538_v48 = vld [vmem:[%s14796_s1 + $0x178] sm:$0xf0] }
 0xae5   :  { %14846 = vst [vmem:[#allocation26_spill] sm:$0xff] %v12134_v61 }
 0xae6   :  { %v3728_v54 = vmul.f32 %v12129_v35, %v12129_v35 }
 0xae8   :  { %3745 = vadd.xlane.f32.xlu1 %v3728_v54  ;;  %3677 = vadd.xlane.f32.xlu2 %v12134_v61 }
 0xae9   :  { %v3668_v49 = vpop.xlane.xlu0 %3667  ;;  %v3608_v14 = vpop.f32.mrf.mxu0 }
 0xaea   :  { %v3559_v16 = vpop.f32.mrf.mxu3  ;;  %v3697_v36 = vmul.f32 %v3668_v49, %v14829_v31  ;;  %v8028_v49 = vor.u32 %v8538_v48, %v8027_v24  ;;  %v7959_v24 = vld [vmem:[%s14796_s1 + $0xf0] sm:$0xf]  ;;  %v8522_v48 = vld [vmem:[%s14796_s1 + $0xf8] sm:$0xf0] }
 0xaeb   :  { %v3609_v59 = vadd.f32 %v3608_v14, %v3559_v16  ;;  %v8007_v16 = vld [vmem:[%s14796_s1 + $0x150] sm:$0xf]  ;;  %v8534_v14 = vld [vmem:[%s14796_s1 + $0x158] sm:$0xf0] }
 0xaec   :  { %v12139_v12 = vsub.f32 %v12085_v22, %v3697_v36  ;;  %4293 = vmatpush.bf16.msrb.mxu3 %v8028_v49  ;;  %v8533_v36 = vld [vmem:[%s14796_s1 + $0x154] sm:$0xf]  ;;  %v7960_v49 = vor.u32 %v8522_v48, %v7959_v24 }
 0xaed   :  { %v3636_v33 = vadd.f32 %v3609_v59, %v11701_v55  ;;  %v8008_v59 = vor.u32 %v8534_v14, %v8007_v16  ;;  %v7961_v16 = vld [vmem:[%s14796_s1 + $0xfc] sm:$0xf0]  ;;  %v7967_v14 = vld [vmem:[%s14796_s1 + $0xf8] sm:$0xf] }
 0xaee   :  { %v3729_v13 = vmul.f32 %v12139_v12, %v12139_v12 }
 0xaef   :  { %v12145_v47 = vadd.f32 %v12068_v60, %v3636_v33  ;;  %v8009_v33 = vld [vmem:[%s14796_s1 + $0x15c] sm:$0xf0] }
 0xaf0   :  { %3747 = vadd.xlane.f32.xlu1 %v3729_v13  ;;  %v8015_v13 = vld [vmem:[%s14796_s1 + $0x158] sm:$0xf] }
 0xaf1   :  { %14847 = vst [vmem:[#allocation27_spill] sm:$0xff] %v12145_v47  ;;  %3679 = vadd.xlane.f32.xlu2 %v12145_v47  ;;  %v3610_v62 = vpop.f32.mrf.mxu0 }
 0xaf2   :  { %v3561_v51 = vpop.f32.mrf.mxu3  ;;  %v3670_v4 = vpop.xlane.xlu2 %3669 }
 0xaf3   :  { %v3611_v19 = vadd.f32 %v3610_v62, %v3561_v51  ;;  %v3698_v56 = vmul.f32 %v3670_v4, %v14829_v31  ;;  %v8535_v51 = vld [vmem:[%s14796_s1 + $0x160] sm:$0xf0]  ;;  %v8012_v62 = vor.u32 %v8533_v36, %v8009_v33  ;;  %v7995_v4 = vld [vmem:[%s14796_s1 + $0x138] sm:$0xf] }
 0xaf4   :  { %v8523_v36 = vld [vmem:[%s14796_s1 + $0x100] sm:$0xf0] }
 0xaf5   :  { %v3637_v63 = vadd.f32 %v3611_v19, %v11717_v9  ;;  %v12151_v18 = vsub.f32 %v12092_v34, %v3698_v56  ;;  %v8016_v19 = vor.u32 %v8535_v51, %v8015_v13  ;;  %v8531_v56 = vld [vmem:[%s14796_s1 + $0x140] sm:$0xf0]  ;;  %v7968_v13 = vor.u32 %v8523_v36, %v7967_v14 }
 0xaf7   :  { %v12154_v55 = vadd.f32 %v12068_v60, %v3637_v63  ;;  %v3730_v43 = vmul.f32 %v12151_v18, %v12151_v18  ;;  %4294 = vmatpush.bf16.msrb.mxu3 %v8016_v19  ;;  %v8530_v63 = vld [vmem:[%s14796_s1 + $0x13c] sm:$0xf] }
 0xaf9   :  { %14848 = vst [vmem:[#allocation23_spill] sm:$0xff] %v12154_v55  ;;  %3681 = vadd.xlane.f32.xlu1 %v12154_v55  ;;  %3749 = vadd.xlane.f32.xlu0 %v3730_v43  ;;  %v7996_v43 = vor.u32 %v8531_v56, %v7995_v4  ;;  %v7947_v4 = vld [vmem:[%s14796_s1 + $0xd8] sm:$0xf]  ;;  %v8519_v56 = vld [vmem:[%s14796_s1 + $0xe0] sm:$0xf0] }
 0xb03   :  { %v3564_v30 = vpop.f32.mrf.mxu3  ;;  %v3613_v46 = vpop.f32.mrf.mxu0 }
 0xb04   :  { %v3614_v8 = vadd.f32 %v3613_v46, %v3564_v30  ;;  %v3672_v11 = vpop.xlane.xlu1 %3671  ;;  %v7997_v30 = vld [vmem:[%s14796_s1 + $0x144] sm:$0xf0]  ;;  %v8003_v46 = vld [vmem:[%s14796_s1 + $0x140] sm:$0xf] }
 0xb05   :  { %v3699_v17 = vmul.f32 %v3672_v11, %v14829_v31  ;;  %v8000_v11 = vor.u32 %v8530_v63, %v7997_v30  ;;  %v8518_v63 = vld [vmem:[%s14796_s1 + $0xdc] sm:$0xf] }
 0xb06   :  { %v3638_v9 = vadd.f32 %v3614_v8, %v11722_v6  ;;  %v8532_v8 = vld [vmem:[%s14796_s1 + $0x148] sm:$0xf0] }
 0xb07   :  { %v12162_v20 = vsub.f32 %v12099_v42, %v3699_v17  ;;  %v8004_v17 = vor.u32 %v8532_v8, %v8003_v46  ;;  %v7948_v46 = vor.u32 %v8519_v56, %v7947_v4  ;;  %v7949_v8 = vld [vmem:[%s14796_s1 + $0xe4] sm:$0xf0] }
 0xb08   :  { %v12165_v28 = vadd.f32 %v12068_v60, %v3638_v9  ;;  %v7983_v9 = vld [vmem:[%s14796_s1 + $0x120] sm:$0xf] }
 0xb09   :  { %v3731_v45 = vmul.f32 %v12162_v20, %v12162_v20  ;;  %4295 = vmatpush.bf16.msrb.mxu3 %v8004_v17  ;;  %v8520_v17 = vld [vmem:[%s14796_s1 + $0xe8] sm:$0xf0] }
 0xb0a   :  { %14849 = vst [vmem:[#allocation2_spill] sm:$0xff] %v12165_v28  ;;  %3683 = vadd.xlane.f32.xlu1 %v12165_v28 }
 0xb0b   :  { %3751 = vadd.xlane.f32.xlu0 %v3731_v45  ;;  %v3566_v52 = vpop.f32.mrf.mxu3  ;;  %v3615_v5 = vpop.f32.mrf.mxu0  ;;  %v8528_v45 = vld [vmem:[%s14796_s1 + $0x128] sm:$0xf0] }
 0xb0c   :  { %v3616_v40 = vadd.f32 %v3615_v5, %v3566_v52  ;;  %v3674_v1 = vpop.xlane.xlu0 %3673  ;;  %v8527_v52 = vld [vmem:[%s14796_s1 + $0x124] sm:$0xf]  ;;  %v7984_v5 = vor.u32 %v8528_v45, %v7983_v9  ;;  %v7952_v45 = vor.u32 %v8518_v63, %v7949_v8 }
 0xb0d   :  { %v3700_v26 = vmul.f32 %v3674_v1, %v14829_v31  ;;  %v7991_v1 = vld [vmem:[%s14796_s1 + $0x128] sm:$0xf] }
 0xb0e   :  { %v3639_v6 = vadd.f32 %v3616_v40, %v11737_v25  ;;  %v8019_v25 = vld [vmem:[%s14796_s1 + $0x168] sm:$0xf]  ;;  %v7985_v40 = vld [vmem:[%s14796_s1 + $0x12c] sm:$0xf0] }
 0xb0f   :  { %v12173_v57 = vsub.f32 %v12104_v39, %v3700_v26  ;;  %v8020_v53 = vor.u32 %v8537_v27, %v8019_v25  ;;  %v8529_v26 = vld [vmem:[%s14796_s1 + $0x130] sm:$0xf0]  ;;  %v7973_v25 = vld [vmem:[%s14796_s1 + $0x114] sm:$0xf0]  ;;  %v7979_v27 = vld [vmem:[%s14796_s1 + $0x110] sm:$0xf] }
 0xb10   :  { %v12176_v44 = vadd.f32 %v12068_v60, %v3639_v6  ;;  %v7988_v6 = vor.u32 %v8527_v52, %v7985_v40 }
 0xb11   :  { %v3732_v38 = vmul.f32 %v12173_v57, %v12173_v57  ;;  %4195 = vmatpush.bf16.msra.mxu1 %v8020_v53 }
 0xb12   :  { %14850 = vst [vmem:[#allocation3_spill] sm:$0xff] %v12176_v44 }
 0xb13   :  { %3685 = vadd.xlane.f32.xlu0 %v12176_v44  ;;  %3753 = vadd.xlane.f32.xlu2 %v3732_v38  ;;  %v7992_v38 = vor.u32 %v8529_v26, %v7991_v1  ;;  %v7935_v26 = vld [vmem:[%s14796_s1 + $0xc0] sm:$0xf] }
 0xb15   :  { %4196 = vmatpush.bf16.msra.mxu1 %v8008_v59  ;;  %4296 = vmatpush.bf16.msrb.mxu3 %v7992_v38 }
 0xb19   :  { %4197 = vmatpush.bf16.msra.mxu1 %v7996_v43 }
 0xb1d   :  { %4198 = vmatpush.bf16.msra.mxu1 %v7984_v5 }
 0xb23   :  { %v3569_v3 = vpop.f32.mrf.mxu3  ;;  %v3618_v29 = vpop.f32.mrf.mxu0 }
 0xb24   :  { %v3619_v21 = vadd.f32 %v3618_v29, %v3569_v3  ;;  %v7971_v3 = vld [vmem:[%s14796_s1 + $0x108] sm:$0xf]  ;;  %v8525_v29 = vld [vmem:[%s14796_s1 + $0x110] sm:$0xf0] }
 0xb26   :  { %v3640_v2 = vadd.f32 %v3619_v21, %v11745_v50  ;;  %v8021_v50 = vld [vmem:[%s14796_s1 + $0x174] sm:$0xf0]  ;;  %v8524_v21 = vld [vmem:[%s14796_s1 + $0x10c] sm:$0xf] }
 0xb27   :  { %v8024_v54 = vor.u32 %v8536_v7, %v8021_v50  ;;  %v8526_v7 = vld [vmem:[%s14796_s1 + $0x118] sm:$0xf0]  ;;  %v7976_v53 = vor.u32 %v8524_v21, %v7973_v25  ;;  %v7943_v21 = vld [vmem:[%s14796_s1 + $0xc8] sm:$0xf]  ;;  %v8517_v25 = vld [vmem:[%s14796_s1 + $0xd0] sm:$0xf0] }
 0xb28   :  { %v12183_v15 = vadd.f32 %v12068_v60, %v3640_v2  ;;  %v7972_v2 = vor.u32 %v8525_v29, %v7971_v3  ;;  %v7980_v50 = vor.u32 %v8526_v7, %v7979_v27  ;;  %v8515_v3 = vld [vmem:[%s14796_s1 + $0xc4] sm:$0xf]  ;;  %v7937_v29 = vld [vmem:[%s14796_s1 + $0xcc] sm:$0xf0]  ;;  %v7944_v7 = vor.u32 %v8517_v25, %v7943_v21 }
 0xb29   :  { %4244 = vmatpush.bf16.msra.mxu2 %v8024_v54  ;;  %v8521_v54 = vld [vmem:[%s14796_s1 + $0xf4] sm:$0xf] }
 0xb2a   :  { %14851 = vst [vmem:[#allocation4_spill] sm:$0xff] %v12183_v15  ;;  %3687 = vadd.xlane.f32.xlu0 %v12183_v15  ;;  %4199 = vmatpush.bf16.msra.mxu1 %v7972_v2  ;;  %v7964_v33 = vor.u32 %v8521_v54, %v7961_v16  ;;  %v7940_v2 = vor.u32 %v8515_v3, %v7937_v29 }
 0xb2b   :  { %4297 = vmatpush.bf16.msrb.mxu3 %v7980_v50  ;;  %v3620_v19 = vpop.f32.mrf.mxu0 }
 0xb2d   :  { %4245 = vmatpush.bf16.msra.mxu2 %v8012_v62  ;;  %v3571_v62 = vpop.f32.mrf.mxu3 }
 0xb2e   :  { %4200 = vmatpush.bf16.msra.mxu1 %v7960_v49  ;;  %v3621_v5 = vadd.f32 %v3620_v19, %v3571_v62 }
 0xb2f   :  { %4298 = vmatpush.bf16.msrb.mxu3 %v7968_v13 }
 0xb30   :  { %v3641_v27 = vadd.f32 %v3621_v5, %v11755_v0 }
 0xb31   :  { %4246 = vmatpush.bf16.msra.mxu2 %v8000_v11  ;;  %v7955_v11 = vld [vmem:[%s14796_s1 + $0xe0] sm:$0xf] }
 0xb32   :  { %v7956_v52 = vor.u32 %v8520_v17, %v7955_v11  ;;  %4201 = vmatpush.bf16.msra.mxu1 %v7948_v46  ;;  %v12341_v54 = vadd.f32 %v12068_v60, %v3641_v27 }
 0xb34   :  { %4299 = vmatpush.bf16.msrb.mxu3 %v7956_v52  ;;  %14852 = vst [vmem:[#allocation5_spill] sm:$0xff] %v12341_v54 }
 0xb35   :  { %4247 = vmatpush.bf16.msra.mxu2 %v7988_v6  ;;  %v8516_v6 = vld [vmem:[%s14796_s1 + $0xc8] sm:$0xf0] }
 0xb36   :  { %v7936_v38 = vor.u32 %v8516_v6, %v7935_v26 }
 0xb38   :  { %4202 = vmatpush.bf16.msra.mxu1 %v7936_v38  ;;  %4300 = vmatpush.bf16.msrb.mxu3 %v7944_v7  ;;  %v7899_v38 = vld [vmem:[%s14690_s4 + $0x8] sm:$0x3f] }
 0xb39   :  { %4248 = vmatpush.bf16.msra.mxu2 %v7976_v53 }
 0xb3d   :  { %4249 = vmatpush.bf16.msra.mxu2 %v7964_v33 }
 0xb41   :  { %4250 = vmatpush.bf16.msra.mxu2 %v7952_v45 }
 0xb45   :  { %4251 = vmatpush.bf16.msra.mxu2 %v7940_v2 }
 0xb50   :  { %v3676_v59 = vpop.xlane.xlu0 %3675 }
 0xb51   :  { %v3701_v51 = vmul.f32 %v3676_v59, %v14829_v31 }
 0xb53   :  { %v12305_v43 = vsub.f32 %v12117_v10, %v3701_v51  ;;  %v3744_v30 = vpop.xlane.xlu2 %3743 }
 0xb54   :  { %v3775_v9 = vmul.f32 %v3744_v30, %v14829_v31 }
 0xb55   :  { %v3733_v40 = vmul.f32 %v12305_v43, %v12305_v43 }
 0xb56   :  { %v3791_v1 = vadd.f32 1e-05, %v3775_v9 }
 0xb57   :  { %3755 = vadd.xlane.f32.xlu2 %v3733_v40 }
 0xb58   :  { %9244 = vrsqrt.f32 %v3791_v1  ;;  %vm3813_vm1 = vweird.f32 %v3791_v1 }
 0xb5b   :  { %v3746_v53 = vpop.xlane.xlu1 %3745  ;;  %v3678_v50 = vpop.xlane.xlu2 %3677 }
 0xb5c   :  { %v3776_v24 = vmul.f32 %v3746_v53, %v14829_v31  ;;  %v3702_v48 = vmul.f32 %v3678_v50, %v14829_v31  ;;  %v12366_v53 = vperm.slane %v7899_v38, 0 }
 0xb5e   :  { %v9245_v49 = vpop.eup %9244  ;;  %v3792_v16 = vadd.f32 1e-05, %v3776_v24  ;;  %v12344_v14 = vsub.f32 %v12134_v61, %v3702_v48 }
 0xb5f   :  { %v3808_v36 = vmul.f32 %v9245_v49, %v3791_v1  ;;  %3689 = vadd.xlane.f32.xlu2 %v12341_v54  ;;  %v3574_v0 = vpop.f32.mrf.mxu3  ;;  %v3623_v59 = vpop.f32.mrf.mxu0  ;;  %vm3814_vm0 = vweird.f32 %v9245_v49 }
 0xb60   :  { %9246 = vrsqrt.f32 %v3792_v16  ;;  %v3624_v33 = vadd.f32 %v3623_v59, %v3574_v0  ;;  %v3734_v13 = vmul.f32 %v12344_v14, %v12344_v14  ;;  %vm3815_vm2 = vmor %vm3813_vm1, %vm3814_vm0  ;;  %vm3823_vm7 = vweird.f32 %v3792_v16 }
 0xb61   :  { %v3809_v51 = vmul.f32 %v9245_v49, %v3808_v36 }
 0xb62   :  { %v3642_v62 = vadd.f32 %v3624_v33, %v11772_v23  ;;  %3757 = vadd.xlane.f32.xlu1 %v3734_v13 }
 0xb63   :  { %v3810_v19 = vmul.f32 0.5, %v3809_v51  ;;  %v3748_v4 = vpop.xlane.xlu1 %3747 }
 0xb64   :  { %v3680_v56 = vpop.xlane.xlu2 %3679  ;;  %v3777_v63 = vmul.f32 %v3748_v4, %v14829_v31  ;;  %v12352_v30 = vadd.f32 %v12068_v60, %v3642_v62 }
 0xb65   :  { %v3811_v46 = vsub.f32 1.5, %v3810_v19  ;;  %v3703_v8 = vmul.f32 %v3680_v56, %v14829_v31 }
 0xb66   :  { %14853 = vst [vmem:[#allocation6_spill] sm:$0xff] %v12352_v30  ;;  %v9247_v11 = vpop.eup %9246  ;;  %v3793_v17 = vadd.f32 1e-05, %v3777_v63 }
 0xb67   :  { %v3812_v9 = vmul.f32 %v9245_v49, %v3811_v46  ;;  %v3818_v45 = vmul.f32 %v9247_v11, %v3792_v16  ;;  %v12356_v52 = vsub.f32 %v12145_v47, %v3703_v8  ;;  %3691 = vadd.xlane.f32.xlu2 %v12352_v30  ;;  %v3576_v23 = vpop.f32.mrf.mxu3  ;;  %v3625_v5 = vpop.f32.mrf.mxu0  ;;  %vm3824_vm3 = vweird.f32 %v9247_v11 }
 0xb68   :  { %9248 = vrsqrt.f32 %v3793_v17  ;;  %v3626_v26 = vadd.f32 %v3625_v5, %v3576_v23  ;;  %vm3825_vm8 = vmor %vm3823_vm7, %vm3824_vm3  ;;  %v12380_v16 = vperm.slane %v7899_v38, 1  ;;  %vm3833_vm10 = vweird.f32 %v3793_v17 }
 0xb69   :  { %v3819_v40 = vmul.f32 %v9247_v11, %v3818_v45  ;;  %v3735_v6 = vmul.f32 %v12356_v52, %v12356_v52  ;;  %v3816_v3 = vsel %vm3815_vm2, %v9245_v49, %v3812_v9 }
 0xb6a   :  { %v3643_v25 = vadd.f32 %v3626_v26, %v11877_v58  ;;  %v3967_v50 = vmul.f32 %v3816_v3, %v12120_v32 }
 0xb6b   :  { %v3820_v29 = vmul.f32 0.5, %v3819_v40  ;;  %3759 = vadd.xlane.f32.xlu1 %v3735_v6 }
 0xb6c   :  { %v3682_v21 = vpop.xlane.xlu1 %3681  ;;  %v3750_v27 = vpop.xlane.xlu0 %3749  ;;  %v12374_v33 = vadd.f32 %v12068_v60, %v3643_v25  ;;  %v3984_v32 = vmul.f32 %v12366_v53, %v3967_v50 }
 0xb6d   :  { %v3821_v2 = vsub.f32 1.5, %v3820_v29  ;;  %v3704_v1 = vmul.f32 %v3682_v21, %v14829_v31  ;;  %v3778_v24 = vmul.f32 %v3750_v27, %v14829_v31 }
 0xb6e   :  { %v9249_v7 = vpop.eup %9248  ;;  %14854 = vst [vmem:[#allocation7_spill] sm:$0xff] %v12374_v33  ;;  %v4001_v60 = vadd.f32 %v12380_v16, %v3984_v32 }
 0xb6f   :  { %v3822_v48 = vmul.f32 %v9247_v11, %v3821_v2  ;;  %v3828_v49 = vmul.f32 %v9249_v7, %v3793_v17  ;;  %v12371_v36 = vsub.f32 %v12154_v55, %v3704_v1  ;;  %v3794_v0 = vadd.f32 1e-05, %v3778_v24  ;;  %v12877_v55 = vld [vmem:[%s14692_s3 + $0x10] sm:$0xff] }
 0xb70   :  { %vm3834_vm9 = vweird.f32 %v9249_v7 }
 0xb71   :  { %v3826_v59 = vsel %vm3825_vm8, %v9247_v11, %v3822_v48  ;;  %v3829_v58 = vmul.f32 %v9249_v7, %v3828_v49  ;;  %v3736_v13 = vmul.f32 %v12371_v36, %v12371_v36  ;;  %9250 = vrsqrt.f32 %v3794_v0  ;;  %vm3835_vm11 = vmor %vm3833_vm10, %vm3834_vm9 }
 0xb72   :  { %v3968_v51 = vmul.f32 %v3826_v59, %v12129_v35  ;;  %vm3843_vm13 = vweird.f32 %v3794_v0 }
 0xb73   :  { %v3830_v62 = vmul.f32 0.5, %v3829_v58  ;;  %3693 = vadd.xlane.f32.xlu1 %v12374_v33  ;;  %3761 = vadd.xlane.f32.xlu0 %v3736_v13 }
 0xb74   :  { %v3985_v19 = vmul.f32 %v12366_v53, %v3968_v51 }
 0xb75   :  { %v3831_v4 = vsub.f32 1.5, %v3830_v62 }
 0xb76   :  { %v4002_v56 = vadd.f32 %v12380_v16, %v3985_v19 }
 0xb77   :  { %v9251_v63 = vpop.eup %9250  ;;  %v3832_v8 = vmul.f32 %v9249_v7, %v3831_v4 }
 0xb78   :  { %v4017_v46 = vpack.c.bf16 %v4002_v56, %v4001_v60  ;;  %v3838_v11 = vmul.f32 %v9251_v63, %v3794_v0  ;;  %vm3844_vm12 = vweird.f32 %v9251_v63 }
 0xb79   :  { %v3836_v9 = vsel %vm3835_vm11, %v9249_v7, %v3832_v8  ;;  %vm3845_vm14 = vmor %vm3843_vm13, %vm3844_vm12 }
 0xb7a   :  { %4203 = vmatmul.bf16.vlgmr.msra.gmra.mxu1 %v4017_v46  ;;  %4252 = vmatmul.bf16.vlgmr.msra.gmra.mxu2 %v4017_v46  ;;  %v3839_v35 = vmul.f32 %v9251_v63, %v3838_v11  ;;  %v3969_v3 = vmul.f32 %v3836_v9, %v12139_v12 }
 0xb7b   :  { %4301 = vmatmul.bf16.vlgmr.msrb.gmra.mxu3 %v4017_v46 }
 0xb7c   :  { %v3840_v45 = vmul.f32 0.5, %v3839_v35  ;;  %v3986_v1 = vmul.f32 %v12366_v53, %v3969_v3 }
 0xb7d   :  { %v3684_v23 = vpop.xlane.xlu1 %3683 }
 0xb7e   :  { %v3705_v5 = vmul.f32 %v3684_v23, %v14829_v31  ;;  %v3752_v40 = vpop.xlane.xlu0 %3751  ;;  %v3841_v26 = vsub.f32 1.5, %v3840_v45  ;;  %v4003_v48 = vadd.f32 %v12380_v16, %v3986_v1 }
 0xb7f   :  { %v3779_v6 = vmul.f32 %v3752_v40, %v14829_v31 }
 0xb80   :  { %v12389_v38 = vsub.f32 %v12165_v28, %v3705_v5  ;;  %v3842_v29 = vmul.f32 %v9251_v63, %v3841_v26 }
 0xb81   :  { %v3795_v17 = vadd.f32 1e-05, %v3779_v6 }
 0xb82   :  { %v3737_v21 = vmul.f32 %v12389_v38, %v12389_v38  ;;  %v3846_v2 = vsel %vm3845_vm14, %v9251_v63, %v3842_v29 }
 0xb83   :  { %9252 = vrsqrt.f32 %v3795_v17  ;;  %v3970_v25 = vmul.f32 %v3846_v2, %v12151_v18  ;;  %vm3853_vm0 = vweird.f32 %v3795_v17 }
 0xb84   :  { %3763 = vadd.xlane.f32.xlu0 %v3737_v21 }
 0xb85   :  { %v3987_v50 = vmul.f32 %v12366_v53, %v3970_v25 }
 0xb86   :  { %v3754_v27 = vpop.xlane.xlu2 %3753  ;;  %v3686_v7 = vpop.xlane.xlu0 %3685 }
 0xb87   :  { %v3780_v12 = vmul.f32 %v3754_v27, %v14829_v31  ;;  %v3706_v24 = vmul.f32 %v3686_v7, %v14829_v31  ;;  %v4004_v49 = vadd.f32 %v12380_v16, %v3987_v50 }
 0xb89   :  { %v9253_v0 = vpop.eup %9252  ;;  %v3796_v59 = vadd.f32 1e-05, %v3780_v12  ;;  %v12402_v58 = vsub.f32 %v12176_v44, %v3706_v24  ;;  %v4018_v13 = vpack.c.bf16 %v4004_v49, %v4003_v48  ;;  %v12862_v44 = vld [vmem:[%s14692_s3 + $0x8] sm:$0xff] }
 0xb8a   :  { %v3848_v18 = vmul.f32 %v9253_v0, %v3795_v17  ;;  %vm3854_vm15 = vweird.f32 %v9253_v0 }
 0xb8b   :  { %9254 = vrsqrt.f32 %v3796_v59  ;;  %v3738_v32 = vmul.f32 %v12402_v58, %v12402_v58  ;;  %4208 = vmatmul.bf16.gmra.mxu1 %v4018_v13  ;;  %4257 = vmatmul.bf16.gmra.mxu2 %v4018_v13  ;;  %vm3855_vm1 = vmor %vm3853_vm0, %vm3854_vm15  ;;  %vm3863_vm3 = vweird.f32 %v3796_v59 }
 0xb8c   :  { %v3849_v51 = vmul.f32 %v9253_v0, %v3848_v18  ;;  %4306 = vmatmul.bf16.gmra.mxu3 %v4018_v13 }
 0xb8d   :  { %3765 = vadd.xlane.f32.xlu2 %v3738_v32 }
 0xb8e   :  { %v3850_v62 = vmul.f32 0.5, %v3849_v51 }
 0xb90   :  { %v3851_v19 = vsub.f32 1.5, %v3850_v62 }
 0xb91   :  { %v9255_v4 = vpop.eup %9254 }
 0xb92   :  { %v3852_v60 = vmul.f32 %v9253_v0, %v3851_v19  ;;  %v3858_v56 = vmul.f32 %v9255_v4, %v3796_v59  ;;  %vm3864_vm2 = vweird.f32 %v9255_v4 }
 0xb93   :  { %vm3865_vm7 = vmor %vm3863_vm3, %vm3864_vm2 }
 0xb94   :  { %v3859_v63 = vmul.f32 %v9255_v4, %v3858_v56  ;;  %v3856_v46 = vsel %vm3855_vm1, %v9253_v0, %v3852_v60 }
 0xb95   :  { %v3971_v35 = vmul.f32 %v3856_v46, %v12162_v20 }
 0xb96   :  { %v3860_v8 = vmul.f32 0.5, %v3859_v63 }
 0xb97   :  { %v3988_v40 = vmul.f32 %v12366_v53, %v3971_v35 }
 0xb98   :  { %v3861_v11 = vsub.f32 1.5, %v3860_v8 }
 0xb99   :  { %v4005_v29 = vadd.f32 %v12380_v16, %v3988_v40 }
 0xb9a   :  { %v3862_v9 = vmul.f32 %v9255_v4, %v3861_v11 }
 0xb9c   :  { %v3866_v45 = vsel %vm3865_vm7, %v9255_v4, %v3862_v9 }
 0xb9d   :  { %v3688_v23 = vpop.xlane.xlu0 %3687  ;;  %v3972_v5 = vmul.f32 %v3866_v45, %v12173_v57 }
 0xb9e   :  { %v3707_v26 = vmul.f32 %v3688_v23, %v14829_v31 }
 0xb9f   :  { %v3989_v6 = vmul.f32 %v12366_v53, %v3972_v5 }
 0xba0   :  { %v12412_v3 = vsub.f32 %v12183_v15, %v3707_v26 }
 0xba1   :  { %v4006_v20 = vadd.f32 %v12380_v16, %v3989_v6 }
 0xba2   :  { %v3739_v17 = vmul.f32 %v12412_v3, %v12412_v3 }
 0xba3   :  { %v4019_v21 = vpack.c.bf16 %v4006_v20, %v4005_v29 }
 0xba4   :  { %3767 = vadd.xlane.f32.xlu1 %v3739_v17 }
 0xba5   :  { %4213 = vmatmul.bf16.gmra.mxu1 %v4019_v21  ;;  %4262 = vmatmul.bf16.gmra.mxu2 %v4019_v21 }
 0xba6   :  { %4311 = vmatmul.bf16.gmra.mxu3 %v4019_v21 }
 0xbca   :  { %v3756_v57 = vpop.xlane.xlu2 %3755 }
 0xbcb   :  { %v3781_v2 = vmul.f32 %v3756_v57, %v14829_v31 }
 0xbcd   :  { %v3797_v25 = vadd.f32 1e-05, %v3781_v2 }
 0xbcf   :  { %9256 = vrsqrt.f32 %v3797_v25  ;;  %vm3873_vm9 = vweird.f32 %v3797_v25 }
 0xbd2   :  { %v3690_v1 = vpop.xlane.xlu2 %3689 }
 0xbd3   :  { %v3708_v27 = vmul.f32 %v3690_v1, %v14829_v31 }
 0xbd5   :  { %v9257_v7 = vpop.eup %9256  ;;  %v12421_v50 = vsub.f32 %v12341_v54, %v3708_v27  ;;  %v3758_v12 = vpop.xlane.xlu1 %3757 }
 0xbd6   :  { %v3868_v24 = vmul.f32 %v9257_v7, %v3797_v25  ;;  %v3782_v48 = vmul.f32 %v3758_v12, %v14829_v31  ;;  %vm3874_vm8 = vweird.f32 %v9257_v7 }
 0xbd7   :  { %v3740_v49 = vmul.f32 %v12421_v50, %v12421_v50  ;;  %vm3875_vm10 = vmor %vm3873_vm9, %vm3874_vm8 }
 0xbd8   :  { %v3869_v0 = vmul.f32 %v9257_v7, %v3868_v24  ;;  %v3798_v59 = vadd.f32 1e-05, %v3782_v48 }
 0xbd9   :  { %3769 = vadd.xlane.f32.xlu0 %v3740_v49 }
 0xbda   :  { %v3870_v18 = vmul.f32 0.5, %v3869_v0  ;;  %9258 = vrsqrt.f32 %v3798_v59  ;;  %v3692_v13 = vpop.xlane.xlu2 %3691  ;;  %vm3883_vm12 = vweird.f32 %v3798_v59 }
 0xbdb   :  { %v3709_v32 = vmul.f32 %v3692_v13, %v14829_v31 }
 0xbdc   :  { %v3871_v51 = vsub.f32 1.5, %v3870_v18 }
 0xbdd   :  { %v12428_v62 = vsub.f32 %v12352_v30, %v3709_v32 }
 0xbde   :  { %v3760_v19 = vpop.xlane.xlu1 %3759  ;;  %v3872_v63 = vmul.f32 %v9257_v7, %v3871_v51 }
 0xbdf   :  { %v3783_v4 = vmul.f32 %v3760_v19, %v14829_v31  ;;  %v3741_v60 = vmul.f32 %v12428_v62, %v12428_v62 }
 0xbe0   :  { %v9259_v56 = vpop.eup %9258  ;;  %v3876_v35 = vsel %vm3875_vm10, %v9257_v7, %v3872_v63 }
 0xbe1   :  { %v3878_v46 = vmul.f32 %v9259_v56, %v3798_v59  ;;  %v3799_v8 = vadd.f32 1e-05, %v3783_v4  ;;  %3771 = vadd.xlane.f32.xlu2 %v3741_v60  ;;  %vm3884_vm11 = vweird.f32 %v9259_v56  ;;  %v3973_v6 = vmul.f32 %v3876_v35, %v12305_v43 }
 0xbe2   :  { %vm3885_vm13 = vmor %vm3883_vm12, %vm3884_vm11 }
 0xbe3   :  { %v3879_v11 = vmul.f32 %v9259_v56, %v3878_v46  ;;  %9260 = vrsqrt.f32 %v3799_v8  ;;  %v3990_v7 = vmul.f32 %v12366_v53, %v3973_v6  ;;  %vm3893_vm15 = vweird.f32 %v3799_v8  ;;  %v7932_v46 = vld [vmem:[%s14691_s6 + $0x3] sm:$0x7] }
 0xbe5   :  { %v3880_v9 = vmul.f32 0.5, %v3879_v11  ;;  %v4007_v48 = vadd.f32 %v12380_v16, %v3990_v7 }
 0xbe6   :  { %v3694_v45 = vpop.xlane.xlu1 %3693  ;;  %v3762_v23 = vpop.xlane.xlu0 %3761 }
 0xbe7   :  { %v3881_v5 = vsub.f32 1.5, %v3880_v9  ;;  %v3710_v40 = vmul.f32 %v3694_v45, %v14829_v31  ;;  %v3784_v26 = vmul.f32 %v3762_v23, %v14829_v31 }
 0xbe9   :  { %v9261_v29 = vpop.eup %9260  ;;  %v3882_v20 = vmul.f32 %v9259_v56, %v3881_v5  ;;  %v12437_v17 = vsub.f32 %v12374_v33, %v3710_v40  ;;  %v3800_v21 = vadd.f32 1e-05, %v3784_v26  ;;  %v12454_v5 = vperm.slane %v7932_v46, 1 }
 0xbea   :  { %v3888_v57 = vmul.f32 %v9261_v29, %v3799_v8  ;;  %vm3894_vm14 = vweird.f32 %v9261_v29  ;;  %v12451_v8 = vperm.slane %v7932_v46, 2 }
 0xbeb   :  { %v3886_v2 = vsel %vm3885_vm13, %v9259_v56, %v3882_v20  ;;  %9262 = vrsqrt.f32 %v3800_v21  ;;  %v3742_v25 = vmul.f32 %v12437_v17, %v12437_v17  ;;  %vm3895_vm0 = vmor %vm3893_vm15, %vm3894_vm14  ;;  %vm3903_vm2 = vweird.f32 %v3800_v21 }
 0xbec   :  { %v3889_v1 = vmul.f32 %v9261_v29, %v3888_v57  ;;  %v3974_v27 = vmul.f32 %v3886_v2, %v12344_v14  ;;  %v12459_v20 = vperm.slane %v7932_v46, 0 }
 0xbed   :  { %3773 = vadd.xlane.f32.xlu1 %v3742_v25 }
 0xbee   :  { %v3890_v43 = vmul.f32 0.5, %v3889_v1  ;;  %v3991_v12 = vmul.f32 %v12366_v53, %v3974_v27 }
 0xbf0   :  { %v3891_v24 = vsub.f32 1.5, %v3890_v43  ;;  %v4008_v49 = vadd.f32 %v12380_v16, %v3991_v12 }
 0xbf1   :  { %v9263_v0 = vpop.eup %9262 }
 0xbf2   :  { %v3898_v59 = vmul.f32 %v9263_v0, %v3800_v21  ;;  %v4020_v18 = vpack.c.bf16 %v4008_v49, %v4007_v48  ;;  %v3892_v13 = vmul.f32 %v9261_v29, %v3891_v24  ;;  %vm3904_vm1 = vweird.f32 %v9263_v0 }
 0xbf3   :  { %vm3905_vm3 = vmor %vm3903_vm2, %vm3904_vm1 }
 0xbf4   :  { %v3899_v32 = vmul.f32 %v9263_v0, %v3898_v59  ;;  %4218 = vmatmul.bf16.gmra.mxu1 %v4020_v18  ;;  %4267 = vmatmul.bf16.gmra.mxu2 %v4020_v18  ;;  %v3896_v51 = vsel %vm3895_vm0, %v9261_v29, %v3892_v13 }
 0xbf5   :  { %4316 = vmatmul.bf16.gmra.mxu3 %v4020_v18  ;;  %v3975_v35 = vmul.f32 %v3896_v51, %v12356_v52 }
 0xbf6   :  { %v3900_v14 = vmul.f32 0.5, %v3899_v32 }
 0xbf7   :  { %v4204_v19 = vpop.f32.mrf.mxu1  ;;  %v3764_v4 = vpop.xlane.xlu0 %3763  ;;  %v3992_v26 = vmul.f32 %v12366_v53, %v3975_v35 }
 0xbf8   :  { %v3901_v60 = vsub.f32 1.5, %v3900_v14  ;;  %v3785_v56 = vmul.f32 %v3764_v4, %v14829_v31  ;;  %v4205_v43 = vadd.f32 %v4204_v19, %v12459_v20 }
 0xbf9   :  { %v4009_v1 = vadd.f32 %v12380_v16, %v3992_v26 }
 0xbfa   :  { %v3902_v63 = vmul.f32 %v9263_v0, %v3901_v60  ;;  %v3801_v11 = vadd.f32 1e-05, %v3785_v56 }
 0xbfc   :  { %v3906_v9 = vsel %vm3905_vm3, %v9263_v0, %v3902_v63  ;;  %9264 = vrsqrt.f32 %v3801_v11  ;;  %vm3913_vm8 = vweird.f32 %v3801_v11 }
 0xbfd   :  { %v4253_v45 = vpop.f32.mrf.mxu2  ;;  %v3976_v23 = vmul.f32 %v3906_v9, %v12371_v36 }
 0xbfe   :  { %v4302_v40 = vpop.f32.mrf.mxu3  ;;  %v4254_v36 = vadd.f32 %v4253_v45, %v12454_v5 }
 0xbff   :  { %v4303_v6 = vadd.f32 %v4302_v40, %v12451_v8  ;;  %v3993_v29 = vmul.f32 %v12366_v53, %v3976_v23  ;;  %v4206_v21 = vpop.f32.mrf.mxu1 }
 0xc00   :  { %v3766_v52 = vpop.xlane.xlu2 %3765  ;;  %v4342_v49 = vpack.c.bf16 %v4254_v36, %v4205_v43  ;;  %v4207_v0 = vadd.f32 %v4206_v21, %v12459_v20 }
 0xc01   :  { %v3786_v57 = vmul.f32 %v3766_v52, %v14829_v31  ;;  %v4010_v2 = vadd.f32 %v12380_v16, %v3993_v29  ;;  %v4343_v32 = vpack.c.bf16 %v4303_v6, %v4303_v6 }
 0xc02   :  { %v9265_v25 = vpop.eup %9264  ;;  %v4390_v60 = vunpack.c.l.b16 %v4342_v49  ;;  %v4414_v56 = vunpack.c.h.b16 %v4342_v49 }
 0xc03   :  { %v3908_v27 = vmul.f32 %v9265_v25, %v3801_v11  ;;  %v3802_v7 = vadd.f32 1e-05, %v3786_v57  ;;  %v4021_v12 = vpack.c.bf16 %v4010_v2, %v4009_v1  ;;  %vm3914_vm7 = vweird.f32 %v9265_v25 }
 0xc04   :  { %v4703_v9 = vunpack.c.l.b16 %v4343_v32  ;;  %vm3915_vm9 = vmor %vm3913_vm8, %vm3914_vm7 }
 0xc05   :  { %v3909_v24 = vmul.f32 %v9265_v25, %v3908_v27  ;;  %9266 = vrsqrt.f32 %v3802_v7  ;;  %v4255_v48 = vpop.f32.mrf.mxu2  ;;  %4223 = vmatmul.bf16.gmra.mxu1 %v4021_v12  ;;  %4272 = vmatmul.bf16.gmra.mxu2 %v4021_v12  ;;  %vm3923_vm11 = vweird.f32 %v3802_v7 }
 0xc06   :  { %v4256_v59 = vadd.f32 %v4255_v48, %v12454_v5  ;;  %v4304_v18 = vpop.f32.mrf.mxu3  ;;  %4321 = vmatmul.bf16.gmra.mxu3 %v4021_v12 }
 0xc07   :  { %v3910_v13 = vmul.f32 0.5, %v3909_v24  ;;  %v4305_v14 = vadd.f32 %v4304_v18, %v12451_v8 }
 0xc08   :  { %v4344_v51 = vpack.c.bf16 %v4256_v59, %v4207_v0  ;;  %v4209_v23 = vpop.f32.mrf.mxu1 }
 0xc09   :  { %v3911_v4 = vsub.f32 1.5, %v3910_v13  ;;  %v4345_v19 = vpack.c.bf16 %v4305_v14, %v4305_v14  ;;  %v4210_v0 = vadd.f32 %v4209_v23, %v12459_v20 }
 0xc0a   :  { %v4391_v63 = vunpack.c.l.b16 %v4344_v51  ;;  %v4415_v46 = vunpack.c.h.b16 %v4344_v51 }
 0xc0b   :  { %v9267_v35 = vpop.eup %9266  ;;  %v4704_v45 = vunpack.c.l.b16 %v4345_v19  ;;  %v3912_v40 = vmul.f32 %v9265_v25, %v3911_v4 }
 0xc0c   :  { %v3918_v26 = vmul.f32 %v9267_v35, %v3802_v7  ;;  %v12469_v29 = vpack.c.b16 %v4391_v63, %v4390_v60  ;;  %v12471_v6 = vpack.c.b16 %v4415_v46, %v4414_v56  ;;  %vm3924_vm10 = vweird.f32 %v9267_v35 }
 0xc0d   :  { %v12473_v52 = vpack.c.b16 %v4704_v45, %v4703_v9  ;;  %v3916_v2 = vsel %vm3915_vm9, %v9265_v25, %v3912_v40  ;;  %vm3925_vm12 = vmor %vm3923_vm11, %vm3924_vm10 }
 0xc0e   :  { %v3919_v21 = vmul.f32 %v9267_v35, %v3918_v26  ;;  %4784 = vrot.lane.b32.xlu0 %v12469_v29, %s9594_s0  ;;  %4800 = vrot.lane.b32.xlu2 %v12471_v6, %s9594_s0  ;;  %v4258_v57 = vpop.f32.mrf.mxu2  ;;  %v3977_v12 = vmul.f32 %v3916_v2, %v12389_v38 }
 0xc0f   :  { %14855 = vst [vmem:[#allocation8_spill] sm:$0xff] %v12473_v52  ;;  %v4307_v1 = vpop.f32.mrf.mxu3  ;;  %v4259_v11 = vadd.f32 %v4258_v57, %v12454_v5 }
 0xc10   :  { %v3920_v36 = vmul.f32 0.5, %v3919_v21  ;;  %v4308_v27 = vadd.f32 %v4307_v1, %v12451_v8  ;;  %v4211_v48 = vpop.f32.mrf.mxu1  ;;  %v3994_v18 = vmul.f32 %v12366_v53, %v3977_v12 }
 0xc11   :  { %v4346_v13 = vpack.c.bf16 %v4259_v11, %v4210_v0  ;;  %v4212_v32 = vadd.f32 %v4211_v48, %v12459_v20 }
 0xc12   :  { %v3921_v43 = vsub.f32 1.5, %v3920_v36  ;;  %v4347_v51 = vpack.c.bf16 %v4308_v27, %v4308_v27  ;;  %v4011_v56 = vadd.f32 %v12380_v16, %v3994_v18 }
 0xc13   :  { %v4392_v21 = vunpack.c.l.b16 %v4346_v13 }
 0xc14   :  { %v3922_v24 = vmul.f32 %v9267_v35, %v3921_v43 }
 0xc16   :  { %v3926_v49 = vsel %vm3925_vm12, %v9267_v35, %v3922_v24  ;;  %v4260_v59 = vpop.f32.mrf.mxu2  ;;  %v4705_v35 = vunpack.c.l.b16 %v4347_v51 }
 0xc17   :  { %v3978_v25 = vmul.f32 %v3926_v49, %v12402_v58  ;;  %v4261_v14 = vadd.f32 %v4260_v59, %v12454_v5  ;;  %v4309_v38 = vpop.f32.mrf.mxu3  ;;  %v4416_v58 = vunpack.c.h.b16 %v4346_v13 }
 0xc18   :  { %v4310_v7 = vadd.f32 %v4309_v38, %v12451_v8 }
 0xc19   :  { %v3995_v4 = vmul.f32 %v12366_v53, %v3978_v25  ;;  %v4348_v19 = vpack.c.bf16 %v4261_v14, %v4212_v32  ;;  %v3768_v32 = vpop.xlane.xlu1 %3767 }
 0xc1a   :  { %v4349_v60 = vpack.c.bf16 %v4310_v7, %v4310_v7 }
 0xc1b   :  { %v4012_v63 = vadd.f32 %v12380_v16, %v3995_v4  ;;  %v4417_v46 = vunpack.c.h.b16 %v4348_v19  ;;  %v4393_v26 = vunpack.c.l.b16 %v4348_v19 }
 0xc1c   :  { %v4706_v9 = vunpack.c.l.b16 %v4349_v60 }
 0xc1d   :  { %v4022_v45 = vpack.c.bf16 %v4012_v63, %v4011_v56  ;;  %v12491_v23 = vpack.c.b16 %v4417_v46, %v4416_v58  ;;  %v12497_v2 = vpack.c.b16 %v4393_v26, %v4392_v21  ;;  %v3787_v56 = vmul.f32 %v3768_v32, %v14829_v31 }
 0xc1e   :  { %v12493_v40 = vpack.c.b16 %v4706_v9, %v4705_v35 }
 0xc1f   :  { %4228 = vmatmul.bf16.gmra.mxu1 %v4022_v45  ;;  %4277 = vmatmul.bf16.gmra.mxu2 %v4022_v45  ;;  %v3803_v35 = vadd.f32 1e-05, %v3787_v56 }
 0xc20   :  { %14856 = vst [vmem:[#allocation10_spill] sm:$0xff] %v12493_v40  ;;  %4802 = vrot.lane.b32.xlu1 %v12491_v23, %s9594_s0  ;;  %4326 = vmatmul.bf16.gmra.mxu3 %v4022_v45 }
 0xc21   :  { %9268 = vrsqrt.f32 %v3803_v35  ;;  %vm3933_vm14 = vweird.f32 %v3803_v35 }
 0xc22   :  { %v4214_v57 = vpop.f32.mrf.mxu1 }
 0xc23   :  { %v4215_v24 = vadd.f32 %v4214_v57, %v12459_v20 }
 0xc27   :  { %v9269_v9 = vpop.eup %9268 }
 0xc28   :  { %4786 = vrot.lane.b32.xlu1 %v12497_v2, %s9594_s0  ;;  %v4263_v36 = vpop.f32.mrf.mxu2  ;;  %v3928_v45 = vmul.f32 %v9269_v9, %v3803_v35  ;;  %vm3934_vm13 = vweird.f32 %v9269_v9 }
 0xc29   :  { %v4312_v1 = vpop.f32.mrf.mxu3  ;;  %v4264_v43 = vadd.f32 %v4263_v36, %v12454_v5  ;;  %vm3935_vm15 = vmor %vm3933_vm14, %vm3934_vm13 }
 0xc2a   :  { %v4313_v27 = vadd.f32 %v4312_v1, %v12451_v8  ;;  %v4216_v12 = vpop.f32.mrf.mxu1  ;;  %v3929_v26 = vmul.f32 %v9269_v9, %v3928_v45 }
 0xc2b   :  { %v4350_v48 = vpack.c.bf16 %v4264_v43, %v4215_v24  ;;  %v4217_v49 = vadd.f32 %v4216_v12, %v12459_v20 }
 0xc2c   :  { %v4351_v25 = vpack.c.bf16 %v4313_v27, %v4313_v27  ;;  %v3930_v1 = vmul.f32 0.5, %v3929_v26 }
 0xc2d   :  { %v4394_v38 = vunpack.c.l.b16 %v4350_v48  ;;  %v4418_v51 = vunpack.c.h.b16 %v4350_v48 }
 0xc2e   :  { %v4707_v19 = vunpack.c.l.b16 %v4351_v25  ;;  %v3931_v27 = vsub.f32 1.5, %v3930_v1 }
 0xc30   :  { %v4265_v11 = vpop.f32.mrf.mxu2  ;;  %v3932_v48 = vmul.f32 %v9269_v9, %v3931_v27 }
 0xc31   :  { %v4266_v0 = vadd.f32 %v4265_v11, %v12454_v5  ;;  %v4314_v59 = vpop.f32.mrf.mxu3 }
 0xc32   :  { %v4315_v18 = vadd.f32 %v4314_v59, %v12451_v8  ;;  %v3936_v59 = vsel %vm3935_vm15, %v9269_v9, %v3932_v48 }
 0xc33   :  { %v4352_v13 = vpack.c.bf16 %v4266_v0, %v4217_v49  ;;  %v3979_v32 = vmul.f32 %v3936_v59, %v12412_v3 }
 0xc34   :  { %v4353_v14 = vpack.c.bf16 %v4315_v18, %v4315_v18 }
 0xc35   :  { %v4395_v7 = vunpack.c.l.b16 %v4352_v13  ;;  %v4419_v4 = vunpack.c.h.b16 %v4352_v13  ;;  %v3996_v35 = vmul.f32 %v12366_v53, %v3979_v32 }
 0xc36   :  { %v4708_v60 = vunpack.c.l.b16 %v4353_v14 }
 0xc37   :  { %v12508_v63 = vpack.c.b16 %v4419_v4, %v4418_v51  ;;  %v12510_v58 = vpack.c.b16 %v4395_v7, %v4394_v38  ;;  %v4013_v3 = vadd.f32 %v12380_v16, %v3996_v35 }
 0xc38   :  { %v12512_v46 = vpack.c.b16 %v4708_v60, %v4707_v19 }
 0xc39   :  { %4804 = vrot.lane.b32.xlu0 %v12508_v63, %s9594_s0  ;;  %4788 = vrot.lane.b32.xlu2 %v12510_v58, %s9594_s0 }
 0xc3a   :  { %14857 = vst [vmem:[#allocation11_spill] sm:$0xff] %v12512_v46 }
 0xc4c   :  { %v3770_v21 = vpop.xlane.xlu0 %3769 }
 0xc4d   :  { %v3788_v57 = vmul.f32 %v3770_v21, %v14829_v31 }
 0xc4f   :  { %v3804_v36 = vadd.f32 1e-05, %v3788_v57 }
 0xc51   :  { %9270 = vrsqrt.f32 %v3804_v36  ;;  %vm3943_vm1 = vweird.f32 %v3804_v36 }
 0xc54   :  { %v3772_v43 = vpop.xlane.xlu2 %3771 }
 0xc55   :  { %v3789_v12 = vmul.f32 %v3772_v43, %v14829_v31 }
 0xc57   :  { %v9271_v24 = vpop.eup %9270  ;;  %v3805_v11 = vadd.f32 1e-05, %v3789_v12 }
 0xc58   :  { %v3938_v49 = vmul.f32 %v9271_v24, %v3804_v36  ;;  %vm3944_vm0 = vweird.f32 %v9271_v24 }
 0xc59   :  { %9272 = vrsqrt.f32 %v3805_v11  ;;  %vm3945_vm2 = vmor %vm3943_vm1, %vm3944_vm0  ;;  %vm3953_vm7 = vweird.f32 %v3805_v11 }
 0xc5a   :  { %v3939_v0 = vmul.f32 %v9271_v24, %v3938_v49 }
 0xc5c   :  { %v3940_v25 = vmul.f32 0.5, %v3939_v0 }
 0xc5e   :  { %v3941_v18 = vsub.f32 1.5, %v3940_v25 }
 0xc5f   :  { %v9273_v13 = vpop.eup %9272 }
 0xc60   :  { %v3942_v14 = vmul.f32 %v9271_v24, %v3941_v18  ;;  %v3948_v38 = vmul.f32 %v9273_v13, %v3805_v11  ;;  %v3774_v51 = vpop.xlane.xlu1 %3773  ;;  %vm3954_vm3 = vweird.f32 %v9273_v13 }
 0xc61   :  { %v3790_v7 = vmul.f32 %v3774_v51, %v14829_v31  ;;  %vm3955_vm8 = vmor %vm3953_vm7, %vm3954_vm3  ;;  %v12894_v31 = vld [vmem:[%s14692_s3 + $0x18] sm:$0xff] }
 0xc62   :  { %v3946_v4 = vsel %vm3945_vm2, %v9271_v24, %v3942_v14  ;;  %v3949_v19 = vmul.f32 %v9273_v13, %v3948_v38 }
 0xc63   :  { %v3806_v60 = vadd.f32 1e-05, %v3790_v7  ;;  %v3980_v56 = vmul.f32 %v3946_v4, %v12421_v50 }
 0xc64   :  { %v3950_v9 = vmul.f32 0.5, %v3949_v19 }
 0xc65   :  { %9274 = vrsqrt.f32 %v3806_v60  ;;  %v3997_v45 = vmul.f32 %v12366_v53, %v3980_v56  ;;  %vm3963_vm10 = vweird.f32 %v3806_v60 }
 0xc66   :  { %v3951_v21 = vsub.f32 1.5, %v3950_v9 }
 0xc67   :  { %v4014_v26 = vadd.f32 %v12380_v16, %v3997_v45 }
 0xc68   :  { %v3952_v1 = vmul.f32 %v9273_v13, %v3951_v21 }
 0xc69   :  { %v4023_v57 = vpack.c.bf16 %v4014_v26, %v4013_v3 }
 0xc6a   :  { %v3956_v43 = vsel %vm3955_vm8, %v9273_v13, %v3952_v1 }
 0xc6b   :  { %v9275_v36 = vpop.eup %9274  ;;  %4233 = vmatmul.bf16.gmra.mxu1 %v4023_v57  ;;  %4282 = vmatmul.bf16.gmra.mxu2 %v4023_v57  ;;  %v3981_v49 = vmul.f32 %v3956_v43, %v12428_v62 }
 0xc6c   :  { %v3958_v27 = vmul.f32 %v9275_v36, %v3806_v60  ;;  %4331 = vmatmul.bf16.gmra.mxu3 %v4023_v57  ;;  %vm3964_vm9 = vweird.f32 %v9275_v36 }
 0xc6d   :  { %vm3965_vm11 = vmor %vm3963_vm10, %vm3964_vm9  ;;  %v3998_v32 = vmul.f32 %v12366_v53, %v3981_v49 }
 0xc6e   :  { %v3959_v50 = vmul.f32 %v9275_v36, %v3958_v27 }
 0xc6f   :  { %v4015_v51 = vadd.f32 %v12380_v16, %v3998_v32 }
 0xc70   :  { %v3960_v12 = vmul.f32 0.5, %v3959_v50 }
 0xc71   :  { %v4219_v24 = vpop.f32.mrf.mxu1 }
 0xc72   :  { %v3961_v48 = vsub.f32 1.5, %v3960_v12  ;;  %v4220_v19 = vadd.f32 %v4219_v24, %v12459_v20 }
 0xc74   :  { %v3962_v0 = vmul.f32 %v9275_v36, %v3961_v48 }
 0xc76   :  { %v3966_v59 = vsel %vm3965_vm11, %v9275_v36, %v3962_v0 }
 0xc77   :  { %v4268_v25 = vpop.f32.mrf.mxu2  ;;  %v3982_v18 = vmul.f32 %v3966_v59, %v12437_v17 }
 0xc78   :  { %v4317_v14 = vpop.f32.mrf.mxu3  ;;  %v4269_v62 = vadd.f32 %v4268_v25, %v12454_v5 }
 0xc79   :  { %v4318_v11 = vadd.f32 %v4317_v14, %v12451_v8  ;;  %v3999_v13 = vmul.f32 %v12366_v53, %v3982_v18  ;;  %v4221_v38 = vpop.f32.mrf.mxu1 }
 0xc7a   :  { %v4354_v60 = vpack.c.bf16 %v4269_v62, %v4220_v19  ;;  %v4222_v56 = vadd.f32 %v4221_v38, %v12459_v20 }
 0xc7b   :  { %v4016_v7 = vadd.f32 %v12380_v16, %v3999_v13  ;;  %v4355_v9 = vpack.c.bf16 %v4318_v11, %v4318_v11 }
 0xc7c   :  { %v4396_v26 = vunpack.c.l.b16 %v4354_v60  ;;  %v4420_v21 = vunpack.c.h.b16 %v4354_v60 }
 0xc7d   :  { %v4024_v4 = vpack.c.bf16 %v4016_v7, %v4015_v51  ;;  %v4709_v1 = vunpack.c.l.b16 %v4355_v9 }
 0xc7f   :  { %4238 = vmatmul.bf16.gmra.mxu1 %v4024_v4  ;;  %4287 = vmatmul.bf16.gmra.mxu2 %v4024_v4  ;;  %v4270_v17 = vpop.f32.mrf.mxu2 }
 0xc80   :  { %4336 = vmatmul.bf16.gmra.mxu3 %v4024_v4  ;;  %v4271_v35 = vadd.f32 %v4270_v17, %v12454_v5  ;;  %v4319_v53 = vpop.f32.mrf.mxu3 }
 0xc81   :  { %v4320_v45 = vadd.f32 %v4319_v53, %v12451_v8 }
 0xc82   :  { %v4356_v3 = vpack.c.bf16 %v4271_v35, %v4222_v56  ;;  %v4224_v50 = vpop.f32.mrf.mxu1 }
 0xc83   :  { %v4357_v16 = vpack.c.bf16 %v4320_v45, %v4320_v45  ;;  %v4225_v18 = vadd.f32 %v4224_v50, %v12459_v20 }
 0xc84   :  { %v4397_v57 = vunpack.c.l.b16 %v4356_v3  ;;  %v4421_v36 = vunpack.c.h.b16 %v4356_v3 }
 0xc85   :  { %v4710_v27 = vunpack.c.l.b16 %v4357_v16 }
 0xc86   :  { %v12539_v43 = vpack.c.b16 %v4397_v57, %v4396_v26  ;;  %v12541_v12 = vpack.c.b16 %v4421_v36, %v4420_v21 }
 0xc87   :  { %v12543_v24 = vpack.c.b16 %v4710_v27, %v4709_v1 }
 0xc88   :  { %4790 = vrot.lane.b32.xlu0 %v12539_v43, %s9594_s0  ;;  %4806 = vrot.lane.b32.xlu2 %v12541_v12, %s9594_s0  ;;  %v4273_v48 = vpop.f32.mrf.mxu2 }
 0xc89   :  { %14858 = vst [vmem:[#allocation12_spill] sm:$0xff] %v12543_v24  ;;  %v4322_v49 = vpop.f32.mrf.mxu3  ;;  %v4274_v59 = vadd.f32 %v4273_v48, %v12454_v5 }
 0xc8a   :  { %v4323_v0 = vadd.f32 %v4322_v49, %v12451_v8  ;;  %v4226_v25 = vpop.f32.mrf.mxu1 }
 0xc8b   :  { %v4358_v14 = vpack.c.bf16 %v4274_v59, %v4225_v18  ;;  %v4227_v11 = vadd.f32 %v4226_v25, %v12459_v20 }
 0xc8c   :  { %v4359_v51 = vpack.c.bf16 %v4323_v0, %v4323_v0 }
 0xc8d   :  { %v4398_v19 = vunpack.c.l.b16 %v4358_v14  ;;  %v4422_v17 = vunpack.c.h.b16 %v4358_v14 }
 0xc8e   :  { %v4711_v35 = vunpack.c.l.b16 %v4359_v51 }
 0xc90   :  { %v4275_v32 = vpop.f32.mrf.mxu2 }
 0xc91   :  { %v4276_v13 = vadd.f32 %v4275_v32, %v12454_v5  ;;  %v4324_v38 = vpop.f32.mrf.mxu3 }
 0xc92   :  { %v4325_v7 = vadd.f32 %v4324_v38, %v12451_v8 }
 0xc93   :  { %v4360_v62 = vpack.c.bf16 %v4276_v13, %v4227_v11 }
 0xc94   :  { %v4361_v4 = vpack.c.bf16 %v4325_v7, %v4325_v7 }
 0xc95   :  { %v4399_v60 = vunpack.c.l.b16 %v4360_v62  ;;  %v4423_v56 = vunpack.c.h.b16 %v4360_v62 }
 0xc96   :  { %v4712_v53 = vunpack.c.l.b16 %v4361_v4 }
 0xc97   :  { %v12555_v9 = vpack.c.b16 %v4423_v56, %v4422_v17  ;;  %v12557_v45 = vpack.c.b16 %v4399_v60, %v4398_v19 }
 0xc98   :  { %v12559_v3 = vpack.c.b16 %v4712_v53, %v4711_v35 }
 0xc99   :  { %5516 = vrot.lane.b32.xlu2 %v12555_v9, %s9595_s26  ;;  %4808 = vrot.lane.b32.xlu0 %v12555_v9, %s9594_s0 }
 0xc9a   :  { %4792 = vrot.lane.b32.xlu1 %v12557_v45, %s9594_s0 }
 0xc9c   :  { %v4229_v16 = vpop.f32.mrf.mxu1 }
 0xc9d   :  { %v4230_v36 = vadd.f32 %v4229_v16, %v12459_v20 }
 0xca2   :  { %v4278_v26 = vpop.f32.mrf.mxu2 }
 0xca3   :  { %v4279_v21 = vadd.f32 %v4278_v26, %v12454_v5  ;;  %v4327_v11 = vpop.f32.mrf.mxu3 }
 0xca4   :  { %v4231_v57 = vpop.f32.mrf.mxu1 }
 0xca5   :  { %v4362_v27 = vpack.c.bf16 %v4279_v21, %v4230_v36  ;;  %v4232_v50 = vadd.f32 %v4231_v57, %v12459_v20 }
 0xca7   :  { %v4400_v0 = vunpack.c.l.b16 %v4362_v27  ;;  %v4424_v59 = vunpack.c.h.b16 %v4362_v27 }
 0xcaa   :  { %v4280_v1 = vpop.f32.mrf.mxu2 }
 0xcab   :  { %v4281_v48 = vadd.f32 %v4280_v1, %v12454_v5  ;;  %v4329_v13 = vpop.f32.mrf.mxu3 }
 0xcad   :  { %v4364_v49 = vpack.c.bf16 %v4281_v48, %v4232_v50 }
 0xcaf   :  { %v4401_v25 = vunpack.c.l.b16 %v4364_v49  ;;  %v4425_v18 = vunpack.c.h.b16 %v4364_v49 }
 0xcb1   :  { %v12571_v32 = vpack.c.b16 %v4425_v18, %v4424_v59  ;;  %v12573_v14 = vpack.c.b16 %v4401_v25, %v4400_v0 }
 0xcb3   :  { %5518 = vrot.lane.b32.xlu0 %v12571_v32, %s9595_s26  ;;  %4810 = vrot.lane.b32.xlu1 %v12571_v32, %s9594_s0 }
 0xcb4   :  { %4794 = vrot.lane.b32.xlu2 %v12573_v14, %s9594_s0 }
 0xce8   :  { %v4234_v38 = vpop.f32.mrf.mxu1 }
 0xce9   :  { %v4235_v19 = vadd.f32 %v4234_v38, %v12459_v20 }
 0xcee   :  { %v4283_v51 = vpop.f32.mrf.mxu2 }
 0xcef   :  { %v4332_v7 = vpop.f32.mrf.mxu3  ;;  %v4284_v62 = vadd.f32 %v4283_v51, %v12454_v5 }
 0xcf0   :  { %v4236_v4 = vpop.f32.mrf.mxu1 }
 0xcf1   :  { %v4366_v60 = vpack.c.bf16 %v4284_v62, %v4235_v19  ;;  %v4237_v56 = vadd.f32 %v4236_v4, %v12459_v20 }
 0xcf3   :  { %v4426_v16 = vunpack.c.h.b16 %v4366_v60  ;;  %v4402_v50 = vunpack.c.l.b16 %v4366_v60  ;;  %v4333_v60 = vadd.f32 %v4332_v7, %v12451_v8 }
 0xcf6   :  { %v4285_v17 = vpop.f32.mrf.mxu2 }
 0xcf7   :  { %v4286_v35 = vadd.f32 %v4285_v17, %v12454_v5  ;;  %v4334_v21 = vpop.f32.mrf.mxu3 }
 0xcf8   :  { %v4335_v38 = vadd.f32 %v4334_v21, %v12451_v8 }
 0xcf9   :  { %v4368_v53 = vpack.c.bf16 %v4286_v35, %v4237_v56 }
 0xcfb   :  { %v4427_v26 = vunpack.c.h.b16 %v4368_v53  ;;  %v4403_v1 = vunpack.c.l.b16 %v4368_v53 }
 0xcfc   :  { %v4239_v36 = vpop.f32.mrf.mxu1 }
 0xcfd   :  { %v4436_v57 = vpack.c.b16 %v4427_v26, %v4426_v16  ;;  %v12588_v49 = vpack.c.b16 %v4403_v1, %v4402_v50  ;;  %v4240_v18 = vadd.f32 %v4239_v36, %v12459_v20  ;;  %v4330_v16 = vadd.f32 %v4329_v13, %v12451_v8 }
 0xcfe   :  { %v4369_v26 = vpack.c.bf16 %v4335_v38, %v4335_v38 }
 0xcff   :  { %5166 = vrot.lane.b32.xlu1 %v4436_v57, %s9596_s27  ;;  %5520 = vrot.lane.b32.xlu0 %v4436_v57, %s9595_s26 }
 0xd00   :  { %4812 = vrot.lane.b32.xlu2 %v4436_v57, %s9594_s0 }
 0xd02   :  { %v4288_v27 = vpop.f32.mrf.mxu2 }
 0xd03   :  { %v4337_v48 = vpop.f32.mrf.mxu3  ;;  %v4289_v0 = vadd.f32 %v4288_v27, %v12454_v5 }
 0xd04   :  { %v4338_v59 = vadd.f32 %v4337_v48, %v12451_v8  ;;  %v4241_v25 = vpop.f32.mrf.mxu1 }
 0xd05   :  { %v4370_v62 = vpack.c.bf16 %v4289_v0, %v4240_v18  ;;  %v4242_v4 = vadd.f32 %v4241_v25, %v12459_v20  ;;  %v4367_v20 = vpack.c.bf16 %v4333_v60, %v4333_v60  ;;  %v4716_v25 = vunpack.c.l.b16 %v4369_v26  ;;  %v12689_v26 = vpop.permute.xlu1 %4802 }
 0xd06   :  { %v4371_v56 = vpack.c.bf16 %v4338_v59, %v4338_v59  ;;  %v4365_v59 = vpack.c.bf16 %v4330_v16, %v4330_v16  ;;  %v4478_v60 = vsel %vm987_vm4, %v12571_v32, 0  ;;  %v4463_v16 = vsel %vm987_vm4, %v12471_v6, 0 }
 0xd07   :  { %4796 = vrot.lane.b32.xlu1 %v12588_v49, %s9594_s0  ;;  %v4404_v36 = vunpack.c.l.b16 %v4370_v62  ;;  %v4428_v27 = vunpack.c.h.b16 %v4370_v62  ;;  %v4715_v38 = vunpack.c.l.b16 %v4367_v20 }
 0xd08   :  { %5514 = vrot.lane.b32.xlu2 %v12541_v12, %s9595_s26  ;;  %v4717_v48 = vunpack.c.l.b16 %v4371_v56  ;;  %v4472_v56 = vsel %vm987_vm4, %v12541_v12, 0 }
 0xd09   :  { %v4725_v62 = vpack.c.b16 %v4716_v25, %v4715_v38 }
 0xd0a   :  { %v4290_v51 = vpop.f32.mrf.mxu2 }
 0xd0b   :  { %v4291_v19 = vadd.f32 %v4290_v51, %v12454_v5  ;;  %v4339_v17 = vpop.f32.mrf.mxu3  ;;  %v4328_v5 = vadd.f32 %v4327_v11, %v12451_v8  ;;  %v4714_v51 = vunpack.c.l.b16 %v4365_v59 }
 0xd0c   :  { %v4340_v35 = vadd.f32 %v4339_v17, %v12451_v8  ;;  %v4481_v17 = vsel %vm987_vm4, %v4436_v57, 0  ;;  %v4475_v57 = vsel %vm987_vm4, %v12555_v9, 0 }
 0xd0d   :  { %v4372_v53 = vpack.c.bf16 %v4291_v19, %v4242_v4  ;;  %v4363_v11 = vpack.c.bf16 %v4328_v5, %v4328_v5 }
 0xd0e   :  { %v4373_v1 = vpack.c.bf16 %v4340_v35, %v4340_v35  ;;  %v4469_v35 = vsel %vm987_vm4, %v12508_v63, 0 }
 0xd0f   :  { %v4405_v21 = vunpack.c.l.b16 %v4372_v53  ;;  %v4429_v50 = vunpack.c.h.b16 %v4372_v53  ;;  %5512 = vrot.lane.b32.xlu1 %v12508_v63, %s9595_s26  ;;  %v4713_v4 = vunpack.c.l.b16 %v4363_v11  ;;  %v4466_v53 = vsel %vm987_vm4, %v12491_v23, 0 }
 0xd10   :  { %v4718_v7 = vunpack.c.l.b16 %v4373_v1  ;;  %5160 = vrot.lane.b32.xlu2 %v12541_v12, %s9596_s27  ;;  %v12701_v1 = vpop.permute.xlu0 %4784 }
 0xd11   :  { %v12608_v0 = vpack.c.b16 %v4429_v50, %v4428_v27  ;;  %v12610_v13 = vpack.c.b16 %v4405_v21, %v4404_v36  ;;  %v12623_v19 = vpack.c.b16 %v4714_v51, %v4713_v4 }
 0xd12   :  { %v12612_v18 = vpack.c.b16 %v4718_v7, %v4717_v48 }
 0xd13   :  { %4814 = vrot.lane.b32.xlu0 %v12608_v0, %s9594_s0  ;;  %v4484_v8 = vsel %vm987_vm4, %v12608_v0, 0 }
 0xd14   :  { %4735 = vmatpush.bf16.msrb.mxu1 %v12612_v18  ;;  %4486 = vmatpush.bf16.xpose.msrb.mxu0 %v4484_v8 }
 0xd17   :  { %5510 = vrot.lane.b32.xlu1 %v12491_v23, %s9595_s26 }
 0xd18   :  { %4736 = vmatpush.bf16.msrb.mxu1 %v4725_v62  ;;  %5158 = vrot.lane.b32.xlu2 %v12508_v63, %s9596_s27  ;;  %v4805_v27 = vpop.permute.xlu0 %4804 }
 0xd1b   :  { %5164 = vrot.lane.b32.xlu0 %v12571_v32, %s9596_s27  ;;  %v12654_v32 = vpop.permute.xlu2 %4800 }
 0xd1c   :  { %4737 = vmatpush.bf16.msrb.mxu1 %v12623_v19  ;;  %4487 = vmatpush.bf16.xpose.msrb.mxu0 %v4481_v17 }
 0xd1f   :  { %5156 = vrot.lane.b32.xlu1 %v12491_v23, %s9596_s27 }
 0xd20   :  { %4738 = vmatpush.bf16.msrb.mxu1 %v12559_v3  ;;  %5492 = vrot.lane.b32.xlu2 %v12469_v29, %s9595_s26  ;;  %v12721_v50 = vpop.permute.xlu0 %4790 }
 0xd23   :  { %5162 = vrot.lane.b32.xlu0 %v12555_v9, %s9596_s27  ;;  %v12664_v9 = vpop.permute.xlu2 %4788 }
 0xd24   :  { %4739 = vmatpush.bf16.msrb.mxu1 %v12543_v24  ;;  %4488 = vmatpush.bf16.xpose.msrb.mxu0 %v4478_v60 }
 0xd27   :  { %5138 = vrot.lane.b32.xlu1 %v12469_v29, %s9596_s27 }
 0xd28   :  { %4740 = vmatpush.bf16.msrb.mxu1 %v12512_v46  ;;  %5494 = vrot.lane.b32.xlu2 %v12497_v2, %s9595_s26  ;;  %v4809_v48 = vpop.permute.xlu0 %4808 }
 0xd2b   :  { %5508 = vrot.lane.b32.xlu0 %v12471_v6, %s9595_s26  ;;  %v12674_v12 = vpop.permute.xlu2 %4806 }
 0xd2c   :  { %4741 = vmatpush.bf16.msrb.mxu1 %v12493_v40  ;;  %4489 = vmatpush.bf16.xpose.msrb.mxu0 %v4475_v57 }
 0xd2f   :  { %5496 = vrot.lane.b32.xlu1 %v12510_v58, %s9595_s26 }
 0xd30   :  { %4742 = vmatpush.bf16.msrb.mxu1 %v12473_v52  ;;  %5142 = vrot.lane.b32.xlu2 %v12510_v58, %s9596_s27  ;;  %v12741_v59 = vpop.permute.xlu0 %5518 }
 0xd33   :  { %5154 = vrot.lane.b32.xlu0 %v12471_v6, %s9596_s27  ;;  %v12683_v63 = vpop.permute.xlu2 %5516  ;;  %v12707_v6 = vpop.permute.xlu1 %4786 }
 0xd34   :  { %4490 = vmatpush.bf16.xpose.msrb.mxu0 %v4472_v56 }
 0xd37   :  { %5502 = vrot.lane.b32.xlu1 %v12573_v14, %s9595_s26 }
 0xd38   :  { %5144 = vrot.lane.b32.xlu2 %v12539_v43, %s9596_s27 }
 0xd3b   :  { %5140 = vrot.lane.b32.xlu0 %v12497_v2, %s9596_s27  ;;  %v12695_v23 = vpop.permute.xlu2 %4794 }
 0xd3c   :  { %4491 = vmatpush.bf16.xpose.msrb.mxu0 %v4469_v35 }
 0xd3f   :  { %5148 = vrot.lane.b32.xlu1 %v12573_v14, %s9596_s27 }
 0xd40   :  { %5146 = vrot.lane.b32.xlu2 %v12557_v45, %s9596_s27 }
 0xd43   :  { %5498 = vrot.lane.b32.xlu0 %v12539_v43, %s9595_s26 }
 0xd44   :  { %4492 = vmatpush.bf16.xpose.msrb.mxu0 %v4466_v53 }
 0xd47   :  { %5075 = vrot.lane.b32.xlu1 %v12623_v19, %s9594_s0 }
 0xd48   :  { %5077 = vrot.lane.b32.xlu2 %v4725_v62, %s9594_s0 }
 0xd4b   :  { %5500 = vrot.lane.b32.xlu0 %v12557_v45, %s9595_s26 }
 0xd4c   :  { %4493 = vmatpush.bf16.xpose.msrb.mxu0 %v4463_v16  ;;  %v4853_v16 = vsel %vm987_vm4, %v4809_v48, 0  ;;  %v4847_v48 = vsel %vm987_vm4, %v4805_v27, 0  ;;  %v4841_v27 = vsel %vm987_vm4, %v12654_v32, 0 }
 0xd4f   :  { %5073 = vrot.lane.b32.xlu1 %v12559_v3, %s9594_s0 }
 0xd50   :  { %5071 = vrot.lane.b32.xlu2 %v12543_v24, %s9594_s0 }
 0xd53   :  { %8029 = vmatmul.msk.bf16.vlgmr.msrb.gmra.mxu0 %vm987_vm4, %v12469_v29  ;;  %5504 = vrot.lane.b32.xlu0 %v12588_v49, %s9595_s26  ;;  %v12713_v29 = vpop.permute.xlu1 %4792 }
 0xd57   :  { %5069 = vrot.lane.b32.xlu1 %v12512_v46, %s9594_s0 }
 0xd58   :  { %5067 = vrot.lane.b32.xlu2 %v12493_v40, %s9594_s0 }
 0xd5a   :  { %v4813_v36 = vpop.permute.xlu2 %4812 }
 0xd5b   :  { %5150 = vrot.lane.b32.xlu0 %v12588_v49, %s9596_s27  ;;  %v4811_v5 = vpop.permute.xlu1 %4810 }
 0xd5c   :  { %v4856_v57 = vsel %vm987_vm4, %v4811_v5, 0 }
 0xd5f   :  { %5785 = vrot.lane.b32.xlu1 %v4725_v62, %s9595_s26 }
 0xd60   :  { %5431 = vrot.lane.b32.xlu2 %v4725_v62, %s9596_s27 }
 0xd62   :  { %v12715_v21 = vpop.permute.xlu2 %5514 }
 0xd63   :  { %8030 = vmatmul.msk.bf16.gmra.mxu0 %vm987_vm4, %v12497_v2  ;;  %5065 = vrot.lane.b32.xlu0 %v12473_v52, %s9594_s0  ;;  %v5558_v61 = vsel %vm987_vm4, %v12715_v21, 0 }
 0xd67   :  { %5783 = vrot.lane.b32.xlu1 %v12623_v19, %s9595_s26 }
 0xd68   :  { %5522 = vrot.lane.b32.xlu2 %v12608_v0, %s9595_s26 }
 0xd6a   :  { %v12727_v20 = vpop.permute.xlu2 %5160 }
 0xd6b   :  { %5779 = vrot.lane.b32.xlu0 %v12543_v24, %s9595_s26 }
 0xd6f   :  { %5781 = vrot.lane.b32.xlu1 %v12559_v3, %s9595_s26 }
 0xd71   :  { %v12733_v2 = vpop.permute.xlu1 %5166  ;;  %v5521_v11 = vpop.permute.xlu0 %5520 }
 0xd72   :  { %v12735_v7 = vpop.permute.xlu2 %5158  ;;  %v5567_v15 = vsel %vm987_vm4, %v5521_v11, 0 }
 0xd73   :  { %8031 = vmatmul.msk.bf16.gmra.mxu0 %vm987_vm4, %v12510_v58  ;;  %5427 = vrot.lane.b32.xlu0 %v12559_v3, %s9596_s27 }
 0xd77   :  { %5429 = vrot.lane.b32.xlu1 %v12623_v19, %s9596_s27 }
 0xd79   :  { %v12745_v25 = vpop.permute.xlu1 %4796 }
 0xd7a   :  { %v12747_v8 = vpop.permute.xlu2 %5492 }
 0xd7b   :  { %4798 = vrot.lane.b32.xlu0 %v12610_v13, %s9594_s0 }
 0xd7f   :  { %5168 = vrot.lane.b32.xlu1 %v12608_v0, %s9596_s27 }
 0xd81   :  { %v12753_v58 = vpop.permute.xlu1 %5512 }
 0xd82   :  { %v12755_v38 = vpop.permute.xlu2 %5494 }
 0xd83   :  { %8032 = vmatmul.msk.bf16.gmra.mxu0 %vm987_vm4, %v12539_v43  ;;  %5079 = vrot.lane.b32.xlu0 %v12612_v18, %s9594_s0  ;;  %v4859_v43 = vsel %vm987_vm4, %v4813_v36, 0 }
 0xd85   :  { %v4815_v3 = vpop.permute.xlu0 %4814 }
 0xd86   :  { %v4862_v51 = vsel %vm987_vm4, %v4815_v3, 0  ;;  %v4850_v3 = vsel %vm987_vm4, %v12674_v12, 0  ;;  %v4844_v12 = vsel %vm987_vm4, %v12689_v26, 0 }
 0xd87   :  { %5152 = vrot.lane.b32.xlu1 %v12610_v13, %s9596_s27  ;;  %4864 = vmatpush.bf16.xpose.msrb.mxu2 %v4862_v51 }
 0xd89   :  { %v12764_v62 = vpop.permute.xlu1 %5510 }
 0xd8a   :  { %v12766_v0 = vpop.permute.xlu2 %5142 }
 0xd8b   :  { %5506 = vrot.lane.b32.xlu0 %v12610_v13, %s9595_s26 }
 0xd8d   :  { %v12770_v4 = vpop.permute.xlu0 %5164 }
 0xd8f   :  { %4865 = vmatpush.bf16.xpose.msrb.mxu2 %v4859_v43 }
 0xd91   :  { %v12773_v19 = vpop.permute.xlu1 %5156 }
 0xd92   :  { %v12775_v17 = vpop.permute.xlu2 %5144 }
 0xd93   :  { %8033 = vmatmul.msk.bf16.gmra.mxu0 %vm987_vm4, %v12557_v45  ;;  %5787 = vrot.lane.b32.xlu0 %v12612_v18, %s9595_s26 }
 0xd95   :  { %v12781_v60 = vpop.permute.xlu0 %5162 }
 0xd97   :  { %4866 = vmatpush.bf16.xpose.msrb.mxu2 %v4856_v57 }
 0xd99   :  { %v12784_v56 = vpop.permute.xlu1 %5138 }
 0xd9a   :  { %v12786_v35 = vpop.permute.xlu2 %5146 }
 0xd9b   :  { %5433 = vrot.lane.b32.xlu0 %v12612_v18, %s9596_s27 }
 0xd9d   :  { %v12790_v53 = vpop.permute.xlu0 %5508 }
 0xd9f   :  { %4867 = vmatpush.bf16.xpose.msrb.mxu2 %v4853_v16 }
 0xda1   :  { %v12793_v45 = vpop.permute.xlu1 %5496 }
 0xda2   :  { %v12795_v36 = vpop.permute.xlu2 %5077 }
 0xda3   :  { %8034 = vmatmul.msk.bf16.gmra.mxu0 %vm987_vm4, %v12573_v14 }
 0xda5   :  { %v12799_v5 = vpop.permute.xlu0 %5154 }
 0xda7   :  { %4868 = vmatpush.bf16.xpose.msrb.mxu2 %v4850_v3 }
 0xda9   :  { %v12803_v51 = vpop.permute.xlu1 %5502 }
 0xdaa   :  { %v12805_v18 = vpop.permute.xlu2 %5071 }
 0xdad   :  { %v12807_v43 = vpop.permute.xlu0 %5140 }
 0xdaf   :  { %4869 = vmatpush.bf16.xpose.msrb.mxu2 %v4847_v48 }
 0xdb1   :  { %v12810_v57 = vpop.permute.xlu1 %5148 }
 0xdb2   :  { %v12812_v16 = vpop.permute.xlu2 %5067 }
 0xdb3   :  { %8035 = vmatmul.msk.bf16.gmra.mxu0 %vm987_vm4, %v12588_v49 }
 0xdb5   :  { %v12816_v14 = vpop.permute.xlu0 %5498 }
 0xdb7   :  { %4870 = vmatpush.bf16.xpose.msrb.mxu2 %v4844_v12 }
 0xdb9   :  { %v12820_v3 = vpop.permute.xlu1 %5075 }
 0xdba   :  { %v12822_v33 = vpop.permute.xlu2 %5431 }
 0xdbd   :  { %v12824_v30 = vpop.permute.xlu0 %5500 }
 0xdbf   :  { %4871 = vmatpush.bf16.xpose.msrb.mxu2 %v4841_v27 }
 0xdc1   :  { %v12828_v48 = vpop.permute.xlu1 %5073 }
 0xdc2   :  { %v5523_v54 = vpop.permute.xlu2 %5522 }
 0xdc3   :  { %v5570_v49 = vsel %vm987_vm4, %v5523_v54, 0  ;;  %8036 = vmatmul.msk.bf16.gmra.mxu0 %vm987_vm4, %v12610_v13  ;;  %v12845_v54 = vld [vmem:[%s14692_s3] sm:$0xff] }
 0xdc5   :  { %v12833_v26 = vpop.permute.xlu0 %5504 }
 0xdc6   :  { %8037 = vmatmul.msk.bf16.vlgmr.msrb.gmra.mxu2 %vm987_vm4, %v12701_v1  ;;  %v5564_v1 = vsel %vm987_vm4, %v12741_v59, 0  ;;  %v5561_v59 = vsel %vm987_vm4, %v12683_v63, 0 }
 0xdc7   :  { %5572 = vmatpush.bf16.xpose.msra.mxu2 %v5570_v49 }
 0xdc9   :  { %v12837_v12 = vpop.permute.xlu1 %5069 }
 0xdcd   :  { %v12840_v32 = vpop.permute.xlu0 %5150 }
 0xdcf   :  { %5573 = vmatpush.bf16.xpose.msra.mxu2 %v5567_v15 }
 0xdd0   :  { %v4495_v27 = vpop.f32.mrf.mxu0 }
 0xdd1   :  { %v12848_v13 = vadd.f32 %v12845_v54, %v4495_v27  ;;  %v12850_v49 = vpop.permute.xlu1 %5785 }
 0xdd3   :  { %4535 = vmax.xlane.f32.xlu0 %v12848_v13 }
 0xdd5   :  { %v12855_v15 = vpop.permute.xlu0 %5065 }
 0xdd6   :  { %8038 = vmatmul.msk.bf16.gmra.mxu2 %vm987_vm4, %v12707_v6 }
 0xdd7   :  { %5574 = vmatpush.bf16.xpose.msra.mxu2 %v5564_v1 }
 0xdd8   :  { %v4497_v11 = vpop.f32.mrf.mxu0 }
 0xdd9   :  { %v12865_v27 = vadd.f32 %v12862_v44, %v4497_v11  ;;  %v12867_v28 = vpop.permute.xlu1 %5783 }
 0xddb   :  { %4537 = vmax.xlane.f32.xlu1 %v12865_v27 }
 0xddd   :  { %v12872_v1 = vpop.permute.xlu0 %5779 }
 0xddf   :  { %5575 = vmatpush.bf16.xpose.msra.mxu2 %v5561_v59 }
 0xde0   :  { %v4500_v6 = vpop.f32.mrf.mxu0 }
 0xde1   :  { %v12880_v47 = vadd.f32 %v12877_v55, %v4500_v6  ;;  %v12882_v11 = vpop.permute.xlu1 %5781 }
 0xde3   :  { %4539 = vmax.xlane.f32.xlu0 %v12880_v47 }
 0xde5   :  { %v12887_v63 = vpop.permute.xlu0 %5427 }
 0xde6   :  { %8039 = vmatmul.msk.bf16.gmra.mxu2 %vm987_vm4, %v12664_v9  ;;  %v12907_v9 = vld [vmem:[%s14692_s3 + $0x20] sm:$0xff] }
 0xde7   :  { %5576 = vmatpush.bf16.xpose.msra.mxu2 %v5558_v61  ;;  %v5555_v61 = vsel %vm987_vm4, %v12753_v58, 0  ;;  %v5552_v58 = vsel %vm987_vm4, %v12764_v62, 0 }
 0xde8   :  { %v4502_v59 = vpop.f32.mrf.mxu0 }
 0xde9   :  { %v12897_v6 = vadd.f32 %v12894_v31, %v4502_v59  ;;  %v5430_v10 = vpop.permute.xlu1 %5429 }
 0xdeb   :  { %4541 = vmax.xlane.f32.xlu1 %v12897_v6 }
 0xded   :  { %v12902_v21 = vpop.permute.xlu0 %4798 }
 0xdef   :  { %5577 = vmatpush.bf16.xpose.msra.mxu2 %v5555_v61 }
 0xdf0   :  { %v4505_v39 = vpop.f32.mrf.mxu0 }
 0xdf1   :  { %v12910_v42 = vadd.f32 %v12907_v9, %v4505_v39  ;;  %v5169_v59 = vpop.permute.xlu1 %5168  ;;  %v12921_v39 = vld [vmem:[%s14692_s3 + $0x28] sm:$0xff] }
 0xdf2   :  { %v5216_v34 = vsel %vm987_vm4, %v5169_v59, 0 }
 0xdf3   :  { %4543 = vmax.xlane.f32.xlu0 %v12910_v42  ;;  %5218 = vmatpush.bf16.xpose.msra.mxu0 %v5216_v34  ;;  %v5213_v34 = vsel %vm987_vm4, %v12733_v2, 0  ;;  %v5210_v2 = vsel %vm987_vm4, %v12770_v4, 0  ;;  %v5207_v4 = vsel %vm987_vm4, %v12781_v60, 0  ;;  %v5204_v60 = vsel %vm987_vm4, %v12727_v20, 0 }
 0xdf4   :  { %v5201_v20 = vsel %vm987_vm4, %v12735_v7, 0  ;;  %v13010_v7 = vld [vmem:[%s14692_s3 + $0x58] sm:$0xff] }
 0xdf5   :  { %v5080_v61 = vpop.permute.xlu0 %5079 }
 0xdf6   :  { %8040 = vmatmul.msk.bf16.gmra.mxu2 %vm987_vm4, %v12721_v50  ;;  %5089 = vmatpush.bf16.msra.mxu3 %v5080_v61  ;;  %v5549_v50 = vsel %vm987_vm4, %v12790_v53, 0  ;;  %v12953_v61 = vld [vmem:[%s14692_s3 + $0x38] sm:$0xff] }
 0xdf7   :  { %5578 = vmatpush.bf16.xpose.msra.mxu2 %v5552_v58 }
 0xdf8   :  { %v4507_v22 = vpop.f32.mrf.mxu0 }
 0xdf9   :  { %v12924_v59 = vadd.f32 %v12921_v39, %v4507_v22  ;;  %v12938_v22 = vld [vmem:[%s14692_s3 + $0x30] sm:$0xff] }
 0xdfa   :  { %5090 = vmatpush.bf16.msra.mxu3 %v12795_v36 }
 0xdfb   :  { %4545 = vmax.xlane.f32.xlu2 %v12924_v59  ;;  %5219 = vmatpush.bf16.xpose.msra.mxu0 %v5213_v34  ;;  %v12966_v34 = vld [vmem:[%s14692_s3 + $0x40] sm:$0xff] }
 0xdfd   :  { %v12932_v62 = vpop.permute.xlu0 %5506 }
 0xdfe   :  { %5091 = vmatpush.bf16.msra.mxu3 %v12820_v3 }
 0xdff   :  { %5579 = vmatpush.bf16.xpose.msra.mxu2 %v5549_v50 }
 0xe00   :  { %v4510_v58 = vpop.f32.mrf.mxu0 }
 0xe01   :  { %v12941_v36 = vadd.f32 %v12938_v22, %v4510_v58  ;;  %v13034_v58 = vld [vmem:[%s14692_s3 + $0x68] sm:$0xff] }
 0xe02   :  { %5092 = vmatpush.bf16.msra.mxu3 %v12828_v48 }
 0xe03   :  { %4547 = vmax.xlane.f32.xlu0 %v12941_v36  ;;  %5220 = vmatpush.bf16.xpose.msra.mxu0 %v5210_v2 }
 0xe05   :  { %v5788_v53 = vpop.permute.xlu0 %5787 }
 0xe06   :  { %8041 = vmatmul.msk.bf16.gmra.mxu2 %vm987_vm4, %v12713_v29  ;;  %5093 = vmatpush.bf16.msra.mxu3 %v12805_v18 }
 0xe08   :  { %v4512_v3 = vpop.f32.mrf.mxu0 }
 0xe09   :  { %v12956_v48 = vadd.f32 %v12953_v61, %v4512_v3 }
 0xe0a   :  { %5094 = vmatpush.bf16.msra.mxu3 %v12837_v12  ;;  %v12982_v12 = vld [vmem:[%s14692_s3 + $0x48] sm:$0xff] }
 0xe0b   :  { %4549 = vmax.xlane.f32.xlu0 %v12956_v48  ;;  %5221 = vmatpush.bf16.xpose.msra.mxu0 %v5207_v4 }
 0xe0d   :  { %v5434_v29 = vpop.permute.xlu0 %5433 }
 0xe0e   :  { %5095 = vmatpush.bf16.msra.mxu3 %v12812_v16  ;;  %5443 = vmatpush.bf16.msra.mxu1 %v5434_v29 }
 0xe10   :  { %v4515_v18 = vpop.f32.mrf.mxu0 }
 0xe11   :  { %v12969_v50 = vadd.f32 %v12966_v34, %v4515_v18 }
 0xe12   :  { %5096 = vmatpush.bf16.msra.mxu3 %v12855_v15  ;;  %5444 = vmatpush.bf16.msra.mxu1 %v12822_v33  ;;  %v5198_v15 = vsel %vm987_vm4, %v12773_v19, 0  ;;  %v5195_v19 = vsel %vm987_vm4, %v12799_v5, 0 }
 0xe13   :  { %4551 = vmax.xlane.f32.xlu1 %v12969_v50  ;;  %5222 = vmatpush.bf16.xpose.msra.mxu0 %v5204_v60 }
 0xe16   :  { %5797 = vmatpush.bf16.msrb.mxu3 %v5788_v53  ;;  %8042 = vmatmul.msk.bf16.gmra.mxu2 %vm987_vm4, %v12695_v23  ;;  %v12996_v23 = vld [vmem:[%s14692_s3 + $0x50] sm:$0xff] }
 0xe17   :  { %5445 = vmatpush.bf16.msra.mxu1 %v5430_v10 }
 0xe18   :  { %v4517_v16 = vpop.f32.mrf.mxu0 }
 0xe19   :  { %v12985_v33 = vadd.f32 %v12982_v12, %v4517_v16  ;;  %v13057_v16 = vld [vmem:[%s14692_s3 + $0x78] sm:$0xff] }
 0xe1a   :  { %5798 = vmatpush.bf16.msrb.mxu3 %v12850_v49 }
 0xe1b   :  { %5446 = vmatpush.bf16.msra.mxu1 %v12887_v63  ;;  %4553 = vmax.xlane.f32.xlu1 %v12985_v33 }
 0xe1c   :  { %5223 = vmatpush.bf16.xpose.msra.mxu0 %v5201_v20 }
 0xe1e   :  { %5799 = vmatpush.bf16.msrb.mxu3 %v12867_v28 }
 0xe20   :  { %v4520_v10 = vpop.f32.mrf.mxu0 }
 0xe21   :  { %v12999_v49 = vadd.f32 %v12996_v23, %v4520_v10 }
 0xe22   :  { %5800 = vmatpush.bf16.msrb.mxu3 %v12882_v11 }
 0xe23   :  { %4555 = vmax.xlane.f32.xlu1 %v12999_v49 }
 0xe24   :  { %5224 = vmatpush.bf16.xpose.msra.mxu0 %v5198_v15 }
 0xe26   :  { %5801 = vmatpush.bf16.msrb.mxu3 %v12872_v1  ;;  %8043 = vmatmul.msk.bf16.gmra.mxu2 %vm987_vm4, %v12745_v25  ;;  %v13021_v25 = vld [vmem:[%s14692_s3 + $0x60] sm:$0xff] }
 0xe28   :  { %v4522_v28 = vpop.f32.mrf.mxu0 }
 0xe29   :  { %v13013_v11 = vadd.f32 %v13010_v7, %v4522_v28 }
 0xe2b   :  { %4557 = vmax.xlane.f32.xlu0 %v13013_v11 }
 0xe2c   :  { %5225 = vmatpush.bf16.xpose.msra.mxu0 %v5195_v19 }
 0xe30   :  { %v4525_v63 = vpop.f32.mrf.mxu0 }
 0xe31   :  { %v13024_v1 = vadd.f32 %v13021_v25, %v4525_v63 }
 0xe33   :  { %8045 = vmatmul.msk.bf16.vlgmr.msra.gmra.mxu0 %vm987_vm4, %v12784_v56  ;;  %4559 = vmax.xlane.f32.xlu2 %v13024_v1  ;;  %v13043_v56 = vld [vmem:[%s14692_s3 + $0x70] sm:$0xff] }
 0xe36   :  { %8044 = vmatmul.msk.bf16.gmra.mxu2 %vm987_vm4, %v12902_v21  ;;  %v5153_v21 = vpop.permute.xlu1 %5152 }
 0xe38   :  { %v4527_v5 = vpop.f32.mrf.mxu0 }
 0xe39   :  { %v13037_v2 = vadd.f32 %v13034_v58, %v4527_v5 }
 0xe3b   :  { %4561 = vmax.xlane.f32.xlu0 %v13037_v2 }
 0xe40   :  { %v4530_v53 = vpop.f32.mrf.mxu0 }
 0xe41   :  { %v13046_v3 = vadd.f32 %v13043_v56, %v4530_v53 }
 0xe43   :  { %8046 = vmatmul.msk.bf16.gmra.mxu0 %vm987_vm4, %v12807_v43  ;;  %4563 = vmax.xlane.f32.xlu2 %v13046_v3 }
 0xe46   :  { %8053 = vmatmul.msk.bf16.vlgmr.msra.gmra.mxu2 %vm987_vm4, %v12747_v8  ;;  %v4536_v4 = vpop.xlane.xlu0 %4535 }
 0xe47   :  { %v4567_v29 = vsub.f32 %v12848_v13, %v4536_v4 }
 0xe48   :  { %v4532_v18 = vpop.f32.mrf.mxu0 }
 0xe49   :  { %v4583_v60 = vmul.f32 1.442695, %v4567_v29  ;;  %v13060_v20 = vadd.f32 %v13057_v16, %v4532_v18  ;;  %v4873_v43 = vpop.f32.mrf.mxu2 }
 0xe4a   :  { %v13063_v10 = vadd.f32 %v12845_v54, %v4873_v43 }
 0xe4b   :  { %4565 = vmax.xlane.f32.xlu0 %v13060_v20  ;;  %9276 = vpow2.f32 %v4583_v60 }
 0xe4c   :  { %4913 = vmax.xlane.f32.xlu1 %v13063_v10 }
 0xe4e   :  { %v4538_v8 = vpop.xlane.xlu1 %4537 }
 0xe4f   :  { %v4568_v13 = vsub.f32 %v12865_v27, %v4538_v8 }
 0xe51   :  { %v4585_v15 = vmul.f32 1.442695, %v4568_v13  ;;  %v4875_v28 = vpop.f32.mrf.mxu2  ;;  %v13073_v63 = vpop.eup %9276 }
 0xe52   :  { %v13069_v19 = vadd.f32 %v12862_v44, %v4875_v28 }
 0xe53   :  { %8047 = vmatmul.msk.bf16.gmra.mxu0 %vm987_vm4, %v12766_v0  ;;  %9278 = vpow2.f32 %v4585_v15 }
 0xe54   :  { %4915 = vmax.xlane.f32.xlu2 %v13069_v19  ;;  %4615 = vadd.xlane.f32.xlu1 %v13073_v63 }
 0xe56   :  { %8054 = vmatmul.msk.bf16.gmra.mxu2 %vm987_vm4, %v12755_v38  ;;  %v4540_v5 = vpop.xlane.xlu0 %4539 }
 0xe57   :  { %v4569_v27 = vsub.f32 %v12880_v47, %v4540_v5 }
 0xe59   :  { %v4587_v53 = vmul.f32 1.442695, %v4569_v27  ;;  %v13080_v4 = vpop.eup %9278  ;;  %v4878_v0 = vpop.f32.mrf.mxu2 }
 0xe5a   :  { %v13133_v27 = vadd.f32 %v12877_v55, %v4878_v0 }
 0xe5b   :  { %9280 = vpow2.f32 %v4587_v53 }
 0xe5c   :  { %4617 = vadd.xlane.f32.xlu2 %v13080_v4 }
 0xe61   :  { %v13083_v29 = vpop.eup %9280  ;;  %v4880_v38 = vpop.f32.mrf.mxu2 }
 0xe62   :  { %4619 = vadd.xlane.f32.xlu0 %v13083_v29  ;;  %v13148_v0 = vadd.f32 %v12894_v31, %v4880_v38 }
 0xe63   :  { %8048 = vmatmul.msk.bf16.gmra.mxu0 %vm987_vm4, %v12775_v17 }
 0xe66   :  { %8055 = vmatmul.msk.bf16.gmra.mxu2 %vm987_vm4, %v12793_v45  ;;  %v4542_v45 = vpop.xlane.xlu1 %4541 }
 0xe69   :  { %v4883_v47 = vpop.f32.mrf.mxu2 }
 0xe6e   :  { %v4546_v43 = vpop.xlane.xlu2 %4545 }
 0xe71   :  { %v13094_v18 = vpop.f32.mrf.mxu2 }
 0xe73   :  { %8049 = vmatmul.msk.bf16.gmra.mxu0 %vm987_vm4, %v12786_v35 }
 0xe76   :  { %8056 = vmatmul.msk.bf16.gmra.mxu2 %vm987_vm4, %v12816_v14 }
 0xe79   :  { %v13100_v17 = vpop.f32.mrf.mxu2 }
 0xe81   :  { %v13102_v60 = vpop.f32.mrf.mxu2 }
 0xe83   :  { %8050 = vmatmul.msk.bf16.gmra.mxu0 %vm987_vm4, %v12810_v57 }
 0xe86   :  { %8057 = vmatmul.msk.bf16.gmra.mxu2 %vm987_vm4, %v12824_v30  ;;  %v13111_v14 = vpop.xlane.xlu1 %4551  ;;  %v4544_v30 = vpop.xlane.xlu0 %4543 }
 0xe89   :  { %v13108_v35 = vpop.f32.mrf.mxu2 }
 0xe8e   :  { %v13117_v8 = vpop.xlane.xlu1 %4553  ;;  %v13126_v15 = vpop.xlane.xlu0 %4547 }
 0xe91   :  { %v13113_v57 = vpop.f32.mrf.mxu2 }
 0xe93   :  { %8051 = vmatmul.msk.bf16.gmra.mxu0 %vm987_vm4, %v12840_v32 }
 0xe96   :  { %8058 = vmatmul.msk.bf16.gmra.mxu2 %vm987_vm4, %v12803_v51  ;;  %v4550_v52 = vpop.xlane.xlu0 %4549 }
 0xe97   :  { %v4574_v38 = vsub.f32 %v12956_v48, %v4550_v52 }
 0xe99   :  { %v13119_v32 = vpop.f32.mrf.mxu2  ;;  %v4597_v24 = vmul.f32 1.442695, %v4574_v38 }
 0xea1   :  { %v13140_v41 = vpop.f32.mrf.mxu2 }
 0xea3   :  { %8052 = vmatmul.msk.bf16.gmra.mxu0 %vm987_vm4, %v5153_v21  ;;  %v4570_v21 = vsub.f32 %v12897_v6, %v4542_v45  ;;  %v4572_v6 = vsub.f32 %v12924_v59, %v4546_v43  ;;  %v4571_v59 = vsub.f32 %v12910_v42, %v4544_v30 }
 0xea6   :  { %8059 = vmatmul.msk.bf16.gmra.mxu2 %vm987_vm4, %v12833_v26  ;;  %v4589_v26 = vmul.f32 1.442695, %v4570_v21  ;;  %v13130_v28 = vpop.xlane.xlu2 %4559  ;;  %v4593_v21 = vmul.f32 1.442695, %v4572_v6 }
 0xea8   :  { %9282 = vpow2.f32 %v4589_v26  ;;  %v4591_v26 = vmul.f32 1.442695, %v4571_v59  ;;  %v4575_v59 = vsub.f32 %v12969_v50, %v13111_v14  ;;  %v13201_v50 = vadd.f32 %v12966_v34, %v13108_v35 }
 0xea9   :  { %v13160_v43 = vpop.f32.mrf.mxu2  ;;  %9284 = vpow2.f32 %v4593_v21 }
 0xeaa   :  { %9286 = vpow2.f32 %v4591_v26 }
 0xeab   :  { %9288 = vpow2.f32 %v4597_v24 }
 0xeae   :  { %v13153_v37 = vpop.eup %9282 }
 0xeb0   :  { %v5227_v13 = vpop.f32.mrf.mxu0 }
 0xeb1   :  { %v13122_v51 = vadd.f32 %v12845_v54, %v5227_v13  ;;  %v13138_v13 = vpop.xlane.xlu1 %4555  ;;  %v4905_v52 = vpop.f32.mrf.mxu2 }
 0xeb3   :  { %14859 = vst [vmem:[#allocation13_spill] sm:$0xff] %v13122_v51  ;;  %5267 = vmax.xlane.f32.xlu1 %v13122_v51  ;;  %v13167_v51 = vadd.f32 %v12907_v9, %v4883_v47  ;;  %v13179_v47 = vadd.f32 %v12921_v39, %v13094_v18 }
 0xeb5   :  { %14863 = vst [vmem:[#allocation17_spill] sm:$0xff] %v13179_v47 }
 0xeb6   :  { %8060 = vmatmul.msk.bf16.gmra.mxu2 %vm987_vm4, %v12932_v62  ;;  %v13145_v62 = vpop.xlane.xlu2 %4563 }
 0xeb8   :  { %v5229_v5 = vpop.f32.mrf.mxu0 }
 0xeb9   :  { %v13136_v53 = vadd.f32 %v12862_v44, %v5229_v5  ;;  %v4908_v18 = vpop.f32.mrf.mxu2 }
 0xebb   :  { %14860 = vst [vmem:[#allocation14_spill] sm:$0xff] %v13136_v53  ;;  %5269 = vmax.xlane.f32.xlu2 %v13136_v53  ;;  %4917 = vmax.xlane.f32.xlu1 %v13133_v27  ;;  %v13172_v53 = vpop.eup %9284 }
 0xebc   :  { %v13181_v30 = vpop.eup %9286 }
 0xebd   :  { %v13183_v21 = vpop.eup %9288 }
 0xebf   :  { %v13155_v40 = vpop.xlane.xlu1 %4913 }
 0xec0   :  { %v5232_v45 = vpop.f32.mrf.mxu0 }
 0xec1   :  { %v13151_v5 = vadd.f32 %v12877_v55, %v5232_v45 }
 0xec3   :  { %14861 = vst [vmem:[#allocation15_spill] sm:$0xff] %v13151_v5  ;;  %4621 = vadd.xlane.f32.xlu2 %v13153_v37  ;;  %4919 = vmax.xlane.f32.xlu1 %v13148_v0 }
 0xec4   :  { %5271 = vmax.xlane.f32.xlu0 %v13151_v5  ;;  %v4558_v5 = vpop.xlane.xlu0 %4557 }
 0xec7   :  { %v13164_v6 = vpop.xlane.xlu2 %4915  ;;  %v4616_v42 = vpop.xlane.xlu1 %4615 }
 0xec8   :  { %v5234_v45 = vpop.f32.mrf.mxu0  ;;  %9290 = vrcp.f32 %v4616_v42 }
 0xec9   :  { %v13170_v46 = vadd.f32 %v12894_v31, %v5234_v45  ;;  %v4599_v45 = vmul.f32 1.442695, %v4575_v59 }
 0xecb   :  { %14862 = vst [vmem:[#allocation16_spill] sm:$0xff] %v13170_v46  ;;  %4921 = vmax.xlane.f32.xlu2 %v13167_v51  ;;  %5273 = vmax.xlane.f32.xlu1 %v13170_v46  ;;  %v13194_v46 = vadd.f32 %v12953_v61, %v13102_v60 }
 0xecc   :  { %4625 = vadd.xlane.f32.xlu0 %v13172_v53 }
 0xece   :  { %v9291_v38 = vpop.eup %9290 }
 0xecf   :  { %v4618_v48 = vpop.xlane.xlu2 %4617  ;;  %v4663_v42 = vmul.f32 %v9291_v38, %v13073_v63  ;;  %v4578_v63 = vsub.f32 %v13013_v11, %v4558_v5  ;;  %v4562_v5 = vpop.xlane.xlu0 %4561 }
 0xed0   :  { %9292 = vrcp.f32 %v4618_v48  ;;  %v5237_v24 = vpop.f32.mrf.mxu0 }
 0xed1   :  { %9294 = vpow2.f32 %v4599_v45  ;;  %v4605_v59 = vmul.f32 1.442695, %v4578_v63  ;;  %v13218_v45 = vpop.f32.mrf.mxu2  ;;  %v13243_v63 = vadd.f32 %v13034_v58, %v4905_v52 }
 0xed3   :  { %4923 = vmax.xlane.f32.xlu1 %v13179_v47  ;;  %4623 = vadd.xlane.f32.xlu2 %v13181_v30  ;;  %v13197_v47 = vadd.f32 %v12907_v9, %v5237_v24  ;;  %9296 = vpow2.f32 %v4605_v59  ;;  %v13253_v59 = vadd.f32 %v12982_v12, %v13113_v57 }
 0xed4   :  { %4629 = vadd.xlane.f32.xlu0 %v13183_v21 }
 0xed5   :  { %14864 = vst [vmem:[#allocation18_spill] sm:$0xff] %v13197_v47 }
 0xed6   :  { %v9293_v26 = vpop.eup %9292 }
 0xed7   :  { %v4664_v48 = vmul.f32 %v9293_v26, %v13080_v4  ;;  %v4577_v4 = vsub.f32 %v12999_v49, %v13138_v13  ;;  %v13212_v38 = vpop.eup %9294  ;;  %v13216_v26 = vadd.f32 %v12996_v23, %v13119_v32  ;;  %v4573_v49 = vsub.f32 %v12941_v36, %v13126_v15 }
 0xed8   :  { %v5239_v60 = vpop.f32.mrf.mxu0  ;;  %v13227_v13 = vadd.f32 %v12938_v22, %v13100_v17  ;;  %v4580_v15 = vsub.f32 %v13037_v2, %v4562_v5 }
 0xed9   :  { %v4679_v14 = vpack.c.bf16 %v4664_v48, %v4663_v42  ;;  %v4603_v24 = vmul.f32 1.442695, %v4577_v4  ;;  %v13210_v35 = vadd.f32 %v12921_v39, %v5239_v60  ;;  %v4595_v11 = vmul.f32 1.442695, %v4573_v49  ;;  %v13229_v32 = vpop.eup %9296  ;;  %v5581_v36 = vpop.f32.mrf.mxu2 }
 0xeda   :  { %v4609_v48 = vmul.f32 1.442695, %v4580_v15  ;;  %v4566_v4 = vpop.xlane.xlu0 %4565  ;;  %v4576_v60 = vsub.f32 %v12985_v33, %v13117_v8  ;;  %v4945_v33 = vsub.f32 %v13063_v10, %v13155_v40  ;;  %v4579_v40 = vsub.f32 %v13024_v1, %v13130_v28 }
 0xedb   :  { %4927 = vmax.xlane.f32.xlu1 %v13194_v46  ;;  %5275 = vmax.xlane.f32.xlu2 %v13197_v47  ;;  %9298 = vpow2.f32 %v4603_v24  ;;  %v4582_v2 = vsub.f32 %v13060_v20, %v4566_v4  ;;  %v13283_v15 = vadd.f32 %v13021_v25, %v13160_v43  ;;  %v14872_v47 = vld [vmem:[#allocation17_spill] sm:$0xff] }
 0xedc   :  { %4929 = vmax.xlane.f32.xlu0 %v13201_v50  ;;  %4743 = vmatmul.bf16.vlgmr.msrb.gmra.mxu1 %v4679_v14  ;;  %9300 = vpow2.f32 %v4595_v11  ;;  %v13238_v14 = vadd.f32 %v13043_v56, %v4908_v18  ;;  %v4601_v18 = vmul.f32 1.442695, %v4576_v60  ;;  %v4961_v20 = vmul.f32 1.442695, %v4945_v33 }
 0xedd   :  { %9302 = vpow2.f32 %v4609_v48  ;;  %v4613_v52 = vmul.f32 1.442695, %v4582_v2  ;;  %v4607_v5 = vmul.f32 1.442695, %v4579_v40  ;;  %v13286_v48 = vadd.f32 %v12845_v54, %v5581_v36 }
 0xede   :  { %9304 = vpow2.f32 %v4601_v18  ;;  %v13308_v36 = vadd.f32 %v13057_v16, %v13218_v45 }
 0xedf   :  { %9306 = vpow2.f32 %v4613_v52 }
 0xee0   :  { %9308 = vpow2.f32 %v4961_v20 }
 0xee1   :  { %v13231_v42 = vpop.eup %9298  ;;  %v5583_v56 = vpop.f32.mrf.mxu2  ;;  %9310 = vpow2.f32 %v4607_v5 }
 0xee2   :  { %v13240_v17 = vpop.eup %9300  ;;  %v13256_v24 = vadd.f32 %v12862_v44, %v5583_v56  ;;  %v13273_v44 = vadd.f32 %v13010_v7, %v13140_v41  ;;  %v4581_v41 = vsub.f32 %v13046_v3, %v13145_v62  ;;  %v4946_v3 = vsub.f32 %v13069_v19, %v13164_v6  ;;  %v4620_v56 = vpop.xlane.xlu0 %4619 }
 0xee3   :  { %4631 = vadd.xlane.f32.xlu1 %v13212_v38  ;;  %5277 = vmax.xlane.f32.xlu2 %v13210_v35  ;;  %v13258_v49 = vpop.eup %9302 }
 0xee4   :  { %4933 = vmax.xlane.f32.xlu0 %v13216_v26  ;;  %14865 = vst [vmem:[#allocation29_spill] sm:$0xff] %v13256_v24  ;;  %v13265_v57 = vpop.eup %9304  ;;  %v4611_v28 = vmul.f32 1.442695, %v4581_v41  ;;  %v4963_v43 = vmul.f32 1.442695, %v4946_v3  ;;  %v5242_v41 = vpop.f32.mrf.mxu0 }
 0xee5   :  { %v13267_v8 = vpop.eup %9306 }
 0xee6   :  { %v13275_v11 = vpop.eup %9308  ;;  %9312 = vpow2.f32 %v4611_v28 }
 0xee7   :  { %v13292_v4 = vpop.eup %9310  ;;  %9314 = vpow2.f32 %v4963_v43 }
 0xee9   :  { %v5586_v10 = vpop.f32.mrf.mxu2 }
 0xeea   :  { %v13321_v20 = vadd.f32 %v12877_v55, %v5586_v10 }
 0xeeb   :  { %4925 = vmax.xlane.f32.xlu2 %v13227_v13  ;;  %4637 = vadd.xlane.f32.xlu1 %v13229_v32 }
 0xeec   :  { %4635 = vadd.xlane.f32.xlu0 %v13231_v42  ;;  %v13299_v54 = vpop.eup %9312 }
 0xeed   :  { %v13314_v33 = vpop.eup %9314 }
 0xef1   :  { %v5588_v1 = vpop.f32.mrf.mxu2 }
 0xef2   :  { %v13295_v60 = vadd.f32 %v12894_v31, %v5588_v1 }
 0xef3   :  { %4627 = vadd.xlane.f32.xlu2 %v13240_v17  ;;  %4941 = vmax.xlane.f32.xlu1 %v13238_v14 }
 0xef4   :  { %4939 = vmax.xlane.f32.xlu0 %v13243_v63  ;;  %14866 = vst [vmem:[#allocation30_spill] sm:$0xff] %v13295_v60 }
 0xefb   :  { %4931 = vmax.xlane.f32.xlu2 %v13253_v59  ;;  %5623 = vmax.xlane.f32.xlu1 %v13256_v24 }
 0xefc   :  { %4641 = vadd.xlane.f32.xlu0 %v13258_v49 }
 0xf03   :  { %4633 = vadd.xlane.f32.xlu2 %v13265_v57 }
 0xf04   :  { %4645 = vadd.xlane.f32.xlu0 %v13267_v8 }
 0xf0b   :  { %4935 = vmax.xlane.f32.xlu2 %v13273_v44 }
 0xf0c   :  { %4993 = vadd.xlane.f32.xlu0 %v13275_v11 }
 0xf13   :  { %4937 = vmax.xlane.f32.xlu2 %v13283_v15 }
 0xf14   :  { %5621 = vmax.xlane.f32.xlu0 %v13286_v48 }
 0xf1b   :  { %4639 = vadd.xlane.f32.xlu2 %v13292_v4 }
 0xf1c   :  { %5627 = vmax.xlane.f32.xlu0 %v13295_v60 }
 0xf23   :  { %4643 = vadd.xlane.f32.xlu2 %v13299_v54 }
 0xf26   :  { %v13304_v62 = vpop.xlane.xlu1 %5267 }
 0xf2b   :  { %4943 = vmax.xlane.f32.xlu2 %v13308_v36 }
 0xf2e   :  { %v13311_v31 = vpop.xlane.xlu2 %5269  ;;  %v4918_v2 = vpop.xlane.xlu1 %4917 }
 0xf2f   :  { %v4947_v18 = vsub.f32 %v13133_v27, %v4918_v2 }
 0xf31   :  { %v4965_v52 = vmul.f32 1.442695, %v4947_v18  ;;  %v13335_v18 = vadd.f32 %v12938_v22, %v5242_v41 }
 0xf33   :  { %4995 = vadd.xlane.f32.xlu2 %v13314_v33  ;;  %9316 = vpow2.f32 %v4965_v52 }
 0xf34   :  { %9318 = vrcp.f32 %v4620_v56 }
 0xf36   :  { %v4622_v19 = vpop.xlane.xlu2 %4621  ;;  %v4920_v6 = vpop.xlane.xlu1 %4919 }
 0xf37   :  { %9320 = vrcp.f32 %v4622_v19  ;;  %v4948_v16 = vsub.f32 %v13148_v0, %v4920_v6  ;;  %v13318_v45 = vpop.xlane.xlu0 %5271  ;;  %v5244_v19 = vpop.f32.mrf.mxu0 }
 0xf39   :  { %v4967_v40 = vmul.f32 1.442695, %v4948_v16  ;;  %v13323_v5 = vpop.eup %9316  ;;  %v13344_v16 = vadd.f32 %v12953_v61, %v5244_v19 }
 0xf3a   :  { %v9319_v27 = vpop.eup %9318  ;;  %4997 = vadd.xlane.f32.xlu1 %v13323_v5 }
 0xf3b   :  { %9322 = vpow2.f32 %v4967_v40  ;;  %5625 = vmax.xlane.f32.xlu2 %v13321_v20  ;;  %v4665_v0 = vmul.f32 %v9319_v27, %v13083_v29  ;;  %14867 = vst [vmem:[#allocation31_spill] sm:$0xff] %v13344_v16 }
 0xf3d   :  { %v9321_v1 = vpop.eup %9320 }
 0xf3e   :  { %v4922_v28 = vpop.xlane.xlu2 %4921  ;;  %v13327_v3 = vpop.xlane.xlu1 %5273  ;;  %v4666_v43 = vmul.f32 %v9321_v1, %v13153_v37 }
 0xf3f   :  { %v4949_v55 = vsub.f32 %v13167_v51, %v4922_v28  ;;  %v4626_v10 = vpop.xlane.xlu0 %4625 }
 0xf40   :  { %v4680_v2 = vpack.c.bf16 %v4666_v43, %v4665_v0 }
 0xf41   :  { %v13332_v56 = vpop.eup %9322  ;;  %v4969_v52 = vmul.f32 1.442695, %v4949_v55 }
 0xf42   :  { %4748 = vmatmul.bf16.gmra.mxu1 %v4680_v2  ;;  %4999 = vadd.xlane.f32.xlu1 %v13332_v56 }
 0xf43   :  { %9324 = vpow2.f32 %v4969_v52  ;;  %5279 = vmax.xlane.f32.xlu2 %v13335_v18 }
 0xf44   :  { %9326 = vrcp.f32 %v4626_v10 }
 0xf46   :  { %v13339_v29 = vpop.xlane.xlu1 %4923  ;;  %v4624_v37 = vpop.xlane.xlu2 %4623 }
 0xf47   :  { %9328 = vrcp.f32 %v4624_v37  ;;  %v4630_v51 = vpop.xlane.xlu0 %4629 }
 0xf49   :  { %v13341_v6 = vpop.eup %9324 }
 0xf4a   :  { %5001 = vadd.xlane.f32.xlu0 %v13341_v6  ;;  %v9327_v40 = vpop.eup %9326 }
 0xf4b   :  { %5281 = vmax.xlane.f32.xlu2 %v13344_v16  ;;  %v4668_v0 = vmul.f32 %v9327_v40, %v13172_v53 }
 0xf4d   :  { %v9329_v27 = vpop.eup %9328 }
 0xf4e   :  { %v4928_v41 = vpop.xlane.xlu1 %4927  ;;  %v13348_v1 = vpop.xlane.xlu2 %5275  ;;  %v4667_v28 = vmul.f32 %v9329_v27, %v13181_v30  ;;  %v14869_v30 = vld [vmem:[#allocation14_spill] sm:$0xff] }
 0xf4f   :  { %14868 = vst [vmem:[#allocation32_spill] sm:$0xff] %v13348_v1  ;;  %v4952_v43 = vsub.f32 %v13194_v46, %v4928_v41  ;;  %v4930_v55 = vpop.xlane.xlu0 %4929  ;;  %v5300_v27 = vsub.f32 %v14869_v30, %v13311_v31  ;;  %v14870_v46 = vld [vmem:[#allocation11_spill] sm:$0xff]  ;;  %v4950_v1 = vsub.f32 %v14872_v47, %v13339_v29 }
 0xf50   :  { %v4681_v10 = vpack.c.bf16 %v4668_v0, %v4667_v28  ;;  %v4953_v52 = vsub.f32 %v13201_v50, %v4930_v55  ;;  %v14871_v50 = vld [vmem:[#allocation12_spill] sm:$0xff] }
 0xf51   :  { %v4975_v2 = vmul.f32 1.442695, %v4952_v43  ;;  %v5317_v40 = vmul.f32 1.442695, %v5300_v27  ;;  %v5591_v27 = vpop.f32.mrf.mxu2 }
 0xf52   :  { %4753 = vmatmul.bf16.gmra.mxu1 %v4681_v10  ;;  %v4977_v37 = vmul.f32 1.442695, %v4953_v52 }
 0xf53   :  { %9330 = vpow2.f32 %v4975_v2 }
 0xf54   :  { %9332 = vpow2.f32 %v4977_v37 }
 0xf55   :  { %9334 = vpow2.f32 %v5317_v40 }
 0xf56   :  { %v13354_v19 = vpop.xlane.xlu2 %5277  ;;  %9336 = vrcp.f32 %v4630_v51  ;;  %v4632_v30 = vpop.xlane.xlu1 %4631 }
 0xf57   :  { %v13375_v52 = vpop.xlane.xlu0 %4933 }
 0xf59   :  { %v13356_v16 = vpop.eup %9330 }
 0xf5a   :  { %5007 = vadd.xlane.f32.xlu0 %v13356_v16  ;;  %v13365_v41 = vpop.eup %9332 }
 0xf5b   :  { %5777 = vrot.lane.b32.xlu1 %v14870_v46, %s9595_s26  ;;  %v13370_v0 = vpop.eup %9334 }
 0xf5c   :  { %v9337_v31 = vpop.eup %9336 }
 0xf5d   :  { %v4670_v2 = vmul.f32 %v9337_v31, %v13183_v21  ;;  %v5593_v31 = vpop.f32.mrf.mxu2 }
 0xf5e   :  { %v13363_v53 = vpop.xlane.xlu2 %4925  ;;  %v4638_v60 = vpop.xlane.xlu1 %4637 }
 0xf5f   :  { %v4636_v40 = vpop.xlane.xlu0 %4635 }
 0xf62   :  { %5009 = vadd.xlane.f32.xlu0 %v13365_v41 }
 0xf63   :  { %5425 = vrot.lane.b32.xlu2 %v14871_v50, %s9596_s27 }
 0xf66   :  { %v4628_v28 = vpop.xlane.xlu2 %4627 }
 0xf67   :  { %9338 = vrcp.f32 %v4628_v28  ;;  %v13385_v47 = vpop.xlane.xlu0 %4939 }
 0xf68   :  { %9340 = vrcp.f32 %v4632_v30  ;;  %v13383_v30 = vadd.f32 %v12907_v9, %v5591_v27  ;;  %v4951_v27 = vsub.f32 %v13227_v13, %v13363_v53 }
 0xf6a   :  { %5349 = vadd.xlane.f32.xlu0 %v13370_v0 }
 0xf6d   :  { %v9339_v43 = vpop.eup %9338 }
 0xf6e   :  { %v4932_v55 = vpop.xlane.xlu2 %4931  ;;  %v4669_v10 = vmul.f32 %v9339_v43, %v13240_v17  ;;  %v9341_v50 = vpop.eup %9340 }
 0xf6f   :  { %v4671_v17 = vmul.f32 %v9341_v50, %v13212_v38  ;;  %v4954_v29 = vsub.f32 %v13253_v59, %v4932_v55  ;;  %v4642_v55 = vpop.xlane.xlu0 %4641 }
 0xf70   :  { %v4682_v37 = vpack.c.bf16 %v4670_v2, %v4669_v10  ;;  %v4971_v2 = vmul.f32 1.442695, %v4950_v1 }
 0xf72   :  { %4758 = vmatmul.bf16.gmra.mxu1 %v4682_v37 }
 0xf76   :  { %v4634_v51 = vpop.xlane.xlu2 %4633 }
 0xf77   :  { %9342 = vrcp.f32 %v4634_v51  ;;  %v4979_v51 = vmul.f32 1.442695, %v4954_v29 }
 0xf78   :  { %9344 = vrcp.f32 %v4638_v60  ;;  %v5596_v60 = vpop.f32.mrf.mxu2 }
 0xf79   :  { %9346 = vrcp.f32 %v4636_v40  ;;  %v13395_v9 = vadd.f32 %v12938_v22, %v5596_v60 }
 0xf7d   :  { %v9343_v28 = vpop.eup %9342 }
 0xf7e   :  { %v4936_v24 = vpop.xlane.xlu2 %4935  ;;  %v4672_v21 = vmul.f32 %v9343_v28, %v13265_v57  ;;  %v9345_v57 = vpop.eup %9344  ;;  %v14873_v28 = vld [vmem:[#allocation13_spill] sm:$0xff] }
 0xf7f   :  { %v4956_v43 = vsub.f32 %v13273_v44, %v4936_v24  ;;  %v9347_v24 = vpop.eup %9346  ;;  %v4674_v59 = vmul.f32 %v9345_v57, %v13229_v32 }
 0xf80   :  { %v4683_v10 = vpack.c.bf16 %v4672_v21, %v4671_v17  ;;  %v4673_v40 = vmul.f32 %v9347_v24, %v13231_v42  ;;  %v5299_v17 = vsub.f32 %v14873_v28, %v13304_v62  ;;  %v4973_v21 = vmul.f32 1.442695, %v4951_v27  ;;  %v5598_v53 = vpop.f32.mrf.mxu2  ;;  %v4646_v62 = vpop.xlane.xlu0 %4645 }
 0xf81   :  { %v4983_v37 = vmul.f32 1.442695, %v4956_v43  ;;  %v13406_v43 = vadd.f32 %v12921_v39, %v5593_v31  ;;  %v4942_v31 = vpop.xlane.xlu1 %4941 }
 0xf82   :  { %4763 = vmatmul.bf16.gmra.mxu1 %v4683_v10  ;;  %v4684_v22 = vpack.c.bf16 %v4674_v59, %v4673_v40  ;;  %v5315_v13 = vmul.f32 1.442695, %v5299_v17  ;;  %v13426_v40 = vadd.f32 %v12953_v61, %v5598_v53  ;;  %v4959_v61 = vsub.f32 %v13238_v14, %v4942_v31 }
 0xf83   :  { %9348 = vpow2.f32 %v4983_v37 }
 0xf84   :  { %9350 = vpow2.f32 %v4971_v2  ;;  %v4989_v28 = vmul.f32 1.442695, %v4959_v61 }
 0xf85   :  { %5629 = vmax.xlane.f32.xlu1 %v13383_v30  ;;  %9352 = vpow2.f32 %v4979_v51 }
 0xf86   :  { %v4938_v38 = vpop.xlane.xlu2 %4937 }
 0xf87   :  { %v4957_v29 = vsub.f32 %v13283_v15, %v4938_v38 }
 0xf88   :  { %v5601_v27 = vpop.f32.mrf.mxu2  ;;  %v4994_v59 = vpop.xlane.xlu0 %4993 }
 0xf89   :  { %v13389_v44 = vpop.eup %9348  ;;  %v13429_v15 = vadd.f32 %v12966_v34, %v5601_v27  ;;  %v13432_v38 = vpop.xlane.xlu1 %5623 }
 0xf8a   :  { %5015 = vadd.xlane.f32.xlu0 %v13389_v44  ;;  %v13392_v1 = vpop.eup %9350 }
 0xf8b   :  { %v13409_v32 = vpop.eup %9352 }
 0xf8c   :  { %5003 = vadd.xlane.f32.xlu2 %v13392_v1 }
 0xf8d   :  { %5633 = vmax.xlane.f32.xlu1 %v13395_v9 }
 0xf8e   :  { %v4640_v50 = vpop.xlane.xlu2 %4639 }
 0xf8f   :  { %9354 = vrcp.f32 %v4640_v50 }
 0xf90   :  { %9356 = vpow2.f32 %v4973_v21 }
 0xf91   :  { %9358 = vrcp.f32 %v4642_v55 }
 0xf92   :  { %4768 = vmatmul.bf16.gmra.mxu1 %v4684_v22  ;;  %9360 = vpow2.f32 %v5315_v13 }
 0xf94   :  { %5631 = vmax.xlane.f32.xlu2 %v13406_v43 }
 0xf95   :  { %5011 = vadd.xlane.f32.xlu1 %v13409_v32  ;;  %v9355_v10 = vpop.eup %9354 }
 0xf96   :  { %v4644_v42 = vpop.xlane.xlu2 %4643  ;;  %v13412_v2 = vpop.eup %9356  ;;  %v4675_v37 = vmul.f32 %v9355_v10, %v13292_v4  ;;  %v4985_v4 = vmul.f32 1.442695, %v4957_v29 }
 0xf97   :  { %v9359_v39 = vpop.eup %9358  ;;  %9362 = vrcp.f32 %v4644_v42 }
 0xf98   :  { %v13416_v57 = vpop.eup %9360  ;;  %v4676_v60 = vmul.f32 %v9359_v39, %v13258_v49  ;;  %9364 = vrcp.f32 %v4646_v62 }
 0xf99   :  { %9366 = vrcp.f32 %v4994_v59 }
 0xf9a   :  { %v4685_v51 = vpack.c.bf16 %v4676_v60, %v4675_v37  ;;  %9368 = vpow2.f32 %v4985_v4 }
 0xf9c   :  { %5005 = vadd.xlane.f32.xlu2 %v13412_v2 }
 0xf9d   :  { %5347 = vadd.xlane.f32.xlu1 %v13416_v57 }
 0xf9e   :  { %v13420_v24 = vpop.xlane.xlu2 %4943  ;;  %5423 = vrot.lane.b32.xlu0 %v14870_v46, %s9596_s27  ;;  %v9363_v46 = vpop.eup %9362 }
 0xf9f   :  { %v9365_v55 = vpop.eup %9364  ;;  %v4677_v21 = vmul.f32 %v9363_v46, %v13299_v54 }
 0xfa0   :  { %v9367_v50 = vpop.eup %9366  ;;  %v4678_v14 = vmul.f32 %v9365_v55, %v13267_v8  ;;  %v14874_v8 = vld [vmem:[#allocation10_spill] sm:$0xff] }
 0xfa1   :  { %v13436_v17 = vpop.eup %9368  ;;  %v5041_v13 = vmul.f32 %v9367_v50, %v13275_v11  ;;  %v5603_v50 = vpop.f32.mrf.mxu2 }
 0xfa2   :  { %4773 = vmatmul.bf16.gmra.mxu1 %v4685_v51  ;;  %v4686_v39 = vpack.c.bf16 %v4678_v14, %v4677_v21  ;;  %v5622_v51 = vpop.xlane.xlu0 %5621 }
 0xfa4   :  { %5635 = vmax.xlane.f32.xlu2 %v13426_v40 }
 0xfa5   :  { %5637 = vmax.xlane.f32.xlu1 %v13429_v15 }
 0xfa6   :  { %v4996_v49 = vpop.xlane.xlu2 %4995 }
 0xfa7   :  { %9370 = vrcp.f32 %v4996_v49  ;;  %v14875_v49 = vld [vmem:[#allocation15_spill] sm:$0xff] }
 0xfa8   :  { %9372 = vpow2.f32 %v4989_v28  ;;  %v5301_v61 = vsub.f32 %v14875_v49, %v13318_v45  ;;  %v14876_v45 = vld [vmem:[#allocation16_spill] sm:$0xff] }
 0xfaa   :  { %v5319_v28 = vmul.f32 1.442695, %v5301_v61  ;;  %v13490_v49 = vpop.xlane.xlu0 %5627 }
 0xfad   :  { %v9371_v22 = vpop.eup %9370  ;;  %5017 = vadd.xlane.f32.xlu1 %v13436_v17  ;;  %v4998_v53 = vpop.xlane.xlu1 %4997 }
 0xfae   :  { %v5042_v42 = vmul.f32 %v9371_v22, %v13314_v33  ;;  %v5626_v62 = vpop.xlane.xlu2 %5625  ;;  %v13443_v31 = vpop.eup %9372  ;;  %9374 = vrcp.f32 %v4998_v53 }
 0xfaf   :  { %v5247_v33 = vpop.f32.mrf.mxu0 }
 0xfb0   :  { %v5057_v10 = vpack.c.bf16 %v5042_v42, %v5041_v13  ;;  %v13449_v29 = vadd.f32 %v12966_v34, %v5247_v33  ;;  %v5653_v34 = vsub.f32 %v13286_v48, %v5622_v51  ;;  %v13465_v13 = vadd.f32 %v12982_v12, %v5603_v50 }
 0xfb1   :  { %v5655_v33 = vsub.f32 %v13321_v20, %v5626_v62 }
 0xfb2   :  { %4778 = vmatmul.bf16.gmra.mxu1 %v4686_v39  ;;  %5097 = vmatmul.bf16.vlgmr.msra.gmra.mxu3 %v5057_v10  ;;  %v5669_v22 = vmul.f32 1.442695, %v5653_v34 }
 0xfb4   :  { %v9375_v37 = vpop.eup %9374 }
 0xfb5   :  { %5021 = vadd.xlane.f32.xlu1 %v13443_v31  ;;  %v5000_v54 = vpop.xlane.xlu1 %4999  ;;  %v5043_v59 = vmul.f32 %v9375_v37, %v13323_v5 }
 0xfb6   :  { %v13446_v11 = vpop.xlane.xlu2 %5279  ;;  %9376 = vrcp.f32 %v5000_v54  ;;  %v4955_v54 = vsub.f32 %v13216_v26, %v13375_v52 }
 0xfb7   :  { %v5249_v55 = vpop.f32.mrf.mxu0  ;;  %9378 = vpow2.f32 %v5319_v28 }
 0xfb8   :  { %v13462_v21 = vadd.f32 %v12982_v12, %v5249_v55  ;;  %9380 = vpow2.f32 %v5669_v22  ;;  %v5606_v12 = vpop.f32.mrf.mxu2 }
 0xfbc   :  { %5775 = vrot.lane.b32.xlu2 %v14874_v8, %s9595_s26  ;;  %v9377_v60 = vpop.eup %9376 }
 0xfbd   :  { %5283 = vmax.xlane.f32.xlu1 %v13449_v29  ;;  %v5044_v4 = vmul.f32 %v9377_v60, %v13332_v56  ;;  %v5302_v56 = vsub.f32 %v14876_v45, %v13327_v3  ;;  %v13471_v42 = vpop.eup %9378  ;;  %v13480_v3 = vadd.f32 %v12996_v23, %v5606_v12  ;;  %v4981_v60 = vmul.f32 1.442695, %v4955_v54  ;;  %v5002_v52 = vpop.xlane.xlu0 %5001 }
 0xfbe   :  { %v13454_v27 = vpop.xlane.xlu2 %5281  ;;  %v13474_v14 = vpop.eup %9380 }
 0xfbf   :  { %v5058_v46 = vpack.c.bf16 %v5044_v4, %v5043_v59  ;;  %v5321_v48 = vmul.f32 1.442695, %v5302_v56  ;;  %v5252_v10 = vpop.f32.mrf.mxu0  ;;  %v5673_v59 = vmul.f32 1.442695, %v5655_v33  ;;  %v5305_v56 = vsub.f32 %v13335_v18, %v13446_v11 }
 0xfc0   :  { %v5608_v37 = vpop.f32.mrf.mxu2  ;;  %v13510_v34 = vadd.f32 %v12996_v23, %v5252_v10 }
 0xfc1   :  { %9382 = vpow2.f32 %v5321_v48  ;;  %v13488_v4 = vadd.f32 %v13010_v7, %v5608_v37  ;;  %v14877_v48 = vld [vmem:[#allocation8_spill] sm:$0xff]  ;;  %v5327_v10 = vmul.f32 1.442695, %v5305_v56 }
 0xfc2   :  { %5102 = vmatmul.bf16.gmra.mxu3 %v5058_v46  ;;  %9384 = vpow2.f32 %v4981_v60 }
 0xfc3   :  { %9386 = vpow2.f32 %v5673_v59 }
 0xfc5   :  { %5285 = vmax.xlane.f32.xlu1 %v13462_v21 }
 0xfc6   :  { %v5426_v5 = vpop.permute.xlu2 %5425 }
 0xfc7   :  { %5447 = vmatpush.bf16.msra.mxu1 %v5426_v5  ;;  %v13477_v39 = vpop.eup %9382  ;;  %v5254_v51 = vpop.f32.mrf.mxu0 }
 0xfc8   :  { %5639 = vmax.xlane.f32.xlu0 %v13465_v13  ;;  %v13493_v61 = vadd.f32 %v13010_v7, %v5254_v51  ;;  %v5611_v26 = vpop.f32.mrf.mxu2  ;;  %v13497_v20 = vpop.eup %9384  ;;  %v5304_v7 = vsub.f32 %v13210_v35, %v13354_v19 }
 0xfc9   :  { %v13499_v62 = vpop.eup %9386  ;;  %v13503_v46 = vadd.f32 %v13021_v25, %v5611_v26 }
 0xfca   :  { %v5325_v55 = vmul.f32 1.442695, %v5304_v7 }
 0xfcc   :  { %9388 = vpow2.f32 %v5325_v55 }
 0xfcd   :  { %v5778_v53 = vpop.permute.xlu1 %5777  ;;  %5351 = vadd.xlane.f32.xlu1 %v13471_v42  ;;  %v5008_v50 = vpop.xlane.xlu0 %5007  ;;  %9390 = vrcp.f32 %v5002_v52 }
 0xfce   :  { %5802 = vmatpush.bf16.msrb.mxu3 %v5778_v53 }
 0xfcf   :  { %v13513_v28 = vpop.f32.mrf.mxu0 }
 0xfd0   :  { %5701 = vadd.xlane.f32.xlu0 %v13474_v14  ;;  %v13535_v11 = vpop.f32.mrf.mxu2 }
 0xfd2   :  { %v13515_v22 = vpop.eup %9388 }
 0xfd5   :  { %5353 = vadd.xlane.f32.xlu1 %v13477_v39  ;;  %v13517_v25 = vpop.xlane.xlu0 %5009 }
 0xfd7   :  { %v5259_v5 = vpop.f32.mrf.mxu0 }
 0xfd8   :  { %5641 = vmax.xlane.f32.xlu0 %v13480_v3  ;;  %v13522_v45 = vadd.f32 %v13034_v58, %v5259_v5  ;;  %v9391_v58 = vpop.eup %9390  ;;  %v5616_v5 = vpop.f32.mrf.mxu2 }
 0xfd9   :  { %v5045_v51 = vmul.f32 %v9391_v58, %v13341_v6 }
 0xfdd   :  { %5643 = vmax.xlane.f32.xlu1 %v13488_v4  ;;  %v5350_v12 = vpop.xlane.xlu0 %5349 }
 0xfe0   :  { %5289 = vmax.xlane.f32.xlu0 %v13493_v61 }
 0xfe5   :  { %5013 = vadd.xlane.f32.xlu2 %v13497_v20  ;;  %5705 = vadd.xlane.f32.xlu1 %v13499_v62 }
 0xfe8   :  { %5645 = vmax.xlane.f32.xlu0 %v13503_v46 }
 0xfed   :  { %5287 = vmax.xlane.f32.xlu1 %v13510_v34 }
 0xff5   :  { %5357 = vadd.xlane.f32.xlu1 %v13515_v22 }
 0xff8   :  { %v5630_v35 = vpop.xlane.xlu1 %5629 }
 0xff9   :  { %v5657_v19 = vsub.f32 %v13383_v30, %v5630_v35  ;;  %v9586_v35 = vld [vmem:[%s14692_s3 + $0x70] sm:$0xff] }
 0xffb   :  { %v5677_v23 = vmul.f32 1.442695, %v5657_v19  ;;  %v13552_v19 = vadd.f32 %v9586_v35, %v5616_v5 }
 0xffd   :  { %5773 = vrot.lane.b32.xlu2 %v14877_v48, %s9595_s26  ;;  %9392 = vpow2.f32 %v5677_v23  ;;  %5293 = vmax.xlane.f32.xlu1 %v13522_v45  ;;  %v13541_v59 = vpop.xlane.xlu0 %5015 }
 0xfff   :  { %v5004_v53 = vpop.xlane.xlu2 %5003 }
0x1000   :  { %9394 = vrcp.f32 %v5004_v53  ;;  %v5634_v54 = vpop.xlane.xlu1 %5633 }
0x1001   :  { %v5659_v30 = vsub.f32 %v13395_v9, %v5634_v54  ;;  %9396 = vpow2.f32 %v5327_v10 }
0x1003   :  { %v13530_v33 = vpop.eup %9392  ;;  %v5681_v37 = vmul.f32 1.442695, %v5659_v30 }
0x1004   :  { %5709 = vadd.xlane.f32.xlu0 %v13530_v33 }
0x1005   :  { %5421 = vrot.lane.b32.xlu2 %v14874_v8, %s9596_s27  ;;  %9398 = vpow2.f32 %v5681_v37 }
0x1006   :  { %v9395_v18 = vpop.eup %9394  ;;  %9400 = vrcp.f32 %v5008_v50 }
0x1007   :  { %v13537_v60 = vpop.xlane.xlu2 %5631  ;;  %v5046_v9 = vmul.f32 %v9395_v18, %v13392_v1  ;;  %v13543_v7 = vpop.eup %9396  ;;  %9402 = vrcp.f32 %v5350_v12 }
0x1008   :  { %v5012_v26 = vpop.xlane.xlu1 %5011 }
0x1009   :  { %v5059_v52 = vpack.c.bf16 %v5046_v9, %v5045_v51 }
0x100b   :  { %5107 = vmatmul.bf16.gmra.mxu3 %v5059_v52  ;;  %v13545_v55 = vpop.eup %9398 }
0x100c   :  { %5713 = vadd.xlane.f32.xlu1 %v13545_v55  ;;  %5359 = vadd.xlane.f32.xlu0 %v13543_v7  ;;  %v9401_v23 = vpop.eup %9400 }
0x100d   :  { %v9403_v56 = vpop.eup %9402  ;;  %v5048_v10 = vmul.f32 %v9401_v23, %v13356_v16  ;;  %v4958_v16 = vsub.f32 %v13243_v63, %v13385_v47  ;;  %v13583_v47 = vld [vmem:[%s14692_s3 + $0x78] sm:$0xff] }
0x100e   :  { %v13559_v58 = vmul.f32 %v9403_v56, %v13370_v0 }
0x100f   :  { %v5006_v8 = vpop.xlane.xlu2 %5005 }
0x1010   :  { %9404 = vrcp.f32 %v5006_v8  ;;  %v5424_v6 = vpop.permute.xlu0 %5423  ;;  %v5348_v1 = vpop.xlane.xlu1 %5347  ;;  %v4987_v8 = vmul.f32 1.442695, %v4958_v16 }
0x1011   :  { %5448 = vmatpush.bf16.msra.mxu1 %v5424_v6  ;;  %9406 = vrcp.f32 %v5348_v1  ;;  %v5618_v6 = vpop.f32.mrf.mxu2 }
0x1012   :  { %9408 = vrcp.f32 %v5012_v26  ;;  %v13586_v1 = vadd.f32 %v13583_v47, %v5618_v6 }
0x1014   :  { %5649 = vmax.xlane.f32.xlu1 %v13552_v19 }
0x1016   :  { %v9405_v53 = vpop.eup %9404 }
0x1017   :  { %v5636_v50 = vpop.xlane.xlu2 %5635  ;;  %v5047_v12 = vmul.f32 %v9405_v53, %v13412_v2  ;;  %v9407_v54 = vpop.eup %9406 }
0x1018   :  { %v5660_v30 = vsub.f32 %v13426_v40, %v5636_v50  ;;  %v13562_v37 = vmul.f32 %v9407_v54, %v13416_v57  ;;  %v13564_v18 = vpop.xlane.xlu1 %5637  ;;  %v9409_v2 = vpop.eup %9408 }
0x1019   :  { %v5060_v51 = vpack.c.bf16 %v5048_v10, %v5047_v12  ;;  %v5050_v5 = vmul.f32 %v9409_v2, %v13409_v32 }
0x101a   :  { %v5683_v9 = vmul.f32 1.442695, %v5660_v30  ;;  %v5411_v52 = vpack.c.bf16 %v13559_v58, %v13562_v37 }
0x101b   :  { %5112 = vmatmul.bf16.gmra.mxu3 %v5060_v51 }
0x101c   :  { %9410 = vpow2.f32 %v5683_v9 }
0x101d   :  { %9412 = vrcp.f32 %v13517_v25  ;;  %v4960_v25 = vsub.f32 %v13308_v36, %v13420_v24  ;;  %v5262_v36 = vpop.f32.mrf.mxu0 }
0x101e   :  { %9414 = vpow2.f32 %v4987_v8  ;;  %v13596_v50 = vadd.f32 %v9586_v35, %v5262_v36 }
0x101f   :  { %v5776_v0 = vpop.permute.xlu2 %5775  ;;  %v4991_v53 = vmul.f32 1.442695, %v4960_v25 }
0x1020   :  { %5803 = vmatpush.bf16.msrb.mxu3 %v5776_v0  ;;  %v13571_v57 = vpop.xlane.xlu1 %5017 }
0x1021   :  { %9416 = vpow2.f32 %v4991_v53 }
0x1022   :  { %v13573_v40 = vpop.eup %9410 }
0x1023   :  { %5715 = vadd.xlane.f32.xlu0 %v13573_v40  ;;  %v9413_v26 = vpop.eup %9412 }
0x1024   :  { %v5049_v63 = vmul.f32 %v9413_v26, %v13365_v41  ;;  %v13591_v32 = vpop.eup %9414  ;;  %v14878_v41 = vld [vmem:[#allocation29_spill] sm:$0xff] }
0x1025   :  { %v5654_v24 = vsub.f32 %v14878_v41, %v13432_v38 }
0x1026   :  { %v5061_v56 = vpack.c.bf16 %v5050_v5, %v5049_v63 }
0x1027   :  { %v5671_v10 = vmul.f32 1.442695, %v5654_v24  ;;  %v13599_v54 = vpop.eup %9416 }
0x1028   :  { %v13588_v23 = vpop.xlane.xlu1 %5021 }
0x1029   :  { %9418 = vpow2.f32 %v5671_v10 }
0x102b   :  { %5651 = vmax.xlane.f32.xlu0 %v13586_v1  ;;  %5117 = vmatmul.bf16.gmra.mxu3 %v5061_v56 }
0x102e   :  { %5019 = vadd.xlane.f32.xlu2 %v13591_v32 }
0x102f   :  { %v13604_v38 = vpop.eup %9418 }
0x1030   :  { %v5284_v12 = vpop.xlane.xlu1 %5283 }
0x1031   :  { %v5307_v2 = vsub.f32 %v13449_v29, %v5284_v12 }
0x1033   :  { %5295 = vmax.xlane.f32.xlu0 %v13596_v50  ;;  %v5331_v26 = vmul.f32 1.442695, %v5307_v2 }
0x1036   :  { %5023 = vadd.xlane.f32.xlu2 %v13599_v54 }
0x1038   :  { %v5286_v30 = vpop.xlane.xlu1 %5285 }
0x1039   :  { %v5308_v51 = vsub.f32 %v13462_v21, %v5286_v30 }
0x103b   :  { %v5640_v9 = vpop.xlane.xlu0 %5639  ;;  %v5333_v16 = vmul.f32 1.442695, %v5308_v51 }
0x103c   :  { %v5662_v0 = vsub.f32 %v13465_v13, %v5640_v9 }
0x103d   :  { %9420 = vpow2.f32 %v5333_v16 }
0x103e   :  { %v5687_v35 = vmul.f32 1.442695, %v5662_v0  ;;  %5703 = vadd.xlane.f32.xlu2 %v13604_v38 }
0x1040   :  { %9422 = vpow2.f32 %v5687_v35  ;;  %v5352_v8 = vpop.xlane.xlu1 %5351 }
0x1041   :  { %9424 = vpow2.f32 %v5331_v26 }
0x1042   :  { %9426 = vrcp.f32 %v5352_v8 }
0x1043   :  { %v13608_v5 = vpop.xlane.xlu0 %5701  ;;  %v13610_v6 = vpop.eup %9420 }
0x1044   :  { %5365 = vadd.xlane.f32.xlu0 %v13610_v6 }
0x1046   :  { %v13613_v21 = vpop.eup %9422 }
0x1047   :  { %5719 = vadd.xlane.f32.xlu1 %v13613_v21  ;;  %v13618_v29 = vpop.eup %9424 }
0x1048   :  { %v5354_v13 = vpop.xlane.xlu1 %5353  ;;  %v9427_v63 = vpop.eup %9426 }
0x1049   :  { %9428 = vrcp.f32 %v5354_v13  ;;  %v13622_v36 = vmul.f32 %v9427_v63, %v13471_v42 }
0x104b   :  { %v13616_v25 = vpop.xlane.xlu0 %5641 }
0x104f   :  { %5363 = vadd.xlane.f32.xlu1 %v13618_v29  ;;  %v9429_v56 = vpop.eup %9428 }
0x1050   :  { %v5644_v53 = vpop.xlane.xlu1 %5643  ;;  %v13625_v41 = vmul.f32 %v9429_v56, %v13477_v39 }
0x1051   :  { %v5664_v24 = vsub.f32 %v13488_v4, %v5644_v53 }
0x1052   :  { %v5412_v10 = vpack.c.bf16 %v13625_v41, %v13622_v36 }
0x1053   :  { %v13628_v12 = vpop.xlane.xlu0 %5289  ;;  %v5691_v30 = vmul.f32 1.442695, %v5664_v24 }
0x1055   :  { %9430 = vpow2.f32 %v5691_v30 }
0x1056   :  { %5419 = vrot.lane.b32.xlu2 %v14877_v48, %s9596_s27  ;;  %9432 = vrcp.f32 %v13541_v59 }
0x1058   :  { %v5014_v51 = vpop.xlane.xlu2 %5013  ;;  %v13635_v42 = vpop.xlane.xlu1 %5705 }
0x1059   :  { %9434 = vrcp.f32 %v5014_v51 }
0x105b   :  { %v5646_v39 = vpop.xlane.xlu0 %5645  ;;  %v13637_v9 = vpop.eup %9430 }
0x105c   :  { %v5665_v4 = vsub.f32 %v13503_v46, %v5646_v39  ;;  %v9433_v16 = vpop.eup %9432  ;;  %5723 = vadd.xlane.f32.xlu1 %v13637_v9 }
0x105d   :  { %v5052_v59 = vmul.f32 %v9433_v16, %v13389_v44  ;;  %v14879_v44 = vld [vmem:[#allocation30_spill] sm:$0xff] }
0x105e   :  { %v5693_v0 = vmul.f32 1.442695, %v5665_v4  ;;  %v14880_v4 = vld [vmem:[#allocation32_spill] sm:$0xff]  ;;  %v14881_v16 = vld [vmem:[#allocation18_spill] sm:$0xff] }
0x105f   :  { %v9435_v35 = vpop.eup %9434 }
0x1060   :  { %9436 = vpow2.f32 %v5693_v0  ;;  %v5774_v2 = vpop.permute.xlu2 %5773  ;;  %v5051_v48 = vmul.f32 %v9435_v35, %v13497_v20  ;;  %v5288_v8 = vpop.xlane.xlu1 %5287  ;;  %v5656_v20 = vsub.f32 %v14879_v44, %v13490_v49  ;;  %v5303_v0 = vsub.f32 %v14881_v16, %v14880_v4 }
0x1061   :  { %5804 = vmatpush.bf16.msrb.mxu3 %v5774_v2  ;;  %v5309_v26 = vsub.f32 %v13510_v34, %v5288_v8  ;;  %v5658_v49 = vsub.f32 %v13406_v43, %v13537_v60 }
0x1062   :  { %v5062_v13 = vpack.c.bf16 %v5052_v59, %v5051_v48  ;;  %v5675_v51 = vmul.f32 1.442695, %v5656_v20  ;;  %v5323_v2 = vmul.f32 1.442695, %v5303_v0 }
0x1063   :  { %v5335_v63 = vmul.f32 1.442695, %v5309_v26 }
0x1064   :  { %5122 = vmatmul.bf16.gmra.mxu3 %v5062_v13 }
0x1065   :  { %9438 = vpow2.f32 %v5335_v63  ;;  %v9588_v63 = vld [vmem:[%s14692_s3 + $0x68] sm:$0xff] }
0x1066   :  { %v13644_v56 = vpop.eup %9436  ;;  %v13679_v43 = vadd.f32 %v9588_v63, %v13535_v11  ;;  %v13695_v11 = vpop.f32.mrf.mxu1 }
0x1067   :  { %5725 = vadd.xlane.f32.xlu1 %v13644_v56 }
0x1068   :  { %v5422_v46 = vpop.permute.xlu2 %5421  ;;  %v13647_v53 = vpop.xlane.xlu1 %5357 }
0x1069   :  { %5449 = vmatpush.bf16.msra.mxu1 %v5422_v46  ;;  %v14882_v46 = vld [vmem:[#allocation31_spill] sm:$0xff] }
0x106a   :  { %v5306_v44 = vsub.f32 %v14882_v46, %v13454_v27  ;;  %v5661_v27 = vsub.f32 %v13429_v15, %v13564_v18 }
0x106b   :  { %v13649_v24 = vpop.eup %9438 }
0x106c   :  { %5367 = vadd.xlane.f32.xlu0 %v13649_v24  ;;  %v5329_v20 = vmul.f32 1.442695, %v5306_v44  ;;  %v5685_v4 = vmul.f32 1.442695, %v5661_v27 }
0x106e   :  { %v13706_v18 = vpop.f32.mrf.mxu1 }
0x1070   :  { %v5294_v34 = vpop.xlane.xlu1 %5293 }
0x1071   :  { %v5312_v30 = vsub.f32 %v13522_v45, %v5294_v34  ;;  %v5679_v45 = vmul.f32 1.442695, %v5658_v49  ;;  %v9589_v34 = vld [vmem:[%s14692_s3 + $0x60] sm:$0xff] }
0x1073   :  { %v5341_v39 = vmul.f32 1.442695, %v5312_v30  ;;  %v13690_v30 = vadd.f32 %v9589_v34, %v13513_v28  ;;  %v5264_v34 = vpop.f32.mrf.mxu0 }
0x1075   :  { %9440 = vpow2.f32 %v5341_v39 }
0x1076   :  { %9442 = vpow2.f32 %v5675_v51 }
0x1077   :  { %9444 = vpow2.f32 %v5323_v2  ;;  %v13665_v59 = vpop.xlane.xlu0 %5709 }
0x1078   :  { %9446 = vpow2.f32 %v5679_v45 }
0x1079   :  { %9448 = vpow2.f32 %v5329_v20 }
0x107a   :  { %9450 = vrcp.f32 %v13571_v57 }
0x107b   :  { %v13657_v35 = vpop.eup %9440 }
0x107c   :  { %5373 = vadd.xlane.f32.xlu1 %v13657_v35  ;;  %v13660_v48 = vpop.eup %9442 }
0x107d   :  { %v13667_v8 = vpop.eup %9444 }
0x107e   :  { %v13670_v26 = vpop.eup %9446 }
0x107f   :  { %5707 = vadd.xlane.f32.xlu2 %v13660_v48  ;;  %v13672_v13 = vpop.xlane.xlu0 %5359  ;;  %v13700_v16 = vpop.eup %9448 }
0x1080   :  { %v9451_v0 = vpop.eup %9450 }
0x1081   :  { %v5053_v46 = vmul.f32 %v9451_v0, %v13436_v17 }
0x1087   :  { %5355 = vadd.xlane.f32.xlu2 %v13667_v8 }
0x108f   :  { %5711 = vadd.xlane.f32.xlu2 %v13670_v26 }
0x1096   :  { %v13681_v60 = vpop.xlane.xlu0 %5715 }
0x1097   :  { %5647 = vmax.xlane.f32.xlu2 %v13679_v43 }
0x109e   :  { %v13692_v51 = vpop.xlane.xlu0 %5651 }
0x109f   :  { %5291 = vmax.xlane.f32.xlu2 %v13690_v30 }
0x10a1   :  { %v5020_v39 = vpop.xlane.xlu2 %5019 }
0x10a2   :  { %9452 = vrcp.f32 %v5020_v39 }
0x10a3   :  { %9454 = vpow2.f32 %v5685_v4  ;;  %v13720_v4 = vadd.f32 %v13583_v47, %v5264_v34 }
0x10a6   :  { %v5296_v28 = vpop.xlane.xlu0 %5295 }
0x10a7   :  { %v5313_v2 = vsub.f32 %v13596_v50, %v5296_v28  ;;  %5361 = vadd.xlane.f32.xlu2 %v13700_v16  ;;  %v5663_v50 = vsub.f32 %v13480_v3, %v13616_v25  ;;  %v5310_v3 = vsub.f32 %v13493_v61, %v13628_v12 }
0x10a8   :  { %v9453_v49 = vpop.eup %9452 }
0x10a9   :  { %v5343_v45 = vmul.f32 1.442695, %v5313_v2  ;;  %v5024_v63 = vpop.xlane.xlu2 %5023  ;;  %v5054_v15 = vmul.f32 %v9453_v49, %v13591_v32  ;;  %v13708_v44 = vpop.eup %9454  ;;  %v5689_v39 = vmul.f32 1.442695, %v5663_v50 }
0x10aa   :  { %v13716_v32 = vpop.f32.mrf.mxu1 }
0x10ab   :  { %9456 = vpow2.f32 %v5343_v45  ;;  %v5063_v57 = vpack.c.bf16 %v5054_v15, %v5053_v46  ;;  %v5337_v45 = vmul.f32 1.442695, %v5310_v3 }
0x10ac   :  { %9458 = vrcp.f32 %v5024_v63 }
0x10ad   :  { %5127 = vmatmul.bf16.gmra.mxu3 %v5063_v57  ;;  %9460 = vrcp.f32 %v13588_v23 }
0x10ae   :  { %9462 = vpow2.f32 %v5689_v39 }
0x10af   :  { %5717 = vadd.xlane.f32.xlu2 %v13708_v44 }
0x10b1   :  { %v13714_v20 = vpop.eup %9456  ;;  %v5704_v17 = vpop.xlane.xlu2 %5703 }
0x10b2   :  { %5375 = vadd.xlane.f32.xlu1 %v13714_v20  ;;  %v9459_v27 = vpop.eup %9458  ;;  %v13727_v49 = vpop.f32.mrf.mxu1  ;;  %9464 = vrcp.f32 %v5704_v17 }
0x10b3   :  { %v9461_v0 = vpop.eup %9460  ;;  %v5056_v23 = vmul.f32 %v9459_v27, %v13599_v54  ;;  %v13734_v54 = vpop.f32.mrf.mxu3  ;;  %9466 = vrcp.f32 %v13608_v5 }
0x10b4   :  { %v5055_v28 = vmul.f32 %v9461_v0, %v13443_v31  ;;  %v13732_v47 = vpop.eup %9462  ;;  %9468 = vpow2.f32 %v5337_v45  ;;  %v5714_v45 = vpop.xlane.xlu1 %5713 }
0x10b5   :  { %9470 = vrcp.f32 %v13635_v42 }
0x10b6   :  { %v5064_v2 = vpack.c.bf16 %v5056_v23, %v5055_v28 }
0x10b7   :  { %5297 = vmax.xlane.f32.xlu2 %v13720_v4 }
0x10b8   :  { %v9465_v31 = vpop.eup %9464 }
0x10b9   :  { %v5420_v25 = vpop.permute.xlu2 %5419  ;;  %v9467_v61 = vpop.eup %9466  ;;  %v5750_v46 = vmul.f32 %v9465_v31, %v13604_v38 }
0x10ba   :  { %5450 = vmatpush.bf16.msra.mxu1 %v5420_v25  ;;  %v13738_v12 = vpop.eup %9468  ;;  %v13740_v63 = vpop.f32.mrf.mxu1  ;;  %v5749_v37 = vmul.f32 %v9467_v61, %v13474_v14 }
0x10bb   :  { %v13744_v58 = vpop.f32.mrf.mxu3 }
0x10bd   :  { %5132 = vmatmul.bf16.gmra.mxu3 %v5064_v2  ;;  %5451 = vmatmul.bf16.vlgmr.msra.gmra.mxu1 %v5411_v52  ;;  %v5765_v52 = vpack.c.bf16 %v5750_v46, %v5749_v37 }
0x10bf   :  { %5721 = vadd.xlane.f32.xlu2 %v13732_v47 }
0x10c2   :  { %v13750_v5 = vpop.f32.mrf.mxu1 }
0x10c3   :  { %v13752_v15 = vpop.f32.mrf.mxu3 }
0x10c7   :  { %5369 = vadd.xlane.f32.xlu2 %v13738_v12 }
0x10ca   :  { %v13754_v57 = vpop.f32.mrf.mxu1 }
0x10cb   :  { %v13756_v50 = vpop.f32.mrf.mxu3 }
0x10cd   :  { %5456 = vmatmul.bf16.gmra.mxu1 %v5412_v10  ;;  %5805 = vmatmul.bf16.vlgmr.msrb.gmra.mxu3 %v5765_v52  ;;  %v9471_v10 = vpop.eup %9470 }
0x10ce   :  { %v5751_v23 = vmul.f32 %v9471_v10, %v13499_v62 }
0x10d2   :  { %v13758_v38 = vpop.f32.mrf.mxu1 }
0x10d3   :  { %v13760_v17 = vpop.f32.mrf.mxu3 }
0x10da   :  { %v13762_v34 = vpop.f32.mrf.mxu1 }
0x10db   :  { %v13764_v14 = vpop.f32.mrf.mxu3 }
0x10e2   :  { %v13767_v41 = vpop.f32.mrf.mxu1 }
0x10e3   :  { %v13769_v27 = vpop.f32.mrf.mxu3 }
0x10ea   :  { %v13774_v42 = vpop.f32.mrf.mxu1 }
0x10eb   :  { %v13777_v31 = vpop.f32.mrf.mxu3 }
0x10f2   :  { %v5708_v36 = vpop.xlane.xlu2 %5707  ;;  %v13781_v52 = vpop.f32.mrf.mxu1 }
0x10f3   :  { %9472 = vrcp.f32 %v5708_v36 }
0x10f4   :  { %9474 = vrcp.f32 %v13647_v53 }
0x10f9   :  { %v9473_v39 = vpop.eup %9472 }
0x10fa   :  { %v5356_v0 = vpop.xlane.xlu2 %5355  ;;  %v5752_v3 = vmul.f32 %v9473_v39, %v13660_v48  ;;  %v9475_v28 = vpop.eup %9474 }
0x10fb   :  { %9476 = vrcp.f32 %v5356_v0  ;;  %v5400_v46 = vmul.f32 %v9475_v28, %v13515_v22  ;;  %v5650_v39 = vpop.xlane.xlu1 %5649 }
0x10fc   :  { %v5766_v25 = vpack.c.bf16 %v5752_v3, %v5751_v23  ;;  %9478 = vrcp.f32 %v13665_v59  ;;  %v13786_v23 = vpop.f32.mrf.mxu3  ;;  %v5667_v22 = vsub.f32 %v13552_v19, %v5650_v39  ;;  %v5668_v19 = vsub.f32 %v13586_v1, %v13692_v51 }
0x10fe   :  { %5810 = vmatmul.bf16.gmra.mxu3 %v5766_v25  ;;  %v5697_v25 = vmul.f32 1.442695, %v5667_v22  ;;  %v5366_v22 = vpop.xlane.xlu0 %5365 }
0x1101   :  { %v9477_v2 = vpop.eup %9476 }
0x1102   :  { %v5712_v61 = vpop.xlane.xlu2 %5711  ;;  %v5399_v53 = vmul.f32 %v9477_v2, %v13667_v8  ;;  %v9479_v48 = vpop.eup %9478 }
0x1103   :  { %9480 = vrcp.f32 %v5712_v61  ;;  %v5753_v10 = vmul.f32 %v9479_v48, %v13530_v33  ;;  %v13791_v2 = vpop.f32.mrf.mxu1 }
0x1104   :  { %v5413_v62 = vpack.c.bf16 %v5400_v46, %v5399_v53  ;;  %v13795_v53 = vpop.f32.mrf.mxu3 }
0x1106   :  { %5461 = vmatmul.bf16.gmra.mxu1 %v5413_v62  ;;  %v5699_v62 = vmul.f32 1.442695, %v5668_v19 }
0x1109   :  { %v9481_v37 = vpop.eup %9480 }
0x110a   :  { %v5648_v36 = vpop.xlane.xlu2 %5647  ;;  %v5754_v59 = vmul.f32 %v9481_v37, %v13670_v26 }
0x110b   :  { %v5666_v0 = vsub.f32 %v13679_v43, %v5648_v36 }
0x110c   :  { %v5767_v8 = vpack.c.bf16 %v5754_v59, %v5753_v10  ;;  %v13807_v59 = vpop.f32.mrf.mxu1  ;;  %v13809_v1 = vpop.f32.mrf.mxu3 }
0x110d   :  { %v5695_v3 = vmul.f32 1.442695, %v5666_v0 }
0x110e   :  { %5815 = vmatmul.bf16.gmra.mxu3 %v5767_v8 }
0x110f   :  { %9482 = vpow2.f32 %v5695_v3 }
0x1110   :  { %9484 = vrcp.f32 %v13681_v60 }
0x1111   :  { %9486 = vrcp.f32 %v5714_v45  ;;  %v5720_v45 = vpop.xlane.xlu1 %5719 }
0x1112   :  { %v5292_v28 = vpop.xlane.xlu2 %5291  ;;  %9488 = vpow2.f32 %v5697_v25 }
0x1113   :  { %v5311_v33 = vsub.f32 %v13690_v30, %v5292_v28 }
0x1114   :  { %v13818_v28 = vpop.f32.mrf.mxu1 }
0x1115   :  { %v13793_v26 = vpop.eup %9482  ;;  %v5339_v43 = vmul.f32 1.442695, %v5311_v33  ;;  %v13820_v33 = vpop.f32.mrf.mxu3 }
0x1116   :  { %v9485_v61 = vpop.eup %9484  ;;  %5727 = vadd.xlane.f32.xlu0 %v13793_v26 }
0x1117   :  { %9490 = vpow2.f32 %v5339_v43  ;;  %v9487_v60 = vpop.eup %9486  ;;  %v5756_v30 = vmul.f32 %v9485_v61, %v13573_v40 }
0x1118   :  { %9492 = vrcp.f32 %v13672_v13  ;;  %v5755_v48 = vmul.f32 %v9487_v60, %v13545_v55  ;;  %v13803_v37 = vpop.eup %9488 }
0x1119   :  { %v5364_v0 = vpop.xlane.xlu1 %5363 }
0x111a   :  { %v5362_v46 = vpop.xlane.xlu2 %5361  ;;  %v5768_v10 = vpack.c.bf16 %v5756_v30, %v5755_v48 }
0x111b   :  { %9494 = vrcp.f32 %v5362_v46 }
0x111c   :  { %9496 = vpow2.f32 %v5699_v62 }
0x111d   :  { %v13805_v36 = vpop.eup %9490  ;;  %9498 = vrcp.f32 %v5720_v45 }
0x111e   :  { %5729 = vadd.xlane.f32.xlu0 %v13803_v37  ;;  %5371 = vadd.xlane.f32.xlu2 %v13805_v36  ;;  %v9493_v40 = vpop.eup %9492 }
0x111f   :  { %5820 = vmatmul.bf16.gmra.mxu3 %v5768_v10  ;;  %v5401_v55 = vmul.f32 %v9493_v40, %v13543_v7  ;;  %v13826_v40 = vpop.f32.mrf.mxu1 }
0x1121   :  { %v9495_v13 = vpop.eup %9494  ;;  %v5724_v46 = vpop.xlane.xlu1 %5723 }
0x1122   :  { %v5718_v51 = vpop.xlane.xlu2 %5717  ;;  %v5402_v39 = vmul.f32 %v9495_v13, %v13700_v16  ;;  %v13815_v3 = vpop.eup %9496 }
0x1123   :  { %9500 = vrcp.f32 %v5718_v51  ;;  %v9499_v25 = vpop.eup %9498 }
0x1124   :  { %v5414_v8 = vpack.c.bf16 %v5402_v39, %v5401_v55  ;;  %9502 = vrcp.f32 %v5364_v0  ;;  %v5758_v61 = vmul.f32 %v9499_v25, %v13613_v21 }
0x1125   :  { %9504 = vrcp.f32 %v5366_v22 }
0x1126   :  { %5466 = vmatmul.bf16.gmra.mxu1 %v5414_v8  ;;  %5731 = vadd.xlane.f32.xlu2 %v13815_v3 }
0x1129   :  { %v9501_v43 = vpop.eup %9500 }
0x112a   :  { %v5298_v7 = vpop.xlane.xlu2 %5297  ;;  %v5757_v16 = vmul.f32 %v9501_v43, %v13708_v44  ;;  %v9503_v30 = vpop.eup %9502 }
0x112b   :  { %v5314_v19 = vsub.f32 %v13720_v4, %v5298_v7  ;;  %v9505_v62 = vpop.eup %9504  ;;  %v5403_v10 = vmul.f32 %v9503_v30, %v13618_v29  ;;  %v5368_v4 = vpop.xlane.xlu0 %5367 }
0x112c   :  { %v5769_v60 = vpack.c.bf16 %v5758_v61, %v5757_v16  ;;  %v5404_v44 = vmul.f32 %v9505_v62, %v13610_v6  ;;  %v8800_v6 = vpack.i.bf16 %v13744_v58, %v13734_v54  ;;  %v8830_v58 = vpack.i.bf16 %v13764_v14, %v13760_v17 }
0x112d   :  { %v5345_v45 = vmul.f32 1.442695, %v5314_v19  ;;  %v8860_v62 = vpack.i.bf16 %v13795_v53, %v13786_v23  ;;  %v8875_v14 = vpack.i.bf16 %v13820_v33, %v13809_v1  ;;  %v5726_v23 = vpop.xlane.xlu1 %5725 }
0x112e   :  { %v5415_v21 = vpack.c.bf16 %v5404_v44, %v5403_v10 }
0x112f   :  { %9506 = vpow2.f32 %v5345_v45  ;;  %5825 = vmatmul.bf16.gmra.mxu3 %v5769_v60 }
0x1130   :  { %v5128_v48 = vpop.f32.mrf.mxu3  ;;  %9508 = vrcp.f32 %v5724_v46 }
0x1132   :  { %v5722_v13 = vpop.xlane.xlu2 %5721 }
0x1133   :  { %9510 = vrcp.f32 %v5722_v13 }
0x1134   :  { %9512 = vrcp.f32 %v5368_v4 }
0x1135   :  { %v13829_v51 = vpop.eup %9506  ;;  %v5374_v1 = vpop.xlane.xlu1 %5373 }
0x1136   :  { %5377 = vadd.xlane.f32.xlu0 %v13829_v51  ;;  %5471 = vmatmul.bf16.gmra.mxu1 %v5415_v21  ;;  %v9509_v55 = vpop.eup %9508 }
0x1137   :  { %v5760_v25 = vmul.f32 %v9509_v55, %v13637_v9  ;;  %v8815_v9 = vpack.i.bf16 %v13756_v50, %v13752_v15 }
0x1138   :  { %v5130_v39 = vpop.f32.mrf.mxu3 }
0x1139   :  { %v9511_v0 = vpop.eup %9510 }
0x113a   :  { %v5452_v8 = vpop.f32.mrf.mxu1  ;;  %v5370_v29 = vpop.xlane.xlu2 %5369  ;;  %v5759_v22 = vmul.f32 %v9511_v0, %v13732_v47 }
0x113b   :  { %9514 = vrcp.f32 %v5370_v29  ;;  %v9513_v7 = vpop.eup %9512 }
0x113c   :  { %v5770_v43 = vpack.c.bf16 %v5760_v25, %v5759_v22  ;;  %v5405_v60 = vmul.f32 %v9513_v7, %v13649_v24  ;;  %v8845_v24 = vpack.i.bf16 %v13777_v31, %v13769_v27  ;;  %v8890_v27 = vpack.i.bf16 %v5130_v39, %v5128_v48 }
0x113d   :  { %9516 = vrcp.f32 %v5726_v23 }
0x113e   :  { %8801 = vrot.lane.b32.xlu2 %v8800_v6, %s9595_s26  ;;  %v8546_v6 = vld [vmem:[%s14693_s7 + $0x78] sm:$0xff] }
0x113f   :  { %5830 = vmatmul.bf16.gmra.mxu3 %v5770_v43  ;;  %6159 = vmatpush.bf16.msrb.mxu0 %v8546_v6 }
0x1140   :  { %v5133_v16 = vpop.f32.mrf.mxu3 }
0x1141   :  { %v9515_v61 = vpop.eup %9514 }
0x1142   :  { %v5454_v19 = vpop.f32.mrf.mxu1  ;;  %v5406_v30 = vmul.f32 %v9515_v61, %v13738_v12  ;;  %v8545_v61 = vld [vmem:[%s14693_s7 + $0x70] sm:$0xff] }
0x1143   :  { %v8805_v45 = vpack.i.bf16 %v5454_v19, %v5452_v8  ;;  %v9517_v33 = vpop.eup %9516  ;;  %6160 = vmatpush.bf16.msrb.mxu0 %v8545_v61 }
0x1144   :  { %v5416_v47 = vpack.c.bf16 %v5406_v30, %v5405_v60  ;;  %v5761_v29 = vmul.f32 %v9517_v33, %v13644_v56 }
0x1145   :  { %8806 = vrot.lane.b32.xlu1 %v8805_v45, %s9596_s27 }
0x1146   :  { %8816 = vrot.lane.b32.xlu2 %v8815_v9, %s9595_s26  ;;  %5476 = vmatmul.bf16.gmra.mxu1 %v5416_v47  ;;  %v8544_v9 = vld [vmem:[%s14693_s7 + $0x68] sm:$0xff] }
0x1147   :  { %6161 = vmatpush.bf16.msrb.mxu0 %v8544_v9 }
0x1148   :  { %v5135_v54 = vpop.f32.mrf.mxu3 }
0x1149   :  { %v8905_v31 = vpack.i.bf16 %v5135_v54, %v5133_v16  ;;  %v8543_v54 = vld [vmem:[%s14693_s7 + $0x60] sm:$0xff] }
0x114a   :  { %v5457_v12 = vpop.f32.mrf.mxu1 }
0x114b   :  { %6162 = vmatpush.bf16.msrb.mxu0 %v8543_v54 }
0x114e   :  { %8831 = vrot.lane.b32.xlu2 %v8830_v58, %s9595_s26 }
0x1150   :  { %v5806_v46 = vpop.f32.mrf.mxu3 }
0x1152   :  { %v5459_v10 = vpop.f32.mrf.mxu1 }
0x1153   :  { %v8820_v17 = vpack.i.bf16 %v5459_v10, %v5457_v12 }
0x1156   :  { %8846 = vrot.lane.b32.xlu2 %v8845_v24, %s9595_s26 }
0x1158   :  { %v5808_v15 = vpop.f32.mrf.mxu3 }
0x1159   :  { %v8810_v50 = vpack.i.bf16 %v5808_v15, %v5806_v46  ;;  %v8542_v15 = vld [vmem:[%s14693_s7 + $0x58] sm:$0xff] }
0x115a   :  { %6163 = vmatpush.bf16.msrb.mxu0 %v8542_v15 }
0x115b   :  { %8811 = vrot.lane.b32.xlu0 %v8810_v50, %s9594_s0  ;;  %v5376_v50 = vpop.xlane.xlu1 %5375 }
0x115e   :  { %8861 = vrot.lane.b32.xlu2 %v8860_v62, %s9595_s26  ;;  %v8541_v62 = vld [vmem:[%s14693_s7 + $0x50] sm:$0xff] }
0x115f   :  { %6164 = vmatpush.bf16.msrb.mxu0 %v8541_v62 }
0x1163   :  { %8821 = vrot.lane.b32.xlu0 %v8820_v17, %s9596_s27 }
0x1166   :  { %8876 = vrot.lane.b32.xlu2 %v8875_v14, %s9595_s26 }
0x116e   :  { %8891 = vrot.lane.b32.xlu2 %v8890_v27, %s9595_s26  ;;  %v8540_v27 = vld [vmem:[%s14693_s7 + $0x48] sm:$0xff] }
0x116f   :  { %6165 = vmatpush.bf16.msrb.mxu0 %v8540_v27 }
0x1176   :  { %8906 = vrot.lane.b32.xlu2 %v8905_v31, %s9595_s26 }
0x1181   :  { %v5811_v13 = vpop.f32.mrf.mxu3 }
0x1183   :  { %v5462_v44 = vpop.f32.mrf.mxu1 }
0x1189   :  { %v5813_v53 = vpop.f32.mrf.mxu3  ;;  %v5728_v21 = vpop.xlane.xlu0 %5727 }
0x118a   :  { %v8825_v4 = vpack.i.bf16 %v5813_v53, %v5811_v13  ;;  %9518 = vrcp.f32 %v5728_v21 }
0x118b   :  { %v5464_v55 = vpop.f32.mrf.mxu1  ;;  %9520 = vrcp.f32 %v5374_v1 }
0x118c   :  { %v8835_v0 = vpack.i.bf16 %v5464_v55, %v5462_v44  ;;  %8826 = vrot.lane.b32.xlu1 %v8825_v4, %s9594_s0  ;;  %v8539_v44 = vld [vmem:[%s14693_s7 + $0x40] sm:$0xff] }
0x118d   :  { %6166 = vmatpush.bf16.msrb.mxu0 %v8539_v44 }
0x118e   :  { %8836 = vrot.lane.b32.xlu0 %v8835_v0, %s9596_s27 }
0x1190   :  { %v9519_v48 = vpop.eup %9518 }
0x1191   :  { %v5372_v39 = vpop.xlane.xlu2 %5371  ;;  %v5816_v8 = vpop.f32.mrf.mxu3  ;;  %v5762_v22 = vmul.f32 %v9519_v48, %v13793_v26 }
0x1192   :  { %9522 = vrcp.f32 %v5372_v39  ;;  %v5730_v43 = vpop.xlane.xlu0 %5729  ;;  %v9521_v7 = vpop.eup %9520 }
0x1193   :  { %v5771_v25 = vpack.c.bf16 %v5762_v22, %v5761_v29  ;;  %9524 = vrcp.f32 %v5730_v43  ;;  %v5408_v60 = vmul.f32 %v9521_v7, %v13657_v35 }
0x1195   :  { %5835 = vmatmul.bf16.gmra.mxu3 %v5771_v25 }
0x1198   :  { %v9523_v16 = vpop.eup %9522 }
0x1199   :  { %v5818_v19 = vpop.f32.mrf.mxu3  ;;  %v5732_v56 = vpop.xlane.xlu2 %5731  ;;  %v5407_v26 = vmul.f32 %v9523_v16, %v13805_v36 }
0x119a   :  { %v8840_v30 = vpack.i.bf16 %v5818_v19, %v5816_v8  ;;  %9526 = vrcp.f32 %v5732_v56  ;;  %v9525_v47 = vpop.eup %9524 }
0x119b   :  { %v5417_v45 = vpack.c.bf16 %v5408_v60, %v5407_v26  ;;  %v5763_v35 = vmul.f32 %v9525_v47, %v13803_v37  ;;  %9528 = vrcp.f32 %v5376_v50 }
0x119c   :  { %8841 = vrot.lane.b32.xlu1 %v8840_v30, %s9594_s0 }
0x119d   :  { %5481 = vmatmul.bf16.gmra.mxu1 %v5417_v45 }
0x11a0   :  { %v9527_v36 = vpop.eup %9526 }
0x11a1   :  { %v5764_v58 = vmul.f32 %v9527_v36, %v13815_v3  ;;  %v9529_v31 = vpop.eup %9528  ;;  %v8802_v29 = vpop.permute.xlu2 %8801 }
0x11a2   :  { %v5821_v46 = vpop.f32.mrf.mxu3  ;;  %v5409_v23 = vmul.f32 %v9529_v31, %v13714_v20  ;;  %v8804_v20 = vunpack.i.h.bf16 %v8802_v29  ;;  %v8803_v25 = vunpack.i.l.bf16 %v8802_v29 }
0x11a3   :  { %v5467_v24 = vpop.f32.mrf.mxu1  ;;  %v5772_v12 = vpack.c.bf16 %v5764_v58, %v5763_v35 }
0x11a4   :  { %v6039_v56 = vsel %vm987_vm4, %v13706_v18, %v8804_v20  ;;  %v6038_v26 = vsel %vm987_vm4, %v13695_v11, %v8803_v25 }
0x11a5   :  { %5840 = vmatmul.bf16.gmra.mxu3 %v5772_v12 }
0x11a9   :  { %v5378_v10 = vpop.xlane.xlu0 %5377  ;;  %v8817_v35 = vpop.permute.xlu2 %8816 }
0x11aa   :  { %v5823_v37 = vpop.f32.mrf.mxu3  ;;  %9530 = vrcp.f32 %v5378_v10  ;;  %v8819_v18 = vunpack.i.h.bf16 %v8817_v35 }
0x11ab   :  { %v8855_v3 = vpack.i.bf16 %v5823_v37, %v5821_v46  ;;  %v5469_v17 = vpop.f32.mrf.mxu1  ;;  %v8818_v46 = vunpack.i.l.bf16 %v8817_v35 }
0x11ac   :  { %v8850_v14 = vpack.i.bf16 %v5469_v17, %v5467_v24  ;;  %v6041_v15 = vsel %vm987_vm4, %v13727_v49, %v8819_v18 }
0x11ad   :  { %8856 = vrot.lane.b32.xlu1 %v8855_v3, %s9594_s0  ;;  %v6040_v50 = vsel %vm987_vm4, %v13716_v32, %v8818_v46 }
0x11ae   :  { %8851 = vrot.lane.b32.xlu0 %v8850_v14, %s9596_s27 }
0x11b0   :  { %v9531_v13 = vpop.eup %9530 }
0x11b1   :  { %v5410_v53 = vmul.f32 %v9531_v13, %v13829_v51  ;;  %v8832_v31 = vpop.permute.xlu2 %8831 }
0x11b2   :  { %v5826_v21 = vpop.f32.mrf.mxu3  ;;  %v8834_v44 = vunpack.i.h.bf16 %v8832_v31 }
0x11b3   :  { %v5472_v4 = vpop.f32.mrf.mxu1  ;;  %v5418_v55 = vpack.c.bf16 %v5410_v53, %v5409_v23  ;;  %v8833_v23 = vunpack.i.l.bf16 %v8832_v31 }
0x11b4   :  { %v6043_v32 = vsel %vm987_vm4, %v13750_v5, %v8834_v44 }
0x11b5   :  { %5486 = vmatmul.bf16.gmra.mxu1 %v5418_v55 }
0x11b7   :  { %v8807_v22 = vpop.permute.xlu1 %8806 }
0x11b8   :  { %v8809_v6 = vunpack.i.h.bf16 %v8807_v22  ;;  %v8808_v43 = vunpack.i.l.bf16 %v8807_v22 }
0x11b9   :  { %v8847_v20 = vpop.permute.xlu2 %8846 }
0x11ba   :  { %v5828_v0 = vpop.f32.mrf.mxu3  ;;  %v6055_v45 = vsel %vm2604_vm5, %v6039_v56, %v8809_v6  ;;  %v6054_v9 = vsel %vm2604_vm5, %v6038_v26, %v8808_v43  ;;  %v8849_v25 = vunpack.i.h.bf16 %v8847_v20  ;;  %v8848_v5 = vunpack.i.l.bf16 %v8847_v20  ;;  %v13955_v20 = vld [vmem:[%s14690_s4 + $0x8] sm:$0x3f] }
0x11bb   :  { %v8870_v1 = vpack.i.bf16 %v5828_v0, %v5826_v21  ;;  %v5474_v33 = vpop.f32.mrf.mxu1 }
0x11bc   :  { %v8865_v48 = vpack.i.bf16 %v5474_v33, %v5472_v4  ;;  %v6042_v4 = vsel %vm987_vm4, %v13740_v63, %v8833_v23 }
0x11bd   :  { %8871 = vrot.lane.b32.xlu1 %v8870_v1, %s9594_s0 }
0x11be   :  { %8866 = vrot.lane.b32.xlu0 %v8865_v48, %s9596_s27 }
0x11c2   :  { %v5831_v39 = vpop.f32.mrf.mxu3 }
0x11c3   :  { %v5477_v8 = vpop.f32.mrf.mxu1 }
0x11ca   :  { %v5833_v51 = vpop.f32.mrf.mxu3 }
0x11cb   :  { %v8885_v7 = vpack.i.bf16 %v5833_v51, %v5831_v39  ;;  %v5479_v16 = vpop.f32.mrf.mxu1 }
0x11cc   :  { %v8880_v61 = vpack.i.bf16 %v5479_v16, %v5477_v8 }
0x11cd   :  { %8886 = vrot.lane.b32.xlu1 %v8885_v7, %s9594_s0  ;;  %v8812_v19 = vpop.permute.xlu0 %8811 }
0x11ce   :  { %v8814_v60 = vunpack.i.h.bf16 %v8812_v19  ;;  %v8813_v30 = vunpack.i.l.bf16 %v8812_v19  ;;  %8881 = vrot.lane.b32.xlu0 %v8880_v61, %s9596_s27  ;;  %v6045_v61 = vsel %vm987_vm4, %v13758_v38, %v8849_v25  ;;  %v6044_v19 = vsel %vm987_vm4, %v13754_v57, %v8848_v5  ;;  %v8862_v57 = vpop.permute.xlu2 %8861  ;;  %v14883_v25 = vld [vmem:[#allocation24_spill] sm:$0xff] }
0x11cf   :  { %v8864_v35 = vunpack.i.h.bf16 %v8862_v57 }
0x11d0   :  { %v6071_v47 = vsel %vm2621_vm6, %v6055_v45, %v8814_v60  ;;  %v6070_v54 = vsel %vm2621_vm6, %v6054_v9, %v8813_v30 }
0x11d1   :  { %v6086_v36 = vpack.c.bf16 %v6071_v47, %v6070_v54 }
0x11d3   :  { %6167 = vmatmul.bf16.vlgmr.msrb.gmra.mxu0 %v6086_v36 }
0x11d5   :  { %v8822_v58 = vpop.permute.xlu0 %8821 }
0x11d6   :  { %v8824_v24 = vunpack.i.h.bf16 %v8822_v58  ;;  %v8823_v11 = vunpack.i.l.bf16 %v8822_v58  ;;  %v8863_v58 = vunpack.i.l.bf16 %v8862_v57 }
0x11d8   :  { %v6057_v37 = vsel %vm2604_vm5, %v6041_v15, %v8824_v24  ;;  %v6056_v3 = vsel %vm2604_vm5, %v6040_v50, %v8823_v11  ;;  %v6047_v50 = vsel %vm987_vm4, %v13767_v41, %v8864_v35  ;;  %v8877_v41 = vpop.permute.xlu2 %8876 }
0x11fe   :  { %v8827_v12 = vpop.permute.xlu1 %8826 }
0x11ff   :  { %v8829_v62 = vunpack.i.h.bf16 %v8827_v12  ;;  %v8828_v10 = vunpack.i.l.bf16 %v8827_v12 }
0x1200   :  { %v8837_v13 = vpop.permute.xlu0 %8836 }
0x1201   :  { %v6072_v17 = vsel %vm2621_vm6, %v6056_v3, %v8828_v10  ;;  %v6073_v14 = vsel %vm2621_vm6, %v6057_v37, %v8829_v62  ;;  %v8839_v49 = vunpack.i.h.bf16 %v8837_v13  ;;  %v8838_v53 = vunpack.i.l.bf16 %v8837_v13 }
0x1202   :  { %v6087_v27 = vpack.c.bf16 %v6073_v14, %v6072_v17  ;;  %v6046_v62 = vsel %vm987_vm4, %v13762_v34, %v8863_v58  ;;  %v8879_v34 = vunpack.i.h.bf16 %v8877_v41 }
0x1203   :  { %v6059_v1 = vsel %vm2604_vm5, %v6043_v32, %v8839_v49  ;;  %v6058_v33 = vsel %vm2604_vm5, %v6042_v4, %v8838_v53  ;;  %v8878_v49 = vunpack.i.l.bf16 %v8877_v41 }
0x1204   :  { %6172 = vmatmul.bf16.gmra.mxu0 %v6087_v27 }
0x120e   :  { %v8842_v21 = vpop.permute.xlu1 %8841 }
0x120f   :  { %v8844_v55 = vunpack.i.h.bf16 %v8842_v21  ;;  %v8843_v0 = vunpack.i.l.bf16 %v8842_v21 }
0x1211   :  { %v6074_v48 = vsel %vm2621_vm6, %v6058_v33, %v8843_v0  ;;  %v6075_v39 = vsel %vm2621_vm6, %v6059_v1, %v8844_v55  ;;  %v6049_v55 = vsel %vm987_vm4, %v13781_v52, %v8879_v34  ;;  %v6048_v0 = vsel %vm987_vm4, %v13774_v42, %v8878_v49 }
0x1212   :  { %v6088_v8 = vpack.c.bf16 %v6075_v39, %v6074_v48  ;;  %v13958_v52 = vperm.slane %v13955_v20, 4 }
0x1214   :  { %6177 = vmatmul.bf16.gmra.mxu0 %v6088_v8 }
0x1218   :  { %v5836_v29 = vpop.f32.mrf.mxu3 }
0x121a   :  { %v5482_v22 = vpop.f32.mrf.mxu1 }
0x121f   :  { %v8857_v51 = vpop.permute.xlu1 %8856 }
0x1220   :  { %v5838_v6 = vpop.f32.mrf.mxu3  ;;  %v8852_v63 = vpop.permute.xlu0 %8851  ;;  %v8859_v56 = vunpack.i.h.bf16 %v8857_v51  ;;  %v8858_v26 = vunpack.i.l.bf16 %v8857_v51 }
0x1221   :  { %v8900_v43 = vpack.i.bf16 %v5838_v6, %v5836_v29  ;;  %v8854_v7 = vunpack.i.h.bf16 %v8852_v63  ;;  %v8853_v16 = vunpack.i.l.bf16 %v8852_v63  ;;  %v14884_v63 = vld [vmem:[#allocation25_spill] sm:$0xff] }
0x1222   :  { %v5484_v60 = vpop.f32.mrf.mxu1 }
0x1223   :  { %v6061_v30 = vsel %vm2604_vm5, %v6045_v61, %v8854_v7  ;;  %v6060_v45 = vsel %vm2604_vm5, %v6044_v19, %v8853_v16  ;;  %v8895_v9 = vpack.i.bf16 %v5484_v60, %v5482_v22  ;;  %8901 = vrot.lane.b32.xlu1 %v8900_v43, %s9594_s0  ;;  %v14885_v61 = vld [vmem:[#allocation20_spill] sm:$0xff]  ;;  %v14886_v60 = vld [vmem:[#allocation21_spill] sm:$0xff] }
0x1224   :  { %v6076_v47 = vsel %vm2621_vm6, %v6060_v45, %v8858_v26  ;;  %v6077_v54 = vsel %vm2621_vm6, %v6061_v30, %v8859_v56 }
0x1225   :  { %8896 = vrot.lane.b32.xlu0 %v8895_v9, %s9596_s27  ;;  %v6089_v38 = vpack.c.bf16 %v6077_v54, %v6076_v47  ;;  %v8892_v47 = vpop.permute.xlu2 %8891  ;;  %v14887_v54 = vld [vmem:[#allocation22_spill] sm:$0xff] }
0x1226   :  { %v8894_v57 = vunpack.i.h.bf16 %v8892_v47  ;;  %v8893_v35 = vunpack.i.l.bf16 %v8892_v47 }
0x1227   :  { %6182 = vmatmul.bf16.gmra.mxu0 %v6089_v38 }
0x1228   :  { %v5841_v36 = vpop.f32.mrf.mxu3 }
0x122f   :  { %v8872_v18 = vpop.permute.xlu1 %8871 }
0x1230   :  { %v5843_v46 = vpop.f32.mrf.mxu3  ;;  %v8867_v24 = vpop.permute.xlu0 %8866  ;;  %v8874_v10 = vunpack.i.h.bf16 %v8872_v18  ;;  %v8873_v37 = vunpack.i.l.bf16 %v8872_v18 }
0x1231   :  { %v8915_v11 = vpack.i.bf16 %v5843_v46, %v5841_v36  ;;  %v8869_v12 = vunpack.i.h.bf16 %v8867_v24  ;;  %v8868_v15 = vunpack.i.l.bf16 %v8867_v24 }
0x1232   :  { %v5487_v3 = vpop.f32.mrf.mxu1 }
0x1233   :  { %v6063_v17 = vsel %vm2604_vm5, %v6047_v50, %v8869_v12  ;;  %v6062_v14 = vsel %vm2604_vm5, %v6046_v62, %v8868_v15  ;;  %8916 = vrot.lane.b32.xlu1 %v8915_v11, %s9594_s0  ;;  %v6051_v11 = vsel %vm987_vm4, %v13807_v59, %v8894_v57  ;;  %v6050_v12 = vsel %vm987_vm4, %v13791_v2, %v8893_v35 }
0x1234   :  { %v6078_v27 = vsel %vm2621_vm6, %v6062_v14, %v8873_v37  ;;  %v6079_v31 = vsel %vm2621_vm6, %v6063_v17, %v8874_v10 }
0x1235   :  { %v6090_v13 = vpack.c.bf16 %v6079_v31, %v6078_v27 }
0x1237   :  { %6187 = vmatmul.bf16.gmra.mxu0 %v6090_v13  ;;  %v14889_v13 = vld [vmem:[#allocation28_spill] sm:$0xff] }
0x123a   :  { %v5489_v44 = vpop.f32.mrf.mxu1 }
0x123b   :  { %v8910_v23 = vpack.i.bf16 %v5489_v44, %v5487_v3  ;;  %v14888_v3 = vld [vmem:[#allocation19_spill] sm:$0xff] }
0x123d   :  { %8911 = vrot.lane.b32.xlu0 %v8910_v23, %s9596_s27  ;;  %v8907_v23 = vpop.permute.xlu2 %8906 }
0x123e   :  { %v8909_v34 = vunpack.i.h.bf16 %v8907_v23  ;;  %v8908_v49 = vunpack.i.l.bf16 %v8907_v23  ;;  %v14895_v23 = vld [vmem:[#allocation3_spill] sm:$0xff] }
0x123f   :  { %v8887_v53 = vpop.permute.xlu1 %8886 }
0x1240   :  { %v8882_v21 = vpop.permute.xlu0 %8881  ;;  %v8889_v1 = vunpack.i.h.bf16 %v8887_v53  ;;  %v8888_v33 = vunpack.i.l.bf16 %v8887_v53 }
0x1241   :  { %v8884_v32 = vunpack.i.h.bf16 %v8882_v21  ;;  %v8883_v4 = vunpack.i.l.bf16 %v8882_v21 }
0x1243   :  { %v6065_v48 = vsel %vm2604_vm5, %v6049_v55, %v8884_v32  ;;  %v6064_v39 = vsel %vm2604_vm5, %v6048_v0, %v8883_v4  ;;  %v6053_v55 = vsel %vm987_vm4, %v13826_v40, %v8909_v34  ;;  %v6052_v0 = vsel %vm987_vm4, %v13818_v28, %v8908_v49 }
0x1244   :  { %v6080_v8 = vsel %vm2621_vm6, %v6064_v39, %v8888_v33  ;;  %v6081_v29 = vsel %vm2621_vm6, %v6065_v48, %v8889_v1 }
0x1245   :  { %v6091_v22 = vpack.c.bf16 %v6081_v29, %v6080_v8 }
0x1247   :  { %6192 = vmatmul.bf16.gmra.mxu0 %v6091_v22 }
0x1250   :  { %v6168_v42 = vpop.f32.mrf.mxu0 }
0x1251   :  { %v6208_v5 = vadd.f32 %v6168_v42, %v14883_v25  ;;  %v14890_v25 = vld [vmem:[#allocation9_spill] sm:$0xff] }
0x1253   :  { %v13962_v51 = vadd.f32 %v13958_v52, %v6208_v5 }
0x1255   :  { %6241 = vadd.xlane.f32.xlu2 %v13962_v51 }
0x1258   :  { %v6170_v6 = vpop.f32.mrf.mxu0 }
0x1259   :  { %v6209_v43 = vadd.f32 %v6170_v6, %v14884_v63  ;;  %v14891_v63 = vld [vmem:[#allocation26_spill] sm:$0xff] }
0x125b   :  { %v13967_v7 = vadd.f32 %v13958_v52, %v6209_v43 }
0x1267   :  { %6243 = vadd.xlane.f32.xlu0 %v13967_v7 }
0x1281   :  { %v6173_v16 = vpop.f32.mrf.mxu0 }
0x1282   :  { %v6210_v19 = vadd.f32 %v6173_v16, %v14885_v61 }
0x1284   :  { %v13972_v56 = vadd.f32 %v13958_v52, %v6210_v19  ;;  %v14892_v19 = vld [vmem:[#allocation27_spill] sm:$0xff] }
0x1286   :  { %6245 = vadd.xlane.f32.xlu1 %v13972_v56 }
0x1289   :  { %v6175_v26 = vpop.f32.mrf.mxu0 }
0x128a   :  { %v6211_v30 = vadd.f32 %v6175_v26, %v14886_v60 }
0x128c   :  { %v13977_v45 = vadd.f32 %v13958_v52, %v6211_v30 }
0x128e   :  { %6247 = vadd.xlane.f32.xlu2 %v13977_v45 }
0x1291   :  { %v6178_v9 = vpop.f32.mrf.mxu0 }
0x1292   :  { %v6212_v38 = vadd.f32 %v6178_v9, %v14887_v54 }
0x1294   :  { %v13982_v36 = vadd.f32 %v13958_v52, %v6212_v38 }
0x1295   :  { %v8902_v58 = vpop.permute.xlu1 %8901 }
0x1296   :  { %6249 = vadd.xlane.f32.xlu0 %v13982_v36  ;;  %v8904_v15 = vunpack.i.h.bf16 %v8902_v58  ;;  %v8903_v50 = vunpack.i.l.bf16 %v8902_v58 }
0x1297   :  { %v8897_v18 = vpop.permute.xlu0 %8896 }
0x1298   :  { %v8899_v46 = vunpack.i.h.bf16 %v8897_v18  ;;  %v8898_v24 = vunpack.i.l.bf16 %v8897_v18 }
0x1299   :  { %v6180_v62 = vpop.f32.mrf.mxu0 }
0x129a   :  { %v6067_v10 = vsel %vm2604_vm5, %v6051_v11, %v8899_v46  ;;  %v6066_v37 = vsel %vm2604_vm5, %v6050_v12, %v8898_v24  ;;  %v6213_v17 = vadd.f32 %v6180_v62, %v14888_v3  ;;  %v14893_v24 = vld [vmem:[#allocation23_spill] sm:$0xff]  ;;  %v14894_v3 = vld [vmem:[#allocation2_spill] sm:$0xff] }
0x129b   :  { %v6082_v14 = vsel %vm2621_vm6, %v6066_v37, %v8903_v50  ;;  %v6083_v27 = vsel %vm2621_vm6, %v6067_v10, %v8904_v15 }
0x129c   :  { %v13995_v31 = vadd.f32 %v13958_v52, %v6213_v17  ;;  %v6092_v59 = vpack.c.bf16 %v6083_v27, %v6082_v14 }
0x129e   :  { %6197 = vmatmul.bf16.gmra.mxu0 %v6092_v59  ;;  %6251 = vadd.xlane.f32.xlu1 %v13995_v31 }
0x12a4   :  { %v6183_v2 = vpop.f32.mrf.mxu0 }
0x12a5   :  { %v6214_v44 = vadd.f32 %v6183_v2, %v14889_v13  ;;  %v8917_v53 = vpop.permute.xlu1 %8916 }
0x12a6   :  { %v8919_v1 = vunpack.i.h.bf16 %v8917_v53  ;;  %v8918_v33 = vunpack.i.l.bf16 %v8917_v53 }
0x12a7   :  { %v14000_v41 = vadd.f32 %v13958_v52, %v6214_v44 }
0x12a9   :  { %6253 = vadd.xlane.f32.xlu1 %v14000_v41 }
0x12ac   :  { %v6185_v6 = vpop.f32.mrf.mxu0 }
0x12ad   :  { %v6215_v43 = vadd.f32 %v6185_v6, %v14891_v63  ;;  %v8562_v63 = vld [vmem:[%s14694_s8 + $0xf4] sm:$0xf0] }
0x12af   :  { %v8912_v21 = vpop.permute.xlu0 %8911  ;;  %v14019_v16 = vadd.f32 %v13958_v52, %v6215_v43  ;;  %v8561_v43 = vld [vmem:[%s14694_s8 + $0xf4] sm:$0xf] }
0x12b0   :  { %v8914_v32 = vunpack.i.h.bf16 %v8912_v21  ;;  %v8913_v4 = vunpack.i.l.bf16 %v8912_v21 }
0x12b2   :  { %v6069_v48 = vsel %vm2604_vm5, %v6053_v55, %v8914_v32  ;;  %v6068_v39 = vsel %vm2604_vm5, %v6052_v0, %v8913_v4  ;;  %v14896_v55 = vld [vmem:[#allocation4_spill] sm:$0xff] }
0x12b3   :  { %v6084_v8 = vsel %vm2621_vm6, %v6068_v39, %v8918_v33  ;;  %v6085_v29 = vsel %vm2621_vm6, %v6069_v48, %v8919_v1 }
0x12b4   :  { %v6093_v22 = vpack.c.bf16 %v6085_v29, %v6084_v8  ;;  %v6188_v61 = vpop.f32.mrf.mxu0 }
0x12b5   :  { %v6216_v26 = vadd.f32 %v6188_v61, %v14892_v19  ;;  %v14898_v61 = vld [vmem:[#allocation6_spill] sm:$0xff] }
0x12b6   :  { %6202 = vmatmul.bf16.gmra.mxu0 %v6093_v22  ;;  %v14897_v22 = vld [vmem:[#allocation5_spill] sm:$0xff] }
0x12b7   :  { %v14025_v9 = vadd.f32 %v13958_v52, %v6216_v26 }
0x12bc   :  { %v6190_v35 = vpop.f32.mrf.mxu0 }
0x12bd   :  { %v6217_v11 = vadd.f32 %v6190_v35, %v14893_v24  ;;  %v8559_v35 = vld [vmem:[%s14694_s8 + $0xe4] sm:$0xf] }
0x12bf   :  { %v14045_v62 = vadd.f32 %v13958_v52, %v6217_v11  ;;  %v8168_v11 = vld [vmem:[%s14694_s8 + $0xd0] sm:$0xf] }
0x12c4   :  { %v6193_v50 = vpop.f32.mrf.mxu0 }
0x12c5   :  { %v6218_v17 = vadd.f32 %v6193_v50, %v14894_v3  ;;  %v8557_v50 = vld [vmem:[%s14694_s8 + $0xd4] sm:$0xf] }
0x12c7   :  { %v14056_v59 = vadd.f32 %v13958_v52, %v6218_v17  ;;  %v8160_v17 = vld [vmem:[%s14694_s8 + $0xc0] sm:$0xf] }
0x12c8   :  { %v6242_v42 = vpop.xlane.xlu2 %6241 }
0x12c9   :  { %v6273_v5 = vmul.f32 %v6242_v42, %v14890_v25 }
0x12cb   :  { %v14013_v40 = vsub.f32 %v13962_v51, %v6273_v5 }
0x12cc   :  { %v6195_v13 = vpop.f32.mrf.mxu0 }
0x12cd   :  { %v6305_v28 = vmul.f32 %v14013_v40, %v14013_v40  ;;  %v6219_v34 = vadd.f32 %v6195_v13, %v14895_v23 }
0x12cf   :  { %6321 = vadd.xlane.f32.xlu2 %v6305_v28  ;;  %v14067_v21 = vadd.f32 %v13958_v52, %v6219_v34  ;;  %v8184_v28 = vld [vmem:[%s14694_s8 + $0xf0] sm:$0xf] }
0x12d0   :  { %v8185_v26 = vor.u32 %v8562_v63, %v8184_v28  ;;  %v8146_v28 = vld [vmem:[%s14694_s8 + $0xa8] sm:$0xf0] }
0x12d2   :  { %6707 = vmatpush.bf16.msrb.mxu1 %v8185_v26  ;;  %v8550_v26 = vld [vmem:[%s14694_s8 + $0x94] sm:$0xf0] }
0x12d7   :  { %6255 = vadd.xlane.f32.xlu2 %v14019_v16 }
0x12da   :  { %v6244_v60 = vpop.xlane.xlu0 %6243 }
0x12db   :  { %v6274_v30 = vmul.f32 %v6244_v60, %v14890_v25  ;;  %v8186_v60 = vld [vmem:[%s14694_s8 + $0xf8] sm:$0xf0] }
0x12dd   :  { %v14028_v47 = vsub.f32 %v13967_v7, %v6274_v30  ;;  %v8189_v30 = vor.u32 %v8561_v43, %v8186_v60  ;;  %v8549_v60 = vld [vmem:[%s14694_s8 + $0x94] sm:$0xf] }
0x12df   :  { %6257 = vadd.xlane.f32.xlu2 %v14025_v9  ;;  %v6306_v54 = vmul.f32 %v14028_v47, %v14028_v47  ;;  %6756 = vmatpush.bf16.msrb.mxu2 %v8189_v30 }
0x12e1   :  { %6323 = vadd.xlane.f32.xlu0 %v6306_v54 }
0x12f9   :  { %v6246_v38 = vpop.xlane.xlu1 %6245 }
0x12fa   :  { %v6275_v57 = vmul.f32 %v6246_v38, %v14890_v25  ;;  %v8176_v38 = vld [vmem:[%s14694_s8 + $0xe0] sm:$0xf] }
0x12fc   :  { %v14035_v58 = vsub.f32 %v13972_v56, %v6275_v57  ;;  %v8560_v57 = vld [vmem:[%s14694_s8 + $0xe4] sm:$0xf0] }
0x12fe   :  { %v6307_v18 = vmul.f32 %v14035_v58, %v14035_v58 }
0x1300   :  { %6325 = vadd.xlane.f32.xlu0 %v6307_v18  ;;  %v8177_v18 = vor.u32 %v8560_v57, %v8176_v38  ;;  %v8138_v38 = vld [vmem:[%s14694_s8 + $0x98] sm:$0xf0] }
0x1301   :  { %v6248_v46 = vpop.xlane.xlu2 %6247 }
0x1302   :  { %v6276_v12 = vmul.f32 %v6248_v46, %v14890_v25  ;;  %v8178_v46 = vld [vmem:[%s14694_s8 + $0xe8] sm:$0xf0]  ;;  %6708 = vmatpush.bf16.msrb.mxu1 %v8177_v18  ;;  %v8141_v18 = vor.u32 %v8549_v60, %v8138_v38  ;;  %v14213_v60 = vperm.slane %v13955_v20, 3 }
0x1303   :  { %v8181_v24 = vor.u32 %v8559_v35, %v8178_v46 }
0x1304   :  { %v14042_v15 = vsub.f32 %v13977_v45, %v6276_v12  ;;  %v8558_v12 = vld [vmem:[%s14694_s8 + $0xd4] sm:$0xf0] }
0x1305   :  { %6757 = vmatpush.bf16.msrb.mxu2 %v8181_v24  ;;  %v8128_v24 = vld [vmem:[%s14694_s8 + $0x80] sm:$0xf] }
0x1306   :  { %v6308_v10 = vmul.f32 %v14042_v15, %v14042_v15 }
0x1308   :  { %6327 = vadd.xlane.f32.xlu1 %v6308_v10  ;;  %6259 = vadd.xlane.f32.xlu0 %v14045_v62  ;;  %v8169_v10 = vor.u32 %v8558_v12, %v8168_v11  ;;  %v8548_v11 = vld [vmem:[%s14694_s8 + $0x84] sm:$0xf0] }
0x1309   :  { %v6250_v37 = vpop.xlane.xlu0 %6249 }
0x130a   :  { %v6277_v14 = vmul.f32 %v6250_v37, %v14890_v25  ;;  %v8170_v37 = vld [vmem:[%s14694_s8 + $0xd8] sm:$0xf0]  ;;  %6709 = vmatpush.bf16.msrb.mxu1 %v8169_v10  ;;  %v8547_v10 = vld [vmem:[%s14694_s8 + $0x84] sm:$0xf] }
0x130b   :  { %v8173_v3 = vor.u32 %v8557_v50, %v8170_v37  ;;  %v8129_v50 = vor.u32 %v8548_v11, %v8128_v24  ;;  %v8130_v37 = vld [vmem:[%s14694_s8 + $0x88] sm:$0xf0] }
0x130c   :  { %v14053_v27 = vsub.f32 %v13982_v36, %v6277_v14  ;;  %v8556_v14 = vld [vmem:[%s14694_s8 + $0xc4] sm:$0xf0] }
0x130d   :  { %6758 = vmatpush.bf16.msrb.mxu2 %v8173_v3  ;;  %v8161_v13 = vor.u32 %v8556_v14, %v8160_v17  ;;  %v8133_v3 = vor.u32 %v8547_v10, %v8130_v37 }
0x130e   :  { %v6309_v2 = vmul.f32 %v14053_v27, %v14053_v27 }
0x130f   :  { %6710 = vmatpush.bf16.msrb.mxu1 %v8161_v13 }
0x1310   :  { %6329 = vadd.xlane.f32.xlu1 %v6309_v2  ;;  %6261 = vadd.xlane.f32.xlu0 %v14056_v59  ;;  %v8555_v2 = vld [vmem:[%s14694_s8 + $0xc4] sm:$0xf] }
0x1311   :  { %v6252_v44 = vpop.xlane.xlu1 %6251 }
0x1312   :  { %v6278_v49 = vmul.f32 %v6252_v44, %v14890_v25  ;;  %v8162_v44 = vld [vmem:[%s14694_s8 + $0xc8] sm:$0xf0] }
0x1313   :  { %v8165_v23 = vor.u32 %v8555_v2, %v8162_v44 }
0x1314   :  { %v14064_v53 = vsub.f32 %v13995_v31, %v6278_v49 }
0x1315   :  { %6759 = vmatpush.bf16.msrb.mxu2 %v8165_v23 }
0x1316   :  { %v6310_v32 = vmul.f32 %v14064_v53, %v14064_v53 }
0x1318   :  { %6331 = vadd.xlane.f32.xlu2 %v6310_v32  ;;  %6263 = vadd.xlane.f32.xlu1 %v14067_v21  ;;  %v8152_v32 = vld [vmem:[%s14694_s8 + $0xb0] sm:$0xf] }
0x131b   :  { %v6198_v4 = vpop.f32.mrf.mxu0 }
0x131c   :  { %v6220_v0 = vadd.f32 %v6198_v4, %v14896_v55  ;;  %v6254_v1 = vpop.xlane.xlu1 %6253  ;;  %v8554_v4 = vld [vmem:[%s14694_s8 + $0xb4] sm:$0xf0]  ;;  %v8553_v55 = vld [vmem:[%s14694_s8 + $0xb4] sm:$0xf] }
0x131d   :  { %v6279_v33 = vmul.f32 %v6254_v1, %v14890_v25  ;;  %v8154_v1 = vld [vmem:[%s14694_s8 + $0xb8] sm:$0xf0] }
0x131e   :  { %v14075_v48 = vadd.f32 %v13958_v52, %v6220_v0  ;;  %v8153_v0 = vor.u32 %v8554_v4, %v8152_v32 }
0x131f   :  { %v14078_v39 = vsub.f32 %v14000_v41, %v6279_v33 }
0x1320   :  { %6265 = vadd.xlane.f32.xlu1 %v14075_v48  ;;  %6711 = vmatpush.bf16.msrb.mxu1 %v8153_v0 }
0x1321   :  { %v6311_v8 = vmul.f32 %v14078_v39, %v14078_v39 }
0x1323   :  { %6333 = vadd.xlane.f32.xlu2 %v6311_v8  ;;  %v6200_v29 = vpop.f32.mrf.mxu0  ;;  %v8157_v8 = vor.u32 %v8553_v55, %v8154_v1  ;;  %v14899_v55 = vld [vmem:[#allocation7_spill] sm:$0xff] }
0x1324   :  { %v6221_v42 = vadd.f32 %v6200_v29, %v14897_v22  ;;  %v8144_v29 = vld [vmem:[%s14694_s8 + $0xa0] sm:$0xf]  ;;  %v8552_v22 = vld [vmem:[%s14694_s8 + $0xa4] sm:$0xf0] }
0x1325   :  { %6760 = vmatpush.bf16.msrb.mxu2 %v8157_v8 }
0x1326   :  { %v14085_v5 = vadd.f32 %v13958_v52, %v6221_v42  ;;  %v8551_v42 = vld [vmem:[%s14694_s8 + $0xa4] sm:$0xf] }
0x1327   :  { %v8149_v63 = vor.u32 %v8551_v42, %v8146_v28 }
0x1329   :  { %6761 = vmatpush.bf16.msrb.mxu2 %v8149_v63 }
0x132b   :  { %6267 = vadd.xlane.f32.xlu2 %v14085_v5 }
0x132d   :  { %6762 = vmatpush.bf16.msrb.mxu2 %v8141_v18 }
0x1331   :  { %6763 = vmatpush.bf16.msrb.mxu2 %v8133_v3 }
0x1333   :  { %v6203_v6 = vpop.f32.mrf.mxu0 }
0x1334   :  { %v6222_v19 = vadd.f32 %v6203_v6, %v14898_v61  ;;  %v8145_v6 = vor.u32 %v8552_v22, %v8144_v29 }
0x1336   :  { %v14102_v54 = vadd.f32 %v13958_v52, %v6222_v19  ;;  %6712 = vmatpush.bf16.msrb.mxu1 %v8145_v6  ;;  %v8136_v19 = vld [vmem:[%s14694_s8 + $0x90] sm:$0xf] }
0x1337   :  { %v8137_v30 = vor.u32 %v8550_v26, %v8136_v19 }
0x1338   :  { %6269 = vadd.xlane.f32.xlu2 %v14102_v54 }
0x133a   :  { %6713 = vmatpush.bf16.msrb.mxu1 %v8137_v30 }
0x133b   :  { %v6205_v32 = vpop.f32.mrf.mxu0 }
0x133c   :  { %v6223_v0 = vadd.f32 %v6205_v32, %v14899_v55 }
0x133e   :  { %6714 = vmatpush.bf16.msrb.mxu1 %v8129_v50  ;;  %v14205_v29 = vadd.f32 %v13958_v52, %v6223_v0 }
0x1342   :  { %v6322_v34 = vpop.xlane.xlu2 %6321 }
0x1343   :  { %v6353_v49 = vmul.f32 %v6322_v34, %v14890_v25 }
0x1345   :  { %v6369_v33 = vadd.f32 1e-05, %v6353_v49 }
0x1347   :  { %9532 = vrsqrt.f32 %v6369_v33  ;;  %vm6391_vm5 = vweird.f32 %v6369_v33 }
0x134a   :  { %v6256_v43 = vpop.xlane.xlu2 %6255 }
0x134b   :  { %v6280_v61 = vmul.f32 %v6256_v43, %v14890_v25 }
0x134d   :  { %v9533_v57 = vpop.eup %9532  ;;  %v14180_v35 = vsub.f32 %v14019_v16, %v6280_v61  ;;  %v14209_v61 = vperm.slane %v13955_v20, 2 }
0x134e   :  { %v6386_v12 = vmul.f32 %v9533_v57, %v6369_v33  ;;  %vm6392_vm4 = vweird.f32 %v9533_v57 }
0x134f   :  { %v6312_v46 = vmul.f32 %v14180_v35, %v14180_v35  ;;  %vm6393_vm6 = vmor %vm6391_vm5, %vm6392_vm4 }
0x1350   :  { %v6387_v2 = vmul.f32 %v9533_v57, %v6386_v12 }
0x1351   :  { %6335 = vadd.xlane.f32.xlu0 %v6312_v46 }
0x1352   :  { %v6258_v17 = vpop.xlane.xlu2 %6257  ;;  %v6388_v4 = vmul.f32 0.5, %v6387_v2 }
0x1353   :  { %v6281_v14 = vmul.f32 %v6258_v17, %v14890_v25 }
0x1354   :  { %v6324_v13 = vpop.xlane.xlu0 %6323  ;;  %v6389_v1 = vsub.f32 1.5, %v6388_v4 }
0x1355   :  { %v14198_v44 = vsub.f32 %v14025_v9, %v6281_v14  ;;  %v6354_v23 = vmul.f32 %v6324_v13, %v14890_v25 }
0x1356   :  { %v6390_v22 = vmul.f32 %v9533_v57, %v6389_v1 }
0x1357   :  { %v6370_v34 = vadd.f32 1e-05, %v6354_v23  ;;  %v6313_v49 = vmul.f32 %v14198_v44, %v14198_v44 }
0x1358   :  { %v6394_v28 = vsel %vm6393_vm6, %v9533_v57, %v6390_v22 }
0x1359   :  { %9534 = vrsqrt.f32 %v6370_v34  ;;  %6337 = vadd.xlane.f32.xlu0 %v6313_v49  ;;  %v6545_v19 = vmul.f32 %v6394_v28, %v14013_v40  ;;  %vm6401_vm13 = vweird.f32 %v6370_v34 }
0x135b   :  { %v6562_v33 = vmul.f32 %v14209_v61, %v6545_v19 }
0x135d   :  { %v6579_v57 = vadd.f32 %v14213_v60, %v6562_v33 }
0x135f   :  { %v9535_v8 = vpop.eup %9534 }
0x1360   :  { %v6396_v42 = vmul.f32 %v9535_v8, %v6370_v34  ;;  %vm6402_vm12 = vweird.f32 %v9535_v8 }
0x1361   :  { %6271 = vadd.xlane.f32.xlu0 %v14205_v29  ;;  %vm6403_vm14 = vmor %vm6401_vm13, %vm6402_vm12 }
0x1362   :  { %v6397_v6 = vmul.f32 %v9535_v8, %v6396_v42 }
0x1364   :  { %v6398_v63 = vmul.f32 0.5, %v6397_v6 }
0x1366   :  { %v6399_v43 = vsub.f32 1.5, %v6398_v63 }
0x1368   :  { %v6400_v26 = vmul.f32 %v9535_v8, %v6399_v43 }
0x136a   :  { %v6404_v52 = vsel %vm6403_vm14, %v9535_v8, %v6400_v26 }
0x136b   :  { %v6546_v30 = vmul.f32 %v6404_v52, %v14028_v47 }
0x136d   :  { %v6563_v38 = vmul.f32 %v14209_v61, %v6546_v30 }
0x136f   :  { %v6580_v18 = vadd.f32 %v14213_v60, %v6563_v38 }
0x1371   :  { %v6595_v46 = vpack.c.bf16 %v6580_v18, %v6579_v57 }
0x1373   :  { %6715 = vmatmul.bf16.vlgmr.msrb.gmra.mxu1 %v6595_v46  ;;  %6764 = vmatmul.bf16.vlgmr.msrb.gmra.mxu2 %v6595_v46  ;;  %v6326_v40 = vpop.xlane.xlu0 %6325 }
0x1374   :  { %v6355_v24 = vmul.f32 %v6326_v40, %v14890_v25 }
0x1376   :  { %v6371_v11 = vadd.f32 1e-05, %v6355_v24 }
0x1378   :  { %9536 = vrsqrt.f32 %v6371_v11  ;;  %vm6411_vm0 = vweird.f32 %v6371_v11 }
0x137b   :  { %v6328_v20 = vpop.xlane.xlu1 %6327  ;;  %v6260_v12 = vpop.xlane.xlu0 %6259 }
0x137c   :  { %v6356_v50 = vmul.f32 %v6328_v20, %v14890_v25  ;;  %v6282_v47 = vmul.f32 %v6260_v12, %v14890_v25 }
0x137e   :  { %v9537_v10 = vpop.eup %9536  ;;  %v6372_v37 = vadd.f32 1e-05, %v6356_v50  ;;  %v14224_v3 = vsub.f32 %v14045_v62, %v6282_v47 }
0x137f   :  { %v6406_v17 = vmul.f32 %v9537_v10, %v6371_v11  ;;  %vm6412_vm15 = vweird.f32 %v9537_v10 }
0x1380   :  { %9538 = vrsqrt.f32 %v6372_v37  ;;  %v6314_v14 = vmul.f32 %v14224_v3, %v14224_v3  ;;  %vm6413_vm1 = vmor %vm6411_vm0, %vm6412_vm15  ;;  %vm6421_vm3 = vweird.f32 %v6372_v37 }
0x1381   :  { %v6407_v2 = vmul.f32 %v9537_v10, %v6406_v17 }
0x1382   :  { %6339 = vadd.xlane.f32.xlu1 %v6314_v14 }
0x1383   :  { %v6408_v13 = vmul.f32 0.5, %v6407_v2  ;;  %v6330_v23 = vpop.xlane.xlu1 %6329  ;;  %v6262_v34 = vpop.xlane.xlu0 %6261 }
0x1384   :  { %v6357_v49 = vmul.f32 %v6330_v23, %v14890_v25  ;;  %v6283_v32 = vmul.f32 %v6262_v34, %v14890_v25 }
0x1385   :  { %v6409_v4 = vsub.f32 1.5, %v6408_v13 }
0x1386   :  { %v9539_v55 = vpop.eup %9538  ;;  %v6373_v0 = vadd.f32 1e-05, %v6357_v49  ;;  %v14231_v1 = vsub.f32 %v14056_v59, %v6283_v32 }
0x1387   :  { %v6410_v8 = vmul.f32 %v9537_v10, %v6409_v4  ;;  %v6416_v22 = vmul.f32 %v9539_v55, %v6372_v37  ;;  %vm6422_vm2 = vweird.f32 %v9539_v55 }
0x1388   :  { %9540 = vrsqrt.f32 %v6373_v0  ;;  %v6315_v42 = vmul.f32 %v14231_v1, %v14231_v1  ;;  %vm6423_vm7 = vmor %vm6421_vm3, %vm6422_vm2  ;;  %vm6431_vm9 = vweird.f32 %v6373_v0 }
0x1389   :  { %v6417_v6 = vmul.f32 %v9539_v55, %v6416_v22  ;;  %v6414_v28 = vsel %vm6413_vm1, %v9537_v10, %v6410_v8 }
0x138a   :  { %6341 = vadd.xlane.f32.xlu1 %v6315_v42  ;;  %v6547_v38 = vmul.f32 %v6414_v28, %v14035_v58 }
0x138b   :  { %v6418_v63 = vmul.f32 0.5, %v6417_v6  ;;  %v6332_v43 = vpop.xlane.xlu2 %6331  ;;  %v6264_v19 = vpop.xlane.xlu1 %6263 }
0x138c   :  { %v6358_v26 = vmul.f32 %v6332_v43, %v14890_v25  ;;  %v6284_v52 = vmul.f32 %v6264_v19, %v14890_v25  ;;  %v6564_v50 = vmul.f32 %v14209_v61, %v6547_v38 }
0x138d   :  { %v6419_v33 = vsub.f32 1.5, %v6418_v63 }
0x138e   :  { %v9541_v30 = vpop.eup %9540  ;;  %v6374_v57 = vadd.f32 1e-05, %v6358_v26  ;;  %v14239_v18 = vsub.f32 %v14067_v21, %v6284_v52  ;;  %v6581_v23 = vadd.f32 %v14213_v60, %v6564_v50 }
0x138f   :  { %v6420_v46 = vmul.f32 %v9539_v55, %v6419_v33  ;;  %v6426_v40 = vmul.f32 %v9541_v30, %v6373_v0  ;;  %vm6432_vm8 = vweird.f32 %v9541_v30 }
0x1390   :  { %9542 = vrsqrt.f32 %v6374_v57  ;;  %v6316_v24 = vmul.f32 %v14239_v18, %v14239_v18  ;;  %vm6433_vm10 = vmor %vm6431_vm9, %vm6432_vm8  ;;  %vm6441_vm4 = vweird.f32 %v6374_v57 }
0x1391   :  { %v6424_v11 = vsel %vm6423_vm7, %v9539_v55, %v6420_v46  ;;  %v6427_v20 = vmul.f32 %v9541_v30, %v6426_v40 }
0x1392   :  { %v6548_v12 = vmul.f32 %v6424_v11, %v14042_v15  ;;  %6343 = vadd.xlane.f32.xlu2 %v6316_v24 }
0x1393   :  { %v6428_v58 = vmul.f32 0.5, %v6427_v20  ;;  %v6266_v47 = vpop.xlane.xlu1 %6265 }
0x1394   :  { %v6285_v10 = vmul.f32 %v6266_v47, %v14890_v25  ;;  %v6565_v17 = vmul.f32 %v14209_v61, %v6548_v12  ;;  %v8569_v47 = vld [vmem:[%s14695_s10 + $0xb0] sm:$0xff] }
0x1395   :  { %v6429_v37 = vsub.f32 1.5, %v6428_v58  ;;  %v8570_v58 = vld [vmem:[%s14695_s10 + $0xb8] sm:$0xff] }
0x1396   :  { %v9543_v14 = vpop.eup %9542  ;;  %v14248_v2 = vsub.f32 %v14075_v48, %v6285_v10  ;;  %v6334_v13 = vpop.xlane.xlu2 %6333  ;;  %v6582_v34 = vadd.f32 %v14213_v60, %v6565_v17  ;;  %6982 = vmatpush.bf16.msra.mxu3 %v8570_v58  ;;  %v8578_v10 = vld [vmem:[%s14695_s10 + $0xf8] sm:$0xff] }
0x1397   :  { %v6430_v15 = vmul.f32 %v9541_v30, %v6429_v37  ;;  %v6436_v49 = vmul.f32 %v9543_v14, %v6374_v57  ;;  %vm6442_vm11 = vweird.f32 %v9543_v14  ;;  %v6359_v24 = vmul.f32 %v6334_v13, %v14890_v25  ;;  %7031 = vmatpush.bf16.msra.mxu0 %v8578_v10  ;;  %v8577_v13 = vld [vmem:[%s14695_s10 + $0xf0] sm:$0xff] }
0x1398   :  { %v6596_v32 = vpack.c.bf16 %v6582_v34, %v6581_v23  ;;  %v6317_v4 = vmul.f32 %v14248_v2, %v14248_v2  ;;  %vm6443_vm5 = vmor %vm6441_vm4, %vm6442_vm11  ;;  %v8568_v23 = vld [vmem:[%s14695_s10 + $0xa8] sm:$0xff] }
0x1399   :  { %v6437_v55 = vmul.f32 %v9543_v14, %v6436_v49  ;;  %v6434_v8 = vsel %vm6433_vm10, %v9541_v30, %v6430_v15  ;;  %v6375_v20 = vadd.f32 1e-05, %v6359_v24  ;;  %v8576_v49 = vld [vmem:[%s14695_s10 + $0xe8] sm:$0xff] }
0x139a   :  { %6720 = vmatmul.bf16.gmra.mxu1 %v6596_v32  ;;  %6769 = vmatmul.bf16.gmra.mxu2 %v6596_v32  ;;  %v6549_v6 = vmul.f32 %v6434_v8, %v14053_v27  ;;  %v8567_v32 = vld [vmem:[%s14695_s10 + $0xa0] sm:$0xff] }
0x139b   :  { %v6438_v22 = vmul.f32 0.5, %v6437_v55  ;;  %6345 = vadd.xlane.f32.xlu0 %v6317_v4  ;;  %9544 = vrsqrt.f32 %v6375_v20  ;;  %6983 = vmatpush.bf16.msra.mxu3 %v8569_v47  ;;  %vm6451_vm12 = vweird.f32 %v6375_v20  ;;  %v8572_v47 = vld [vmem:[%s14695_s10 + $0xc8] sm:$0xff] }
0x139c   :  { %v6566_v52 = vmul.f32 %v14209_v61, %v6549_v6  ;;  %7032 = vmatpush.bf16.msra.mxu0 %v8577_v13  ;;  %v8566_v6 = vld [vmem:[%s14695_s10 + $0x98] sm:$0xff] }
0x139d   :  { %v6439_v42 = vsub.f32 1.5, %v6438_v22 }
0x139e   :  { %v6268_v28 = vpop.xlane.xlu2 %6267  ;;  %v6583_v27 = vadd.f32 %v14213_v60, %v6566_v52 }
0x139f   :  { %v6440_v63 = vmul.f32 %v9543_v14, %v6439_v42  ;;  %v6286_v43 = vmul.f32 %v6268_v28, %v14890_v25  ;;  %6984 = vmatpush.bf16.msra.mxu3 %v8568_v23 }
0x13a0   :  { %7033 = vmatpush.bf16.msra.mxu0 %v8576_v49 }
0x13a1   :  { %v6444_v19 = vsel %vm6443_vm5, %v9543_v14, %v6440_v63  ;;  %v14257_v0 = vsub.f32 %v14085_v5, %v6286_v43  ;;  %v9545_v12 = vpop.eup %9544  ;;  %v8575_v63 = vld [vmem:[%s14695_s10 + $0xe0] sm:$0xff]  ;;  %v8565_v43 = vld [vmem:[%s14695_s10 + $0x90] sm:$0xff] }
0x13a2   :  { %v6550_v26 = vmul.f32 %v6444_v19, %v14064_v53  ;;  %v6446_v50 = vmul.f32 %v9545_v12, %v6375_v20  ;;  %vm6452_vm6 = vweird.f32 %v9545_v12 }
0x13a3   :  { %v6318_v33 = vmul.f32 %v14257_v0, %v14257_v0  ;;  %6985 = vmatpush.bf16.msra.mxu3 %v8567_v32  ;;  %vm6453_vm13 = vmor %vm6451_vm12, %vm6452_vm6 }
0x13a4   :  { %v6567_v30 = vmul.f32 %v14209_v61, %v6550_v26  ;;  %v6447_v17 = vmul.f32 %v9545_v12, %v6446_v50  ;;  %7034 = vmatpush.bf16.msra.mxu0 %v8575_v63  ;;  %v8563_v50 = vld [vmem:[%s14695_s10 + $0x80] sm:$0xff] }
0x13a5   :  { %6347 = vadd.xlane.f32.xlu1 %v6318_v33 }
0x13a6   :  { %v6584_v38 = vadd.f32 %v14213_v60, %v6567_v30  ;;  %v6448_v15 = vmul.f32 0.5, %v6447_v17 }
0x13a7   :  { %6986 = vmatpush.bf16.msra.mxu3 %v8566_v6 }
0x13a8   :  { %v6597_v57 = vpack.c.bf16 %v6584_v38, %v6583_v27  ;;  %v6449_v4 = vsub.f32 1.5, %v6448_v15  ;;  %v8574_v27 = vld [vmem:[%s14695_s10 + $0xd8] sm:$0xff] }
0x13a9   :  { %7035 = vmatpush.bf16.msra.mxu0 %v8574_v27 }
0x13aa   :  { %6725 = vmatmul.bf16.gmra.mxu1 %v6597_v57  ;;  %6774 = vmatmul.bf16.gmra.mxu2 %v6597_v57  ;;  %v6450_v22 = vmul.f32 %v9545_v12, %v6449_v4 }
0x13ab   :  { %v6270_v46 = vpop.xlane.xlu2 %6269  ;;  %6987 = vmatpush.bf16.msra.mxu3 %v8565_v43 }
0x13ac   :  { %v6287_v40 = vmul.f32 %v6270_v46, %v14890_v25  ;;  %v6454_v19 = vsel %vm6453_vm13, %v9545_v12, %v6450_v22 }
0x13ad   :  { %v6551_v38 = vmul.f32 %v6454_v19, %v14078_v39  ;;  %v8573_v39 = vld [vmem:[%s14695_s10 + $0xd0] sm:$0xff] }
0x13ae   :  { %v14268_v53 = vsub.f32 %v14102_v54, %v6287_v40  ;;  %v8564_v40 = vld [vmem:[%s14695_s10 + $0x88] sm:$0xff]  ;;  %7036 = vmatpush.bf16.msra.mxu0 %v8573_v39 }
0x13af   :  { %6988 = vmatpush.bf16.msra.mxu3 %v8564_v40  ;;  %v6568_v12 = vmul.f32 %v14209_v61, %v6551_v38 }
0x13b0   :  { %v6319_v11 = vmul.f32 %v14268_v53, %v14268_v53 }
0x13b1   :  { %v6585_v10 = vadd.f32 %v14213_v60, %v6568_v12 }
0x13b2   :  { %6349 = vadd.xlane.f32.xlu2 %v6319_v11  ;;  %7037 = vmatpush.bf16.msra.mxu0 %v8572_v47 }
0x13b3   :  { %6989 = vmatpush.bf16.msra.mxu3 %v8563_v50 }
0x13c4   :  { %v6336_v37 = vpop.xlane.xlu0 %6335 }
0x13c5   :  { %v6360_v14 = vmul.f32 %v6336_v37, %v14890_v25 }
0x13c7   :  { %v6376_v34 = vadd.f32 1e-05, %v6360_v14  ;;  %v8571_v14 = vld [vmem:[%s14695_s10 + $0xc0] sm:$0xff] }
0x13c8   :  { %7038 = vmatpush.bf16.msra.mxu0 %v8571_v14 }
0x13c9   :  { %9546 = vrsqrt.f32 %v6376_v34  ;;  %vm6461_vm15 = vweird.f32 %v6376_v34 }
0x13cc   :  { %v6338_v55 = vpop.xlane.xlu0 %6337 }
0x13cf   :  { %v9547_v8 = vpop.eup %9546 }
0x13d0   :  { %v6456_v42 = vmul.f32 %v9547_v8, %v6376_v34  ;;  %vm6462_vm14 = vweird.f32 %v9547_v8  ;;  %v8125_v34 = vld [vmem:[%s14696_s9 + $0x2] sm:$0x3] }
0x13d1   :  { %vm6463_vm0 = vmor %vm6461_vm15, %vm6462_vm14  ;;  %v14338_v32 = vperm.slane %v8125_v34, 0  ;;  %v14342_v43 = vperm.slane %v8125_v34, 1 }
0x13d2   :  { %v6457_v28 = vmul.f32 %v9547_v8, %v6456_v42 }
0x13d4   :  { %v6458_v26 = vmul.f32 0.5, %v6457_v28  ;;  %v6272_v52 = vpop.xlane.xlu0 %6271 }
0x13d5   :  { %v6288_v33 = vmul.f32 %v6272_v52, %v14890_v25 }
0x13d6   :  { %v6459_v30 = vsub.f32 1.5, %v6458_v26 }
0x13d7   :  { %v14310_v57 = vsub.f32 %v14205_v29, %v6288_v33 }
0x13d8   :  { %v6460_v46 = vmul.f32 %v9547_v8, %v6459_v30 }
0x13d9   :  { %v6320_v24 = vmul.f32 %v14310_v57, %v14310_v57 }
0x13da   :  { %v6464_v11 = vsel %vm6463_vm0, %v9547_v8, %v6460_v46 }
0x13db   :  { %v6552_v20 = vmul.f32 %v6464_v11, %v14180_v35  ;;  %6351 = vadd.xlane.f32.xlu0 %v6320_v24  ;;  %v6361_v35 = vmul.f32 %v6338_v55, %v14890_v25 }
0x13dd   :  { %v6569_v58 = vmul.f32 %v14209_v61, %v6552_v20  ;;  %v6377_v13 = vadd.f32 1e-05, %v6361_v35 }
0x13df   :  { %v6586_v17 = vadd.f32 %v14213_v60, %v6569_v58  ;;  %9548 = vrsqrt.f32 %v6377_v13  ;;  %vm6471_vm2 = vweird.f32 %v6377_v13 }
0x13e1   :  { %v6598_v37 = vpack.c.bf16 %v6586_v17, %v6585_v10 }
0x13e3   :  { %6730 = vmatmul.bf16.gmra.mxu1 %v6598_v37  ;;  %6779 = vmatmul.bf16.gmra.mxu2 %v6598_v37 }
0x13e5   :  { %v9549_v23 = vpop.eup %9548 }
0x13e6   :  { %v6466_v49 = vmul.f32 %v9549_v23, %v6377_v13  ;;  %vm6472_vm1 = vweird.f32 %v9549_v23 }
0x13e7   :  { %vm6473_vm3 = vmor %vm6471_vm2, %vm6472_vm1 }
0x13e8   :  { %v6467_v4 = vmul.f32 %v9549_v23, %v6466_v49 }
0x13ea   :  { %v6468_v63 = vmul.f32 0.5, %v6467_v4 }
0x13ec   :  { %v6469_v33 = vsub.f32 1.5, %v6468_v63 }
0x13ee   :  { %v6470_v20 = vmul.f32 %v9549_v23, %v6469_v33 }
0x13f0   :  { %v6716_v15 = vpop.f32.mrf.mxu1  ;;  %v6474_v17 = vsel %vm6473_vm3, %v9549_v23, %v6470_v20 }
0x13f1   :  { %v6717_v42 = vadd.f32 %v6716_v15, %v14338_v32  ;;  %v6553_v49 = vmul.f32 %v6474_v17, %v14198_v44 }
0x13f3   :  { %v6805_v26 = vmax.f32 %v6717_v42, 0.0  ;;  %v6570_v42 = vmul.f32 %v14209_v61, %v6553_v49 }
0x13f5   :  { %v6340_v55 = vpop.xlane.xlu1 %6339  ;;  %v6587_v33 = vadd.f32 %v14213_v60, %v6570_v42 }
0x13f6   :  { %v6362_v8 = vmul.f32 %v6340_v55, %v14890_v25  ;;  %v6765_v22 = vpop.f32.mrf.mxu2 }
0x13f7   :  { %v6766_v30 = vadd.f32 %v6765_v22, %v14342_v43 }
0x13f8   :  { %v6378_v6 = vadd.f32 1e-05, %v6362_v8  ;;  %v6718_v28 = vpop.f32.mrf.mxu1 }
0x13f9   :  { %v6719_v19 = vadd.f32 %v6718_v28, %v14338_v32  ;;  %v6806_v50 = vmax.f32 %v6766_v30, 0.0 }
0x13fa   :  { %9550 = vrsqrt.f32 %v6378_v6  ;;  %vm6481_vm8 = vweird.f32 %v6378_v6 }
0x13fb   :  { %v6807_v52 = vmax.f32 %v6719_v19, 0.0 }
0x13fd   :  { %v6837_v27 = vpack.c.bf16 %v6807_v52, %v6805_v26  ;;  %v6342_v38 = vpop.xlane.xlu1 %6341 }
0x13fe   :  { %v6363_v46 = vmul.f32 %v6342_v38, %v14890_v25  ;;  %v6767_v40 = vpop.f32.mrf.mxu2 }
0x13ff   :  { %v6768_v24 = vadd.f32 %v6767_v40, %v14342_v43  ;;  %6990 = vmatmul.bf16.vlgmr.msra.gmra.mxu3 %v6837_v27 }
0x1400   :  { %v9551_v11 = vpop.eup %9550  ;;  %v6379_v39 = vadd.f32 1e-05, %v6363_v46 }
0x1401   :  { %v6476_v12 = vmul.f32 %v9551_v11, %v6378_v6  ;;  %v6808_v58 = vmax.f32 %v6768_v24, 0.0  ;;  %vm6482_vm7 = vweird.f32 %v9551_v11 }
0x1402   :  { %9552 = vrsqrt.f32 %v6379_v39  ;;  %vm6483_vm9 = vmor %vm6481_vm8, %vm6482_vm7  ;;  %vm6491_vm11 = vweird.f32 %v6379_v39 }
0x1403   :  { %v6477_v47 = vmul.f32 %v9551_v11, %v6476_v12  ;;  %v6838_v10 = vpack.c.bf16 %v6808_v58, %v6806_v50 }
0x1405   :  { %v6478_v35 = vmul.f32 0.5, %v6477_v47  ;;  %7039 = vmatmul.bf16.vlgmr.msra.gmra.mxu0 %v6838_v10  ;;  %v6344_v37 = vpop.xlane.xlu2 %6343 }
0x1406   :  { %v6364_v14 = vmul.f32 %v6344_v37, %v14890_v25 }
0x1407   :  { %v6479_v34 = vsub.f32 1.5, %v6478_v35 }
0x1408   :  { %v9553_v15 = vpop.eup %9552  ;;  %v6380_v4 = vadd.f32 1e-05, %v6364_v14 }
0x1409   :  { %v6480_v55 = vmul.f32 %v9551_v11, %v6479_v34  ;;  %v6486_v8 = vmul.f32 %v9553_v15, %v6379_v39  ;;  %vm6492_vm10 = vweird.f32 %v9553_v15 }
0x140a   :  { %9554 = vrsqrt.f32 %v6380_v4  ;;  %vm6493_vm4 = vmor %vm6491_vm11, %vm6492_vm10  ;;  %vm6501_vm6 = vweird.f32 %v6380_v4 }
0x140b   :  { %v6484_v13 = vsel %vm6483_vm9, %v9551_v11, %v6480_v55  ;;  %v6487_v22 = vmul.f32 %v9553_v15, %v6486_v8 }
0x140c   :  { %v6554_v23 = vmul.f32 %v6484_v13, %v14224_v3 }
0x140d   :  { %v6488_v28 = vmul.f32 0.5, %v6487_v22 }
0x140e   :  { %v6346_v63 = vpop.xlane.xlu0 %6345  ;;  %v6571_v19 = vmul.f32 %v14209_v61, %v6554_v23 }
0x140f   :  { %v6489_v26 = vsub.f32 1.5, %v6488_v28  ;;  %v6365_v52 = vmul.f32 %v6346_v63, %v14890_v25 }
0x1410   :  { %v9555_v44 = vpop.eup %9554  ;;  %v6588_v6 = vadd.f32 %v14213_v60, %v6571_v19 }
0x1411   :  { %v6490_v30 = vmul.f32 %v9553_v15, %v6489_v26  ;;  %v6496_v27 = vmul.f32 %v9555_v44, %v6380_v4  ;;  %v6381_v38 = vadd.f32 1e-05, %v6365_v52  ;;  %vm6502_vm5 = vweird.f32 %v9555_v44 }
0x1412   :  { %v6599_v46 = vpack.c.bf16 %v6588_v6, %v6587_v33  ;;  %vm6503_vm12 = vmor %vm6501_vm6, %vm6502_vm5 }
0x1413   :  { %v6497_v3 = vmul.f32 %v9555_v44, %v6496_v27  ;;  %9556 = vrsqrt.f32 %v6381_v38  ;;  %v6494_v40 = vsel %vm6493_vm4, %v9553_v15, %v6490_v30  ;;  %vm6511_vm14 = vweird.f32 %v6381_v38 }
0x1414   :  { %6735 = vmatmul.bf16.gmra.mxu1 %v6599_v46  ;;  %6784 = vmatmul.bf16.gmra.mxu2 %v6599_v46  ;;  %v6555_v12 = vmul.f32 %v6494_v40, %v14231_v1 }
0x1415   :  { %v6498_v24 = vmul.f32 0.5, %v6497_v3 }
0x1416   :  { %v6572_v34 = vmul.f32 %v14209_v61, %v6555_v12 }
0x1417   :  { %v6499_v11 = vsub.f32 1.5, %v6498_v24  ;;  %v6721_v20 = vpop.f32.mrf.mxu1 }
0x1418   :  { %v6348_v50 = vpop.xlane.xlu1 %6347  ;;  %v6722_v1 = vadd.f32 %v6721_v20, %v14338_v32  ;;  %v6589_v22 = vadd.f32 %v14213_v60, %v6572_v34 }
0x1419   :  { %v9557_v58 = vpop.eup %9556  ;;  %v6500_v47 = vmul.f32 %v9555_v44, %v6499_v11  ;;  %v6366_v10 = vmul.f32 %v6348_v50, %v14890_v25 }
0x141a   :  { %v6506_v39 = vmul.f32 %v9557_v58, %v6381_v38  ;;  %v6809_v42 = vmax.f32 %v6722_v1, 0.0  ;;  %vm6512_vm13 = vweird.f32 %v9557_v58 }
0x141b   :  { %v6504_v17 = vsel %vm6503_vm12, %v9555_v44, %v6500_v47  ;;  %v6382_v35 = vadd.f32 1e-05, %v6366_v10  ;;  %vm6513_vm15 = vmor %vm6511_vm14, %vm6512_vm13 }
0x141c   :  { %v6556_v37 = vmul.f32 %v6504_v17, %v14239_v18  ;;  %v6507_v14 = vmul.f32 %v9557_v58, %v6506_v39 }
0x141d   :  { %9558 = vrsqrt.f32 %v6382_v35  ;;  %v6770_v15 = vpop.f32.mrf.mxu2  ;;  %vm6521_vm1 = vweird.f32 %v6382_v35 }
0x141e   :  { %v6508_v49 = vmul.f32 0.5, %v6507_v14  ;;  %v6573_v55 = vmul.f32 %v14209_v61, %v6556_v37  ;;  %v6771_v19 = vadd.f32 %v6770_v15, %v14342_v43 }
0x141f   :  { %v6723_v8 = vpop.f32.mrf.mxu1 }
0x1420   :  { %v6509_v4 = vsub.f32 1.5, %v6508_v49  ;;  %v6724_v13 = vadd.f32 %v6723_v8, %v14338_v32  ;;  %v6590_v23 = vadd.f32 %v14213_v60, %v6573_v55  ;;  %v6810_v40 = vmax.f32 %v6771_v19, 0.0 }
0x1422   :  { %v6811_v18 = vmax.f32 %v6724_v13, 0.0  ;;  %v6600_v28 = vpack.c.bf16 %v6590_v23, %v6589_v22  ;;  %v6510_v26 = vmul.f32 %v9557_v58, %v6509_v4 }
0x1423   :  { %v9559_v63 = vpop.eup %9558 }
0x1424   :  { %v6516_v52 = vmul.f32 %v9559_v63, %v6382_v35  ;;  %6740 = vmatmul.bf16.gmra.mxu1 %v6600_v28  ;;  %6789 = vmatmul.bf16.gmra.mxu2 %v6600_v28  ;;  %v6839_v44 = vpack.c.bf16 %v6811_v18, %v6809_v42  ;;  %v6514_v46 = vsel %vm6513_vm15, %v9557_v58, %v6510_v26  ;;  %vm6522_vm0 = vweird.f32 %v9559_v63 }
0x1425   :  { %v6772_v33 = vpop.f32.mrf.mxu2  ;;  %v6557_v12 = vmul.f32 %v6514_v46, %v14248_v2  ;;  %vm6523_vm2 = vmor %vm6521_vm1, %vm6522_vm0  ;;  %v6350_v4 = vpop.xlane.xlu2 %6349 }
0x1426   :  { %v6517_v6 = vmul.f32 %v9559_v63, %v6516_v52  ;;  %v6773_v30 = vadd.f32 %v6772_v33, %v14342_v43  ;;  %6995 = vmatmul.bf16.gmra.mxu3 %v6839_v44  ;;  %v6367_v23 = vmul.f32 %v6350_v4, %v14890_v25  ;;  %v8580_v4 = vld [vmem:[%s14697_s12 + $0x8] sm:$0xff] }
0x1427   :  { %v6726_v27 = vpop.f32.mrf.mxu1  ;;  %v6574_v58 = vmul.f32 %v14209_v61, %v6557_v12 }
0x1428   :  { %v6518_v3 = vmul.f32 0.5, %v6517_v6  ;;  %v6812_v24 = vmax.f32 %v6773_v30, 0.0  ;;  %v6727_v10 = vadd.f32 %v6726_v27, %v14338_v32  ;;  %v6383_v18 = vadd.f32 1e-05, %v6367_v23  ;;  %v8586_v6 = vld [vmem:[%s14697_s12 + $0x38] sm:$0xff]  ;;  %v8585_v30 = vld [vmem:[%s14697_s12 + $0x30] sm:$0xff] }
0x1429   :  { %v6591_v2 = vadd.f32 %v14213_v60, %v6574_v58  ;;  %7189 = vmatpush.bf16.msra.mxu1 %v8586_v6 }
0x142a   :  { %v6519_v11 = vsub.f32 1.5, %v6518_v3  ;;  %v6840_v20 = vpack.c.bf16 %v6812_v24, %v6810_v40  ;;  %v6813_v34 = vmax.f32 %v6727_v10, 0.0  ;;  %9560 = vrsqrt.f32 %v6383_v18  ;;  %v8584_v3 = vld [vmem:[%s14697_s12 + $0x28] sm:$0xff] }
0x142b   :  { %vm6531_vm7 = vweird.f32 %v6383_v18 }
0x142c   :  { %v6520_v50 = vmul.f32 %v9559_v63, %v6519_v11  ;;  %7044 = vmatmul.bf16.gmra.mxu0 %v6840_v20  ;;  %v8583_v11 = vld [vmem:[%s14697_s12 + $0x20] sm:$0xff] }
0x142d   :  { %v6775_v38 = vpop.f32.mrf.mxu2  ;;  %7190 = vmatpush.bf16.msra.mxu1 %v8585_v30 }
0x142e   :  { %v6524_v47 = vsel %vm6523_vm2, %v9559_v63, %v6520_v50  ;;  %v6776_v49 = vadd.f32 %v6775_v38, %v14342_v43 }
0x142f   :  { %v6558_v39 = vmul.f32 %v6524_v47, %v14257_v0  ;;  %v6728_v17 = vpop.f32.mrf.mxu1 }
0x1430   :  { %v6729_v37 = vadd.f32 %v6728_v17, %v14338_v32  ;;  %v6814_v13 = vmax.f32 %v6776_v49, 0.0  ;;  %v9561_v28 = vpop.eup %9560  ;;  %v8582_v17 = vld [vmem:[%s14697_s12 + $0x18] sm:$0xff] }
0x1431   :  { %v6575_v14 = vmul.f32 %v14209_v61, %v6558_v39  ;;  %v6526_v63 = vmul.f32 %v9561_v28, %v6383_v18  ;;  %vm6532_vm3 = vweird.f32 %v9561_v28  ;;  %7191 = vmatpush.bf16.msra.mxu1 %v8584_v3 }
0x1432   :  { %v6815_v15 = vmax.f32 %v6729_v37, 0.0  ;;  %vm6533_vm8 = vmor %vm6531_vm7, %vm6532_vm3 }
0x1433   :  { %v6592_v35 = vadd.f32 %v14213_v60, %v6575_v14  ;;  %v6527_v19 = vmul.f32 %v9561_v28, %v6526_v63 }
0x1434   :  { %v6841_v1 = vpack.c.bf16 %v6815_v15, %v6813_v34 }
0x1435   :  { %v6777_v55 = vpop.f32.mrf.mxu2  ;;  %v6601_v8 = vpack.c.bf16 %v6592_v35, %v6591_v2  ;;  %v6528_v33 = vmul.f32 0.5, %v6527_v19  ;;  %7192 = vmatpush.bf16.msra.mxu1 %v8583_v11 }
0x1436   :  { %v6778_v0 = vadd.f32 %v6777_v55, %v14342_v43  ;;  %7000 = vmatmul.bf16.gmra.mxu3 %v6841_v1 }
0x1437   :  { %6745 = vmatmul.bf16.gmra.mxu1 %v6601_v8  ;;  %6794 = vmatmul.bf16.gmra.mxu2 %v6601_v8  ;;  %v6529_v27 = vsub.f32 1.5, %v6528_v33  ;;  %v9591_v33 = vld [vmem:[%s14690_s4 + $0x8] sm:$0x3f] }
0x1438   :  { %v6816_v22 = vmax.f32 %v6778_v0, 0.0  ;;  %v14417_v6 = vperm.slane %v9591_v33, 5 }
0x1439   :  { %7193 = vmatpush.bf16.msra.mxu1 %v8582_v17 }
0x143a   :  { %v6842_v42 = vpack.c.bf16 %v6816_v22, %v6814_v13 }
0x143c   :  { %7049 = vmatmul.bf16.gmra.mxu0 %v6842_v42 }
0x144e   :  { %v6352_v26 = vpop.xlane.xlu0 %6351 }
0x144f   :  { %v6368_v52 = vmul.f32 %v6352_v26, %v14890_v25  ;;  %v6530_v25 = vmul.f32 %v9561_v28, %v6529_v27 }
0x1451   :  { %v6384_v44 = vadd.f32 1e-05, %v6368_v52  ;;  %v6534_v20 = vsel %vm6533_vm8, %v9561_v28, %v6530_v25 }
0x1452   :  { %v6559_v47 = vmul.f32 %v6534_v20, %v14268_v53  ;;  %v8581_v53 = vld [vmem:[%s14697_s12 + $0x10] sm:$0xff] }
0x1453   :  { %9562 = vrsqrt.f32 %v6384_v44  ;;  %vm6541_vm10 = vweird.f32 %v6384_v44  ;;  %7194 = vmatpush.bf16.msra.mxu1 %v8581_v53 }
0x1454   :  { %v6576_v37 = vmul.f32 %v14209_v61, %v6559_v47 }
0x1456   :  { %v6593_v49 = vadd.f32 %v14213_v60, %v6576_v37 }
0x1457   :  { %7195 = vmatpush.bf16.msra.mxu1 %v8580_v4 }
0x1459   :  { %v9563_v46 = vpop.eup %9562 }
0x145a   :  { %v6536_v40 = vmul.f32 %v9563_v46, %v6384_v44  ;;  %vm6542_vm9 = vweird.f32 %v9563_v46 }
0x145b   :  { %vm6543_vm11 = vmor %vm6541_vm10, %vm6542_vm9 }
0x145c   :  { %v6537_v24 = vmul.f32 %v9563_v46, %v6536_v40 }
0x145e   :  { %v6538_v12 = vmul.f32 0.5, %v6537_v24 }
0x1460   :  { %v6539_v50 = vsub.f32 1.5, %v6538_v12  ;;  %v6731_v38 = vpop.f32.mrf.mxu1 }
0x1461   :  { %v6732_v34 = vadd.f32 %v6731_v38, %v14338_v32 }
0x1462   :  { %v6540_v10 = vmul.f32 %v9563_v46, %v6539_v50 }
0x1464   :  { %v6544_v39 = vsel %vm6543_vm11, %v9563_v46, %v6540_v10 }
0x1465   :  { %v6560_v58 = vmul.f32 %v6544_v39, %v14310_v57  ;;  %v6817_v57 = vmax.f32 %v6732_v34, 0.0 }
0x1466   :  { %v6780_v14 = vpop.f32.mrf.mxu2 }
0x1467   :  { %v6577_v15 = vmul.f32 %v14209_v61, %v6560_v58  ;;  %v6781_v61 = vadd.f32 %v6780_v14, %v14342_v43 }
0x1468   :  { %v6733_v2 = vpop.f32.mrf.mxu1 }
0x1469   :  { %v6734_v35 = vadd.f32 %v6733_v2, %v14338_v32  ;;  %v6594_v1 = vadd.f32 %v14213_v60, %v6577_v15  ;;  %v8579_v60 = vld [vmem:[%s14697_s12] sm:$0xff]  ;;  %v6818_v23 = vmax.f32 %v6781_v61, 0.0 }
0x146a   :  { %7196 = vmatpush.bf16.msra.mxu1 %v8579_v60 }
0x146b   :  { %v6819_v55 = vmax.f32 %v6734_v35, 0.0  ;;  %v6602_v8 = vpack.c.bf16 %v6594_v1, %v6593_v49 }
0x146d   :  { %6750 = vmatmul.bf16.gmra.mxu1 %v6602_v8  ;;  %6799 = vmatmul.bf16.gmra.mxu2 %v6602_v8  ;;  %v6843_v0 = vpack.c.bf16 %v6819_v55, %v6817_v57 }
0x146e   :  { %v6782_v13 = vpop.f32.mrf.mxu2 }
0x146f   :  { %v6783_v22 = vadd.f32 %v6782_v13, %v14342_v43  ;;  %7005 = vmatmul.bf16.gmra.mxu3 %v6843_v0 }
0x1471   :  { %v6820_v42 = vmax.f32 %v6783_v22, 0.0 }
0x1473   :  { %v6844_v18 = vpack.c.bf16 %v6820_v42, %v6818_v23 }
0x1475   :  { %7054 = vmatmul.bf16.gmra.mxu0 %v6844_v18 }
0x1482   :  { %v6991_v28 = vpop.f32.mrf.mxu3  ;;  %v7040_v63 = vpop.f32.mrf.mxu0 }
0x1483   :  { %v7041_v19 = vadd.f32 %v7040_v63, %v6991_v28 }
0x1485   :  { %v7080_v44 = vadd.f32 %v7041_v19, %v13962_v51 }
0x1487   :  { %v7097_v46 = vadd.f32 %v14417_v6, %v7080_v44 }
0x148a   :  { %v6993_v26 = vpop.f32.mrf.mxu3  ;;  %v7042_v52 = vpop.f32.mrf.mxu0 }
0x148b   :  { %v7043_v30 = vadd.f32 %v7042_v52, %v6993_v26 }
0x148d   :  { %v7081_v27 = vadd.f32 %v7043_v30, %v13967_v7 }
0x148f   :  { %v7098_v3 = vadd.f32 %v14417_v6, %v7081_v27 }
0x1491   :  { %v14422_v25 = vpack.c.bf16 %v7098_v3, %v7097_v46  ;;  %v6736_v40 = vpop.f32.mrf.mxu1 }
0x1492   :  { %v6737_v51 = vadd.f32 %v6736_v40, %v14338_v32 }
0x1493   :  { %7197 = vmatmul.bf16.vlgmr.msra.gmra.mxu1 %v14422_v25 }
0x1494   :  { %v6821_v12 = vmax.f32 %v6737_v51, 0.0 }
0x1497   :  { %v6785_v24 = vpop.f32.mrf.mxu2 }
0x1498   :  { %v6786_v38 = vadd.f32 %v6785_v24, %v14342_v43 }
0x1499   :  { %v6738_v11 = vpop.f32.mrf.mxu1 }
0x149a   :  { %v6739_v20 = vadd.f32 %v6738_v11, %v14338_v32  ;;  %v6822_v17 = vmax.f32 %v6786_v38, 0.0 }
0x149c   :  { %v6823_v50 = vmax.f32 %v6739_v20, 0.0 }
0x149e   :  { %v6845_v7 = vpack.c.bf16 %v6823_v50, %v6821_v12 }
0x149f   :  { %v6787_v47 = vpop.f32.mrf.mxu2 }
0x14a0   :  { %v6788_v10 = vadd.f32 %v6787_v47, %v14342_v43  ;;  %7010 = vmatmul.bf16.gmra.mxu3 %v6845_v7 }
0x14a1   :  { %v6741_v39 = vpop.f32.mrf.mxu1 }
0x14a2   :  { %v6824_v58 = vmax.f32 %v6788_v10, 0.0  ;;  %v6742_v34 = vadd.f32 %v6741_v39, %v14338_v32 }
0x14a4   :  { %v6846_v37 = vpack.c.bf16 %v6824_v58, %v6822_v17  ;;  %v6825_v49 = vmax.f32 %v6742_v34, 0.0 }
0x14a6   :  { %7059 = vmatmul.bf16.gmra.mxu0 %v6846_v37 }
0x14a7   :  { %v6790_v14 = vpop.f32.mrf.mxu2 }
0x14a8   :  { %v6791_v57 = vadd.f32 %v6790_v14, %v14342_v43 }
0x14a9   :  { %v6743_v15 = vpop.f32.mrf.mxu1  ;;  %v6996_v53 = vpop.f32.mrf.mxu3 }
0x14aa   :  { %v6744_v2 = vadd.f32 %v6743_v15, %v14338_v32  ;;  %v7045_v35 = vpop.f32.mrf.mxu0  ;;  %v6826_v13 = vmax.f32 %v6791_v57, 0.0 }
0x14ab   :  { %v7046_v8 = vadd.f32 %v7045_v35, %v6996_v53 }
0x14ac   :  { %v6827_v1 = vmax.f32 %v6744_v2, 0.0 }
0x14ad   :  { %v7082_v23 = vadd.f32 %v7046_v8, %v13972_v56 }
0x14ae   :  { %v6847_v55 = vpack.c.bf16 %v6827_v1, %v6825_v49 }
0x14af   :  { %v6792_v4 = vpop.f32.mrf.mxu2  ;;  %v7099_v19 = vadd.f32 %v14417_v6, %v7082_v23 }
0x14b0   :  { %v6793_v61 = vadd.f32 %v6792_v4, %v14342_v43  ;;  %7015 = vmatmul.bf16.gmra.mxu3 %v6847_v55 }
0x14b1   :  { %v6998_v0 = vpop.f32.mrf.mxu3 }
0x14b2   :  { %v6828_v22 = vmax.f32 %v6793_v61, 0.0  ;;  %v7047_v60 = vpop.f32.mrf.mxu0 }
0x14b3   :  { %v7048_v42 = vadd.f32 %v7047_v60, %v6998_v0 }
0x14b4   :  { %v6848_v18 = vpack.c.bf16 %v6828_v22, %v6826_v13  ;;  %v6746_v28 = vpop.f32.mrf.mxu1 }
0x14b5   :  { %v7083_v63 = vadd.f32 %v7048_v42, %v13977_v45  ;;  %v6747_v27 = vadd.f32 %v6746_v28, %v14338_v32 }
0x14b6   :  { %7064 = vmatmul.bf16.gmra.mxu0 %v6848_v18 }
0x14b7   :  { %v7100_v26 = vadd.f32 %v14417_v6, %v7083_v63  ;;  %v6829_v3 = vmax.f32 %v6747_v27, 0.0 }
0x14b9   :  { %v7001_v52 = vpop.f32.mrf.mxu3  ;;  %v14437_v44 = vpack.c.bf16 %v7100_v26, %v7099_v19  ;;  %v14465_v26 = vld [vmem:[%s14698_s13] ss:$0 sm:$0xff] }
0x14ba   :  { %v7050_v33 = vpop.f32.mrf.mxu0  ;;  %v6795_v30 = vpop.f32.mrf.mxu2 }
0x14bb   :  { %7202 = vmatmul.bf16.gmra.mxu1 %v14437_v44  ;;  %v7051_v40 = vadd.f32 %v7050_v33, %v7001_v52  ;;  %v6796_v24 = vadd.f32 %v6795_v30, %v14342_v43 }
0x14bc   :  { %v6748_v56 = vpop.f32.mrf.mxu1 }
0x14bd   :  { %v6749_v46 = vadd.f32 %v6748_v56, %v14338_v32  ;;  %v7084_v50 = vadd.f32 %v7051_v40, %v13982_v36  ;;  %v6830_v47 = vmax.f32 %v6796_v24, 0.0 }
0x14bf   :  { %v6831_v45 = vmax.f32 %v6749_v46, 0.0  ;;  %v7101_v17 = vadd.f32 %v14417_v6, %v7084_v50 }
0x14c1   :  { %v6849_v51 = vpack.c.bf16 %v6831_v45, %v6829_v3  ;;  %v7003_v11 = vpop.f32.mrf.mxu3 }
0x14c2   :  { %v7052_v20 = vpop.f32.mrf.mxu0  ;;  %v6797_v12 = vpop.f32.mrf.mxu2 }
0x14c3   :  { %v7053_v38 = vadd.f32 %v7052_v20, %v7003_v11  ;;  %v6798_v7 = vadd.f32 %v6797_v12, %v14342_v43  ;;  %7020 = vmatmul.bf16.gmra.mxu3 %v6849_v51 }
0x14c5   :  { %v7085_v10 = vadd.f32 %v7053_v38, %v13995_v31  ;;  %v6832_v39 = vmax.f32 %v6798_v7, 0.0 }
0x14c7   :  { %v7102_v58 = vadd.f32 %v14417_v6, %v7085_v10  ;;  %v6850_v37 = vpack.c.bf16 %v6832_v39, %v6830_v47 }
0x14c9   :  { %7069 = vmatmul.bf16.gmra.mxu0 %v6850_v37  ;;  %v14448_v14 = vpack.c.bf16 %v7102_v58, %v7101_v17 }
0x14cb   :  { %7207 = vmatmul.bf16.gmra.mxu1 %v14448_v14 }
0x14ea   :  { %v6751_v34 = vpop.f32.mrf.mxu1 }
0x14eb   :  { %v6752_v15 = vadd.f32 %v6751_v34, %v14338_v32 }
0x14ed   :  { %v6833_v49 = vmax.f32 %v6752_v15, 0.0 }
0x14f0   :  { %v6800_v36 = vpop.f32.mrf.mxu2 }
0x14f1   :  { %v6801_v57 = vadd.f32 %v6800_v36, %v14342_v43 }
0x14f2   :  { %v6753_v53 = vpop.f32.mrf.mxu1  ;;  %v7006_v2 = vpop.f32.mrf.mxu3 }
0x14f3   :  { %v6754_v35 = vadd.f32 %v6753_v53, %v14338_v32  ;;  %v7055_v31 = vpop.f32.mrf.mxu0  ;;  %v6834_v13 = vmax.f32 %v6801_v57, 0.0 }
0x14f4   :  { %v7056_v8 = vadd.f32 %v7055_v31, %v7006_v2 }
0x14f5   :  { %v6835_v1 = vmax.f32 %v6754_v35, 0.0 }
0x14f6   :  { %v7086_v23 = vadd.f32 %v7056_v8, %v14000_v41 }
0x14f7   :  { %v6851_v55 = vpack.c.bf16 %v6835_v1, %v6833_v49 }
0x14f8   :  { %v6802_v4 = vpop.f32.mrf.mxu2  ;;  %v7103_v28 = vadd.f32 %v14417_v6, %v7086_v23 }
0x14f9   :  { %v6803_v61 = vadd.f32 %v6802_v4, %v14342_v43  ;;  %7025 = vmatmul.bf16.gmra.mxu3 %v6851_v55 }
0x14fa   :  { %v7008_v0 = vpop.f32.mrf.mxu3 }
0x14fb   :  { %v6836_v22 = vmax.f32 %v6803_v61, 0.0  ;;  %v7057_v60 = vpop.f32.mrf.mxu0 }
0x14fc   :  { %v7058_v42 = vadd.f32 %v7057_v60, %v7008_v0 }
0x14fd   :  { %v6852_v18 = vpack.c.bf16 %v6836_v22, %v6834_v13 }
0x14fe   :  { %v7087_v32 = vadd.f32 %v7058_v42, %v14019_v16 }
0x14ff   :  { %7074 = vmatmul.bf16.gmra.mxu0 %v6852_v18 }
0x1500   :  { %v7104_v63 = vadd.f32 %v14417_v6, %v7087_v32 }
0x1502   :  { %v14459_v19 = vpack.c.bf16 %v7104_v63, %v7103_v28 }
0x1504   :  { %7212 = vmatmul.bf16.gmra.mxu1 %v14459_v19 }
0x1510   :  { %v7198_v43 = vpop.f32.mrf.mxu1 }
0x1511   :  { %v7199_v52 = vadd.f32 %v14465_v26, %v7198_v43 }
0x1518   :  { %v7200_v41 = vpop.f32.mrf.mxu1 }
0x1519   :  { %v7201_v16 = vadd.f32 %v14465_v26, %v7200_v41 }
0x151b   :  { %v8623_v33 = vpack.c.bf16 %v7201_v16, %v7199_v52 }
0x151d   :  { %8624 = vst [vmem:[%s14699_s18] sm:$0xff] %v8623_v33  }
0x1523   :  { %v7011_v30 = vpop.f32.mrf.mxu3  ;;  %v7060_v27 = vpop.f32.mrf.mxu0 }
0x1524   :  { %v7061_v56 = vadd.f32 %v7060_v27, %v7011_v30 }
0x1526   :  { %v7088_v40 = vadd.f32 %v7061_v56, %v14025_v9 }
0x1528   :  { %v7105_v51 = vadd.f32 %v14417_v6, %v7088_v40 }
0x152b   :  { %v7013_v46 = vpop.f32.mrf.mxu3  ;;  %v7062_v3 = vpop.f32.mrf.mxu0 }
0x152c   :  { %v7063_v45 = vadd.f32 %v7062_v3, %v7013_v46 }
0x152e   :  { %v7089_v24 = vadd.f32 %v7063_v45, %v14045_v62 }
0x1530   :  { %v7106_v11 = vadd.f32 %v14417_v6, %v7089_v24 }
0x1532   :  { %v7117_v20 = vpack.c.bf16 %v7106_v11, %v7105_v51 }
0x1533   :  { %v7016_v12 = vpop.f32.mrf.mxu3  ;;  %v7065_v50 = vpop.f32.mrf.mxu0 }
0x1534   :  { %7217 = vmatmul.bf16.gmra.mxu1 %v7117_v20  ;;  %v7066_v38 = vadd.f32 %v7065_v50, %v7016_v12  ;;  %v8380_v50 = vld [vmem:[%s14701_s14 + $0x70] sm:$0xf] }
0x1536   :  { %v7090_v39 = vadd.f32 %v7066_v38, %v14056_v59  ;;  %v8603_v38 = vld [vmem:[%s14701_s14 + $0x74] sm:$0xf0] }
0x1538   :  { %v7203_v7 = vpop.f32.mrf.mxu1  ;;  %v7107_v58 = vadd.f32 %v14417_v6, %v7090_v39 }
0x1539   :  { %v7204_v34 = vadd.f32 %v14465_v26, %v7203_v7  ;;  %v8372_v7 = vld [vmem:[%s14701_s14 + $0x60] sm:$0xf] }
0x153b   :  { %v7018_v47 = vpop.f32.mrf.mxu3  ;;  %v7067_v10 = vpop.f32.mrf.mxu0 }
0x153c   :  { %v7068_v17 = vadd.f32 %v7067_v10, %v7018_v47  ;;  %v8381_v47 = vor.u32 %v8603_v38, %v8380_v50  ;;  %v8601_v10 = vld [vmem:[%s14701_s14 + $0x64] sm:$0xf0]  ;;  %v8607_v50 = vld [vmem:[%s14702_s16 + $0x18] sm:$0xff] }
0x153d   :  { %v8373_v39 = vor.u32 %v8601_v10, %v8372_v7  ;;  %v8615_v38 = vld [vmem:[%s14702_s16 + $0x58] sm:$0xff]  ;;  %v8606_v7 = vld [vmem:[%s14702_s16 + $0x10] sm:$0xff]  ;;  %v8605_v10 = vld [vmem:[%s14702_s16 + $0x8] sm:$0xff] }
0x153e   :  { %v7091_v9 = vadd.f32 %v7068_v17, %v14067_v21  ;;  %7395 = vmatpush.bf16.msrb.mxu3 %v8381_v47  ;;  %v8364_v17 = vld [vmem:[%s14701_s14 + $0x50] sm:$0xf] }
0x153f   :  { %v8614_v47 = vld [vmem:[%s14702_s16 + $0x50] sm:$0xff] }
0x1540   :  { %v7108_v62 = vadd.f32 %v14417_v6, %v7091_v9  ;;  %v7205_v37 = vpop.f32.mrf.mxu1  ;;  %v8602_v9 = vld [vmem:[%s14701_s14 + $0x74] sm:$0xf] }
0x1541   :  { %v7206_v36 = vadd.f32 %v14465_v26, %v7205_v37 }
0x1542   :  { %v7118_v15 = vpack.c.bf16 %v7108_v62, %v7107_v58  ;;  %v8382_v58 = vld [vmem:[%s14701_s14 + $0x78] sm:$0xf0]  ;;  %v8599_v62 = vld [vmem:[%s14701_s14 + $0x54] sm:$0xf0]  ;;  %7396 = vmatpush.bf16.msrb.mxu3 %v8373_v39  ;;  %v8613_v39 = vld [vmem:[%s14702_s16 + $0x48] sm:$0xff] }
0x1543   :  { %v8628_v53 = vpack.c.bf16 %v7206_v36, %v7204_v34  ;;  %v8385_v37 = vor.u32 %v8602_v9, %v8382_v58  ;;  %v8600_v34 = vld [vmem:[%s14701_s14 + $0x64] sm:$0xf]  ;;  %v8374_v36 = vld [vmem:[%s14701_s14 + $0x68] sm:$0xf0]  ;;  %v7309_v58 = vld [vmem:[%s14704_s15] sm:$0x3] }
0x1544   :  { %7222 = vmatmul.bf16.gmra.mxu1 %v7118_v15  ;;  %v8612_v9 = vld [vmem:[%s14702_s16 + $0x40] sm:$0xff] }
0x1545   :  { %8660 = vst [vmem:[%s14699_s18 + $0x8] sm:$0xff] %v8628_v53   ;;  %v8365_v53 = vor.u32 %v8599_v62, %v8364_v17  ;;  %v8604_v17 = vld [vmem:[%s14702_s16] sm:$0xff] }
0x1546   :  { %v7021_v59 = vpop.f32.mrf.mxu3  ;;  %v7070_v2 = vpop.f32.mrf.mxu0 }
0x1547   :  { %v7071_v21 = vadd.f32 %v7070_v2, %v7021_v59  ;;  %v8598_v59 = vld [vmem:[%s14701_s14 + $0x54] sm:$0xf]  ;;  %v8366_v2 = vld [vmem:[%s14701_s14 + $0x58] sm:$0xf0]  ;;  %7397 = vmatpush.bf16.msrb.mxu3 %v8365_v53 }
0x1548   :  { %v7208_v35 = vpop.f32.mrf.mxu1 }
0x1549   :  { %v7092_v1 = vadd.f32 %v7071_v21, %v14075_v48  ;;  %v7209_v8 = vadd.f32 %v14465_v26, %v7208_v35  ;;  %v8356_v35 = vld [vmem:[%s14701_s14 + $0x40] sm:$0xf]  ;;  %v8597_v21 = vld [vmem:[%s14701_s14 + $0x44] sm:$0xf0] }
0x154b   :  { %v7109_v0 = vadd.f32 %v14417_v6, %v7092_v1  ;;  %v8596_v1 = vld [vmem:[%s14701_s14 + $0x44] sm:$0xf] }
0x154e   :  { %v7023_v31 = vpop.f32.mrf.mxu3  ;;  %v7072_v49 = vpop.f32.mrf.mxu0 }
0x154f   :  { %v7073_v57 = vadd.f32 %v7072_v49, %v7023_v31  ;;  %v8369_v31 = vor.u32 %v8598_v59, %v8366_v2  ;;  %v8357_v49 = vor.u32 %v8597_v21, %v8356_v35 }
0x1550   :  { %v7210_v55 = vpop.f32.mrf.mxu1 }
0x1551   :  { %v7093_v4 = vadd.f32 %v7073_v57, %v14085_v5  ;;  %v7211_v61 = vadd.f32 %v14465_v26, %v7210_v55  ;;  %v8358_v57 = vld [vmem:[%s14701_s14 + $0x48] sm:$0xf0]  ;;  %v8348_v55 = vld [vmem:[%s14701_s14 + $0x30] sm:$0xf]  ;;  %7398 = vmatpush.bf16.msrb.mxu3 %v8357_v49 }
0x1553   :  { %v7110_v13 = vadd.f32 %v14417_v6, %v7093_v4  ;;  %v8633_v22 = vpack.c.bf16 %v7211_v61, %v7209_v8  ;;  %v8595_v8 = vld [vmem:[%s14701_s14 + $0x34] sm:$0xf0]  ;;  %v8361_v4 = vor.u32 %v8596_v1, %v8358_v57 }
0x1554   :  { %v8349_v61 = vor.u32 %v8595_v8, %v8348_v55 }
0x1555   :  { %8661 = vst [vmem:[%s14699_s18 + $0x10] sm:$0xff] %v8633_v22   ;;  %v7119_v60 = vpack.c.bf16 %v7110_v13, %v7109_v0  ;;  %v8594_v0 = vld [vmem:[%s14701_s14 + $0x34] sm:$0xf]  ;;  %v8350_v13 = vld [vmem:[%s14701_s14 + $0x38] sm:$0xf0] }
0x1556   :  { %v8340_v22 = vld [vmem:[%s14701_s14 + $0x20] sm:$0xf]  ;;  %7399 = vmatpush.bf16.msrb.mxu3 %v8349_v61 }
0x1557   :  { %7227 = vmatmul.bf16.gmra.mxu1 %v7119_v60 }
0x157c   :  { %v7026_v48 = vpop.f32.mrf.mxu3  ;;  %v7075_v23 = vpop.f32.mrf.mxu0 }
0x157d   :  { %v7076_v42 = vadd.f32 %v7075_v23, %v7026_v48  ;;  %v8353_v48 = vor.u32 %v8594_v0, %v8350_v13 }
0x157f   :  { %v7094_v5 = vadd.f32 %v7076_v42, %v14102_v54  ;;  %v8587_v54 = vld [vmem:[%s14700_s11] sm:$0xff] }
0x1581   :  { %v7213_v18 = vpop.f32.mrf.mxu1  ;;  %v7111_v41 = vadd.f32 %v14417_v6, %v7094_v5  ;;  %v8332_v5 = vld [vmem:[%s14701_s14 + $0x10] sm:$0xf] }
0x1582   :  { %v7214_v33 = vadd.f32 %v14465_v26, %v7213_v18  ;;  %v8592_v18 = vld [vmem:[%s14701_s14 + $0x24] sm:$0xf] }
0x1584   :  { %v7028_v32 = vpop.f32.mrf.mxu3  ;;  %v7077_v28 = vpop.f32.mrf.mxu0 }
0x1585   :  { %v7078_v63 = vadd.f32 %v7077_v28, %v7028_v32  ;;  %v8342_v32 = vld [vmem:[%s14701_s14 + $0x28] sm:$0xf0] }
0x1586   :  { %v8345_v28 = vor.u32 %v8592_v18, %v8342_v32 }
0x1587   :  { %v7095_v43 = vadd.f32 %v7078_v63, %v14205_v29  ;;  %v8591_v63 = vld [vmem:[%s14701_s14 + $0x14] sm:$0xf0] }
0x1589   :  { %v7112_v52 = vadd.f32 %v14417_v6, %v7095_v43  ;;  %v7215_v16 = vpop.f32.mrf.mxu1  ;;  %v8590_v43 = vld [vmem:[%s14701_s14 + $0x14] sm:$0xf] }
0x158a   :  { %v7216_v30 = vadd.f32 %v14465_v26, %v7215_v16 }
0x158b   :  { %v7120_v27 = vpack.c.bf16 %v7112_v52, %v7111_v41  ;;  %v8333_v41 = vor.u32 %v8591_v63, %v8332_v5  ;;  %v8334_v52 = vld [vmem:[%s14701_s14 + $0x18] sm:$0xf0] }
0x158c   :  { %v8638_v56 = vpack.c.bf16 %v7216_v30, %v7214_v33  ;;  %v8337_v16 = vor.u32 %v8590_v43, %v8334_v52 }
0x158d   :  { %7232 = vmatmul.bf16.gmra.mxu1 %v7120_v27  ;;  %7278 = vmatpush.bf16.msra.mxu2 %v7120_v27 }
0x158e   :  { %8662 = vst [vmem:[%s14699_s18 + $0x18] sm:$0xff] %v8638_v56  }
0x1591   :  { %7279 = vmatpush.bf16.msra.mxu2 %v7119_v60  ;;  %v8593_v60 = vld [vmem:[%s14701_s14 + $0x24] sm:$0xf0] }
0x1592   :  { %v8341_v42 = vor.u32 %v8593_v60, %v8340_v22 }
0x1594   :  { %7400 = vmatpush.bf16.msrb.mxu3 %v8341_v42 }
0x1595   :  { %7280 = vmatpush.bf16.msra.mxu2 %v7118_v15  ;;  %v8377_v15 = vor.u32 %v8600_v34, %v8374_v36  ;;  %v7311_v34 = vperm.slane %v7309_v58, 0  ;;  %v7312_v36 = vperm.slane %v7309_v58, 1 }
0x1598   :  { %7401 = vmatpush.bf16.msrb.mxu3 %v8333_v41 }
0x1599   :  { %7281 = vmatpush.bf16.msra.mxu2 %v7117_v20 }
0x159d   :  { %7282 = vmatpush.bf16.msra.mxu2 %v14459_v19 }
0x15a1   :  { %7283 = vmatpush.bf16.msra.mxu2 %v14448_v14 }
0x15a5   :  { %7284 = vmatpush.bf16.msra.mxu2 %v14437_v44 }
0x15a9   :  { %7285 = vmatpush.bf16.msra.mxu2 %v14422_v25 }
0x15ac   :  { %7286 = vmatmul.bf16.vlgmr.msra.gmra.mxu2 %v8587_v54  ;;  %v8324_v54 = vld [vmem:[%s14701_s14] sm:$0xf] }
0x15ad   :  { %7409 = vmatpush.bf16.msrb.mxu2 %v8385_v37 }
0x15b1   :  { %v7218_v29 = vpop.f32.mrf.mxu1  ;;  %7410 = vmatpush.bf16.msrb.mxu2 %v8377_v15 }
0x15b2   :  { %v7219_v46 = vadd.f32 %v14465_v26, %v7218_v29  ;;  %v8589_v29 = vld [vmem:[%s14701_s14 + $0x4] sm:$0xf0] }
0x15b5   :  { %7411 = vmatpush.bf16.msrb.mxu2 %v8369_v31 }
0x15b9   :  { %v7220_v6 = vpop.f32.mrf.mxu1  ;;  %7412 = vmatpush.bf16.msrb.mxu2 %v8361_v4  ;;  %v8921_v4 = vld [vmem:[%s14703_s17] ss:$0 sm:$0xff] }
0x15ba   :  { %v7221_v3 = vadd.f32 %v14465_v26, %v7220_v6  ;;  %v8588_v6 = vld [vmem:[%s14701_s14 + $0x4] sm:$0xf] }
0x15bc   :  { %v8643_v40 = vpack.c.bf16 %v7221_v3, %v7219_v46  ;;  %v8325_v46 = vor.u32 %v8589_v29, %v8324_v54 }
0x15bd   :  { %7413 = vmatpush.bf16.msrb.mxu2 %v8353_v48 }
0x15be   :  { %8663 = vst [vmem:[%s14699_s18 + $0x20] sm:$0xff] %v8643_v40   ;;  %7402 = vmatpush.bf16.msrb.mxu3 %v8325_v46  ;;  %v8611_v40 = vld [vmem:[%s14702_s16 + $0x38] sm:$0xff] }
0x15c1   :  { %v7223_v14 = vpop.f32.mrf.mxu1  ;;  %7414 = vmatpush.bf16.msrb.mxu2 %v8345_v28 }
0x15c2   :  { %v7224_v19 = vadd.f32 %v14465_v26, %v7223_v14  ;;  %v8619_v14 = vld [vmem:[%s14702_s16 + $0x78] sm:$0xff]  ;;  %7561 = vmatpush.bf16.msra.mxu3 %v8611_v40 }
0x15c5   :  { %7415 = vmatpush.bf16.msrb.mxu2 %v8337_v16 }
0x15c9   :  { %v7225_v44 = vpop.f32.mrf.mxu1 }
0x15ca   :  { %v7226_v45 = vadd.f32 %v14465_v26, %v7225_v44  ;;  %v8610_v44 = vld [vmem:[%s14702_s16 + $0x30] sm:$0xff] }
0x15cb   :  { %7562 = vmatpush.bf16.msra.mxu3 %v8610_v44 }
0x15cc   :  { %v8648_v24 = vpack.c.bf16 %v7226_v45, %v7224_v19  ;;  %v8618_v19 = vld [vmem:[%s14702_s16 + $0x70] sm:$0xff]  ;;  %v8609_v45 = vld [vmem:[%s14702_s16 + $0x28] sm:$0xff] }
0x15ce   :  { %8664 = vst [vmem:[%s14699_s18 + $0x28] sm:$0xff] %v8648_v24   ;;  %v8617_v24 = vld [vmem:[%s14702_s16 + $0x68] sm:$0xff] }
0x15cf   :  { %7563 = vmatpush.bf16.msra.mxu3 %v8609_v45 }
0x15d4   :  { %v7228_v25 = vpop.f32.mrf.mxu1 }
0x15d5   :  { %v7229_v11 = vadd.f32 %v14465_v26, %v7228_v25  ;;  %v8608_v25 = vld [vmem:[%s14702_s16 + $0x20] sm:$0xff] }
0x15d6   :  { %7564 = vmatpush.bf16.msra.mxu3 %v8608_v25 }
0x15da   :  { %7565 = vmatpush.bf16.msra.mxu3 %v8607_v50 }
0x15dc   :  { %v7230_v51 = vpop.f32.mrf.mxu1 }
0x15dd   :  { %v7231_v20 = vadd.f32 %v14465_v26, %v7230_v51  ;;  %v8616_v51 = vld [vmem:[%s14702_s16 + $0x60] sm:$0xff] }
0x15de   :  { %7566 = vmatpush.bf16.msra.mxu3 %v8606_v7 }
0x15df   :  { %v8653_v12 = vpack.c.bf16 %v7231_v20, %v7229_v11 }
0x15e1   :  { %8665 = vst [vmem:[%s14699_s18 + $0x30] sm:$0xff] %v8653_v12  }
0x15e2   :  { %7567 = vmatpush.bf16.msra.mxu3 %v8605_v10 }
0x15e6   :  { %7568 = vmatpush.bf16.msra.mxu3 %v8604_v17 }
0x160a   :  { %v7233_v23 = vpop.f32.mrf.mxu1 }
0x160b   :  { %v7234_v30 = vadd.f32 %v14465_v26, %v7233_v23 }
0x1612   :  { %v7235_v33 = vpop.f32.mrf.mxu1 }
0x1613   :  { %v7236_v27 = vadd.f32 %v14465_v26, %v7235_v33  ;;  %v8326_v26 = vld [vmem:[%s14701_s14 + $0x8] sm:$0xf0] }
0x1614   :  { %v8329_v3 = vor.u32 %v8588_v6, %v8326_v26 }
0x1615   :  { %v8658_v56 = vpack.c.bf16 %v7236_v27, %v7234_v30 }
0x1616   :  { %7416 = vmatpush.bf16.msrb.mxu2 %v8329_v3 }
0x1617   :  { %8666 = vst [vmem:[%s14699_s18 + $0x38] sm:$0xff] %v8658_v56  }
0x161a   :  { %7575 = vmatpush.bf16.msra.mxu2 %v8619_v14 }
0x161e   :  { %7576 = vmatpush.bf16.msra.mxu2 %v8618_v19 }
0x1622   :  { %7577 = vmatpush.bf16.msra.mxu2 %v8617_v24 }
0x1626   :  { %7578 = vmatpush.bf16.msra.mxu2 %v8616_v51 }
0x162a   :  { %7579 = vmatpush.bf16.msra.mxu2 %v8615_v38 }
0x162e   :  { %7580 = vmatpush.bf16.msra.mxu2 %v8614_v47 }
0x162f   :  { %v7287_v11 = vpop.f32.mrf.mxu2 }
0x1632   :  { %7581 = vmatpush.bf16.msra.mxu2 %v8613_v39 }
0x1636   :  { %7582 = vmatpush.bf16.msra.mxu2 %v8612_v9 }
0x1637   :  { %v7289_v20 = vpop.f32.mrf.mxu2 }
0x1638   :  { %v7292_v12 = vpack.c.bf16 %v7289_v20, %v7287_v11 }
0x163a   :  { %7403 = vmatmul.bf16.vlgmr.msrb.gmra.mxu3 %v7292_v12  ;;  %7417 = vmatmul.bf16.vlgmr.msrb.gmra.mxu2 %v7292_v12 }
0x16bd   :  { %v7404_v62 = vpop.f32.mrf.mxu3  ;;  %v7418_v37 = vpop.f32.mrf.mxu2 }
0x16be   :  { %v7405_v15 = vadd.f32 %v7404_v62, %v7311_v34  ;;  %v7419_v53 = vadd.f32 %v7418_v37, %v7312_v36 }
0x16c0   :  { %v7423_v31 = vmax.f32 %v7405_v15, 0.0  ;;  %v7424_v49 = vmax.f32 %v7419_v53, 0.0 }
0x16c5   :  { %v7406_v59 = vpop.f32.mrf.mxu3  ;;  %v7420_v2 = vpop.f32.mrf.mxu2 }
0x16c6   :  { %v7407_v35 = vadd.f32 %v7406_v59, %v7311_v34  ;;  %v7421_v21 = vadd.f32 %v7420_v2, %v7312_v36 }
0x16c8   :  { %v7425_v1 = vmax.f32 %v7407_v35, 0.0  ;;  %v7426_v57 = vmax.f32 %v7421_v21, 0.0 }
0x16ca   :  { %v7427_v55 = vpack.c.bf16 %v7425_v1, %v7423_v31  ;;  %v7428_v8 = vpack.c.bf16 %v7426_v57, %v7424_v49 }
0x16cc   :  { %7569 = vmatmul.bf16.vlgmr.msra.gmra.mxu3 %v7427_v55  ;;  %7583 = vmatmul.bf16.vlgmr.msra.gmra.mxu2 %v7428_v8 }
0x174f   :  { %v7570_v61 = vpop.f32.mrf.mxu3  ;;  %v7584_v0 = vpop.f32.mrf.mxu2 }
0x1750   :  { %v7571_v13 = vadd.f32 %v8921_v4, %v7570_v61 }
0x1752   :  { %v7585_v22 = vadd.f32 %v7584_v0, %v7571_v13 }
0x1754   :  { %7589 = vst [vmem:[%s14705_s19] sm:$0xff] %v7585_v22 }
0x1757   :  { %v7572_v60 = vpop.f32.mrf.mxu3  ;;  %v7586_v23 = vpop.f32.mrf.mxu2 }
0x1758   :  { %v7573_v48 = vadd.f32 %v8921_v4, %v7572_v60 }
0x175a   :  { %v7587_v42 = vadd.f32 %v7586_v23, %v7573_v48 }
0x175c   :  { %7590 = vst [vmem:[%s14705_s19 + $0x8] sm:$0xff] %v7587_v42 }

</bundles_post_ra>
